<compile_context>
chip_gen: v7x
topology: tpu7x:2x2x1
jax: 0.10.0
libtpu: 0.0.40
codegen_flags: <defaults>
</compile_context>

<pallas_src>
import functools

import jax
import jax.numpy as jnp
from jax.experimental import pallas as pl
from jax.experimental.pallas import tpu as pltpu


# ----------------------------------------------------------------------------
# Fused kernel: compress convs + weight_levels + softmax + weighted fusion
#               + 3x3 Conv(BN folded) + SiLU, one row-tile per grid step.
# ----------------------------------------------------------------------------
def asff4_kernel(H,
                 x0m_ref, x1m_ref, x2m_ref, x3m_ref,      # main row tiles (1,TH,W,C) bf16
                 x0t_ref, x1t_ref, x2t_ref, x3t_ref,      # top halo rows  (1,1,W,C)  bf16
                 x0b_ref, x1b_ref, x2b_ref, x3b_ref,      # bottom halo    (1,1,W,C)  bf16
                 wlw_ref, wlb_ref, ww_ref, bw_ref,        # compress / weight_levels
                 wc_ref, bc_ref,                          # 3x3 conv: (3,C,3C) bf16, (1,C) f32
                 out_ref,                                 # (1,TH,W,C) f32
                 xp_ref):                                 # VMEM scratch (TH+2,WP,C) bf16
    TH = out_ref.shape[1]
    W = out_ref.shape[2]
    C = out_ref.shape[3]
    WP = xp_ref.shape[1]

    r = pl.program_id(1)
    nr = pl.num_programs(1)

    # Small weights, loaded once per grid step.
    wlw = [wlw_ref[l] for l in range(4)]                       # (C, 8)  bf16
    wlb = [wlb_ref[l] for l in range(4)]                       # (1, 8)  f32
    ww_blk = [ww_ref[l * 8:(l + 1) * 8, :] for l in range(4)]  # (8, 4)  f32
    bw = bw_ref[...]                                           # (1, 4)  f32

    def fuse(x_list):
        # x_list: 4 arrays (M, C) bf16 -> fused (M, C) f32.
        logits = bw
        for l in range(4):
            # 1x1 compress Conv+BN+SiLU: bf16 MXU operands, f32 accumulation.
            y = jnp.dot(x_list[l], wlw[l],
                        preferred_element_type=jnp.float32) + wlb[l]
            comp = y * jax.nn.sigmoid(y)                       # SiLU, f32 elementwise
            # weight_levels (concat + 1x1 conv) == sum of per-level (8->4) matmuls.
            logits = logits + jnp.dot(comp, ww_blk[l],
                                      preferred_element_type=jnp.float32)
        m = jnp.max(logits, axis=-1, keepdims=True)
        e = jnp.exp(logits - m)
        inv = pl.reciprocal(jnp.sum(e, axis=-1, keepdims=True), approx=True)
        sm = e * inv                                           # softmax over 4 levels
        return (x_list[0].astype(jnp.float32) * sm[:, 0:1]
                + x_list[1].astype(jnp.float32) * sm[:, 1:2]
                + x_list[2].astype(jnp.float32) * sm[:, 2:3]
                + x_list[3].astype(jnp.float32) * sm[:, 3:4])

    mains = [ref[0].reshape(TH * W, C)
             for ref in (x0m_ref, x1m_ref, x2m_ref, x3m_ref)]
    tops = [ref[0, 0] for ref in (x0t_ref, x1t_ref, x2t_ref, x3t_ref)]   # (W, C)
    bots = [ref[0, 0] for ref in (x0b_ref, x1b_ref, x2b_ref, x3b_ref)]   # (W, C)

    fused_main = fuse(mains).reshape(TH, W, C)
    # Recompute the cheap fuse math for the 1-row halos (2/TH extra work).
    fused_top = fuse(tops)                                     # (W, C)
    fused_bot = fuse(bots)                                     # (W, C)

    # Image-boundary halo rows lie outside the image -> zero padding.
    fused_top = fused_top * jnp.where(r > 0, 1.0, 0.0)
    fused_bot = fused_bot * jnp.where(r < nr - 1, 1.0, 0.0)

    # Partial last tile: rows past the image bottom must be zero so the 3x3
    # conv of the last valid row sees zero padding (out-of-range output rows
    # are dropped by the masked output store).
    if H % TH != 0:
        row_ids = jax.lax.broadcasted_iota(jnp.int32, (TH, 1, 1), 0)
        fused_main = jnp.where(row_ids < (H - r * TH), fused_main, 0.0)

    # Stage the fused tile in the bf16 scratch.  Only the two pad COLUMNS are
    # zeroed; the pad ROWS are written with the boundary-zeroed halo rows;
    # columns >= W+2 hold garbage that the output slices below never read.
    pad_col = jnp.zeros((TH + 2, 1, C), jnp.bfloat16)
    xp_ref[:, 0:1, :] = pad_col
    xp_ref[:, W + 1:W + 2, :] = pad_col
    xp_ref[0:1, 1:W + 1, :] = fused_top[None].astype(jnp.bfloat16)
    xp_ref[1:TH + 1, 1:W + 1, :] = fused_main.astype(jnp.bfloat16)
    xp_ref[TH + 1:TH + 2, 1:W + 1, :] = fused_bot[None].astype(jnp.bfloat16)

    # 3x3 Conv(BN folded) + SiLU.  One matmul per dy against the dx-stacked
    # (C, 3C) weight (N=3C fills the MXU columns); f32 accumulation directly in
    # the VMEM-resident output block (keeps vreg pressure low at large C).
    out_ref[0] = jnp.broadcast_to(bc_ref[...].reshape(1, 1, C), (TH, W, C))
    for dy in range(3):
        slab = xp_ref[dy:dy + TH, :, :].reshape(TH * WP, C)    # free view (WP % 16 == 0)
        y3 = jnp.dot(slab, wc_ref[dy],
                     preferred_element_type=jnp.float32).reshape(TH, WP, 3 * C)
        out_ref[0] = out_ref[0] + (y3[:, 0:W, 0:C]
                                   + y3[:, 1:W + 1, C:2 * C]
                                   + y3[:, 2:W + 2, 2 * C:3 * C])
    a = out_ref[0]
    out_ref[0] = (a * jax.nn.sigmoid(a)).astype(out_ref.dtype)


# ----------------------------------------------------------------------------
# Wrapper (NHWC end-to-end): tiling params, BlockSpecs, weight prep.
# ----------------------------------------------------------------------------
def asff4_forward(x0, x1, x2, x3, params, *, row_tile=16):
    """Fused ASFF_4 forward.  Inputs/outputs are NHWC; inputs may be bf16 or f32
    (cast to bf16 at the kernel boundary).  Returns float32 NHWC."""
    B, H, W, C = x0.shape
    xs = [x.astype(jnp.bfloat16) for x in (x0, x1, x2, x3)]

    TH = min(row_tile, H)                         # rows per tile
    n_row = pl.cdiv(H, TH)
    WP = ((W + 2 + 15) // 16) * 16                # bf16 sublane tile is 16

    wlw = params["wl_w"].astype(jnp.bfloat16)     # (4, C, 8)  MXU operand
    wlb = params["wl_b"]                          # (4, 1, 8)  f32
    ww = params["ww"]                             # (32, 4)    f32
    bw = params["bw"]                             # (1, 4)     f32
    wc = params["conv_w"].astype(jnp.bfloat16)    # (3, 3, C, C)
    # Stack the 3 dx taps along N -> (3, C, 3C): 3 matmuls instead of 9.
    wc_stack = jnp.concatenate([wc[:, 0], wc[:, 1], wc[:, 2]], axis=-1)
    bc = params["conv_b"]                         # (1, C)     f32

    main_spec = pl.BlockSpec((1, TH, W, C), lambda b, r: (b, r, 0, 0))
    top_spec = pl.BlockSpec(
        (1, 1, W, C), lambda b, r: (b, jnp.maximum(r * TH - 1, 0), 0, 0))
    bot_spec = pl.BlockSpec(
        (1, 1, W, C), lambda b, r: (b, jnp.minimum((r + 1) * TH, H - 1), 0, 0))

    # TODO(synk): at production C=512 mark these constant-weight specs with
    # pipeline_mode=pl.Buffered(1) to avoid double-buffering ~4.7 MiB of conv
    # weights; omitted here for portability across JAX versions.
    def full_spec(shape):
        nd = len(shape)
        return pl.BlockSpec(shape, lambda b, r, nd=nd: (0,) * nd)

    in_specs = ([main_spec] * 4 + [top_spec] * 4 + [bot_spec] * 4 +
                [full_spec(wlw.shape), full_spec(wlb.shape),
                 full_spec(ww.shape), full_spec(bw.shape),
                 full_spec(wc_stack.shape), full_spec(bc.shape)])

    # Per-generation VMEM limit: 3/4 of physical capacity, capped (v7x: ~48 MiB,
    # v5e/v6e: raised for larger tiles), never the full physical VMEM.
    try:
        vmem_cap = int(getattr(pltpu.get_tpu_info(), "vmem_capacity_bytes",
                               64 * 1024 * 1024))
    except Exception:
        vmem_cap = 64 * 1024 * 1024
    vmem_limit = max(32 * 1024 * 1024,
                     min(vmem_cap * 3 // 4, 100 * 1024 * 1024))

    # Advisory cost estimate (3x3 conv dominates FLOPs; inputs are bf16).
    flops = 2 * B * H * W * (4 * C * 8 + 4 * 8 * 4 + 4 * C + 9 * C * C)
    transcendentals = B * H * W * (4 * 8 + 4 + 1 + C)
    bytes_accessed = (4 * B * H * W * C * 2 + B * H * W * C * 4
                      + int(wc_stack.size) * 2 + int(wlw.size) * 2
                      + (int(wlb.size) + int(ww.size) + int(bw.size)
                         + int(bc.size)) * 4)

    return pl.pallas_call(
        functools.partial(asff4_kernel, H),
        out_shape=jax.ShapeDtypeStruct((B, H, W, C), jnp.float32),
        grid=(B, n_row),
        in_specs=in_specs,
        out_specs=pl.BlockSpec((1, TH, W, C), lambda b, r: (b, r, 0, 0)),
        scratch_shapes=[pltpu.VMEM((TH + 2, WP, C), jnp.bfloat16)],
        compiler_params=pltpu.CompilerParams(
            dimension_semantics=("parallel", "parallel"),
            vmem_limit_bytes=vmem_limit),
        cost_estimate=pl.CostEstimate(flops=flops,
                                      transcendentals=transcendentals,
                                      bytes_accessed=bytes_accessed),
    )(xs[0], xs[1], xs[2], xs[3],          # main row tiles
      xs[0], xs[1], xs[2], xs[3],          # top halo rows (same buffers)
      xs[0], xs[1], xs[2], xs[3],          # bottom halo rows
      wlw, wlb, ww, bw, wc_stack, bc)


def asff4_forward_nchw(x0, x1, x2, x3, params, **kw):
    """Drop-in for the PyTorch NCHW interface.  Prefer the NHWC entry point:
    these transposes are extra HBM passes outside the kernel."""
    nhwc = lambda t: jnp.transpose(t, (0, 2, 3, 1))
    out = asff4_forward(nhwc(x0), nhwc(x1), nhwc(x2), nhwc(x3), params, **kw)
    return jnp.transpose(out, (0, 3, 1, 2))


# ----------------------------------------------------------------------------
# Deterministic synthetic parameters (BatchNorm folded, eval mode, eps=1e-5).
# ----------------------------------------------------------------------------
def init_params(key, C, compress_c=8):
    eps = 1e-5

    def fold_bn(w, k):
        cout = w.shape[-1]
        k1, k2, k3, k4 = jax.random.split(k, 4)
        gamma = jax.random.uniform(k1, (cout,), minval=0.5, maxval=1.5)
        beta = 0.1 * jax.random.normal(k2, (cout,))
        mean = 0.1 * jax.random.normal(k3, (cout,))
        var = jax.random.uniform(k4, (cout,), minval=0.5, maxval=1.5)
        scale = gamma / jnp.sqrt(var + eps)
        w_f = (w * scale).astype(jnp.float32)
        b_f = (beta - mean * scale).reshape(1, cout).astype(jnp.float32)
        return w_f, b_f

    keys = jax.random.split(key, 12)
    wl_w, wl_b = [], []
    for i in range(4):
        w = 0.1 * jax.random.normal(keys[i], (C, compress_c))
        wf, bf = fold_bn(w, keys[4 + i])
        wl_w.append(wf)
        wl_b.append(bf)
    ww = (0.1 * jax.random.normal(keys[8], (4 * compress_c, 4))).astype(jnp.float32)
    bw = (0.05 * jax.random.normal(keys[9], (1, 4))).astype(jnp.float32)
    wc = 0.05 * jax.random.normal(keys[10], (3, 3, C, C))
    wcf, bcf = fold_bn(wc, keys[11])
    return {"wl_w": jnp.stack(wl_w),       # (4, C, 8)
            "wl_b": jnp.stack(wl_b),       # (4, 1, 8)
            "ww": ww, "bw": bw,            # (32, 4), (1, 4)
            "conv_w": wcf, "conv_b": bcf}  # (3, 3, C, C), (1, C)


# ----------------------------------------------------------------------------
# Pure-JAX NHWC reference of the same (BN-folded) forward, for validation.
# ----------------------------------------------------------------------------
def ref_forward_nhwc(x0, x1, x2, x3, params):
    xs = [v.astype(jnp.float32) for v in (x0, x1, x2, x3)]
    comps = []
    for l in range(4):
        y = jnp.einsum('bhwc,cd->bhwd', xs[l], params["wl_w"][l]) + params["wl_b"][l, 0]
        comps.append(y * jax.nn.sigmoid(y))
    cat = jnp.concatenate(comps, axis=-1)
    logits = jnp.einsum('bhwc,cd->bhwd', cat, params["ww"]) + params["bw"][0]
    sm = jax.nn.softmax(logits, axis=-1)
    fused = sum(xs[l] * sm[..., l:l + 1] for l in range(4))
    wc, bc = params["conv_w"], params["conv_b"]
    B, H, W, C = fused.shape
    pad = jnp.pad(fused, ((0, 0), (1, 1), (1, 1), (0, 0)))
    acc = jnp.zeros_like(fused) + bc[0]
    for dy in range(3):
        for dx in range(3):
            acc = acc + jnp.einsum('bhwc,cd->bhwd',
                                   pad[:, dy:dy + H, dx:dx + W, :], wc[dy, dx])
    return acc * jax.nn.sigmoid(acc)


if __name__ == "__main__":
    key = jax.random.PRNGKey(0)
    # Small synthetic proxy of the module: inter_dim=64 (vs. 512), NHWC layout,
    # H=32 with row_tile=16 so the halo path between row tiles is exercised.
    B, H, W, C = 2, 32, 16, 64
    kx, kp = jax.random.split(key)
    kxs = jax.random.split(kx, 4)
    # The producer hands the feature maps to the kernel already in bf16.
    inputs = [jax.random.normal(k, (B, H, W, C), jnp.float32).astype(jnp.bfloat16)
              for k in kxs]
    params = init_params(kp, C)

    out = jax.block_until_ready(jax.jit(asff4_forward)(*inputs, params))
    assert out.shape == (B, H, W, C), out.shape

    ref = jax.block_until_ready(ref_forward_nhwc(*inputs, params))
    err = float(jnp.max(jnp.abs(out - ref)))
    # bf16 inputs / bf16 staged intermediate / bf16 MXU weights, f32 accumulation.
    assert err < 1e-1, f"max abs err {err}"
    print("KERNEL_OK")
</pallas_src>

<mosaic_0001>
module attributes {stable_mosaic.version = 11 : i64} {
  func.func @asff4_kernel(%arg0: i32, %arg1: i32, %arg2: memref<1x16x16x64xbf16, #tpu.memory_space<vmem>>, %arg3: memref<1x16x16x64xbf16, #tpu.memory_space<vmem>>, %arg4: memref<1x16x16x64xbf16, #tpu.memory_space<vmem>>, %arg5: memref<1x16x16x64xbf16, #tpu.memory_space<vmem>>, %arg6: memref<1x1x16x64xbf16, #tpu.memory_space<vmem>>, %arg7: memref<1x1x16x64xbf16, #tpu.memory_space<vmem>>, %arg8: memref<1x1x16x64xbf16, #tpu.memory_space<vmem>>, %arg9: memref<1x1x16x64xbf16, #tpu.memory_space<vmem>>, %arg10: memref<1x1x16x64xbf16, #tpu.memory_space<vmem>>, %arg11: memref<1x1x16x64xbf16, #tpu.memory_space<vmem>>, %arg12: memref<1x1x16x64xbf16, #tpu.memory_space<vmem>>, %arg13: memref<1x1x16x64xbf16, #tpu.memory_space<vmem>>, %arg14: memref<4x64x8xbf16, #tpu.memory_space<vmem>>, %arg15: memref<4x1x8xf32, #tpu.memory_space<vmem>>, %arg16: memref<32x4xf32, #tpu.memory_space<vmem>>, %arg17: memref<1x4xf32, #tpu.memory_space<vmem>>, %arg18: memref<3x64x192xbf16, #tpu.memory_space<vmem>>, %arg19: memref<1x64xf32, #tpu.memory_space<vmem>>, %arg20: memref<1x16x16x64xf32, #tpu.memory_space<vmem>>, %arg21: memref<18x32x64xbf16, #tpu.memory_space<vmem>>) attributes {dimension_semantics = [#tpu.dimension_semantics<parallel>, #tpu.dimension_semantics<parallel>], iteration_bounds = array<i64: 2, 2>, scalar_prefetch = 0 : i64, scratch_operands = 1 : i64, tpu.core_type = #tpu.core_type<tc>, window_params = [{transform_indices = @transform_0, window_bounds = array<i64: 1, 16, 16, 64>}, {transform_indices = @transform_1, window_bounds = array<i64: 1, 16, 16, 64>}, {transform_indices = @transform_2, window_bounds = array<i64: 1, 16, 16, 64>}, {transform_indices = @transform_3, window_bounds = array<i64: 1, 16, 16, 64>}, {transform_indices = @transform_4, window_bounds = array<i64: 1, 1, 16, 64>}, {transform_indices = @transform_5, window_bounds = array<i64: 1, 1, 16, 64>}, {transform_indices = @transform_6, window_bounds = array<i64: 1, 1, 16, 64>}, {transform_indices = @transform_7, window_bounds = array<i64: 1, 1, 16, 64>}, {transform_indices = @transform_8, window_bounds = array<i64: 1, 1, 16, 64>}, {transform_indices = @transform_9, window_bounds = array<i64: 1, 1, 16, 64>}, {transform_indices = @transform_10, window_bounds = array<i64: 1, 1, 16, 64>}, {transform_indices = @transform_11, window_bounds = array<i64: 1, 1, 16, 64>}, {pipeline_mode = #tpu.pipeline_mode<synchronous>, transform_indices = @transform_12, window_bounds = array<i64: 4, 64, 8>}, {pipeline_mode = #tpu.pipeline_mode<synchronous>, transform_indices = @transform_13, window_bounds = array<i64: 4, 1, 8>}, {pipeline_mode = #tpu.pipeline_mode<synchronous>, transform_indices = @transform_14, window_bounds = array<i64: 32, 4>}, {pipeline_mode = #tpu.pipeline_mode<synchronous>, transform_indices = @transform_15, window_bounds = array<i64: 1, 4>}, {pipeline_mode = #tpu.pipeline_mode<synchronous>, transform_indices = @transform_16, window_bounds = array<i64: 3, 64, 192>}, {pipeline_mode = #tpu.pipeline_mode<synchronous>, transform_indices = @transform_17, window_bounds = array<i64: 1, 64>}, {transform_indices = @transform_18, window_bounds = array<i64: 1, 16, 16, 64>}]} {
    %c0 = arith.constant 0 : index
    %c0_0 = arith.constant 0 : index
    %c0_1 = arith.constant 0 : index
    %0 = vector.load %arg14[%c0, %c0_0, %c0_1] : memref<4x64x8xbf16, #tpu.memory_space<vmem>>, vector<1x64x8xbf16>
    %1 = vector.shape_cast %0 : vector<1x64x8xbf16> to vector<64x8xbf16>
    %c1 = arith.constant 1 : index
    %c0_2 = arith.constant 0 : index
    %c0_3 = arith.constant 0 : index
    %2 = vector.load %arg14[%c1, %c0_2, %c0_3] : memref<4x64x8xbf16, #tpu.memory_space<vmem>>, vector<1x64x8xbf16>
    %3 = vector.shape_cast %2 : vector<1x64x8xbf16> to vector<64x8xbf16>
    %c2 = arith.constant 2 : index
    %c0_4 = arith.constant 0 : index
    %c0_5 = arith.constant 0 : index
    %4 = vector.load %arg14[%c2, %c0_4, %c0_5] : memref<4x64x8xbf16, #tpu.memory_space<vmem>>, vector<1x64x8xbf16>
    %5 = vector.shape_cast %4 : vector<1x64x8xbf16> to vector<64x8xbf16>
    %c3 = arith.constant 3 : index
    %c0_6 = arith.constant 0 : index
    %c0_7 = arith.constant 0 : index
    %6 = vector.load %arg14[%c3, %c0_6, %c0_7] : memref<4x64x8xbf16, #tpu.memory_space<vmem>>, vector<1x64x8xbf16>
    %7 = vector.shape_cast %6 : vector<1x64x8xbf16> to vector<64x8xbf16>
    %c0_8 = arith.constant 0 : index
    %c0_9 = arith.constant 0 : index
    %c0_10 = arith.constant 0 : index
    %8 = vector.load %arg15[%c0_8, %c0_9, %c0_10] : memref<4x1x8xf32, #tpu.memory_space<vmem>>, vector<1x1x8xf32>
    %9 = vector.shape_cast %8 : vector<1x1x8xf32> to vector<1x8xf32>
    %c1_11 = arith.constant 1 : index
    %c0_12 = arith.constant 0 : index
    %c0_13 = arith.constant 0 : index
    %10 = vector.load %arg15[%c1_11, %c0_12, %c0_13] : memref<4x1x8xf32, #tpu.memory_space<vmem>>, vector<1x1x8xf32>
    %11 = vector.shape_cast %10 : vector<1x1x8xf32> to vector<1x8xf32>
    %c2_14 = arith.constant 2 : index
    %c0_15 = arith.constant 0 : index
    %c0_16 = arith.constant 0 : index
    %12 = vector.load %arg15[%c2_14, %c0_15, %c0_16] : memref<4x1x8xf32, #tpu.memory_space<vmem>>, vector<1x1x8xf32>
    %13 = vector.shape_cast %12 : vector<1x1x8xf32> to vector<1x8xf32>
    %c3_17 = arith.constant 3 : index
    %c0_18 = arith.constant 0 : index
    %c0_19 = arith.constant 0 : index
    %14 = vector.load %arg15[%c3_17, %c0_18, %c0_19] : memref<4x1x8xf32, #tpu.memory_space<vmem>>, vector<1x1x8xf32>
    %15 = vector.shape_cast %14 : vector<1x1x8xf32> to vector<1x8xf32>
    %c0_20 = arith.constant 0 : index
    %c0_21 = arith.constant 0 : index
    %16 = vector.load %arg16[%c0_20, %c0_21] : memref<32x4xf32, #tpu.memory_space<vmem>>, vector<8x4xf32>
    %c8 = arith.constant 8 : index
    %c0_22 = arith.constant 0 : index
    %17 = vector.load %arg16[%c8, %c0_22] : memref<32x4xf32, #tpu.memory_space<vmem>>, vector<8x4xf32>
    %c16 = arith.constant 16 : index
    %c0_23 = arith.constant 0 : index
    %18 = vector.load %arg16[%c16, %c0_23] : memref<32x4xf32, #tpu.memory_space<vmem>>, vector<8x4xf32>
    %c24 = arith.constant 24 : index
    %c0_24 = arith.constant 0 : index
    %19 = vector.load %arg16[%c24, %c0_24] : memref<32x4xf32, #tpu.memory_space<vmem>>, vector<8x4xf32>
    %c0_25 = arith.constant 0 : index
    %c0_26 = arith.constant 0 : index
    %20 = vector.load %arg17[%c0_25, %c0_26] : memref<1x4xf32, #tpu.memory_space<vmem>>, vector<1x4xf32>
    %c0_27 = arith.constant 0 : index
    %c0_28 = arith.constant 0 : index
    %c0_29 = arith.constant 0 : index
    %c0_30 = arith.constant 0 : index
    %21 = vector.load %arg2[%c0_27, %c0_28, %c0_29, %c0_30] : memref<1x16x16x64xbf16, #tpu.memory_space<vmem>>, vector<1x16x16x64xbf16>
    %22 = vector.shape_cast %21 : vector<1x16x16x64xbf16> to vector<16x16x64xbf16>
    %23 = vector.shape_cast %22 : vector<16x16x64xbf16> to vector<256x64xbf16>
    %c0_31 = arith.constant 0 : index
    %c0_32 = arith.constant 0 : index
    %c0_33 = arith.constant 0 : index
    %c0_34 = arith.constant 0 : index
    %24 = vector.load %arg3[%c0_31, %c0_32, %c0_33, %c0_34] : memref<1x16x16x64xbf16, #tpu.memory_space<vmem>>, vector<1x16x16x64xbf16>
    %25 = vector.shape_cast %24 : vector<1x16x16x64xbf16> to vector<16x16x64xbf16>
    %26 = vector.shape_cast %25 : vector<16x16x64xbf16> to vector<256x64xbf16>
    %c0_35 = arith.constant 0 : index
    %c0_36 = arith.constant 0 : index
    %c0_37 = arith.constant 0 : index
    %c0_38 = arith.constant 0 : index
    %27 = vector.load %arg4[%c0_35, %c0_36, %c0_37, %c0_38] : memref<1x16x16x64xbf16, #tpu.memory_space<vmem>>, vector<1x16x16x64xbf16>
    %28 = vector.shape_cast %27 : vector<1x16x16x64xbf16> to vector<16x16x64xbf16>
    %29 = vector.shape_cast %28 : vector<16x16x64xbf16> to vector<256x64xbf16>
    %c0_39 = arith.constant 0 : index
    %c0_40 = arith.constant 0 : index
    %c0_41 = arith.constant 0 : index
    %c0_42 = arith.constant 0 : index
    %30 = vector.load %arg5[%c0_39, %c0_40, %c0_41, %c0_42] : memref<1x16x16x64xbf16, #tpu.memory_space<vmem>>, vector<1x16x16x64xbf16>
    %31 = vector.shape_cast %30 : vector<1x16x16x64xbf16> to vector<16x16x64xbf16>
    %32 = vector.shape_cast %31 : vector<16x16x64xbf16> to vector<256x64xbf16>
    %c0_43 = arith.constant 0 : index
    %c0_44 = arith.constant 0 : index
    %c0_45 = arith.constant 0 : index
    %c0_46 = arith.constant 0 : index
    %33 = vector.load %arg6[%c0_43, %c0_44, %c0_45, %c0_46] : memref<1x1x16x64xbf16, #tpu.memory_space<vmem>>, vector<1x1x16x64xbf16>
    %34 = vector.shape_cast %33 : vector<1x1x16x64xbf16> to vector<16x64xbf16>
    %c0_47 = arith.constant 0 : index
    %c0_48 = arith.constant 0 : index
    %c0_49 = arith.constant 0 : index
    %c0_50 = arith.constant 0 : index
    %35 = vector.load %arg7[%c0_47, %c0_48, %c0_49, %c0_50] : memref<1x1x16x64xbf16, #tpu.memory_space<vmem>>, vector<1x1x16x64xbf16>
    %36 = vector.shape_cast %35 : vector<1x1x16x64xbf16> to vector<16x64xbf16>
    %c0_51 = arith.constant 0 : index
    %c0_52 = arith.constant 0 : index
    %c0_53 = arith.constant 0 : index
    %c0_54 = arith.constant 0 : index
    %37 = vector.load %arg8[%c0_51, %c0_52, %c0_53, %c0_54] : memref<1x1x16x64xbf16, #tpu.memory_space<vmem>>, vector<1x1x16x64xbf16>
    %38 = vector.shape_cast %37 : vector<1x1x16x64xbf16> to vector<16x64xbf16>
    %c0_55 = arith.constant 0 : index
    %c0_56 = arith.constant 0 : index
    %c0_57 = arith.constant 0 : index
    %c0_58 = arith.constant 0 : index
    %39 = vector.load %arg9[%c0_55, %c0_56, %c0_57, %c0_58] : memref<1x1x16x64xbf16, #tpu.memory_space<vmem>>, vector<1x1x16x64xbf16>
    %40 = vector.shape_cast %39 : vector<1x1x16x64xbf16> to vector<16x64xbf16>
    %c0_59 = arith.constant 0 : index
    %c0_60 = arith.constant 0 : index
    %c0_61 = arith.constant 0 : index
    %c0_62 = arith.constant 0 : index
    %41 = vector.load %arg10[%c0_59, %c0_60, %c0_61, %c0_62] : memref<1x1x16x64xbf16, #tpu.memory_space<vmem>>, vector<1x1x16x64xbf16>
    %42 = vector.shape_cast %41 : vector<1x1x16x64xbf16> to vector<16x64xbf16>
    %c0_63 = arith.constant 0 : index
    %c0_64 = arith.constant 0 : index
    %c0_65 = arith.constant 0 : index
    %c0_66 = arith.constant 0 : index
    %43 = vector.load %arg11[%c0_63, %c0_64, %c0_65, %c0_66] : memref<1x1x16x64xbf16, #tpu.memory_space<vmem>>, vector<1x1x16x64xbf16>
    %44 = vector.shape_cast %43 : vector<1x1x16x64xbf16> to vector<16x64xbf16>
    %c0_67 = arith.constant 0 : index
    %c0_68 = arith.constant 0 : index
    %c0_69 = arith.constant 0 : index
    %c0_70 = arith.constant 0 : index
    %45 = vector.load %arg12[%c0_67, %c0_68, %c0_69, %c0_70] : memref<1x1x16x64xbf16, #tpu.memory_space<vmem>>, vector<1x1x16x64xbf16>
    %46 = vector.shape_cast %45 : vector<1x1x16x64xbf16> to vector<16x64xbf16>
    %c0_71 = arith.constant 0 : index
    %c0_72 = arith.constant 0 : index
    %c0_73 = arith.constant 0 : index
    %c0_74 = arith.constant 0 : index
    %47 = vector.load %arg13[%c0_71, %c0_72, %c0_73, %c0_74] : memref<1x1x16x64xbf16, #tpu.memory_space<vmem>>, vector<1x1x16x64xbf16>
    %48 = vector.shape_cast %47 : vector<1x1x16x64xbf16> to vector<16x64xbf16>
    %cst = arith.constant dense<0.000000e+00> : vector<256x8xf32>
    %49 = tpu.matmul %23, %1, %cst {dimension_numbers = #tpu.dot_dimension_numbers<[1], [0], [0], [1], [0, 0, 1, 1], [], []>} : vector<256x64xbf16>, vector<64x8xbf16>, vector<256x8xf32> -> vector<256x8xf32>
    %50 = vector.broadcast %9 : vector<1x8xf32> to vector<256x8xf32>
    %51 = arith.addf %49, %50 : vector<256x8xf32>
    %52 = arith.negf %51 : vector<256x8xf32>
    %53 = math.exp %52 : vector<256x8xf32>
    %cst_75 = arith.constant 1.000000e+00 : f32
    %54 = vector.broadcast %cst_75 : f32 to vector<256x8xf32>
    %55 = arith.addf %54, %53 : vector<256x8xf32>
    %56 = arith.divf %54, %55 : vector<256x8xf32>
    %57 = arith.mulf %51, %56 : vector<256x8xf32>
    %cst_76 = arith.constant dense<0.000000e+00> : vector<256x4xf32>
    %58 = tpu.matmul %57, %16, %cst_76 {dimension_numbers = #tpu.dot_dimension_numbers<[1], [0], [0], [1], [0, 0, 1, 1], [], []>} : vector<256x8xf32>, vector<8x4xf32>, vector<256x4xf32> -> vector<256x4xf32>
    %59 = vector.broadcast %20 : vector<1x4xf32> to vector<256x4xf32>
    %60 = arith.addf %59, %58 : vector<256x4xf32>
    %cst_77 = arith.constant dense<0.000000e+00> : vector<256x8xf32>
    %61 = tpu.matmul %26, %3, %cst_77 {dimension_numbers = #tpu.dot_dimension_numbers<[1], [0], [0], [1], [0, 0, 1, 1], [], []>} : vector<256x64xbf16>, vector<64x8xbf16>, vector<256x8xf32> -> vector<256x8xf32>
    %62 = vector.broadcast %11 : vector<1x8xf32> to vector<256x8xf32>
    %63 = arith.addf %61, %62 : vector<256x8xf32>
    %64 = arith.negf %63 : vector<256x8xf32>
    %65 = math.exp %64 : vector<256x8xf32>
    %cst_78 = arith.constant 1.000000e+00 : f32
    %66 = vector.broadcast %cst_78 : f32 to vector<256x8xf32>
    %67 = arith.addf %66, %65 : vector<256x8xf32>
    %68 = arith.divf %66, %67 : vector<256x8xf32>
    %69 = arith.mulf %63, %68 : vector<256x8xf32>
    %cst_79 = arith.constant dense<0.000000e+00> : vector<256x4xf32>
    %70 = tpu.matmul %69, %17, %cst_79 {dimension_numbers = #tpu.dot_dimension_numbers<[1], [0], [0], [1], [0, 0, 1, 1], [], []>} : vector<256x8xf32>, vector<8x4xf32>, vector<256x4xf32> -> vector<256x4xf32>
    %71 = arith.addf %60, %70 : vector<256x4xf32>
    %cst_80 = arith.constant dense<0.000000e+00> : vector<256x8xf32>
    %72 = tpu.matmul %29, %5, %cst_80 {dimension_numbers = #tpu.dot_dimension_numbers<[1], [0], [0], [1], [0, 0, 1, 1], [], []>} : vector<256x64xbf16>, vector<64x8xbf16>, vector<256x8xf32> -> vector<256x8xf32>
    %73 = vector.broadcast %13 : vector<1x8xf32> to vector<256x8xf32>
    %74 = arith.addf %72, %73 : vector<256x8xf32>
    %75 = arith.negf %74 : vector<256x8xf32>
    %76 = math.exp %75 : vector<256x8xf32>
    %cst_81 = arith.constant 1.000000e+00 : f32
    %77 = vector.broadcast %cst_81 : f32 to vector<256x8xf32>
    %78 = arith.addf %77, %76 : vector<256x8xf32>
    %79 = arith.divf %77, %78 : vector<256x8xf32>
    %80 = arith.mulf %74, %79 : vector<256x8xf32>
    %cst_82 = arith.constant dense<0.000000e+00> : vector<256x4xf32>
    %81 = tpu.matmul %80, %18, %cst_82 {dimension_numbers = #tpu.dot_dimension_numbers<[1], [0], [0], [1], [0, 0, 1, 1], [], []>} : vector<256x8xf32>, vector<8x4xf32>, vector<256x4xf32> -> vector<256x4xf32>
    %82 = arith.addf %71, %81 : vector<256x4xf32>
    %cst_83 = arith.constant dense<0.000000e+00> : vector<256x8xf32>
    %83 = tpu.matmul %32, %7, %cst_83 {dimension_numbers = #tpu.dot_dimension_numbers<[1], [0], [0], [1], [0, 0, 1, 1], [], []>} : vector<256x64xbf16>, vector<64x8xbf16>, vector<256x8xf32> -> vector<256x8xf32>
    %84 = vector.broadcast %15 : vector<1x8xf32> to vector<256x8xf32>
    %85 = arith.addf %83, %84 : vector<256x8xf32>
    %86 = arith.negf %85 : vector<256x8xf32>
    %87 = math.exp %86 : vector<256x8xf32>
    %cst_84 = arith.constant 1.000000e+00 : f32
    %88 = vector.broadcast %cst_84 : f32 to vector<256x8xf32>
    %89 = arith.addf %88, %87 : vector<256x8xf32>
    %90 = arith.divf %88, %89 : vector<256x8xf32>
    %91 = arith.mulf %85, %90 : vector<256x8xf32>
    %cst_85 = arith.constant dense<0.000000e+00> : vector<256x4xf32>
    %92 = tpu.matmul %91, %19, %cst_85 {dimension_numbers = #tpu.dot_dimension_numbers<[1], [0], [0], [1], [0, 0, 1, 1], [], []>} : vector<256x8xf32>, vector<8x4xf32>, vector<256x4xf32> -> vector<256x4xf32>
    %93 = arith.addf %82, %92 : vector<256x4xf32>
    %cst_86 = arith.constant dense<0xFF800000> : vector<256xf32>
    %94 = vector.multi_reduction <maximumf>, %93, %cst_86 [1] : vector<256x4xf32> to vector<256xf32>
    %95 = vector.shape_cast %94 : vector<256xf32> to vector<256x1xf32>
    %96 = vector.broadcast %95 : vector<256x1xf32> to vector<256x4xf32>
    %97 = arith.subf %93, %96 : vector<256x4xf32>
    %98 = math.exp %97 : vector<256x4xf32>
    %cst_87 = arith.constant dense<0.000000e+00> : vector<256xf32>
    %99 = vector.multi_reduction <add>, %98, %cst_87 [1] : vector<256x4xf32> to vector<256xf32>
    %100 = vector.shape_cast %99 : vector<256xf32> to vector<256x1xf32>
    %101 = tpu.reciprocal %100 {approx = true} : vector<256x1xf32> -> vector<256x1xf32>
    %102 = vector.broadcast %101 : vector<256x1xf32> to vector<256x4xf32>
    %103 = arith.mulf %98, %102 : vector<256x4xf32>
    %104 = arith.extf %23 : vector<256x64xbf16> to vector<256x64xf32>
    %105 = vector.extract_strided_slice %103 {offsets = [0, 0], sizes = [256, 1], strides = [1, 1]} : vector<256x4xf32> to vector<256x1xf32>
    %106 = vector.broadcast %105 : vector<256x1xf32> to vector<256x64xf32>
    %107 = arith.mulf %104, %106 : vector<256x64xf32>
    %108 = arith.extf %26 : vector<256x64xbf16> to vector<256x64xf32>
    %109 = vector.extract_strided_slice %103 {offsets = [0, 1], sizes = [256, 1], strides = [1, 1]} : vector<256x4xf32> to vector<256x1xf32>
    %110 = vector.broadcast %109 : vector<256x1xf32> to vector<256x64xf32>
    %111 = arith.mulf %108, %110 : vector<256x64xf32>
    %112 = arith.addf %107, %111 : vector<256x64xf32>
    %113 = arith.extf %29 : vector<256x64xbf16> to vector<256x64xf32>
    %114 = vector.extract_strided_slice %103 {offsets = [0, 2], sizes = [256, 1], strides = [1, 1]} : vector<256x4xf32> to vector<256x1xf32>
    %115 = vector.broadcast %114 : vector<256x1xf32> to vector<256x64xf32>
    %116 = arith.mulf %113, %115 : vector<256x64xf32>
    %117 = arith.addf %112, %116 : vector<256x64xf32>
    %118 = arith.extf %32 : vector<256x64xbf16> to vector<256x64xf32>
    %119 = vector.extract_strided_slice %103 {offsets = [0, 3], sizes = [256, 1], strides = [1, 1]} : vector<256x4xf32> to vector<256x1xf32>
    %120 = vector.broadcast %119 : vector<256x1xf32> to vector<256x64xf32>
    %121 = arith.mulf %118, %120 : vector<256x64xf32>
    %122 = arith.addf %117, %121 : vector<256x64xf32>
    %123 = vector.shape_cast %122 : vector<256x64xf32> to vector<16x16x64xf32>
    %cst_88 = arith.constant dense<0.000000e+00> : vector<16x8xf32>
    %124 = tpu.matmul %34, %1, %cst_88 {dimension_numbers = #tpu.dot_dimension_numbers<[1], [0], [0], [1], [0, 0, 1, 1], [], []>} : vector<16x64xbf16>, vector<64x8xbf16>, vector<16x8xf32> -> vector<16x8xf32>
    %125 = vector.broadcast %9 : vector<1x8xf32> to vector<16x8xf32>
    %126 = arith.addf %124, %125 : vector<16x8xf32>
    %127 = arith.negf %126 : vector<16x8xf32>
    %128 = math.exp %127 : vector<16x8xf32>
    %cst_89 = arith.constant 1.000000e+00 : f32
    %129 = vector.broadcast %cst_89 : f32 to vector<16x8xf32>
    %130 = arith.addf %129, %128 : vector<16x8xf32>
    %131 = arith.divf %129, %130 : vector<16x8xf32>
    %132 = arith.mulf %126, %131 : vector<16x8xf32>
    %cst_90 = arith.constant dense<0.000000e+00> : vector<16x4xf32>
    %133 = tpu.matmul %132, %16, %cst_90 {dimension_numbers = #tpu.dot_dimension_numbers<[1], [0], [0], [1], [0, 0, 1, 1], [], []>} : vector<16x8xf32>, vector<8x4xf32>, vector<16x4xf32> -> vector<16x4xf32>
    %134 = vector.broadcast %20 : vector<1x4xf32> to vector<16x4xf32>
    %135 = arith.addf %134, %133 : vector<16x4xf32>
    %cst_91 = arith.constant dense<0.000000e+00> : vector<16x8xf32>
    %136 = tpu.matmul %36, %3, %cst_91 {dimension_numbers = #tpu.dot_dimension_numbers<[1], [0], [0], [1], [0, 0, 1, 1], [], []>} : vector<16x64xbf16>, vector<64x8xbf16>, vector<16x8xf32> -> vector<16x8xf32>
    %137 = vector.broadcast %11 : vector<1x8xf32> to vector<16x8xf32>
    %138 = arith.addf %136, %137 : vector<16x8xf32>
    %139 = arith.negf %138 : vector<16x8xf32>
    %140 = math.exp %139 : vector<16x8xf32>
    %cst_92 = arith.constant 1.000000e+00 : f32
    %141 = vector.broadcast %cst_92 : f32 to vector<16x8xf32>
    %142 = arith.addf %141, %140 : vector<16x8xf32>
    %143 = arith.divf %141, %142 : vector<16x8xf32>
    %144 = arith.mulf %138, %143 : vector<16x8xf32>
    %cst_93 = arith.constant dense<0.000000e+00> : vector<16x4xf32>
    %145 = tpu.matmul %144, %17, %cst_93 {dimension_numbers = #tpu.dot_dimension_numbers<[1], [0], [0], [1], [0, 0, 1, 1], [], []>} : vector<16x8xf32>, vector<8x4xf32>, vector<16x4xf32> -> vector<16x4xf32>
    %146 = arith.addf %135, %145 : vector<16x4xf32>
    %cst_94 = arith.constant dense<0.000000e+00> : vector<16x8xf32>
    %147 = tpu.matmul %38, %5, %cst_94 {dimension_numbers = #tpu.dot_dimension_numbers<[1], [0], [0], [1], [0, 0, 1, 1], [], []>} : vector<16x64xbf16>, vector<64x8xbf16>, vector<16x8xf32> -> vector<16x8xf32>
    %148 = vector.broadcast %13 : vector<1x8xf32> to vector<16x8xf32>
    %149 = arith.addf %147, %148 : vector<16x8xf32>
    %150 = arith.negf %149 : vector<16x8xf32>
    %151 = math.exp %150 : vector<16x8xf32>
    %cst_95 = arith.constant 1.000000e+00 : f32
    %152 = vector.broadcast %cst_95 : f32 to vector<16x8xf32>
    %153 = arith.addf %152, %151 : vector<16x8xf32>
    %154 = arith.divf %152, %153 : vector<16x8xf32>
    %155 = arith.mulf %149, %154 : vector<16x8xf32>
    %cst_96 = arith.constant dense<0.000000e+00> : vector<16x4xf32>
    %156 = tpu.matmul %155, %18, %cst_96 {dimension_numbers = #tpu.dot_dimension_numbers<[1], [0], [0], [1], [0, 0, 1, 1], [], []>} : vector<16x8xf32>, vector<8x4xf32>, vector<16x4xf32> -> vector<16x4xf32>
    %157 = arith.addf %146, %156 : vector<16x4xf32>
    %cst_97 = arith.constant dense<0.000000e+00> : vector<16x8xf32>
    %158 = tpu.matmul %40, %7, %cst_97 {dimension_numbers = #tpu.dot_dimension_numbers<[1], [0], [0], [1], [0, 0, 1, 1], [], []>} : vector<16x64xbf16>, vector<64x8xbf16>, vector<16x8xf32> -> vector<16x8xf32>
    %159 = vector.broadcast %15 : vector<1x8xf32> to vector<16x8xf32>
    %160 = arith.addf %158, %159 : vector<16x8xf32>
    %161 = arith.negf %160 : vector<16x8xf32>
    %162 = math.exp %161 : vector<16x8xf32>
    %cst_98 = arith.constant 1.000000e+00 : f32
    %163 = vector.broadcast %cst_98 : f32 to vector<16x8xf32>
    %164 = arith.addf %163, %162 : vector<16x8xf32>
    %165 = arith.divf %163, %164 : vector<16x8xf32>
    %166 = arith.mulf %160, %165 : vector<16x8xf32>
    %cst_99 = arith.constant dense<0.000000e+00> : vector<16x4xf32>
    %167 = tpu.matmul %166, %19, %cst_99 {dimension_numbers = #tpu.dot_dimension_numbers<[1], [0], [0], [1], [0, 0, 1, 1], [], []>} : vector<16x8xf32>, vector<8x4xf32>, vector<16x4xf32> -> vector<16x4xf32>
    %168 = arith.addf %157, %167 : vector<16x4xf32>
    %cst_100 = arith.constant dense<0xFF800000> : vector<16xf32>
    %169 = vector.multi_reduction <maximumf>, %168, %cst_100 [1] : vector<16x4xf32> to vector<16xf32>
    %170 = vector.shape_cast %169 : vector<16xf32> to vector<16x1xf32>
    %171 = vector.broadcast %170 : vector<16x1xf32> to vector<16x4xf32>
    %172 = arith.subf %168, %171 : vector<16x4xf32>
    %173 = math.exp %172 : vector<16x4xf32>
    %cst_101 = arith.constant dense<0.000000e+00> : vector<16xf32>
    %174 = vector.multi_reduction <add>, %173, %cst_101 [1] : vector<16x4xf32> to vector<16xf32>
    %175 = vector.shape_cast %174 : vector<16xf32> to vector<16x1xf32>
    %176 = tpu.reciprocal %175 {approx = true} : vector<16x1xf32> -> vector<16x1xf32>
    %177 = vector.broadcast %176 : vector<16x1xf32> to vector<16x4xf32>
    %178 = arith.mulf %173, %177 : vector<16x4xf32>
    %179 = arith.extf %34 : vector<16x64xbf16> to vector<16x64xf32>
    %180 = vector.extract_strided_slice %178 {offsets = [0, 0], sizes = [16, 1], strides = [1, 1]} : vector<16x4xf32> to vector<16x1xf32>
    %181 = vector.broadcast %180 : vector<16x1xf32> to vector<16x64xf32>
    %182 = arith.mulf %179, %181 : vector<16x64xf32>
    %183 = arith.extf %36 : vector<16x64xbf16> to vector<16x64xf32>
    %184 = vector.extract_strided_slice %178 {offsets = [0, 1], sizes = [16, 1], strides = [1, 1]} : vector<16x4xf32> to vector<16x1xf32>
    %185 = vector.broadcast %184 : vector<16x1xf32> to vector<16x64xf32>
    %186 = arith.mulf %183, %185 : vector<16x64xf32>
    %187 = arith.addf %182, %186 : vector<16x64xf32>
    %188 = arith.extf %38 : vector<16x64xbf16> to vector<16x64xf32>
    %189 = vector.extract_strided_slice %178 {offsets = [0, 2], sizes = [16, 1], strides = [1, 1]} : vector<16x4xf32> to vector<16x1xf32>
    %190 = vector.broadcast %189 : vector<16x1xf32> to vector<16x64xf32>
    %191 = arith.mulf %188, %190 : vector<16x64xf32>
    %192 = arith.addf %187, %191 : vector<16x64xf32>
    %193 = arith.extf %40 : vector<16x64xbf16> to vector<16x64xf32>
    %194 = vector.extract_strided_slice %178 {offsets = [0, 3], sizes = [16, 1], strides = [1, 1]} : vector<16x4xf32> to vector<16x1xf32>
    %195 = vector.broadcast %194 : vector<16x1xf32> to vector<16x64xf32>
    %196 = arith.mulf %193, %195 : vector<16x64xf32>
    %197 = arith.addf %192, %196 : vector<16x64xf32>
    %cst_102 = arith.constant dense<0.000000e+00> : vector<16x8xf32>
    %198 = tpu.matmul %42, %1, %cst_102 {dimension_numbers = #tpu.dot_dimension_numbers<[1], [0], [0], [1], [0, 0, 1, 1], [], []>} : vector<16x64xbf16>, vector<64x8xbf16>, vector<16x8xf32> -> vector<16x8xf32>
    %199 = vector.broadcast %9 : vector<1x8xf32> to vector<16x8xf32>
    %200 = arith.addf %198, %199 : vector<16x8xf32>
    %201 = arith.negf %200 : vector<16x8xf32>
    %202 = math.exp %201 : vector<16x8xf32>
    %cst_103 = arith.constant 1.000000e+00 : f32
    %203 = vector.broadcast %cst_103 : f32 to vector<16x8xf32>
    %204 = arith.addf %203, %202 : vector<16x8xf32>
    %205 = arith.divf %203, %204 : vector<16x8xf32>
    %206 = arith.mulf %200, %205 : vector<16x8xf32>
    %cst_104 = arith.constant dense<0.000000e+00> : vector<16x4xf32>
    %207 = tpu.matmul %206, %16, %cst_104 {dimension_numbers = #tpu.dot_dimension_numbers<[1], [0], [0], [1], [0, 0, 1, 1], [], []>} : vector<16x8xf32>, vector<8x4xf32>, vector<16x4xf32> -> vector<16x4xf32>
    %208 = vector.broadcast %20 : vector<1x4xf32> to vector<16x4xf32>
    %209 = arith.addf %208, %207 : vector<16x4xf32>
    %cst_105 = arith.constant dense<0.000000e+00> : vector<16x8xf32>
    %210 = tpu.matmul %44, %3, %cst_105 {dimension_numbers = #tpu.dot_dimension_numbers<[1], [0], [0], [1], [0, 0, 1, 1], [], []>} : vector<16x64xbf16>, vector<64x8xbf16>, vector<16x8xf32> -> vector<16x8xf32>
    %211 = vector.broadcast %11 : vector<1x8xf32> to vector<16x8xf32>
    %212 = arith.addf %210, %211 : vector<16x8xf32>
    %213 = arith.negf %212 : vector<16x8xf32>
    %214 = math.exp %213 : vector<16x8xf32>
    %cst_106 = arith.constant 1.000000e+00 : f32
    %215 = vector.broadcast %cst_106 : f32 to vector<16x8xf32>
    %216 = arith.addf %215, %214 : vector<16x8xf32>
    %217 = arith.divf %215, %216 : vector<16x8xf32>
    %218 = arith.mulf %212, %217 : vector<16x8xf32>
    %cst_107 = arith.constant dense<0.000000e+00> : vector<16x4xf32>
    %219 = tpu.matmul %218, %17, %cst_107 {dimension_numbers = #tpu.dot_dimension_numbers<[1], [0], [0], [1], [0, 0, 1, 1], [], []>} : vector<16x8xf32>, vector<8x4xf32>, vector<16x4xf32> -> vector<16x4xf32>
    %220 = arith.addf %209, %219 : vector<16x4xf32>
    %cst_108 = arith.constant dense<0.000000e+00> : vector<16x8xf32>
    %221 = tpu.matmul %46, %5, %cst_108 {dimension_numbers = #tpu.dot_dimension_numbers<[1], [0], [0], [1], [0, 0, 1, 1], [], []>} : vector<16x64xbf16>, vector<64x8xbf16>, vector<16x8xf32> -> vector<16x8xf32>
    %222 = vector.broadcast %13 : vector<1x8xf32> to vector<16x8xf32>
    %223 = arith.addf %221, %222 : vector<16x8xf32>
    %224 = arith.negf %223 : vector<16x8xf32>
    %225 = math.exp %224 : vector<16x8xf32>
    %cst_109 = arith.constant 1.000000e+00 : f32
    %226 = vector.broadcast %cst_109 : f32 to vector<16x8xf32>
    %227 = arith.addf %226, %225 : vector<16x8xf32>
    %228 = arith.divf %226, %227 : vector<16x8xf32>
    %229 = arith.mulf %223, %228 : vector<16x8xf32>
    %cst_110 = arith.constant dense<0.000000e+00> : vector<16x4xf32>
    %230 = tpu.matmul %229, %18, %cst_110 {dimension_numbers = #tpu.dot_dimension_numbers<[1], [0], [0], [1], [0, 0, 1, 1], [], []>} : vector<16x8xf32>, vector<8x4xf32>, vector<16x4xf32> -> vector<16x4xf32>
    %231 = arith.addf %220, %230 : vector<16x4xf32>
    %cst_111 = arith.constant dense<0.000000e+00> : vector<16x8xf32>
    %232 = tpu.matmul %48, %7, %cst_111 {dimension_numbers = #tpu.dot_dimension_numbers<[1], [0], [0], [1], [0, 0, 1, 1], [], []>} : vector<16x64xbf16>, vector<64x8xbf16>, vector<16x8xf32> -> vector<16x8xf32>
    %233 = vector.broadcast %15 : vector<1x8xf32> to vector<16x8xf32>
    %234 = arith.addf %232, %233 : vector<16x8xf32>
    %235 = arith.negf %234 : vector<16x8xf32>
    %236 = math.exp %235 : vector<16x8xf32>
    %cst_112 = arith.constant 1.000000e+00 : f32
    %237 = vector.broadcast %cst_112 : f32 to vector<16x8xf32>
    %238 = arith.addf %237, %236 : vector<16x8xf32>
    %239 = arith.divf %237, %238 : vector<16x8xf32>
    %240 = arith.mulf %234, %239 : vector<16x8xf32>
    %cst_113 = arith.constant dense<0.000000e+00> : vector<16x4xf32>
    %241 = tpu.matmul %240, %19, %cst_113 {dimension_numbers = #tpu.dot_dimension_numbers<[1], [0], [0], [1], [0, 0, 1, 1], [], []>} : vector<16x8xf32>, vector<8x4xf32>, vector<16x4xf32> -> vector<16x4xf32>
    %242 = arith.addf %231, %241 : vector<16x4xf32>
    %cst_114 = arith.constant dense<0xFF800000> : vector<16xf32>
    %243 = vector.multi_reduction <maximumf>, %242, %cst_114 [1] : vector<16x4xf32> to vector<16xf32>
    %244 = vector.shape_cast %243 : vector<16xf32> to vector<16x1xf32>
    %245 = vector.broadcast %244 : vector<16x1xf32> to vector<16x4xf32>
    %246 = arith.subf %242, %245 : vector<16x4xf32>
    %247 = math.exp %246 : vector<16x4xf32>
    %cst_115 = arith.constant dense<0.000000e+00> : vector<16xf32>
    %248 = vector.multi_reduction <add>, %247, %cst_115 [1] : vector<16x4xf32> to vector<16xf32>
    %249 = vector.shape_cast %248 : vector<16xf32> to vector<16x1xf32>
    %250 = tpu.reciprocal %249 {approx = true} : vector<16x1xf32> -> vector<16x1xf32>
    %251 = vector.broadcast %250 : vector<16x1xf32> to vector<16x4xf32>
    %252 = arith.mulf %247, %251 : vector<16x4xf32>
    %253 = arith.extf %42 : vector<16x64xbf16> to vector<16x64xf32>
    %254 = vector.extract_strided_slice %252 {offsets = [0, 0], sizes = [16, 1], strides = [1, 1]} : vector<16x4xf32> to vector<16x1xf32>
    %255 = vector.broadcast %254 : vector<16x1xf32> to vector<16x64xf32>
    %256 = arith.mulf %253, %255 : vector<16x64xf32>
    %257 = arith.extf %44 : vector<16x64xbf16> to vector<16x64xf32>
    %258 = vector.extract_strided_slice %252 {offsets = [0, 1], sizes = [16, 1], strides = [1, 1]} : vector<16x4xf32> to vector<16x1xf32>
    %259 = vector.broadcast %258 : vector<16x1xf32> to vector<16x64xf32>
    %260 = arith.mulf %257, %259 : vector<16x64xf32>
    %261 = arith.addf %256, %260 : vector<16x64xf32>
    %262 = arith.extf %46 : vector<16x64xbf16> to vector<16x64xf32>
    %263 = vector.extract_strided_slice %252 {offsets = [0, 2], sizes = [16, 1], strides = [1, 1]} : vector<16x4xf32> to vector<16x1xf32>
    %264 = vector.broadcast %263 : vector<16x1xf32> to vector<16x64xf32>
    %265 = arith.mulf %262, %264 : vector<16x64xf32>
    %266 = arith.addf %261, %265 : vector<16x64xf32>
    %267 = arith.extf %48 : vector<16x64xbf16> to vector<16x64xf32>
    %268 = vector.extract_strided_slice %252 {offsets = [0, 3], sizes = [16, 1], strides = [1, 1]} : vector<16x4xf32> to vector<16x1xf32>
    %269 = vector.broadcast %268 : vector<16x1xf32> to vector<16x64xf32>
    %270 = arith.mulf %267, %269 : vector<16x64xf32>
    %271 = arith.addf %266, %270 : vector<16x64xf32>
    %c0_i32 = arith.constant 0 : i32
    %272 = arith.cmpi sgt, %arg1, %c0_i32 : i32
    %cst_116 = arith.constant 1.000000e+00 : f32
    %cst_117 = arith.constant 0.000000e+00 : f32
    %273 = arith.select %272, %cst_116, %cst_117 : f32
    %274 = vector.broadcast %273 : f32 to vector<16x64xf32>
    %275 = arith.mulf %197, %274 : vector<16x64xf32>
    %c1_i32 = arith.constant 1 : i32
    %276 = arith.cmpi slt, %arg1, %c1_i32 : i32
    %cst_118 = arith.constant 1.000000e+00 : f32
    %cst_119 = arith.constant 0.000000e+00 : f32
    %277 = arith.select %276, %cst_118, %cst_119 : f32
    %278 = vector.broadcast %277 : f32 to vector<16x64xf32>
    %279 = arith.mulf %271, %278 : vector<16x64xf32>
    %cst_120 = arith.constant 0.000000e+00 : bf16
    %280 = vector.broadcast %cst_120 : bf16 to vector<18x1x64xbf16>
    %c0_121 = arith.constant 0 : index
    %c0_122 = arith.constant 0 : index
    %c0_123 = arith.constant 0 : index
    %281 = vector.load %arg21[%c0_121, %c0_122, %c0_123] : memref<18x32x64xbf16, #tpu.memory_space<vmem>>, vector<18x1x64xbf16>
    tpu.vector_store %arg21[%c0_121, %c0_122, %c0_123], %280 {strides = array<i32>} : memref<18x32x64xbf16, #tpu.memory_space<vmem>>, vector<18x1x64xbf16>,
    %c0_124 = arith.constant 0 : index
    %c17 = arith.constant 17 : index
    %c0_125 = arith.constant 0 : index
    %282 = vector.load %arg21[%c0_124, %c17, %c0_125] : memref<18x32x64xbf16, #tpu.memory_space<vmem>>, vector<18x1x64xbf16>
    tpu.vector_store %arg21[%c0_124, %c17, %c0_125], %280 {strides = array<i32>} : memref<18x32x64xbf16, #tpu.memory_space<vmem>>, vector<18x1x64xbf16>,
    %283 = vector.shape_cast %275 : vector<16x64xf32> to vector<1x16x64xf32>
    %284 = arith.truncf %283 : vector<1x16x64xf32> to vector<1x16x64xbf16>
    %c0_126 = arith.constant 0 : index
    %c1_127 = arith.constant 1 : index
    %c0_128 = arith.constant 0 : index
    %285 = vector.load %arg21[%c0_126, %c1_127, %c0_128] : memref<18x32x64xbf16, #tpu.memory_space<vmem>>, vector<1x16x64xbf16>
    tpu.vector_store %arg21[%c0_126, %c1_127, %c0_128], %284 {strides = array<i32>} : memref<18x32x64xbf16, #tpu.memory_space<vmem>>, vector<1x16x64xbf16>,
    %286 = arith.truncf %123 : vector<16x16x64xf32> to vector<16x16x64xbf16>
    %c1_129 = arith.constant 1 : index
    %c1_130 = arith.constant 1 : index
    %c0_131 = arith.constant 0 : index
    %287 = vector.load %arg21[%c1_129, %c1_130, %c0_131] : memref<18x32x64xbf16, #tpu.memory_space<vmem>>, vector<16x16x64xbf16>
    tpu.vector_store %arg21[%c1_129, %c1_130, %c0_131], %286 {strides = array<i32>} : memref<18x32x64xbf16, #tpu.memory_space<vmem>>, vector<16x16x64xbf16>,
    %288 = vector.shape_cast %279 : vector<16x64xf32> to vector<1x16x64xf32>
    %289 = arith.truncf %288 : vector<1x16x64xf32> to vector<1x16x64xbf16>
    %c17_132 = arith.constant 17 : index
    %c1_133 = arith.constant 1 : index
    %c0_134 = arith.constant 0 : index
    %290 = vector.load %arg21[%c17_132, %c1_133, %c0_134] : memref<18x32x64xbf16, #tpu.memory_space<vmem>>, vector<1x16x64xbf16>
    tpu.vector_store %arg21[%c17_132, %c1_133, %c0_134], %289 {strides = array<i32>} : memref<18x32x64xbf16, #tpu.memory_space<vmem>>, vector<1x16x64xbf16>,
    %c0_135 = arith.constant 0 : index
    %c0_136 = arith.constant 0 : index
    %291 = vector.load %arg19[%c0_135, %c0_136] : memref<1x64xf32, #tpu.memory_space<vmem>>, vector<1x64xf32>
    %292 = vector.shape_cast %291 : vector<1x64xf32> to vector<1x1x64xf32>
    %293 = vector.shape_cast %292 : vector<1x1x64xf32> to vector<1x1x64xf32>
    %294 = vector.broadcast %293 : vector<1x1x64xf32> to vector<16x16x64xf32>
    %c0_137 = arith.constant 0 : index
    %c0_138 = arith.constant 0 : index
    %c0_139 = arith.constant 0 : index
    %c0_140 = arith.constant 0 : index
    %295 = vector.load %arg20[%c0_137, %c0_138, %c0_139, %c0_140] : memref<1x16x16x64xf32, #tpu.memory_space<vmem>>, vector<1x16x16x64xf32>
    %296 = vector.shape_cast %295 : vector<1x16x16x64xf32> to vector<16x16x64xf32>
    %297 = vector.shape_cast %294 : vector<16x16x64xf32> to vector<1x16x16x64xf32>
    tpu.vector_store %arg20[%c0_137, %c0_138, %c0_139, %c0_140], %297 {strides = array<i32>} : memref<1x16x16x64xf32, #tpu.memory_space<vmem>>, vector<1x16x16x64xf32>,
    %c0_141 = arith.constant 0 : index
    %c0_142 = arith.constant 0 : index
    %c0_143 = arith.constant 0 : index
    %298 = vector.load %arg21[%c0_141, %c0_142, %c0_143] : memref<18x32x64xbf16, #tpu.memory_space<vmem>>, vector<16x32x64xbf16>
    %299 = vector.shape_cast %298 : vector<16x32x64xbf16> to vector<512x64xbf16>
    %c0_144 = arith.constant 0 : index
    %c0_145 = arith.constant 0 : index
    %c0_146 = arith.constant 0 : index
    %300 = vector.load %arg18[%c0_144, %c0_145, %c0_146] : memref<3x64x192xbf16, #tpu.memory_space<vmem>>, vector<1x64x192xbf16>
    %301 = vector.shape_cast %300 : vector<1x64x192xbf16> to vector<64x192xbf16>
    %cst_147 = arith.constant dense<0.000000e+00> : vector<512x192xf32>
    %302 = tpu.matmul %299, %301, %cst_147 {dimension_numbers = #tpu.dot_dimension_numbers<[1], [0], [0], [1], [0, 0, 1, 1], [], []>} : vector<512x64xbf16>, vector<64x192xbf16>, vector<512x192xf32> -> vector<512x192xf32>
    %303 = vector.shape_cast %302 : vector<512x192xf32> to vector<16x32x192xf32>
    %c0_148 = arith.constant 0 : index
    %c0_149 = arith.constant 0 : index
    %c0_150 = arith.constant 0 : index
    %c0_151 = arith.constant 0 : index
    %304 = vector.load %arg20[%c0_148, %c0_149, %c0_150, %c0_151] : memref<1x16x16x64xf32, #tpu.memory_space<vmem>>, vector<1x16x16x64xf32>
    %305 = vector.shape_cast %304 : vector<1x16x16x64xf32> to vector<16x16x64xf32>
    %306 = vector.extract_strided_slice %303 {offsets = [0, 0, 0], sizes = [16, 16, 64], strides = [1, 1, 1]} : vector<16x32x192xf32> to vector<16x16x64xf32>
    %307 = vector.extract_strided_slice %303 {offsets = [0, 1, 64], sizes = [16, 16, 64], strides = [1, 1, 1]} : vector<16x32x192xf32> to vector<16x16x64xf32>
    %308 = arith.addf %306, %307 : vector<16x16x64xf32>
    %309 = vector.extract_strided_slice %303 {offsets = [0, 2, 128], sizes = [16, 16, 64], strides = [1, 1, 1]} : vector<16x32x192xf32> to vector<16x16x64xf32>
    %310 = arith.addf %308, %309 : vector<16x16x64xf32>
    %311 = arith.addf %305, %310 : vector<16x16x64xf32>
    %c0_152 = arith.constant 0 : index
    %c0_153 = arith.constant 0 : index
    %c0_154 = arith.constant 0 : index
    %c0_155 = arith.constant 0 : index
    %312 = vector.load %arg20[%c0_152, %c0_153, %c0_154, %c0_155] : memref<1x16x16x64xf32, #tpu.memory_space<vmem>>, vector<1x16x16x64xf32>
    %313 = vector.shape_cast %312 : vector<1x16x16x64xf32> to vector<16x16x64xf32>
    %314 = vector.shape_cast %311 : vector<16x16x64xf32> to vector<1x16x16x64xf32>
    tpu.vector_store %arg20[%c0_152, %c0_153, %c0_154, %c0_155], %314 {strides = array<i32>} : memref<1x16x16x64xf32, #tpu.memory_space<vmem>>, vector<1x16x16x64xf32>,
    %c1_156 = arith.constant 1 : index
    %c0_157 = arith.constant 0 : index
    %c0_158 = arith.constant 0 : index
    %315 = vector.load %arg21[%c1_156, %c0_157, %c0_158] : memref<18x32x64xbf16, #tpu.memory_space<vmem>>, vector<16x32x64xbf16>
    %316 = vector.shape_cast %315 : vector<16x32x64xbf16> to vector<512x64xbf16>
    %c1_159 = arith.constant 1 : index
    %c0_160 = arith.constant 0 : index
    %c0_161 = arith.constant 0 : index
    %317 = vector.load %arg18[%c1_159, %c0_160, %c0_161] : memref<3x64x192xbf16, #tpu.memory_space<vmem>>, vector<1x64x192xbf16>
    %318 = vector.shape_cast %317 : vector<1x64x192xbf16> to vector<64x192xbf16>
    %cst_162 = arith.constant dense<0.000000e+00> : vector<512x192xf32>
    %319 = tpu.matmul %316, %318, %cst_162 {dimension_numbers = #tpu.dot_dimension_numbers<[1], [0], [0], [1], [0, 0, 1, 1], [], []>} : vector<512x64xbf16>, vector<64x192xbf16>, vector<512x192xf32> -> vector<512x192xf32>
    %320 = vector.shape_cast %319 : vector<512x192xf32> to vector<16x32x192xf32>
    %c0_163 = arith.constant 0 : index
    %c0_164 = arith.constant 0 : index
    %c0_165 = arith.constant 0 : index
    %c0_166 = arith.constant 0 : index
    %321 = vector.load %arg20[%c0_163, %c0_164, %c0_165, %c0_166] : memref<1x16x16x64xf32, #tpu.memory_space<vmem>>, vector<1x16x16x64xf32>
    %322 = vector.shape_cast %321 : vector<1x16x16x64xf32> to vector<16x16x64xf32>
    %323 = vector.extract_strided_slice %320 {offsets = [0, 0, 0], sizes = [16, 16, 64], strides = [1, 1, 1]} : vector<16x32x192xf32> to vector<16x16x64xf32>
    %324 = vector.extract_strided_slice %320 {offsets = [0, 1, 64], sizes = [16, 16, 64], strides = [1, 1, 1]} : vector<16x32x192xf32> to vector<16x16x64xf32>
    %325 = arith.addf %323, %324 : vector<16x16x64xf32>
    %326 = vector.extract_strided_slice %320 {offsets = [0, 2, 128], sizes = [16, 16, 64], strides = [1, 1, 1]} : vector<16x32x192xf32> to vector<16x16x64xf32>
    %327 = arith.addf %325, %326 : vector<16x16x64xf32>
    %328 = arith.addf %322, %327 : vector<16x16x64xf32>
    %c0_167 = arith.constant 0 : index
    %c0_168 = arith.constant 0 : index
    %c0_169 = arith.constant 0 : index
    %c0_170 = arith.constant 0 : index
    %329 = vector.load %arg20[%c0_167, %c0_168, %c0_169, %c0_170] : memref<1x16x16x64xf32, #tpu.memory_space<vmem>>, vector<1x16x16x64xf32>
    %330 = vector.shape_cast %329 : vector<1x16x16x64xf32> to vector<16x16x64xf32>
    %331 = vector.shape_cast %328 : vector<16x16x64xf32> to vector<1x16x16x64xf32>
    tpu.vector_store %arg20[%c0_167, %c0_168, %c0_169, %c0_170], %331 {strides = array<i32>} : memref<1x16x16x64xf32, #tpu.memory_space<vmem>>, vector<1x16x16x64xf32>,
    %c2_171 = arith.constant 2 : index
    %c0_172 = arith.constant 0 : index
    %c0_173 = arith.constant 0 : index
    %332 = vector.load %arg21[%c2_171, %c0_172, %c0_173] : memref<18x32x64xbf16, #tpu.memory_space<vmem>>, vector<16x32x64xbf16>
    %333 = vector.shape_cast %332 : vector<16x32x64xbf16> to vector<512x64xbf16>
    %c2_174 = arith.constant 2 : index
    %c0_175 = arith.constant 0 : index
    %c0_176 = arith.constant 0 : index
    %334 = vector.load %arg18[%c2_174, %c0_175, %c0_176] : memref<3x64x192xbf16, #tpu.memory_space<vmem>>, vector<1x64x192xbf16>
    %335 = vector.shape_cast %334 : vector<1x64x192xbf16> to vector<64x192xbf16>
    %cst_177 = arith.constant dense<0.000000e+00> : vector<512x192xf32>
    %336 = tpu.matmul %333, %335, %cst_177 {dimension_numbers = #tpu.dot_dimension_numbers<[1], [0], [0], [1], [0, 0, 1, 1], [], []>} : vector<512x64xbf16>, vector<64x192xbf16>, vector<512x192xf32> -> vector<512x192xf32>
    %337 = vector.shape_cast %336 : vector<512x192xf32> to vector<16x32x192xf32>
    %c0_178 = arith.constant 0 : index
    %c0_179 = arith.constant 0 : index
    %c0_180 = arith.constant 0 : index
    %c0_181 = arith.constant 0 : index
    %338 = vector.load %arg20[%c0_178, %c0_179, %c0_180, %c0_181] : memref<1x16x16x64xf32, #tpu.memory_space<vmem>>, vector<1x16x16x64xf32>
    %339 = vector.shape_cast %338 : vector<1x16x16x64xf32> to vector<16x16x64xf32>
    %340 = vector.extract_strided_slice %337 {offsets = [0, 0, 0], sizes = [16, 16, 64], strides = [1, 1, 1]} : vector<16x32x192xf32> to vector<16x16x64xf32>
    %341 = vector.extract_strided_slice %337 {offsets = [0, 1, 64], sizes = [16, 16, 64], strides = [1, 1, 1]} : vector<16x32x192xf32> to vector<16x16x64xf32>
    %342 = arith.addf %340, %341 : vector<16x16x64xf32>
    %343 = vector.extract_strided_slice %337 {offsets = [0, 2, 128], sizes = [16, 16, 64], strides = [1, 1, 1]} : vector<16x32x192xf32> to vector<16x16x64xf32>
    %344 = arith.addf %342, %343 : vector<16x16x64xf32>
    %345 = arith.addf %339, %344 : vector<16x16x64xf32>
    %c0_182 = arith.constant 0 : index
    %c0_183 = arith.constant 0 : index
    %c0_184 = arith.constant 0 : index
    %c0_185 = arith.constant 0 : index
    %346 = vector.load %arg20[%c0_182, %c0_183, %c0_184, %c0_185] : memref<1x16x16x64xf32, #tpu.memory_space<vmem>>, vector<1x16x16x64xf32>
    %347 = vector.shape_cast %346 : vector<1x16x16x64xf32> to vector<16x16x64xf32>
    %348 = vector.shape_cast %345 : vector<16x16x64xf32> to vector<1x16x16x64xf32>
    tpu.vector_store %arg20[%c0_182, %c0_183, %c0_184, %c0_185], %348 {strides = array<i32>} : memref<1x16x16x64xf32, #tpu.memory_space<vmem>>, vector<1x16x16x64xf32>,
    %c0_186 = arith.constant 0 : index
    %c0_187 = arith.constant 0 : index
    %c0_188 = arith.constant 0 : index
    %c0_189 = arith.constant 0 : index
    %349 = vector.load %arg20[%c0_186, %c0_187, %c0_188, %c0_189] : memref<1x16x16x64xf32, #tpu.memory_space<vmem>>, vector<1x16x16x64xf32>
    %350 = vector.shape_cast %349 : vector<1x16x16x64xf32> to vector<16x16x64xf32>
    %351 = arith.negf %350 : vector<16x16x64xf32>
    %352 = math.exp %351 : vector<16x16x64xf32>
    %cst_190 = arith.constant 1.000000e+00 : f32
    %353 = vector.broadcast %cst_190 : f32 to vector<16x16x64xf32>
    %354 = arith.addf %353, %352 : vector<16x16x64xf32>
    %355 = arith.divf %353, %354 : vector<16x16x64xf32>
    %356 = arith.mulf %350, %355 : vector<16x16x64xf32>
    %c0_191 = arith.constant 0 : index
    %c0_192 = arith.constant 0 : index
    %c0_193 = arith.constant 0 : index
    %c0_194 = arith.constant 0 : index
    %357 = vector.load %arg20[%c0_191, %c0_192, %c0_193, %c0_194] : memref<1x16x16x64xf32, #tpu.memory_space<vmem>>, vector<1x16x16x64xf32>
    %358 = vector.shape_cast %357 : vector<1x16x16x64xf32> to vector<16x16x64xf32>
    %359 = vector.shape_cast %356 : vector<16x16x64xf32> to vector<1x16x16x64xf32>
    tpu.vector_store %arg20[%c0_191, %c0_192, %c0_193, %c0_194], %359 {strides = array<i32>} : memref<1x16x16x64xf32, #tpu.memory_space<vmem>>, vector<1x16x16x64xf32>,
    return
  }
  func.func @transform_0(%arg0: i32, %arg1: i32) -> (i32, i32, i32, i32) {
    %c0_i32 = arith.constant 0 : i32
    %c0_i32_0 = arith.constant 0 : i32
    %c0_i32_1 = arith.constant 0 : i32
    return %arg0, %arg1, %c0_i32, %c0_i32_0 : i32, i32, i32, i32
  }
  func.func @transform_1(%arg0: i32, %arg1: i32) -> (i32, i32, i32, i32) {
    %c0_i32 = arith.constant 0 : i32
    %c0_i32_0 = arith.constant 0 : i32
    %c0_i32_1 = arith.constant 0 : i32
    return %arg0, %arg1, %c0_i32, %c0_i32_0 : i32, i32, i32, i32
  }
  func.func @transform_2(%arg0: i32, %arg1: i32) -> (i32, i32, i32, i32) {
    %c0_i32 = arith.constant 0 : i32
    %c0_i32_0 = arith.constant 0 : i32
    %c0_i32_1 = arith.constant 0 : i32
    return %arg0, %arg1, %c0_i32, %c0_i32_0 : i32, i32, i32, i32
  }
  func.func @transform_3(%arg0: i32, %arg1: i32) -> (i32, i32, i32, i32) {
    %c0_i32 = arith.constant 0 : i32
    %c0_i32_0 = arith.constant 0 : i32
    %c0_i32_1 = arith.constant 0 : i32
    return %arg0, %arg1, %c0_i32, %c0_i32_0 : i32, i32, i32, i32
  }
  func.func @transform_4(%arg0: i32, %arg1: i32) -> (i32, i32, i32, i32) {
    %c16_i32 = arith.constant 16 : i32
    %0 = arith.muli %arg1, %c16_i32 : i32
    %c1_i32 = arith.constant 1 : i32
    %1 = arith.subi %0, %c1_i32 : i32
    %c0_i32 = arith.constant 0 : i32
    %2 = arith.maxsi %1, %c0_i32 : i32
    %c0_i32_0 = arith.constant 0 : i32
    %c0_i32_1 = arith.constant 0 : i32
    %c0_i32_2 = arith.constant 0 : i32
    return %arg0, %2, %c0_i32_0, %c0_i32_1 : i32, i32, i32, i32
  }
  func.func @transform_5(%arg0: i32, %arg1: i32) -> (i32, i32, i32, i32) {
    %c16_i32 = arith.constant 16 : i32
    %0 = arith.muli %arg1, %c16_i32 : i32
    %c1_i32 = arith.constant 1 : i32
    %1 = arith.subi %0, %c1_i32 : i32
    %c0_i32 = arith.constant 0 : i32
    %2 = arith.maxsi %1, %c0_i32 : i32
    %c0_i32_0 = arith.constant 0 : i32
    %c0_i32_1 = arith.constant 0 : i32
    %c0_i32_2 = arith.constant 0 : i32
    return %arg0, %2, %c0_i32_0, %c0_i32_1 : i32, i32, i32, i32
  }
  func.func @transform_6(%arg0: i32, %arg1: i32) -> (i32, i32, i32, i32) {
    %c16_i32 = arith.constant 16 : i32
    %0 = arith.muli %arg1, %c16_i32 : i32
    %c1_i32 = arith.constant 1 : i32
    %1 = arith.subi %0, %c1_i32 : i32
    %c0_i32 = arith.constant 0 : i32
    %2 = arith.maxsi %1, %c0_i32 : i32
    %c0_i32_0 = arith.constant 0 : i32
    %c0_i32_1 = arith.constant 0 : i32
    %c0_i32_2 = arith.constant 0 : i32
    return %arg0, %2, %c0_i32_0, %c0_i32_1 : i32, i32, i32, i32
  }
  func.func @transform_7(%arg0: i32, %arg1: i32) -> (i32, i32, i32, i32) {
    %c16_i32 = arith.constant 16 : i32
    %0 = arith.muli %arg1, %c16_i32 : i32
    %c1_i32 = arith.constant 1 : i32
    %1 = arith.subi %0, %c1_i32 : i32
    %c0_i32 = arith.constant 0 : i32
    %2 = arith.maxsi %1, %c0_i32 : i32
    %c0_i32_0 = arith.constant 0 : i32
    %c0_i32_1 = arith.constant 0 : i32
    %c0_i32_2 = arith.constant 0 : i32
    return %arg0, %2, %c0_i32_0, %c0_i32_1 : i32, i32, i32, i32
  }
  func.func @transform_8(%arg0: i32, %arg1: i32) -> (i32, i32, i32, i32) {
    %c1_i32 = arith.constant 1 : i32
    %0 = arith.addi %arg1, %c1_i32 : i32
    %c16_i32 = arith.constant 16 : i32
    %1 = arith.muli %0, %c16_i32 : i32
    %c31_i32 = arith.constant 31 : i32
    %2 = arith.minsi %1, %c31_i32 : i32
    %c0_i32 = arith.constant 0 : i32
    %c0_i32_0 = arith.constant 0 : i32
    %c0_i32_1 = arith.constant 0 : i32
    return %arg0, %2, %c0_i32, %c0_i32_0 : i32, i32, i32, i32
  }
  func.func @transform_9(%arg0: i32, %arg1: i32) -> (i32, i32, i32, i32) {
    %c1_i32 = arith.constant 1 : i32
    %0 = arith.addi %arg1, %c1_i32 : i32
    %c16_i32 = arith.constant 16 : i32
    %1 = arith.muli %0, %c16_i32 : i32
    %c31_i32 = arith.constant 31 : i32
    %2 = arith.minsi %1, %c31_i32 : i32
    %c0_i32 = arith.constant 0 : i32
    %c0_i32_0 = arith.constant 0 : i32
    %c0_i32_1 = arith.constant 0 : i32
    return %arg0, %2, %c0_i32, %c0_i32_0 : i32, i32, i32, i32
  }
  func.func @transform_10(%arg0: i32, %arg1: i32) -> (i32, i32, i32, i32) {
    %c1_i32 = arith.constant 1 : i32
    %0 = arith.addi %arg1, %c1_i32 : i32
    %c16_i32 = arith.constant 16 : i32
    %1 = arith.muli %0, %c16_i32 : i32
    %c31_i32 = arith.constant 31 : i32
    %2 = arith.minsi %1, %c31_i32 : i32
    %c0_i32 = arith.constant 0 : i32
    %c0_i32_0 = arith.constant 0 : i32
    %c0_i32_1 = arith.constant 0 : i32
    return %arg0, %2, %c0_i32, %c0_i32_0 : i32, i32, i32, i32
  }
  func.func @transform_11(%arg0: i32, %arg1: i32) -> (i32, i32, i32, i32) {
    %c1_i32 = arith.constant 1 : i32
    %0 = arith.addi %arg1, %c1_i32 : i32
    %c16_i32 = arith.constant 16 : i32
    %1 = arith.muli %0, %c16_i32 : i32
    %c31_i32 = arith.constant 31 : i32
    %2 = arith.minsi %1, %c31_i32 : i32
    %c0_i32 = arith.constant 0 : i32
    %c0_i32_0 = arith.constant 0 : i32
    %c0_i32_1 = arith.constant 0 : i32
    return %arg0, %2, %c0_i32, %c0_i32_0 : i32, i32, i32, i32
  }
  func.func @transform_12(%arg0: i32, %arg1: i32) -> (i32, i32, i32) {
    %c0_i32 = arith.constant 0 : i32
    %c0_i32_0 = arith.constant 0 : i32
    %c0_i32_1 = arith.constant 0 : i32
    %c0_i32_2 = arith.constant 0 : i32
    return %c0_i32, %c0_i32_0, %c0_i32_1 : i32, i32, i32
  }
  func.func @transform_13(%arg0: i32, %arg1: i32) -> (i32, i32, i32) {
    %c0_i32 = arith.constant 0 : i32
    %c0_i32_0 = arith.constant 0 : i32
    %c0_i32_1 = arith.constant 0 : i32
    %c0_i32_2 = arith.constant 0 : i32
    return %c0_i32, %c0_i32_0, %c0_i32_1 : i32, i32, i32
  }
  func.func @transform_14(%arg0: i32, %arg1: i32) -> (i32, i32) {
    %c0_i32 = arith.constant 0 : i32
    %c0_i32_0 = arith.constant 0 : i32
    %c0_i32_1 = arith.constant 0 : i32
    return %c0_i32, %c0_i32_0 : i32, i32
  }
  func.func @transform_15(%arg0: i32, %arg1: i32) -> (i32, i32) {
    %c0_i32 = arith.constant 0 : i32
    %c0_i32_0 = arith.constant 0 : i32
    %c0_i32_1 = arith.constant 0 : i32
    return %c0_i32, %c0_i32_0 : i32, i32
  }
  func.func @transform_16(%arg0: i32, %arg1: i32) -> (i32, i32, i32) {
    %c0_i32 = arith.constant 0 : i32
    %c0_i32_0 = arith.constant 0 : i32
    %c0_i32_1 = arith.constant 0 : i32
    %c0_i32_2 = arith.constant 0 : i32
    return %c0_i32, %c0_i32_0, %c0_i32_1 : i32, i32, i32
  }
  func.func @transform_17(%arg0: i32, %arg1: i32) -> (i32, i32) {
    %c0_i32 = arith.constant 0 : i32
    %c0_i32_0 = arith.constant 0 : i32
    %c0_i32_1 = arith.constant 0 : i32
    return %c0_i32, %c0_i32_0 : i32, i32
  }
  func.func @transform_18(%arg0: i32, %arg1: i32) -> (i32, i32, i32, i32) {
    %c0_i32 = arith.constant 0 : i32
    %c0_i32_0 = arith.constant 0 : i32
    %c0_i32_1 = arith.constant 0 : i32
    return %arg0, %arg1, %c0_i32, %c0_i32_0 : i32, i32, i32, i32
  }
}

</mosaic_0001>

<bundles_post_ra>
// kernel: asff4_forward.1
= control target key start
LH: loop header
LB: loop body
LE: loop exit
PB: predicated region body
PF: predicated region fallthrough
CT: control target
= control target key end

     0   :  { %s21006_s0 = inlined_call_operand.vmem [shape: bf16[2,32,16,64], index: 0, kind: input, shape index: {}, may-alias: {0,4,8}]   ;;  %s21007_s1 = inlined_call_operand.vmem [shape: bf16[2,32,16,64], index: 1, kind: input, shape index: {}, may-alias: {1,5,9}]   ;;  %s21008_s2 = inlined_call_operand.hbm [shape: bf16[2,32,16,64], index: 2, kind: input, shape index: {}, may-alias: {2,6,10}]   ;;  %s21009_s3 = inlined_call_operand.hbm [shape: bf16[2,32,16,64], index: 3, kind: input, shape index: {}, may-alias: {3,7,11}]   ;;  %s21010_s4 = inlined_call_operand.vmem [shape: bf16[2,32,16,64], index: 4, kind: input, shape index: {}, may-alias: {0,4,8}]   ;;  %s21011_s5 = inlined_call_operand.vmem [shape: bf16[2,32,16,64], index: 5, kind: input, shape index: {}, may-alias: {1,5,9}]   ;;  %s21012_s6 = inlined_call_operand.hbm [shape: bf16[2,32,16,64], index: 6, kind: input, shape index: {}, may-alias: {2,6,10}]   ;;  %s21013_s7 = inlined_call_operand.hbm [shape: bf16[2,32,16,64], index: 7, kind: input, shape index: {}, may-alias: {3,7,11}]   ;;  %s21014_s8 = inlined_call_operand.vmem [shape: bf16[2,32,16,64], index: 8, kind: input, shape index: {}, may-alias: {0,4,8}]   ;;  %s21015_s9 = inlined_call_operand.vmem [shape: bf16[2,32,16,64], index: 9, kind: input, shape index: {}, may-alias: {1,5,9}]   ;;  %s21016_s10 = inlined_call_operand.hbm [shape: bf16[2,32,16,64], index: 10, kind: input, shape index: {}, may-alias: {2,6,10}]   ;;  %s21017_s11 = inlined_call_operand.hbm [shape: bf16[2,32,16,64], index: 11, kind: input, shape index: {}, may-alias: {3,7,11}]   ;;  %s21018_s12 = inlined_call_operand.vmem [shape: bf16[4,64,8], index: 12, kind: input, shape index: {}]   ;;  %s21019_s13 = inlined_call_operand.vmem [shape: f32[4,1,8], index: 13, kind: input, shape index: {}]   ;;  %s21020_s14 = inlined_call_operand.vmem [shape: f32[32,4], index: 14, kind: input, shape index: {}]   ;;  %s21021_s15 = inlined_call_operand.vmem [shape: f32[1,4], index: 15, kind: input, shape index: {}]   ;;  %s21022_s16 = inlined_call_operand.vmem [shape: bf16[3,64,192], index: 16, kind: input, shape index: {}]   ;;  %s21023_s17 = inlined_call_operand.vmem [shape: f32[1,64], index: 17, kind: input, shape index: {}]   ;;  %s21024_s18 = inlined_call_operand.hbm [shape: f32[2,32,16,64], index: 18, kind: output, shape index: {}]  }
   0x1   :  { %21211 = sst [smem:[#allocation178_spill]] %s21006_s0 }
   0x2   :  { %21212 = sst [smem:[#allocation179_spill]] %s21007_s1 }
   0x3   :  { %21213 = sst [smem:[#allocation180_spill]] %s21008_s2 }
   0x4   :  { %21214 = sst [smem:[#allocation181_spill]] %s21009_s3 }
   0x5   :  { %21215 = sst [smem:[#allocation182_spill]] %s21010_s4 }
   0x6   :  { %21216 = sst [smem:[#allocation183_spill]] %s21011_s5 }
   0x7   :  { %21217 = sst [smem:[#allocation184_spill]] %s21012_s6 }
   0x8   :  { %21218 = sst [smem:[#allocation185_spill]] %s21013_s7 }
   0x9   :  { %21219 = sst [smem:[#allocation186_spill]] %s21014_s8 }
   0xa   :  { %21220 = sst [smem:[#allocation187_spill]] %s21015_s9 }
   0xb   :  { %21221 = sst [smem:[#allocation188_spill]] %s21016_s10 }
   0xc   :  { %21222 = sst [smem:[#allocation189_spill]] %s21017_s11 }
   0xd   :  { %21223 = sst [smem:[#allocation190_spill]] %s21018_s12 }
   0xe   :  { %21224 = sst [smem:[#allocation191_spill]] %s21019_s13 }
   0xf   :  { %21225 = sst [smem:[#allocation192_spill]] %s21020_s14 }
  0x10   :  { %21226 = sst [smem:[#allocation193_spill]] %s21021_s15 }
  0x11   :  { %21227 = sst [smem:[#allocation194_spill]] %s21022_s16 }
  0x12   :  { %21228 = sst [smem:[#allocation195_spill]] %s21023_s17 }
  0x13   :  { %21229 = sst [smem:[#allocation196_spill]] %s21024_s18 }
  0x14   :  { %23 = vsyncpa [#allocation4], 0 }
  0x15   :  { %25 = vsyncpa [#allocation4 + $0x1], 0 }
  0x16   :  { %26 = vsyncpa [#allocation7], 0 }
  0x17   :  { %28 = vsyncpa [#allocation7 + $0x1], 0 }
  0x18   :  { %29 = vsyncpa [#allocation10], 0 }
  0x19   :  { %31 = vsyncpa [#allocation10 + $0x1], 0 }
  0x1a   :  { %32 = vsyncpa [#allocation13], 0 }
  0x1b   :  { %34 = vsyncpa [#allocation13 + $0x1], 0 }
  0x1c   :  { %35 = vsyncpa [#allocation5], 0 }
  0x1d   :  { %37 = vsyncpa [#allocation5 + $0x1], 0  ;;  %s15377_s27 = smov 0   ;;  %s15379_s28 = smov 0  }
  0x1e   :  { %s15381_s29 = smov 0   ;;  %s15383_s30 = smov 0  }
  0x1f   :  { %s15385_s0 = smov 0   ;;  %s15387_s19 = smov 0  }
  0x20   :  { %s15389_s1 = smov 0   ;;  %s15391_s20 = smov 0  }
  0x21   :  { %s15393_s21 = smov 0   ;;  %s15395_s22 = smov 0  }
  0x22   :  { %s15397_s2 = smov 0   ;;  %s15399_s23 = smov 0  }
  0x23   :  { %s15401_s24 = smov 0   ;;  %s15403_s25 = smov 0  }
  0x24 LB: > { %21230 = sst [smem:[#allocation22_spill]] %s15226_s0  ;;  %s15448_s26 = sadd.s32 4294967295, %s15262_s25   ;;  %s15262_s25 = sphi %s15403_s25, %s43_s25   ;;  %s15258_s24 = sphi %s15401_s24, %s21915_s24   ;;  %s15254_s23 = sphi %s15399_s23, %s21914_s23   ;;  %s15250_s2 = sphi %s15397_s2, %s21913_s2   ;;  %s15246_s22 = sphi %s15395_s22, %s21921_s22   ;;  %s15242_s21 = sphi %s15393_s21, %s21920_s21   ;;  %s15238_s20 = sphi %s15391_s20, %s21919_s20   ;;  %s15234_s1 = sphi %s15389_s1, %s21910_s1   ;;  %s15230_s19 = sphi %s15387_s19, %s21909_s19   ;;  %s15226_s0 = sphi %s15385_s0, %s21908_s0   ;;  %s15222_s30 = sphi %s15383_s30, %s21907_s30   ;;  %s15218_s29 = sphi %s15381_s29, %s21918_s29   ;;  %s15214_s28 = sphi %s15379_s28, %s21917_s28   ;;  %s15210_s27 = sphi %s15377_s27, %s21916_s27  }
  0x25   : > { %21231 = sst [smem:[#allocation23_spill]] %s15230_s19  ;;  %s11806_s18 = sadd.s32 4294967294, %s15262_s25  }
  0x26   : > { %21232 = sst [smem:[#allocation24_spill]] %s15234_s1  ;;  %s52_s17 = sadd.s32 1, %s15254_s23 }
  0x27   : > { %21233 = sst [smem:[#allocation25_spill]] %s15238_s20  ;;  %s55_s16 = sadd.s32 1, %s15258_s24 }
  0x28   : > { %21234 = sst [smem:[#allocation26_spill]] %s15246_s22  ;;  %p53_p0 = scmp.ge.s32.totalorder %s52_s17, 2 }
  0x29   : > { %21235 = sst [smem:[#allocation27_spill]] %s15250_s2  ;;  %p127_p1 = scmp.ne.s32.totalorder %s15242_s21, %s15238_s20 }
  0x2a   : > { %21236 = sst [smem:[#allocation28_spill]] %s15254_s23  ;;  %p21046_p2 = scmp.eq.s32.totalorder %s15262_s25, 0 }
  0x2b   : > { %21237 = sst [smem:[#allocation29_spill]] %s15258_s24  ;;  %s21923_s17 = smov (%p53_p0, %s52_s17), 0 }
  0x2c   : > { %21238 = sst [smem:[#allocation30_spill]] %s15448_s26  ;;  %s21925_s16 = smov (!%p53_p0, %s55_s16), %s15258_s24 }
  0x2d   : > { %21239 = sst [smem:[#allocation31_spill]] %s21923_s17  ;;  %p15466_p3 = por %p21046_p2, %p127_p1 }
  0x2e   : > { %p133_p4 = scmp.ne.s32.totalorder %s15238_s20, %s15234_s1  ;;  %p21045_p5 = scmp.eq.s32.totalorder %s15448_s26, 0 }
  0x2f   : > { %p601_p6 = scmp.eq.s32.totalorder %s15448_s26, 3  ;;  %p607_p7 = scmp.eq.s32.totalorder %s11806_s18, 3 }
  0x30   : > { %p15476_p8 = por %p21045_p5, %p133_p4  ;;  %p21044_p11 = scmp.lt.s32.totalorder %s15262_s25, 4 }
  0x31   : > { %p15480_p9 = por %p601_p6, %p127_p1  ;;  %p15484_p10 = por %p607_p7, %p133_p4 }
  0x32   : > { %s21241_s8 = scalar_select %p15476_p8, 1, 0 }
  0x33   : > { %s21243_s5 = scalar_select %p15480_p9, 1, 0 }
  0x34   : > { %21242 = sst [smem:[#allocation32_spill]] %s21241_s8  ;;  %s21035_s1 = sand.u32 1, %s15242_s21  }
  0x35   : > { %21244 = sst [smem:[#allocation33_spill]] %s21243_s5  ;;  %s15492_s13 = sshll.u32 %s21035_s1, 7 }
  0x36   : > { %s21245_s9 = scalar_select %p15484_p10, 1, 0 }
  0x37   : > { %s12587_s18 = sshll.u32 %s15254_s23, 5  ;;  %s15496_s4 = sshll.u32 %s15258_s24, 6 }
  0x38   : > { %21246 = sst [smem:[#allocation34_spill]] %s21245_s9  ;;  %p15502_p12 = pnand %p21044_p11, %p15466_p3 }
  0x39   : > { %21247 = sst [smem:[#allocation35_spill]] %s15496_s4  ;;  %s15507_s5 = sadd.s32 %s12587_s18, %s15496_s4 }
  0x3a   : > { %s21042_s9 = sshll.u32 %s15507_s5, 6  ;;  %s21047_s1 = sand.u32 1, %s15262_s25  }
  0x3b   : > { %s21249_s3 = sld [smem:[#allocation181_spill]]  ;;  %s701_s15 = scalar_lea.vmem [#allocation6], %s15492_s13 }
  0x3c   : > { %s711_s8 = sshll.u32 %s701_s15, 4  ;;  %s15524_s18 = scalar_lea.sflag [#allocation7], %s21047_s1  ;;  %s15519_s8 = int_to_ptr.vmem [resolvable:$true] %s711_s8 }
  0x3d   : > { %p21063_p1 = pneg %p15502_p12 }
  0x41   : > { %s15516_s22 = scalar_lea.hbm %s21249_s3, %s21042_s9  ;;  %s14921_s9 = scalar_lea.hbm %s21249_s3, 8192 }
  0x42   : > { %s14916_s20 = scalar_lea.hbm %s15516_s22, 2048  ;;  %p14922_p6 = scmp.lt.u32.totalorder %s15516_s22, %s21249_s3 }
  0x43   : > { %p14917_p0 = scmp.ne.s32.totalorder %s15516_s22, %s14916_s20  ;;  %p14923_p7 = scmp.lt.u32.totalorder %s14921_s9, %s14916_s20 }
  0x44   : > { %p14925_p5 = scmp.lt.u32.totalorder %s14916_s20, %s15516_s22 }
  0x45   : > { %p14919_p3 = pnand %p21063_p1, %p14917_p0  ;;  %p14924_p11 = por %p14923_p7, %p14922_p6 }
  0x47   : > { %p14920_p4 = pneg %p14919_p3  ;;  %p14926_p2 = por %p14925_p5, %p14924_p11 }
  0x49   : > { %p14927_p13 = pnand %p14926_p2, %p14920_p4 }
  0x4b   : > { %14930 = shalt.err (!%p14927_p13)
}
  0x4c   : > { %s14931_s1 = scalar_lea.vmem %s15519_s8, 2048  ;;  %s15264_s12 = smov [#allocation6]  }
  0x4d   : > { %p14932_p0 = scmp.ne.s32.totalorder %s15519_s8, %s14931_s1  ;;  %s14936_s2 = sshll.u32 %s15264_s12, 4  ;;  %s14937_s2 = int_to_ptr.vmem [resolvable:$false] %s14936_s2 }
  0x4e   : > { %s14938_s11 = scalar_lea.vmem %s14937_s2, 4096  ;;  %p14939_p9 = scmp.lt.s32.totalorder %s15519_s8, %s14937_s2 }
  0x4f   : > { %p14934_p3 = pnand %p14932_p0, %p21063_p1  ;;  %p14940_p6 = scmp.lt.s32.totalorder %s14938_s11, %s14931_s1 }
  0x51   : > { %p14935_p10 = pneg %p14934_p3  ;;  %p14941_p7 = por %p14940_p6, %p14939_p9 }
  0x53   : > { %p14942_p5 = pnand %p14941_p7, %p14935_p10 }
  0x55   : > { %14945 = shalt.err (!%p14942_p5)
}
  0x56   : > { %s21049_s9 = smov 64   ;;  %s21051_s20 = smov 4  }
  0x57   : > { %13546 = dma.hbm_to_vmem [thread:$0]  (!%p15502_p12), %s15516_s22, 2048, %s15519_s8, %s15524_s18, %s21049_s9, %s21049_s9, %s21051_s20  }
  0x58   : > { %p907_p2 = scmp.lt.s32.totalorder %s15262_s25, 5  ;;  %p21250_p9 = scmp.ge.s32.totalorder %s15262_s25, 1 }
  0x59   : > { %p57_p11 = scmp.ge.s32.totalorder %s21925_s16, 2  ;;  %s11815_s15 = sshll.u32 %s15254_s23, 4 }
  0x5a   : > { %p15558_p10 = pnand %p21250_p9, %p907_p2  ;;  %s11816_s12 = sadd.s32 4294967295, %s11815_s15 }
  0x5b   : > { %s11817_s2 = sshll.u32 %s21923_s17, 4  ;;  %s21927_s16 = smov (%p57_p11, %s21925_s16), 0 }
  0x5c   : > { %s21251_s1 = scalar_select %p15558_p10, 1, 0 }
  0x5d   : > { %21253 = sst [smem:[#allocation37_spill]] %s21927_s16  ;;  %p245_p13 = scmp.gt.s32.totalorder %s11816_s12, 0 }
  0x5e   : > { %21252 = sst [smem:[#allocation36_spill]] %s21251_s1  ;;  %s11818_s8 = sadd.s32 4294967295, %s11817_s2 }
  0x5f   : > { %s15570_s22 = ssub.s32 %s15258_s24, %s21927_s16  ;;  %p249_p4 = scmp.gt.s32.totalorder %s11818_s8, 0 }
  0x60   : > { %s21254_s11 = ssub.s32 %s15254_s23, %s21923_s17  ;;  %s256_s20 = sadd.s32 1, %s15230_s19 }
  0x61   : > { %s117_s9 = sor.u32 %s21254_s11, %s15570_s22  ;;  %p263_p3 = scmp.ne.s32.totalorder %s15230_s19, %s15226_s0 }
  0x62   : > { %p118_p0 = scmp.eq.s32.totalorder %s117_s9, 0  ;;  %s21929_s12 = smov (!%p245_p13, %s11816_s12), 0 }
  0x63   : > { %s21255_s3 = sadd.s32 1, %s15242_s21  ;;  %s21931_s8 = smov (!%p249_p4, %s11818_s8), 0 }
  0x64   : > { %s15582_s1 = scalar_select %p118_p0, %s15242_s21, %s21255_s3  }
  0x65   : > { %p21257_p6 = scmp.eq.s32.totalorder %s15262_s25, 0  ;;  %p269_p5 = scmp.ne.s32.totalorder %s15226_s0, %s15222_s30 }
  0x66   : > { %21256 = sst [smem:[#allocation38_spill]] %s15582_s1  ;;  %s252_s24 = ssub.s32 %s21929_s12, %s21931_s8 }
  0x67   : > { %p15586_p7 = por %p263_p3, %p21257_p6  ;;  %s15592_s17 = sadd.s32 16, %s11815_s15 }
  0x68   : > { %s253_s11 = sor.u32 %s252_s24, %s15570_s22  ;;  %p21259_p2 = scmp.eq.s32.totalorder %s15448_s26, 0 }
  0x69   : > { %p254_p11 = scmp.eq.s32.totalorder %s253_s11, 0  ;;  %s15602_s3 = sadd.s32 16, %s11817_s2 }
  0x6a   : > { %p15597_p9 = por %p269_p5, %p21259_p2  ;;  %s763_s23 = sand.u32 1, %s15230_s19  }
  0x6b   : > { %s15606_s30 = scalar_select %p254_p11, %s15230_s19, %s256_s20  }
  0x6c   : > { %s21260_s9 = scalar_select %p15597_p9, 1, 0 }
  0x6d   : > { %21262 = sst [smem:[#allocation40_spill]] %s15606_s30  ;;  %s11843_s15 = sshll.u32 %s763_s23, 3 }
  0x6e   : > { %21261 = sst [smem:[#allocation39_spill]] %s21260_s9  ;;  %s11846_s8 = sshll.u32 %s21929_s12, 1 }
  0x6f   : > { %s775_s24 = sadd.s32 %s11846_s8, %s15496_s4  ;;  %s765_s1 = scalar_lea.vmem [#allocation8], %s11843_s15 }
  0x70   : > { %s778_s0 = sshll.u32 %s765_s1, 4  ;;  %s11848_s10 = sshll.u32 %s775_s24, 6  ;;  %s15610_s0 = int_to_ptr.vmem [resolvable:$true] %s778_s0 }
  0x71   : > { %s21263_s6 = sld [smem:[#allocation184_spill]]  ;;  %p21264_p0 = scmp.lt.s32.totalorder %s15262_s25, 4 }
  0x72   : > { %s21266_s7 = sld [smem:[#allocation185_spill]]  ;;  %s792_s26 = scalar_lea.vmem [#allocation9], %s11843_s15 }
  0x73   : > { %p15621_p3 = pnand %p21264_p0, %p15586_p7  ;;  %s805_s12 = sshll.u32 %s792_s26, 4  ;;  %s15630_s12 = int_to_ptr.vmem [resolvable:$true] %s805_s12 }
  0x74   : > { %s21267_s16 = sand.u32 1, %s15262_s25  }
  0x75   : > { %s15634_s9 = scalar_lea.sflag [#allocation10], %s21267_s16  ;;  %p21068_p7 = pneg %p15621_p3 }
  0x77   : > { %s15615_s11 = scalar_lea.hbm %s21263_s6, %s11848_s10 }
  0x78   : > { %s15628_s1 = scalar_lea.hbm %s21266_s7, %s11848_s10  ;;  %s14951_s20 = scalar_lea.hbm %s21266_s7, 8192 }
  0x79   : > { %s14946_s8 = scalar_lea.hbm %s15628_s1, 128  ;;  %p14952_p11 = scmp.lt.u32.totalorder %s15628_s1, %s21266_s7 }
  0x7a   : > { %p14947_p6 = scmp.ne.s32.totalorder %s15628_s1, %s14946_s8  ;;  %p14953_p0 = scmp.lt.u32.totalorder %s14951_s20, %s14946_s8 }
  0x7b   : > { %p14955_p13 = scmp.lt.u32.totalorder %s14946_s8, %s15628_s1 }
  0x7c   : > { %p14949_p5 = pnand %p21068_p7, %p14947_p6  ;;  %p14954_p4 = por %p14953_p0, %p14952_p11 }
  0x7e   : > { %p14950_p2 = pneg %p14949_p5  ;;  %p14956_p1 = por %p14955_p13, %p14954_p4 }
  0x80   : > { %p14957_p9 = pnand %p14956_p1, %p14950_p2 }
  0x82   : > { %14960 = shalt.err (!%p14957_p9)
}
  0x83   : > { %s14961_s26 = scalar_lea.vmem %s15630_s12, 128  ;;  %s15267_s16 = smov [#allocation9]  }
  0x84   : > { %p14962_p6 = scmp.ne.s32.totalorder %s15630_s12, %s14961_s26  ;;  %s14966_s10 = sshll.u32 %s15267_s16, 4  ;;  %s14967_s10 = int_to_ptr.vmem [resolvable:$false] %s14966_s10 }
  0x85   : > { %s14968_s24 = scalar_lea.vmem %s14967_s10, 256  ;;  %p14969_p10 = scmp.lt.s32.totalorder %s15630_s12, %s14967_s10 }
  0x86   : > { %p14964_p5 = pnand %p14962_p6, %p21068_p7  ;;  %p14970_p11 = scmp.lt.s32.totalorder %s14968_s24, %s14961_s26 }
  0x88   : > { %p14965_p8 = pneg %p14964_p5  ;;  %p14971_p0 = por %p14970_p11, %p14969_p10 }
  0x8a   : > { %p14972_p13 = pnand %p14971_p0, %p14965_p8 }
  0x8c   : > { %14975 = shalt.err (!%p14972_p13)
}
  0x8d   : > { %s21268_s8 = smov 4   ;;  %s21269_s20 = smov 64  }
  0x8e   : > { %13552 = dma.hbm_to_vmem [thread:$0]  (!%p15621_p3), %s15628_s1, 128, %s15630_s12, %s15634_s9, %s21269_s20, %s21269_s20, %s21268_s8  }
  0x8f   : > { %s21270_s23 = sshll.u32 %s15507_s5, 6  ;;  %s21271_s26 = sld [smem:[#allocation180_spill]] }
  0x90   : > { %s677_s24 = scalar_lea.vmem [#allocation3], %s15492_s13  ;;  %s21272_s30 = sand.u32 1, %s15242_s21  }
  0x91   : > { %s687_s7 = sshll.u32 %s677_s24, 4  ;;  %s15677_s19 = scalar_lea.sflag [#allocation4], %s21272_s30  ;;  %s15673_s7 = int_to_ptr.vmem [resolvable:$true] %s687_s7 }
  0x92   : > { %p21273_p1 = pneg %p15502_p12 }
  0x95   : > { %s15670_s10 = scalar_lea.hbm %s21271_s26, %s21270_s23  ;;  %s14981_s12 = scalar_lea.hbm %s21271_s26, 8192 }
  0x96   : > { %s14976_s4 = scalar_lea.hbm %s15670_s10, 2048  ;;  %p14982_p4 = scmp.lt.u32.totalorder %s15670_s10, %s21271_s26 }
  0x97   : > { %p14977_p8 = scmp.ne.s32.totalorder %s15670_s10, %s14976_s4  ;;  %p14983_p2 = scmp.lt.u32.totalorder %s14981_s12, %s14976_s4 }
  0x98   : > { %p14985_p5 = scmp.lt.u32.totalorder %s14976_s4, %s15670_s10 }
  0x99   : > { %p14979_p10 = pnand %p14977_p8, %p21273_p1  ;;  %p14984_p6 = por %p14983_p2, %p14982_p4 }
  0x9b   : > { %p14980_p9 = pneg %p14979_p10  ;;  %p14986_p11 = por %p14985_p5, %p14984_p6 }
  0x9d   : > { %p14987_p0 = pnand %p14986_p11, %p14980_p9 }
  0x9f   : > { %14990 = shalt.err (!%p14987_p0)
}
  0xa0   : > { %s14991_s13 = scalar_lea.vmem %s15673_s7, 2048  ;;  %p21274_p8 = pmov %p21273_p1 }
  0xa1   : > { %p14992_p13 = scmp.ne.s32.totalorder %s15673_s7, %s14991_s13  ;;  %s15268_s30 = smov [#allocation3]  }
  0xa2   : > { %s14996_s16 = sshll.u32 %s15268_s30, 4  ;;  %s14997_s16 = int_to_ptr.vmem [resolvable:$false] %s14996_s16 }
  0xa3   : > { %p14994_p1 = pnand %p14992_p13, %p21274_p8  ;;  %s14998_s24 = scalar_lea.vmem %s14997_s16, 4096 }
  0xa4   : > { %p14999_p7 = scmp.lt.s32.totalorder %s15673_s7, %s14997_s16  ;;  %p15000_p4 = scmp.lt.s32.totalorder %s14998_s24, %s14991_s13 }
  0xa5   : > { %p14995_p10 = pneg %p14994_p1 }
  0xa6   : > { %p15001_p2 = por %p15000_p4, %p14999_p7 }
  0xa8   : > { %p15002_p6 = pnand %p15001_p2, %p14995_p10 }
  0xaa   : > { %15005 = shalt.err (!%p15002_p6)
}
  0xab   : > { %13543 = dma.hbm_to_vmem [thread:$0]  (!%p15502_p12), %s15670_s10, 2048, %s15673_s7, %s15677_s19, %s21269_s20, %s21269_s20, %s21268_s8  }
  0xac   : > { %s15006_s4 = scalar_lea.hbm %s15615_s11, 128  ;;  %p21275_p7 = pneg %p15621_p3 }
  0xad   : > { %p15007_p9 = scmp.ne.s32.totalorder %s15615_s11, %s15006_s4  ;;  %s15011_s1 = scalar_lea.hbm %s21263_s6, 8192 }
  0xae   : > { %p15012_p0 = scmp.lt.u32.totalorder %s15615_s11, %s21263_s6  ;;  %p15013_p13 = scmp.lt.u32.totalorder %s15011_s1, %s15006_s4 }
  0xaf   : > { %p15009_p5 = pnand %p15007_p9, %p21275_p7  ;;  %p15015_p1 = scmp.lt.u32.totalorder %s15006_s4, %s15615_s11 }
  0xb0   : > { %p15014_p8 = por %p15013_p13, %p15012_p0 }
  0xb1   : > { %p15010_p11 = pneg %p15009_p5 }
  0xb2   : > { %p15016_p10 = por %p15015_p1, %p15014_p8 }
  0xb4   : > { %p15017_p4 = pnand %p15016_p10, %p15010_p11 }
  0xb6   : > { %15020 = shalt.err (!%p15017_p4)
}
  0xb7   : > { %s15021_s7 = scalar_lea.vmem %s15610_s0, 128  ;;  %p21276_p2 = pmov %p21275_p7 }
  0xb8   : > { %p15022_p12 = scmp.ne.s32.totalorder %s15610_s0, %s15021_s7  ;;  %s15269_s19 = smov [#allocation8]  }
  0xb9   : > { %s15026_s10 = sshll.u32 %s15269_s19, 4  ;;  %s15027_s10 = int_to_ptr.vmem [resolvable:$false] %s15026_s10 }
  0xba   : > { %p15024_p6 = pnand %p15022_p12, %p21276_p2  ;;  %s15028_s15 = scalar_lea.vmem %s15027_s10, 256 }
  0xbb   : > { %p15029_p7 = scmp.lt.s32.totalorder %s15610_s0, %s15027_s10  ;;  %p15030_p5 = scmp.lt.s32.totalorder %s15028_s15, %s15021_s7 }
  0xbc   : > { %p15025_p9 = pneg %p15024_p6 }
  0xbd   : > { %p15031_p0 = por %p15030_p5, %p15029_p7 }
  0xbf   : > { %p15032_p13 = pnand %p15031_p0, %p15025_p9 }
  0xc1   : > { %15035 = shalt.err (!%p15032_p13)
}
  0xc2   : > { %s21277_s13 = sld [smem:[#allocation30_spill]]  ;;  %s21278_s2 = sld [smem:[#allocation35_spill]] }
  0xc3   : > { %13549 = dma.hbm_to_vmem [thread:$0]  (!%p15621_p3), %s15615_s11, 128, %s15610_s0, %s15524_s18, %s21269_s20, %s21269_s20, %s21268_s8  }
  0xc4   : > { %s400_s30 = sadd.s32 1, %s15218_s29  ;;  %p21279_p11 = scmp.lt.s32.totalorder %s15592_s17, 31 }
  0xc5   : > { %p21280_p8 = scmp.lt.s32.totalorder %s15602_s3, 31  ;;  %p407_p1 = scmp.ne.s32.totalorder %s15218_s29, %s15214_s28 }
  0xc6   : > { %s21933_s17 = smov (!%p21279_p11, %s15592_s17), 31  ;;  %p413_p10 = scmp.ne.s32.totalorder %s15214_s28, %s15210_s27 }
  0xc7   : > { %s21935_s3 = smov (!%p21280_p8, %s15602_s3), 31  ;;  %s857_s24 = sand.u32 1, %s15218_s29  }
  0xc8   : > { %s396_s16 = ssub.s32 %s21933_s17, %s21935_s3  ;;  %p21281_p4 = scmp.eq.s32.totalorder %s15262_s25, 0 }
  0xc9   : > { %s397_s4 = sor.u32 %s396_s16, %s15570_s22  ;;  %p21282_p6 = scmp.eq.s32.totalorder %s21277_s13, 0 }
  0xca   : > { %p409_p12 = por %p407_p1, %p21281_p4  ;;  %p398_p2 = scmp.eq.s32.totalorder %s397_s4, 0 }
  0xcb   : > { %p15750_p9 = por %p413_p10, %p21282_p6  ;;  %s11855_s0 = sshll.u32 %s857_s24, 3 }
  0xcc   : > { %s11857_s18 = sshll.u32 %s21933_s17, 1  ;;  %s859_s27 = scalar_lea.vmem [#allocation11], %s11855_s0 }
  0xcd   : > { %s15757_s11 = scalar_select %p398_p2, %s15218_s29, %s400_s30  }
  0xce   : > { %s869_s14 = sadd.s32 %s11857_s18, %s21278_s2  ;;  %s872_s12 = sshll.u32 %s859_s27, 4  ;;  %s15765_s12 = int_to_ptr.vmem [resolvable:$true] %s872_s12 }
  0xcf   : > { %s11859_s1 = sshll.u32 %s869_s14, 6  ;;  %s21284_s22 = sld [smem:[#allocation188_spill]] }
  0xd0   : > { %p21286_p3 = scmp.lt.s32.totalorder %s15262_s25, 4  ;;  %s21288_s13 = sld [smem:[#allocation189_spill]] }
  0xd1   : > { %s886_s30 = scalar_lea.vmem [#allocation12], %s11855_s0 }
  0xd2   : > { %p15769_p7 = pnand %p21286_p3, %p409_p12  ;;  %s15778_s16 = sshll.u32 %s886_s30, 4  ;;  %s15810_s16 = int_to_ptr.vmem [resolvable:$true] %s15778_s16 }
  0xd4   : > { %p15038_p0 = pneg %p15769_p7 }
  0xd5   : > { %s21285_s7 = smov %s21284_s22  ;;  %s15763_s19 = scalar_lea.hbm %s21284_s22, %s11859_s1 }
  0xd6   : > { %s15776_s2 = scalar_lea.hbm %s21288_s13, %s11859_s1  ;;  %s15036_s4 = scalar_lea.hbm %s15763_s19, 128 }
  0xd7   : > { %p15037_p5 = scmp.ne.s32.totalorder %s15763_s19, %s15036_s4  ;;  %s15041_s27 = scalar_lea.hbm %s21285_s7, 8192 }
  0xd8   : > { %p15042_p8 = scmp.lt.u32.totalorder %s15763_s19, %s21285_s7  ;;  %p15043_p1 = scmp.lt.u32.totalorder %s15041_s27, %s15036_s4 }
  0xd9   : > { %p15039_p13 = pnand %p15038_p0, %p15037_p5  ;;  %p15045_p4 = scmp.lt.u32.totalorder %s15036_s4, %s15763_s19 }
  0xda   : > { %p15044_p10 = por %p15043_p1, %p15042_p8 }
  0xdb   : > { %p15040_p11 = pneg %p15039_p13 }
  0xdc   : > { %p15046_p12 = por %p15045_p4, %p15044_p10 }
  0xde   : > { %p15047_p2 = pnand %p15046_p12, %p15040_p11 }
  0xe0   : > { %15050 = shalt.err (!%p15047_p2)
}
  0xe1   : > { %s15051_s0 = scalar_lea.vmem %s15765_s12, 128  ;;  %s15270_s1 = smov [#allocation11]  }
  0xe2   : > { %p15052_p6 = scmp.ne.s32.totalorder %s15765_s12, %s15051_s0  ;;  %s15056_s22 = sshll.u32 %s15270_s1, 4  ;;  %s15057_s22 = int_to_ptr.vmem [resolvable:$false] %s15056_s22 }
  0xe3   : > { %s15058_s10 = scalar_lea.vmem %s15057_s22, 256  ;;  %p15059_p13 = scmp.lt.s32.totalorder %s15765_s12, %s15057_s22 }
  0xe4   : > { %p15054_p3 = pnand %p15052_p6, %p15038_p0  ;;  %p15060_p8 = scmp.lt.s32.totalorder %s15058_s10, %s15051_s0 }
  0xe6   : > { %p15055_p5 = pneg %p15054_p3  ;;  %p15061_p1 = por %p15060_p8, %p15059_p13 }
  0xe8   : > { %p15062_p10 = pnand %p15061_p1, %p15055_p5 }
  0xea   : > { %15065 = shalt.err (!%p15062_p10)
}
  0xeb   : > { %13555 = dma.hbm_to_vmem [thread:$0]  (!%p15769_p7), %s15763_s19, 128, %s15765_s12, %s15634_s9, %s21269_s20, %s21269_s20, %s21268_s8  }
  0xec   : > { %s15814_s15 = scalar_lea.sflag [#allocation13], %s857_s24  ;;  %s15066_s30 = scalar_lea.hbm %s15776_s2, 128 }
  0xed   : > { %p15067_p11 = scmp.ne.s32.totalorder %s15776_s2, %s15066_s30  ;;  %s15071_s14 = scalar_lea.hbm %s21288_s13, 8192 }
  0xee   : > { %p15072_p2 = scmp.lt.u32.totalorder %s15776_s2, %s21288_s13  ;;  %p15073_p6 = scmp.lt.u32.totalorder %s15071_s14, %s15066_s30 }
  0xef   : > { %p15069_p4 = pnand %p15067_p11, %p15038_p0  ;;  %p15075_p5 = scmp.lt.u32.totalorder %s15066_s30, %s15776_s2 }
  0xf0   : > { %p15074_p3 = por %p15073_p6, %p15072_p2 }
  0xf1   : > { %p15070_p12 = pneg %p15069_p4 }
  0xf2   : > { %p15076_p13 = por %p15075_p5, %p15074_p3 }
  0xf4   : > { %p15077_p8 = pnand %p15076_p13, %p15070_p12 }
  0xf6   : > { %15080 = shalt.err (!%p15077_p8)
}
  0xf7   : > { %s15081_s9 = scalar_lea.vmem %s15810_s16, 128  ;;  %s15271_s24 = smov [#allocation12]  }
  0xf8   : > { %p15082_p1 = scmp.ne.s32.totalorder %s15810_s16, %s15081_s9  ;;  %s15086_s12 = sshll.u32 %s15271_s24, 4  ;;  %s15087_s12 = int_to_ptr.vmem [resolvable:$false] %s15086_s12 }
  0xf9   : > { %s15088_s19 = scalar_lea.vmem %s15087_s12, 256  ;;  %p15089_p4 = scmp.lt.s32.totalorder %s15810_s16, %s15087_s12 }
  0xfa   : > { %p15084_p10 = pnand %p15082_p1, %p15038_p0  ;;  %p15090_p2 = scmp.lt.s32.totalorder %s15088_s19, %s15081_s9 }
  0xfc   : > { %p15085_p11 = pneg %p15084_p10  ;;  %p15091_p6 = por %p15090_p2, %p15089_p4 }
  0xfe   : > { %p15092_p3 = pnand %p15091_p6, %p15085_p11 }
 0x100   : > { %15095 = shalt.err (!%p15092_p3)
}
 0x101   : > { %13558 = dma.hbm_to_vmem [thread:$0]  (!%p15769_p7), %s15776_s2, 128, %s15810_s16, %s15814_s15, %s21269_s20, %s21269_s20, %s21268_s8  }
 0x102   : > { %s21289_s23 = sld [smem:[#allocation36_spill]] }
 0x108   : > { %p21290_p0 = scmp.ne.s32.totalorder %s21289_s23, 0 }
 0x10a   : > { %911 = sbr.rel (%p21290_p0) target bundleno = 3174 (0xc66), region = 92 }
 0x111   : > { %s21291_s0 = sld [smem:[#allocation25_spill]]  ;;  %s21292_s1 = sld [smem:[#allocation32_spill]] }
 0x117   : > { %s15846_s22 = sand.u32 1, %s21291_s0   ;;  %p21293_p12 = scmp.ne.s32.totalorder %s21292_s1, 0 }
 0x118   : > { %s11866_s10 = sshll.u32 %s15846_s22, 7  ;;  %s914_s30 = scalar_lea.sflag [#allocation4], %s15846_s22 }
 0x119   : > { %s15850_s4 = scalar_lea.vmem [#allocation3], %s11866_s10 }
 0x11a   : > { %15181 = dma.done.wait (%p21293_p12), %s914_s30, 2048  }
 0x11b   : > { %15183 = vsyncadd (%p21293_p12), %s914_s30, 4294965248  ;;  %s21294_s17 = sld [smem:[#allocation30_spill]]  ;;  %s15857_s2 = scalar_lea.vmem [#allocation6], %s11866_s10 }
 0x121   : > { %s922_s8 = sand.u32 1, %s21294_s17  }
 0x122   : > { %s923_s20 = scalar_lea.sflag [#allocation7], %s922_s8 }
 0x123   : > { %15185 = dma.done.wait (%p21293_p12), %s923_s20, 2048  }
 0x124   : > { %15187 = vsyncadd (%p21293_p12), %s923_s20, 4294965248  ;;  %s21295_s16 = sld [smem:[#allocation22_spill]]  ;;  %s21296_s15 = sld [smem:[#allocation39_spill]] }
 0x12a   : > { %s933_s18 = sand.u32 1, %s21295_s16   ;;  %p21297_p7 = scmp.ne.s32.totalorder %s21296_s15, 0 }
 0x12b   : > { %s15864_s14 = sshll.u32 %s933_s18, 3 }
 0x12c   : > { %15189 = dma.done.wait (%p21297_p7), %s923_s20, 128  }
 0x12d   : > { %15191 = vsyncadd (%p21297_p7), %s923_s20, 4294967168  ;;  %s941_s3 = scalar_lea.sflag [#allocation10], %s922_s8 }
 0x12e   : > { %15193 = dma.done.wait (%p21297_p7), %s941_s3, 128  }
 0x12f   : > { %15195 = vsyncadd (%p21297_p7), %s941_s3, 4294967168  ;;  %s951_s24 = sand.u32 1, %s15214_s28  }
 0x130   : > { %s15877_s12 = sshll.u32 %s951_s24, 3 }
 0x131   : > { %15197 = dma.done.wait (%p15750_p9), %s941_s3, 128  }
 0x132   : > { %15199 = vsyncadd (%p15750_p9), %s941_s3, 4294967168  ;;  %s959_s23 = scalar_lea.sflag [#allocation13], %s951_s24 }
 0x133   : > { %15201 = dma.done.wait (%p15750_p9), %s959_s23, 128  }
 0x134   : > { %15203 = vsyncadd (%p15750_p9), %s959_s23, 4294967168  ;;  %s21298_s1 = sld [smem:[#allocation26_spill]]  ;;  %s21299_s10 = sld [smem:[#allocation27_spill]]  ;;  %vm1523_vm0 = vcmask 523264   ;;  %v1333_v25 = vld [vmem:[%s15850_s4] sm:$0xff]   ;;  %v1335_v26 = vld [vmem:[%s15850_s4 + $0x8] sm:$0xff]  }
 0x135   : > { %s21300_s3 = sld [smem:[#allocation190_spill]]  ;;  %s21301_s9 = sld [smem:[#allocation178_spill]]  ;;  %v1337_v27 = vld [vmem:[%s15850_s4 + $0x10] sm:$0xff]   ;;  %v1339_v29 = vld [vmem:[%s15850_s4 + $0x18] sm:$0xff]   ;;  %v1341_v30 = vld [vmem:[%s15850_s4 + $0x20] sm:$0xff]   ;;  %v21070_v35 = vmov 0.0  }
 0x136   : > { %v1343_v33 = vld [vmem:[%s15850_s4 + $0x28] sm:$0xff]   ;;  %v1345_v34 = vld [vmem:[%s15850_s4 + $0x30] sm:$0xff]   ;;  %v1347_v36 = vld [vmem:[%s15850_s4 + $0x38] sm:$0xff]   ;;  %s21302_s23 = sld [smem:[#allocation192_spill]]  ;;  %s21304_s19 = sld [smem:[#allocation182_spill]]  ;;  %vm15273_vm1 = vmmov 0  }
 0x137   : > { %v1349_v37 = vld [vmem:[%s15850_s4 + $0x40] sm:$0xff]   ;;  %v1351_v38 = vld [vmem:[%s15850_s4 + $0x48] sm:$0xff]   ;;  %v1353_v39 = vld [vmem:[%s15850_s4 + $0x50] sm:$0xff]   ;;  %vm1957_vm2 = vcmask 64512   ;;  %vm5005_vm3 = vcmask 31744   ;;  %vm7588_vm4 = vcmask 516096  }
 0x138   : > { %v1355_v40 = vld [vmem:[%s15850_s4 + $0x58] sm:$0xff]   ;;  %v1357_v41 = vld [vmem:[%s15850_s4 + $0x60] sm:$0xff]   ;;  %v1359_v42 = vld [vmem:[%s15850_s4 + $0x68] sm:$0xff]   ;;  %vm7589_vm5 = vsmask.f32 256  ;;  %vm8609_vm10 = vcmask 1046528  }
 0x139   : > { %v1361_v43 = vld [vmem:[%s15850_s4 + $0x70] sm:$0xff]   ;;  %v1363_v44 = vld [vmem:[%s15850_s4 + $0x78] sm:$0xff]   ;;  %v1365_v45 = vld [vmem:[%s15857_s2] sm:$0xff]   ;;  %vm7645_vm7 = vsmask.f32 7938  ;;  %vm8866_vm11 = vcmask 1045504  }
 0x13a   : > { %s15890_s30 = sshll.u32 %s21298_s1, 4  ;;  %p1113_p5 = scmp.lt.s32.totalorder %s21299_s10, 1  ;;  %v1367_v47 = vld [vmem:[%s15857_s2 + $0x8] sm:$0xff]   ;;  %v1369_v48 = vld [vmem:[%s15857_s2 + $0x10] sm:$0xff]   ;;  %v1371_v49 = vld [vmem:[%s15857_s2 + $0x18] sm:$0xff]  }
 0x13b   : > { %p1115_p13 = scmp.lt.s32.totalorder %s15890_s30, 31  ;;  %v15904_v0 = vld [vmem:[%s21300_s3] sm:$0xff]   ;;  %v15910_v1 = vld [vmem:[%s21300_s3 + $0x8] sm:$0xff]   ;;  %v15925_v2 = vld [vmem:[%s21300_s3 + $0x10] sm:$0xff]   ;;  %s12598_s7 = sadd.s32 16, %s15890_s30 }
 0x13c   : > { %s1114_s17 = scalar_select %p1113_p5, %s21299_s10, 1  ;;  %12878 = vmatprep.subr.bf16.mxu0 %v15904_v0  ;;  %v15934_v4 = vld [vmem:[%s21300_s3 + $0x18] sm:$0xff]   ;;  %v13772_v6 = vld [vmem:[%s21300_s3 + $0x40] sm:$0xff]   ;;  %v13777_v8 = vld [vmem:[%s21300_s3 + $0x48] sm:$0xff]  }
 0x13d   : > { %s1116_s8 = scalar_select %p1115_p13, %s15890_s30, 31  ;;  %12879 = vmatpush3.bf16.msra.mxu0 %v15904_v0  ;;  %v13782_v11 = vld [vmem:[%s21300_s3 + $0x50] sm:$0xff]   ;;  %v13787_v12 = vld [vmem:[%s21300_s3 + $0x58] sm:$0xff]   ;;  %v13792_v15 = vld [vmem:[%s21300_s3 + $0x60] sm:$0xff]  }
 0x13e   : > { %s15896_s20 = sshll.u32 %s1114_s17, 6  ;;  %12880 = vmatprep.subr.bf16.mxu0 %v15910_v1  ;;  %v13797_v28 = vld [vmem:[%s21300_s3 + $0x68] sm:$0xff]   ;;  %v13802_v31 = vld [vmem:[%s21300_s3 + $0x70] sm:$0xff]   ;;  %v13807_v32 = vld [vmem:[%s21300_s3 + $0x78] sm:$0xff]   ;;  %s21303_s17 = smov %s21302_s23 }
 0x13f   : > { %s11874_s16 = sshll.u32 %s1116_s8, 1  ;;  %v1264_v46 = vld [vmem:[%s21302_s23] sm:$0xff]  ;;  %v1375_v51 = vld [vmem:[%s15857_s2 + $0x28] sm:$0xff]   ;;  %v1377_v52 = vld [vmem:[%s15857_s2 + $0x30] sm:$0xff]   ;;  %p17513_p1 = scmp.lt.s32.totalorder %s12598_s7, 31 }
 0x140   : > { %s15899_s15 = sadd.s32 %s15896_s20, %s11874_s16  ;;  %12918 = vmatprep.subr.mxu1 %v1264_v46  ;;  %v1373_v50 = vld [vmem:[%s15857_s2 + $0x20] sm:$0xff]   ;;  %v1379_v53 = vld [vmem:[%s15857_s2 + $0x38] sm:$0xff]   ;;  %v1383_v55 = vld [vmem:[%s15857_s2 + $0x48] sm:$0xff]   ;;  %s11882_s16 = sadd.s32 4294967295, %s15890_s30 }
 0x141   : > { %s21069_s24 = sshll.u32 %s15899_s15, 2  ;;  %12881 = vmatpush3.bf16.msra.mxu0 %v15910_v1  ;;  %12919 = vmatpush3.msra.mxu1 %v1264_v46  ;;  %v1381_v54 = vld [vmem:[%s15857_s2 + $0x40] sm:$0xff]   ;;  %v1385_v56 = vld [vmem:[%s15857_s2 + $0x50] sm:$0xff]   ;;  %p1138_p9 = scmp.gt.s32.totalorder %s11882_s16, 0  ;;  %v1387_v57 = vld [vmem:[%s15857_s2 + $0x58] sm:$0xff]  }
 0x142   : > { %s15917_s8 = scalar_lea.vmem %s21301_s9, %s21069_s24  ;;  %12882 = vmatprep.subr.bf16.mxu0 %v15925_v2  ;;  %v1389_v58 = vld [vmem:[%s15857_s2 + $0x60] sm:$0xff]   ;;  %p11883_p8 = scmp.lt.s32.totalorder %s11882_s16, 31  ;;  %v1391_v60 = vld [vmem:[%s15857_s2 + $0x68] sm:$0xff]   ;;  %v1393_v61 = vld [vmem:[%s15857_s2 + $0x70] sm:$0xff]  }
 0x143   : > { %v1269_v3 = vld [vmem:[%s15917_s8] sm:$0xff]   ;;  %v1271_v5 = vld [vmem:[%s15917_s8 + $0x8] sm:$0xff]   ;;  %v1273_v7 = vld [vmem:[%s15917_s8 + $0x10] sm:$0xff]   ;;  %s1139_s18 = scalar_select %p1138_p9, %s11882_s16, 0 }
 0x144   : > { %12886 = vmatprep.mubr.msk.bf16.mxu0 %vm1523_vm0, %v1269_v3  ;;  %v1275_v9 = vld [vmem:[%s15917_s8 + $0x18] sm:$0xff]   ;;  %v1277_v10 = vld [vmem:[%s15917_s8 + $0x20] sm:$0xff]   ;;  %v1279_v13 = vld [vmem:[%s15917_s8 + $0x28] sm:$0xff]   ;;  %s21305_s24 = sld [smem:[#allocation191_spill]]  ;;  %s21398_s16 = scalar_lea.vmem [#allocation8], %s15864_s14 }
 0x145   : > { %12883 = vmatpush3.bf16.msra.mxu0 %v15925_v2  ;;  %v1281_v14 = vld [vmem:[%s15917_s8 + $0x30] sm:$0xff]   ;;  %v1283_v16 = vld [vmem:[%s15917_s8 + $0x38] sm:$0xff]   ;;  %v1285_v17 = vld [vmem:[%s15917_s8 + $0x40] sm:$0xff]   ;;  %s21937_s18 = smov (!%p11883_p8, %s1139_s18), 31  ;;  %s21349_s9 = sld [smem:[#allocation183_spill]] }
 0x146   : > { %12884 = vmatprep.subr.bf16.mxu0 %v15934_v4  ;;  %v1287_v18 = vld [vmem:[%s15917_s8 + $0x48] sm:$0xff]   ;;  %v1289_v19 = vld [vmem:[%s15917_s8 + $0x50] sm:$0xff]   ;;  %v1291_v20 = vld [vmem:[%s15917_s8 + $0x58] sm:$0xff]   ;;  %s11888_s0 = sshll.u32 %s21937_s18, 1  ;;  %s21939_s7 = smov (!%p17513_p1, %s12598_s7), 31 }
 0x147   : > { %v1293_v21 = vld [vmem:[%s15917_s8 + $0x60] sm:$0xff]   ;;  %v1295_v22 = vld [vmem:[%s15917_s8 + $0x68] sm:$0xff]   ;;  %v1297_v23 = vld [vmem:[%s15917_s8 + $0x70] sm:$0xff]   ;;  %s16073_s5 = sadd.s32 %s11888_s0, %s15896_s20  ;;  %s21941_s7 = smov (!%p17513_p1, %s21939_s7), 31 }
 0x148   : > { %v1299_v24 = vld [vmem:[%s15917_s8 + $0x78] sm:$0xff]   ;;  %v16064_v59 = vld [vmem:[%s21300_s3 + $0x20] sm:$0xff]   ;;  %s11890_s23 = sshll.u32 %s16073_s5, 2  ;;  %s11905_s30 = sshll.u32 %s21941_s7, 1  ;;  %vm17988_vm6 = vmand %vm7588_vm4, %vm7589_vm5 }
 0x149   : > { %12885 = vmatpush3.bf16.msra.mxu0 %v15934_v4  ;;  %12968 = vmatprep.subr.bf16.mxu1 %v16064_v59  ;;  %v1395_v62 = vld [vmem:[%s15857_s2 + $0x78] sm:$0xff]   ;;  %s16083_s27 = scalar_lea.vmem %s21304_s19, %s11890_s23  ;;  %s21308_s19 = sld [smem:[#allocation179_spill]]  ;;  %vm17996_vm8 = vmand %vm7588_vm4, %vm7645_vm7 }
 0x14a   : > { %13058 = vmatprep.subr.bf16.mxu0 %v13772_v6  ;;  %v1397_v63 = vld [vmem:[%s16083_s27] sm:$0xff]   ;;  %s21306_s6 = smov %s21305_s24  ;;  %s1188_s5 = sadd.s32 %s11905_s30, %s15896_s20  ;;  %vm18250_vm9 = vmand %vm1523_vm0, %vm7645_vm7 }
 0x14b   : > { %s21525_s0 = scalar_lea.vmem [#allocation8], %s15864_s14  ;;  %p7578_p10 = scmp.gt.s32.totalorder %s21298_s1, 0 }
 0x14c   : > { %12887 = vmatmul.mubr.msk.bf16.vlgmr.msra.gmra.mrb[0].mxu0 %vm1523_vm0, %v1271_v5  ;;  %s15278_s20 = smov 64   ;;  %p7583_p11 = scmp.lt.s32.totalorder %s21298_s1, 1 }
 0x14d   : > { %13059 = vmatpush3.bf16.msra.mxu0 %v13772_v6  ;;  %12890 = vmatprep.mubr.msk.bf16.mxu0 %vm1523_vm0, %v1273_v7 }
 0x14e   : > { %13060 = vmatprep.subr.bf16.mxu0 %v13777_v8 }
 0x151   : > { %13061 = vmatpush3.bf16.msra.mxu0 %v13777_v8 }
 0x152   : > { %13062 = vmatprep.subr.bf16.mxu0 %v13782_v11 }
 0x154   : > { %12891 = vmatmul.mubr.msk.bf16.gmra.mrb[4].mxu0 %vm1523_vm0, %v1275_v9 }
 0x155   : > { %12894 = vmatprep.mubr.msk.bf16.mxu0 %vm1523_vm0, %v1277_v10  ;;  %13063 = vmatpush3.bf16.msra.mxu0 %v13782_v11 }
 0x156   : > { %13064 = vmatprep.subr.bf16.mxu0 %v13787_v12 }
 0x159   : > { %13065 = vmatpush3.bf16.msra.mxu0 %v13787_v12 }
 0x15a   : > { %13148 = vmatprep.subr.bf16.mxu0 %v13792_v15 }
 0x15c   : > { %12895 = vmatmul.mubr.msk.bf16.gmra.mrb[8].mxu0 %vm1523_vm0, %v1279_v13 }
 0x15d   : > { %12898 = vmatprep.mubr.msk.bf16.mxu0 %vm1523_vm0, %v1281_v14 }
 0x164   : > { %12899 = vmatmul.mubr.msk.bf16.gmra.mrb[12].mxu0 %vm1523_vm0, %v1283_v16 }
 0x165   : > { %12902 = vmatprep.mubr.msk.bf16.mxu0 %vm1523_vm0, %v1285_v17 }
 0x16c   : > { %12903 = vmatmul.mubr.msk.bf16.gmra.mrb[16].mxu0 %vm1523_vm0, %v1287_v18 }
 0x16d   : > { %12906 = vmatprep.mubr.msk.bf16.mxu0 %vm1523_vm0, %v1289_v19 }
 0x174   : > { %12907 = vmatmul.mubr.msk.bf16.gmra.mrb[20].mxu0 %vm1523_vm0, %v1291_v20 }
 0x175   : > { %12910 = vmatprep.mubr.msk.bf16.mxu0 %vm1523_vm0, %v1293_v21 }
 0x17c   : > { %12911 = vmatmul.mubr.msk.bf16.gmra.mrb[24].mxu0 %vm1523_vm0, %v1295_v22 }
 0x17d   : > { %12914 = vmatprep.mubr.msk.bf16.mxu0 %vm1523_vm0, %v1297_v23 }
 0x184   : > { %12915 = vmatmul.mubr.msk.bf16.gmra.mrb[28].mxu0 %vm1523_vm0, %v1299_v24 }
 0x185   : > { %13066 = vmatprep.mubr.msk.bf16.mxu0 %vm1523_vm0, %v1333_v25 }
 0x18c   : > { %13067 = vmatmul.mubr.msk.bf16.vlgmr.msra.gmra.mrb[32].mxu0 %vm1523_vm0, %v1335_v26 }
 0x18d   : > { %13149 = vmatpush3.bf16.msra.mxu0 %v13792_v15  ;;  %13070 = vmatprep.mubr.msk.bf16.mxu0 %vm1523_vm0, %v1337_v27 }
 0x18e   : > { %13150 = vmatprep.subr.bf16.mxu0 %v13797_v28 }
 0x191   : > { %13151 = vmatpush3.bf16.msra.mxu0 %v13797_v28 }
 0x192   : > { %13152 = vmatprep.subr.bf16.mxu0 %v13802_v31 }
 0x194   : > { %13071 = vmatmul.mubr.msk.bf16.gmra.mrb[36].mxu0 %vm1523_vm0, %v1339_v29 }
 0x195   : > { %13074 = vmatprep.mubr.msk.bf16.mxu0 %vm1523_vm0, %v1341_v30  ;;  %13153 = vmatpush3.bf16.msra.mxu0 %v13802_v31 }
 0x196   : > { %13154 = vmatprep.subr.bf16.mxu0 %v13807_v32 }
 0x199   : > { %13155 = vmatpush3.bf16.msra.mxu0 %v13807_v32 }
 0x19a   : > { %13238 = vmatprep.subr.bf16.mxu0 %v21070_v35 }
 0x19c   : > { %13075 = vmatmul.mubr.msk.bf16.gmra.mrb[40].mxu0 %vm1523_vm0, %v1343_v33 }
 0x19d   : > { %13078 = vmatprep.mubr.msk.bf16.mxu0 %vm1523_vm0, %v1345_v34 }
 0x1a4   : > { %13079 = vmatmul.mubr.msk.bf16.gmra.mrb[44].mxu0 %vm1523_vm0, %v1347_v36 }
 0x1a5   : > { %13082 = vmatprep.mubr.msk.bf16.mxu0 %vm1523_vm0, %v1349_v37 }
 0x1ac   : > { %13083 = vmatmul.mubr.msk.bf16.gmra.mrb[48].mxu0 %vm1523_vm0, %v1351_v38 }
 0x1ad   : > { %13086 = vmatprep.mubr.msk.bf16.mxu0 %vm1523_vm0, %v1353_v39 }
 0x1b4   : > { %13087 = vmatmul.mubr.msk.bf16.gmra.mrb[52].mxu0 %vm1523_vm0, %v1355_v40 }
 0x1b5   : > { %13090 = vmatprep.mubr.msk.bf16.mxu0 %vm1523_vm0, %v1357_v41 }
 0x1bc   : > { %13091 = vmatmul.mubr.msk.bf16.gmra.mrb[56].mxu0 %vm1523_vm0, %v1359_v42 }
 0x1bd   : > { %13094 = vmatprep.mubr.msk.bf16.mxu0 %vm1523_vm0, %v1361_v43 }
 0x1c4   : > { %13095 = vmatmul.mubr.msk.bf16.gmra.mrb[60].mxu0 %vm1523_vm0, %v1363_v44 }
 0x1c5   : > { %13156 = vmatprep.mubr.msk.bf16.mxu0 %vm1523_vm0, %v1365_v45 }
 0x1cc   : > { %13157 = vmatmul.mubr.msk.bf16.vlgmr.msra.gmra.mrb[64].mxu0 %vm1523_vm0, %v1367_v47 }
 0x1cd   : > { %13239 = vmatpush3.bf16.msra.mxu0 %v15904_v0  ;;  %13160 = vmatprep.mubr.msk.bf16.mxu0 %vm1523_vm0, %v1369_v48  ;;  %v16094_v0 = vld [vmem:[%s21305_s24] ss:$0 sm:$0xff]  ;;  %s21307_s24 = sshll.u32 %s15899_s15, 2  ;;  %s21400_s15 = scalar_lea.vmem [#allocation9], %s15864_s14 }
 0x1ce   : > { %13240 = vmatprep.subr.bf16.mxu0 %v21070_v35  ;;  %s16330_s18 = scalar_lea.vmem %s21308_s19, %s21307_s24  ;;  %s16495_s19 = scalar_lea.vmem %s21349_s9, %s11890_s23 }
 0x1cf   : > { %s21402_s24 = sld [smem:[#allocation187_spill]]  ;;  %s21411_s9 = sld [smem:[#allocation186_spill]] }
 0x1d0   : > { %s21419_s23 = scalar_lea.vmem [#allocation12], %s15877_s12 }
 0x1d1   : > { %13241 = vmatpush3.bf16.msra.mxu0 %v15910_v1 }
 0x1d2   : > { %13242 = vmatprep.subr.bf16.mxu0 %v21070_v35 }
 0x1d4   : > { %13161 = vmatmul.mubr.msk.bf16.gmra.mrb[68].mxu0 %vm1523_vm0, %v1371_v49 }
 0x1d5   : > { %13164 = vmatprep.mubr.msk.bf16.mxu0 %vm1523_vm0, %v1373_v50  ;;  %13243 = vmatpush3.bf16.msra.mxu0 %v15925_v2 }
 0x1d6   : > { %13244 = vmatprep.subr.bf16.mxu0 %v21070_v35 }
 0x1d9   : > { %13245 = vmatpush3.bf16.msra.mxu0 %v15934_v4 }
 0x1da   : > { %13250 = vmatprep.subr.mxu0 %v1264_v46 }
 0x1dc   : > { %13165 = vmatmul.mubr.msk.bf16.gmra.mrb[72].mxu0 %vm1523_vm0, %v1375_v51 }
 0x1dd   : > { %13168 = vmatprep.mubr.msk.bf16.mxu0 %vm1523_vm0, %v1377_v52 }
 0x1e4   : > { %13169 = vmatmul.mubr.msk.bf16.gmra.mrb[76].mxu0 %vm1523_vm0, %v1379_v53 }
 0x1e5   : > { %13172 = vmatprep.mubr.msk.bf16.mxu0 %vm1523_vm0, %v1381_v54 }
 0x1ec   : > { %13173 = vmatmul.mubr.msk.bf16.gmra.mrb[80].mxu0 %vm1523_vm0, %v1383_v55 }
 0x1ed   : > { %13176 = vmatprep.mubr.msk.bf16.mxu0 %vm1523_vm0, %v1385_v56 }
 0x1f4   : > { %13177 = vmatmul.mubr.msk.bf16.gmra.mrb[84].mxu0 %vm1523_vm0, %v1387_v57 }
 0x1f5   : > { %13180 = vmatprep.mubr.msk.bf16.mxu0 %vm1523_vm0, %v1389_v58 }
 0x1fc   : > { %13181 = vmatmul.mubr.msk.bf16.gmra.mrb[88].mxu0 %vm1523_vm0, %v1391_v60 }
 0x1fd   : > { %13184 = vmatprep.mubr.msk.bf16.mxu0 %vm1523_vm0, %v1393_v61 }
 0x204   : > { %13185 = vmatmul.mubr.msk.bf16.gmra.mrb[92].mxu0 %vm1523_vm0, %v1395_v62 }
 0x205   : > { %13246 = vmatprep.mubr.msk.bf16.mxu0 %vm15273_vm1, %v21070_v35 }
 0x20c   : > { %13247 = vmatmul.mubr.msk.bf16.vlgmr.msra.gmra.mrb[96].mxu0 %vm1523_vm0, %v1397_v63 }
 0x20d   : > { %13251 = vmatpush3.msra.mxu0 %v1264_v46 }
 0x20e   : > { %13255 = vmatprep.subr.bf16.mxu0 %v21070_v35 }
 0x21f   : > { %v12888_v1 = vpop.f32.mrb[0].mxu0 }
 0x220   : > { %v16097_v2 = vadd.f32 %v12888_v1, %v16094_v0  ;;  %v1606_v3 = vpop.f32.mrb[1].mxu0 }
 0x221   : > { %v12889_v4 = vpop.f32.mrb[2].mxu0  ;;  %v16100_v5 = vadd.f32 %v16094_v0, %v1606_v3 }
 0x222   : > { %v11981_v6 = vmul.f32 -1.442695, %v16097_v2  ;;  %v16104_v7 = vadd.f32 %v12889_v4, %v16094_v0  ;;  %v1609_v8 = vpop.f32.mrb[3].mxu0 }
 0x223   : > { %v16107_v9 = vadd.f32 %v16094_v0, %v1609_v8  ;;  %v11979_v10 = vmul.f32 -1.442695, %v16100_v5 }
 0x224   : > { %13962 = vpow2.f32 %v11981_v6  ;;  %v11982_v11 = vmul.f32 -1.442695, %v16104_v7 }
 0x225   : > { %v11980_v12 = vmul.f32 -1.442695, %v16107_v9  ;;  %13964 = vpow2.f32 %v11979_v10 }
 0x226   : > { %13966 = vpow2.f32 %v11982_v11 }
 0x227   : > { %13968 = vpow2.f32 %v11980_v12  ;;  %v12892_v13 = vpop.f32.mrb[4].mxu0 }
 0x228   : > { %v16113_v14 = vadd.f32 %v12892_v13, %v16094_v0  ;;  %v1622_v15 = vpop.f32.mrb[5].mxu0 }
 0x229   : > { %v16116_v16 = vadd.f32 %v16094_v0, %v1622_v15  ;;  %v12893_v17 = vpop.f32.mrb[6].mxu0 }
 0x22a   : > { %v11985_v18 = vmul.f32 -1.442695, %v16113_v14  ;;  %v16120_v19 = vadd.f32 %v12893_v17, %v16094_v0  ;;  %v1625_v20 = vpop.f32.mrb[7].mxu0 }
 0x22b   : > { %v11983_v21 = vmul.f32 -1.442695, %v16116_v16  ;;  %v16124_v22 = vadd.f32 %v16094_v0, %v1625_v20 }
 0x22c   : > { %13970 = vpow2.f32 %v11985_v18  ;;  %v11986_v23 = vmul.f32 -1.442695, %v16120_v19  ;;  %v16166_v18 = vld [vmem:[%s21300_s3 + $0x28] sm:$0xff]  }
 0x22d   : > { %13972 = vpow2.f32 %v11983_v21  ;;  %v11984_v24 = vmul.f32 -1.442695, %v16124_v22 }
 0x22e   : > { %v13963_v25 = vpop.eup %13962  ;;  %13974 = vpow2.f32 %v11986_v23 }
 0x22f   : > { %v13965_v26 = vpop.eup %13964  ;;  %v1831_v27 = vadd.f32 1.0, %v13963_v25  ;;  %13976 = vpow2.f32 %v11984_v24  ;;  %v12896_v28 = vpop.f32.mrb[8].mxu0 }
 0x230   : > { %v13967_v29 = vpop.eup %13966  ;;  %v16129_v30 = vadd.f32 %v12896_v28, %v16094_v0  ;;  %v1638_v31 = vpop.f32.mrb[9].mxu0  ;;  %v1829_v32 = vadd.f32 1.0, %v13965_v26 }
 0x231   : > { %v13969_v33 = vpop.eup %13968  ;;  %13978 = vrcp.f32 %v1831_v27  ;;  %v1832_v34 = vadd.f32 1.0, %v13967_v29  ;;  %v16132_v36 = vadd.f32 %v16094_v0, %v1638_v31  ;;  %v12897_v37 = vpop.f32.mrb[10].mxu0 }
 0x232   : > { %v1830_v38 = vadd.f32 1.0, %v13969_v33  ;;  %v11989_v39 = vmul.f32 -1.442695, %v16129_v30  ;;  %v16136_v40 = vadd.f32 %v12897_v37, %v16094_v0  ;;  %v1641_v41 = vpop.f32.mrb[11].mxu0  ;;  %13980 = vrcp.f32 %v1829_v32 }
 0x233   : > { %13982 = vrcp.f32 %v1832_v34  ;;  %v11987_v42 = vmul.f32 -1.442695, %v16132_v36  ;;  %v16140_v43 = vadd.f32 %v16094_v0, %v1641_v41 }
 0x234   : > { %13984 = vrcp.f32 %v1830_v38  ;;  %v11990_v44 = vmul.f32 -1.442695, %v16136_v40 }
 0x235   : > { %13986 = vpow2.f32 %v11989_v39  ;;  %v11988_v45 = vmul.f32 -1.442695, %v16140_v43  ;;  %v16191_v39 = vld [vmem:[%s21300_s3 + $0x30] sm:$0xff]  }
 0x236   : > { %v13971_v46 = vpop.eup %13970  ;;  %13988 = vpow2.f32 %v11987_v42 }
 0x237   : > { %v13973_v47 = vpop.eup %13972  ;;  %v1835_v48 = vadd.f32 1.0, %v13971_v46  ;;  %13990 = vpow2.f32 %v11990_v44  ;;  %v12900_v49 = vpop.f32.mrb[12].mxu0 }
 0x238   : > { %v13975_v50 = vpop.eup %13974  ;;  %v1833_v51 = vadd.f32 1.0, %v13973_v47  ;;  %13992 = vpow2.f32 %v11988_v45  ;;  %v16145_v52 = vadd.f32 %v12900_v49, %v16094_v0  ;;  %v1654_v53 = vpop.f32.mrb[13].mxu0 }
 0x239   : > { %v13977_v54 = vpop.eup %13976  ;;  %13994 = vrcp.f32 %v1835_v48  ;;  %v1836_v55 = vadd.f32 1.0, %v13975_v50  ;;  %v16148_v56 = vadd.f32 %v16094_v0, %v1654_v53  ;;  %v12901_v57 = vpop.f32.mrb[14].mxu0 }
 0x23a   : > { %13996 = vrcp.f32 %v1833_v51  ;;  %v1834_v58 = vadd.f32 1.0, %v13977_v54  ;;  %v11993_v60 = vmul.f32 -1.442695, %v16145_v52  ;;  %v16152_v61 = vadd.f32 %v12901_v57, %v16094_v0  ;;  %v1657_v62 = vpop.f32.mrb[15].mxu0 }
 0x23b   : > { %v13979_v63 = vpop.eup %13978  ;;  %13998 = vrcp.f32 %v1836_v55  ;;  %v11991_v1 = vmul.f32 -1.442695, %v16148_v56  ;;  %v16156_v3 = vadd.f32 %v16094_v0, %v1657_v62 }
 0x23c   : > { %v13981_v4 = vpop.eup %13980  ;;  %14000 = vrcp.f32 %v1834_v58  ;;  %v11994_v6 = vmul.f32 -1.442695, %v16152_v61  ;;  %v1927_v21 = vmul.f32 %v13979_v63, %v16097_v2 }
 0x23d   : > { %v13983_v8 = vpop.eup %13982  ;;  %14002 = vpow2.f32 %v11993_v60  ;;  %v11992_v10 = vmul.f32 -1.442695, %v16156_v3  ;;  %v1925_v11 = vmul.f32 %v13981_v4, %v16100_v5 }
 0x23e   : > { %v13985_v12 = vpop.eup %13984  ;;  %14004 = vpow2.f32 %v11991_v1 }
 0x23f   : > { %v13987_v13 = vpop.eup %13986  ;;  %v1926_v15 = vmul.f32 %v13985_v12, %v16107_v9  ;;  %14006 = vpow2.f32 %v11994_v6  ;;  %v12904_v17 = vpop.f32.mrb[16].mxu0  ;;  %12920 = vmatprep.mubr.msk.f32.mxu1 %vm1957_vm2, %v1925_v11  ;;  %v1928_v9 = vmul.f32 %v13983_v8, %v16104_v7 }
 0x240   : > { %v13989_v20 = vpop.eup %13988  ;;  %v1839_v23 = vadd.f32 1.0, %v13987_v13  ;;  %14008 = vpow2.f32 %v11992_v10  ;;  %v16170_v5 = vadd.f32 %v12904_v17, %v16094_v0  ;;  %v1670_v24 = vpop.f32.mrb[17].mxu0 }
 0x241   : > { %v13991_v25 = vpop.eup %13990  ;;  %v1837_v26 = vadd.f32 1.0, %v13989_v20  ;;  %v16174_v27 = vadd.f32 %v16094_v0, %v1670_v24  ;;  %v12905_v28 = vpop.f32.mrb[18].mxu0  ;;  %12921 = vmatmul.mubr.msk.f32.vlgmr.msra.gmra.mrb[0].mxu1 %vm1957_vm2, %v1926_v15 }
 0x242   : > { %v13993_v29 = vpop.eup %13992  ;;  %14010 = vrcp.f32 %v1839_v23  ;;  %v1840_v31 = vadd.f32 1.0, %v13991_v25  ;;  %v11997_v2 = vmul.f32 -1.442695, %v16170_v5  ;;  %v16179_v32 = vadd.f32 %v12905_v28, %v16094_v0  ;;  %v1673_v33 = vpop.f32.mrb[19].mxu0  ;;  %12923 = vmatprep.mubr.msk.f32.mxu1 %vm1957_vm2, %v1927_v21  ;;  %12969 = vmatpush3.bf16.msra.mxu1 %v16064_v59 }
 0x243   : > { %v13995_v7 = vpop.eup %13994  ;;  %14012 = vrcp.f32 %v1837_v26  ;;  %v1838_v34 = vadd.f32 1.0, %v13993_v29  ;;  %v11995_v37 = vmul.f32 -1.442695, %v16174_v27  ;;  %v16185_v38 = vadd.f32 %v16094_v0, %v1673_v33  ;;  %12970 = vmatprep.subr.bf16.mxu1 %v16166_v18 }
 0x244   : > { %v13997_v41 = vpop.eup %13996  ;;  %14014 = vrcp.f32 %v1840_v31  ;;  %v11998_v42 = vmul.f32 -1.442695, %v16179_v32  ;;  %v1931_v53 = vmul.f32 %v13995_v7, %v16113_v14 }
 0x245   : > { %v13999_v44 = vpop.eup %13998  ;;  %v1929_v45 = vmul.f32 %v13997_v41, %v16116_v16  ;;  %14016 = vrcp.f32 %v1838_v34  ;;  %v11996_v46 = vmul.f32 -1.442695, %v16185_v38  ;;  %12924 = vmatmul.mubr.msk.f32.gmra.mrb[2].mxu1 %vm1957_vm2, %v1928_v9  ;;  %v16204_v16 = vld [vmem:[%s21300_s3 + $0x38] sm:$0xff]  }
 0x246   : > { %v14001_v47 = vpop.eup %14000  ;;  %14018 = vpow2.f32 %v11997_v2  ;;  %12971 = vmatpush3.bf16.msra.mxu1 %v16166_v18  ;;  %v1932_v58 = vmul.f32 %v13999_v44, %v16120_v19 }
 0x247   : > { %v14003_v48 = vpop.eup %14002  ;;  %v1930_v49 = vmul.f32 %v14001_v47, %v16124_v22  ;;  %14020 = vpow2.f32 %v11995_v37  ;;  %v12908_v50 = vpop.f32.mrb[20].mxu0  ;;  %12926 = vmatprep.mubr.msk.f32.mxu1 %vm1957_vm2, %v1929_v45  ;;  %12972 = vmatprep.subr.bf16.mxu1 %v16191_v39 }
 0x248   : > { %v14005_v51 = vpop.eup %14004  ;;  %v1843_v54 = vadd.f32 1.0, %v14003_v48  ;;  %14022 = vpow2.f32 %v11998_v42  ;;  %v16208_v55 = vadd.f32 %v12908_v50, %v16094_v0  ;;  %v1686_v22 = vpop.f32.mrb[21].mxu0 }
 0x249   : > { %v14007_v57 = vpop.eup %14006  ;;  %v1841_v60 = vadd.f32 1.0, %v14005_v51  ;;  %14024 = vpow2.f32 %v11996_v46  ;;  %v16212_v62 = vadd.f32 %v16094_v0, %v1686_v22  ;;  %v12909_v63 = vpop.f32.mrb[22].mxu0  ;;  %12927 = vmatmul.mubr.msk.f32.gmra.mrb[4].mxu1 %vm1957_vm2, %v1930_v49 }
 0x24a   : > { %v14009_v1 = vpop.eup %14008  ;;  %14026 = vrcp.f32 %v1843_v54  ;;  %v1844_v14 = vadd.f32 1.0, %v14007_v57  ;;  %v12001_v4 = vmul.f32 -1.442695, %v16208_v55  ;;  %v16217_v6 = vadd.f32 %v12909_v63, %v16094_v0  ;;  %v1689_v8 = vpop.f32.mrb[23].mxu0  ;;  %12929 = vmatprep.mubr.msk.f32.mxu1 %vm1957_vm2, %v1931_v53  ;;  %12973 = vmatpush3.bf16.msra.mxu1 %v16191_v39 }
 0x24b   : > { %14028 = vrcp.f32 %v1841_v60  ;;  %v1842_v19 = vadd.f32 1.0, %v14009_v1  ;;  %v11999_v10 = vmul.f32 -1.442695, %v16212_v62  ;;  %v16223_v11 = vadd.f32 %v16094_v0, %v1689_v8  ;;  %12974 = vmatprep.subr.bf16.mxu1 %v16204_v16 }
 0x24c   : > { %v14011_v12 = vpop.eup %14010  ;;  %14030 = vrcp.f32 %v1844_v14  ;;  %v12002_v13 = vmul.f32 -1.442695, %v16217_v6 }
 0x24d   : > { %v14013_v15 = vpop.eup %14012  ;;  %14032 = vrcp.f32 %v1842_v19  ;;  %v12000_v17 = vmul.f32 -1.442695, %v16223_v11  ;;  %12930 = vmatmul.mubr.msk.f32.gmra.mrb[6].mxu1 %vm1957_vm2, %v1932_v58  ;;  %v1935_v31 = vmul.f32 %v14011_v12, %v16129_v30 }
 0x24e   : > { %v14015_v20 = vpop.eup %14014  ;;  %v1933_v21 = vmul.f32 %v14013_v15, %v16132_v36  ;;  %14034 = vpow2.f32 %v12001_v4  ;;  %12975 = vmatpush3.bf16.msra.mxu1 %v16204_v16 }
 0x24f   : > { %v14017_v23 = vpop.eup %14016  ;;  %14036 = vpow2.f32 %v11999_v10  ;;  %v12912_v24 = vpop.f32.mrb[24].mxu0  ;;  %v1936_v46 = vmul.f32 %v14015_v20, %v16136_v40 }
 0x250   : > { %v14019_v25 = vpop.eup %14018  ;;  %v1934_v9 = vmul.f32 %v14017_v23, %v16140_v43  ;;  %14038 = vpow2.f32 %v12002_v13  ;;  %v16233_v26 = vadd.f32 %v12912_v24, %v16094_v0  ;;  %12932 = vmatprep.mubr.msk.f32.mxu1 %vm1957_vm2, %v1933_v21  ;;  %v1702_v28 = vpop.f32.mrb[25].mxu0 }
 0x251   : > { %v14021_v29 = vpop.eup %14020  ;;  %v1847_v36 = vadd.f32 1.0, %v14019_v25  ;;  %14040 = vpow2.f32 %v12000_v17  ;;  %v16238_v2 = vadd.f32 %v16094_v0, %v1702_v28  ;;  %v12913_v33 = vpop.f32.mrb[26].mxu0 }
 0x252   : > { %v14023_v7 = vpop.eup %14022  ;;  %v1845_v34 = vadd.f32 1.0, %v14021_v29  ;;  %v16241_v43 = vadd.f32 %v12913_v33, %v16094_v0  ;;  %12933 = vmatmul.mubr.msk.f32.gmra.mrb[8].mxu1 %vm1957_vm2, %v1934_v9  ;;  %v1705_v37 = vpop.f32.mrb[27].mxu0  ;;  %v12005_v44 = vmul.f32 -1.442695, %v16233_v26 }
 0x253   : > { %v14025_v41 = vpop.eup %14024  ;;  %14042 = vrcp.f32 %v1847_v36  ;;  %v1848_v42 = vadd.f32 1.0, %v14023_v7  ;;  %v16246_v30 = vadd.f32 %v16094_v0, %v1705_v37  ;;  %12935 = vmatprep.mubr.msk.f32.mxu1 %vm1957_vm2, %v1935_v31  ;;  %v12003_v48 = vmul.f32 -1.442695, %v16238_v2 }
 0x254   : > { %v14027_v45 = vpop.eup %14026  ;;  %14044 = vrcp.f32 %v1845_v34  ;;  %v1846_v47 = vadd.f32 1.0, %v14025_v41  ;;  %v12006_v50 = vmul.f32 -1.442695, %v16241_v43 }
 0x255   : > { %v14029_v49 = vpop.eup %14028  ;;  %14046 = vrcp.f32 %v1848_v42  ;;  %v12004_v54 = vmul.f32 -1.442695, %v16246_v30 }
 0x256   : > { %v14031_v51 = vpop.eup %14030  ;;  %v1937_v53 = vmul.f32 %v14029_v49, %v16148_v56  ;;  %14048 = vrcp.f32 %v1846_v47  ;;  %12936 = vmatmul.mubr.msk.f32.gmra.mrb[10].mxu1 %vm1957_vm2, %v1936_v46  ;;  %v1939_v56 = vmul.f32 %v14027_v45, %v16145_v52 }
 0x257   : > { %v14033_v22 = vpop.eup %14032  ;;  %14050 = vpow2.f32 %v12005_v44  ;;  %v12916_v57 = vpop.f32.mrb[28].mxu0  ;;  %v1940_v20 = vmul.f32 %v14031_v51, %v16152_v61 }
 0x258   : > { %v14035_v40 = vpop.eup %14034  ;;  %v1938_v58 = vmul.f32 %v14033_v22, %v16156_v3  ;;  %14052 = vpow2.f32 %v12003_v48  ;;  %v16257_v60 = vadd.f32 %v12916_v57, %v16094_v0  ;;  %12938 = vmatprep.mubr.msk.f32.mxu1 %vm1957_vm2, %v1937_v53  ;;  %v1718_v63 = vpop.f32.mrb[29].mxu0 }
 0x259   : > { %v14037_v1 = vpop.eup %14036  ;;  %v1851_v14 = vadd.f32 1.0, %v14035_v40  ;;  %14054 = vpow2.f32 %v12006_v50  ;;  %v16262_v4 = vadd.f32 %v16094_v0, %v1718_v63  ;;  %v12917_v8 = vpop.f32.mrb[30].mxu0 }
 0x25a   : > { %v14039_v19 = vpop.eup %14038  ;;  %v1849_v10 = vadd.f32 1.0, %v14037_v1  ;;  %14056 = vpow2.f32 %v12004_v54  ;;  %v16265_v3 = vadd.f32 %v12917_v8, %v16094_v0  ;;  %12939 = vmatmul.mubr.msk.f32.gmra.mrb[12].mxu1 %vm1957_vm2, %v1938_v58  ;;  %v1721_v12 = vpop.f32.mrb[31].mxu0  ;;  %v12009_v52 = vmul.f32 -1.442695, %v16257_v60 }
 0x25b   : > { %v14041_v13 = vpop.eup %14040  ;;  %14058 = vrcp.f32 %v1851_v14  ;;  %v1852_v15 = vadd.f32 1.0, %v14039_v19  ;;  %v16270_v17 = vadd.f32 %v16094_v0, %v1721_v12  ;;  %12941 = vmatprep.mubr.msk.f32.mxu1 %vm1957_vm2, %v1939_v56  ;;  %v12007_v23 = vmul.f32 -1.442695, %v16262_v4 }
 0x25c   : > { %14060 = vrcp.f32 %v1849_v10  ;;  %v1850_v21 = vadd.f32 1.0, %v14041_v13  ;;  %v12010_v25 = vmul.f32 -1.442695, %v16265_v3 }
 0x25d   : > { %v14043_v24 = vpop.eup %14042  ;;  %14062 = vrcp.f32 %v1852_v15  ;;  %v12008_v28 = vmul.f32 -1.442695, %v16270_v17 }
 0x25e   : > { %v14045_v9 = vpop.eup %14044  ;;  %14064 = vrcp.f32 %v1850_v21  ;;  %12942 = vmatmul.mubr.msk.f32.gmra.mrb[14].mxu1 %vm1957_vm2, %v1940_v20  ;;  %v1943_v42 = vmul.f32 %v14043_v24, %v16170_v5 }
 0x25f   : > { %v14047_v29 = vpop.eup %14046  ;;  %v1941_v31 = vmul.f32 %v14045_v9, %v16174_v27  ;;  %14066 = vpow2.f32 %v12009_v52  ;;  %v16279_v36 = vpop.f32.mrb[32].mxu0 }
 0x260   : > { %v14049_v61 = vpop.eup %14048  ;;  %14068 = vpow2.f32 %v12007_v23  ;;  %v16281_v33 = vpop.f32.mrb[33].mxu0  ;;  %v1944_v48 = vmul.f32 %v14047_v29, %v16179_v32 }
 0x261   : > { %v14051_v7 = vpop.eup %14050  ;;  %v1942_v34 = vmul.f32 %v14049_v61, %v16185_v38  ;;  %14070 = vpow2.f32 %v12010_v25  ;;  %12944 = vmatprep.mubr.msk.f32.mxu1 %vm1957_vm2, %v1941_v31  ;;  %v16285_v37 = vpop.f32.mrb[34].mxu0 }
 0x262   : > { %v14053_v41 = vpop.eup %14052  ;;  %v1855_v44 = vadd.f32 1.0, %v14051_v7  ;;  %14072 = vpow2.f32 %v12008_v28  ;;  %v16288_v27 = vpop.f32.mrb[35].mxu0 }
 0x263   : > { %v14055_v45 = vpop.eup %14054  ;;  %v1853_v46 = vadd.f32 1.0, %v14053_v41  ;;  %12945 = vmatmul.mubr.msk.f32.gmra.mrb[16].mxu1 %vm1957_vm2, %v1942_v34  ;;  %v1301_v41 = vld [vmem:[%s16330_s18] sm:$0xff]  }
 0x264   : > { %v14057_v47 = vpop.eup %14056  ;;  %12947 = vmatprep.mubr.msk.f32.mxu1 %vm1957_vm2, %v1943_v42  ;;  %v1856_v49 = vadd.f32 1.0, %v14055_v45 }
 0x265   : > { %v14059_v38 = vpop.eup %14058  ;;  %14074 = vrcp.f32 %v1853_v46  ;;  %v1854_v50 = vadd.f32 1.0, %v14057_v47  ;;  %v1305_v46 = vld [vmem:[%s16330_s18 + $0x10] sm:$0xff]  }
 0x266   : > { %v14061_v51 = vpop.eup %14060  ;;  %14076 = vrcp.f32 %v1855_v44  ;;  %v1947_v1 = vmul.f32 %v14059_v38, %v16208_v55 }
 0x267   : > { %v14063_v5 = vpop.eup %14062  ;;  %v1945_v53 = vmul.f32 %v14061_v51, %v16212_v62  ;;  %14078 = vrcp.f32 %v1854_v50  ;;  %12948 = vmatmul.mubr.msk.f32.gmra.mrb[18].mxu1 %vm1957_vm2, %v1944_v48  ;;  %v16295_v54 = vpop.f32.mrb[36].mxu0  ;;  %v1309_v48 = vld [vmem:[%s16330_s18 + $0x20] sm:$0xff]  }
 0x268   : > { %v14065_v22 = vpop.eup %14064  ;;  %v16297_v57 = vpop.f32.mrb[37].mxu0  ;;  %14080 = vrcp.f32 %v1856_v49 }
 0x269   : > { %v14067_v40 = vpop.eup %14066  ;;  %v1946_v58 = vmul.f32 %v14065_v22, %v16223_v11  ;;  %12950 = vmatprep.mubr.msk.f32.mxu1 %vm1957_vm2, %v1945_v53  ;;  %v16301_v32 = vpop.f32.mrb[38].mxu0  ;;  %v1948_v11 = vmul.f32 %v14063_v5, %v16217_v6  ;;  %v1311_v53 = vld [vmem:[%s16330_s18 + $0x28] sm:$0xff]   ;;  %v1313_v22 = vld [vmem:[%s16330_s18 + $0x30] sm:$0xff]  }
 0x26a   : > { %v14069_v63 = vpop.eup %14068  ;;  %v1859_v62 = vadd.f32 1.0, %v14067_v40  ;;  %v16304_v56 = vpop.f32.mrb[39].mxu0 }
 0x26b   : > { %v14071_v14 = vpop.eup %14070  ;;  %v1857_v8 = vadd.f32 1.0, %v14069_v63  ;;  %12951 = vmatmul.mubr.msk.f32.gmra.mrb[20].mxu1 %vm1957_vm2, %v1946_v58 }
 0x26c   : > { %v14073_v19 = vpop.eup %14072  ;;  %12953 = vmatprep.mubr.msk.f32.mxu1 %vm1957_vm2, %v1947_v1  ;;  %v1860_v10 = vadd.f32 1.0, %v14071_v14  ;;  %v1317_v14 = vld [vmem:[%s16330_s18 + $0x40] sm:$0xff]  }
 0x26d   : > { %14082 = vrcp.f32 %v1857_v8  ;;  %v1858_v12 = vadd.f32 1.0, %v14073_v19 }
 0x26e   : > { %14084 = vrcp.f32 %v1859_v62  ;;  %v1315_v62 = vld [vmem:[%s16330_s18 + $0x38] sm:$0xff]  }
 0x26f   : > { %v14075_v13 = vpop.eup %14074  ;;  %14086 = vrcp.f32 %v1858_v12  ;;  %12954 = vmatmul.mubr.msk.f32.gmra.mrb[22].mxu1 %vm1957_vm2, %v1948_v11  ;;  %v16310_v55 = vpop.f32.mrb[40].mxu0  ;;  %v1319_v12 = vld [vmem:[%s16330_s18 + $0x48] sm:$0xff]  }
 0x270   : > { %v14077_v15 = vpop.eup %14076  ;;  %v1949_v52 = vmul.f32 %v14075_v13, %v16238_v2  ;;  %v16313_v20 = vpop.f32.mrb[41].mxu0  ;;  %14088 = vrcp.f32 %v1860_v10  ;;  %v1321_v13 = vld [vmem:[%s16330_s18 + $0x50] sm:$0xff]  }
 0x271   : > { %v14079_v21 = vpop.eup %14078  ;;  %v16315_v23 = vpop.f32.mrb[42].mxu0  ;;  %v1951_v9 = vmul.f32 %v14077_v15, %v16233_v26 }
 0x272   : > { %v1950_v6 = vmul.f32 %v14079_v21, %v16246_v30  ;;  %12956 = vmatprep.mubr.msk.f32.mxu1 %vm1957_vm2, %v1949_v52  ;;  %v16319_v24 = vpop.f32.mrb[43].mxu0  ;;  %v14081_v25 = vpop.eup %14080 }
 0x273   : > { %v1952_v2 = vmul.f32 %v14081_v25, %v16241_v43  ;;  %v1323_v25 = vld [vmem:[%s16330_s18 + $0x58] sm:$0xff]  }
 0x274   : > { %12957 = vmatmul.mubr.msk.f32.gmra.mrb[24].mxu1 %vm1957_vm2, %v1950_v6 }
 0x275   : > { %12959 = vmatprep.mubr.msk.f32.mxu1 %vm1957_vm2, %v1951_v9  ;;  %v1325_v9 = vld [vmem:[%s16330_s18 + $0x60] sm:$0xff]  }
 0x277   : > { %v14083_v28 = vpop.eup %14082  ;;  %v16332_v30 = vpop.f32.mrb[44].mxu0 }
 0x278   : > { %v14085_v29 = vpop.eup %14084  ;;  %v1953_v26 = vmul.f32 %v14083_v28, %v16262_v4  ;;  %12960 = vmatmul.mubr.msk.f32.gmra.mrb[26].mxu1 %vm1957_vm2, %v1952_v2  ;;  %v16336_v31 = vpop.f32.mrb[45].mxu0  ;;  %v1303_v4 = vld [vmem:[%s16330_s18 + $0x8] sm:$0xff]  }
 0x279   : > { %v14087_v43 = vpop.eup %14086  ;;  %v16338_v61 = vpop.f32.mrb[46].mxu0  ;;  %v1955_v44 = vmul.f32 %v14085_v29, %v16257_v60 }
 0x27a   : > { %v1954_v7 = vmul.f32 %v14087_v43, %v16270_v17  ;;  %12962 = vmatprep.mubr.msk.f32.mxu1 %vm1957_vm2, %v1953_v26  ;;  %v16342_v34 = vpop.f32.mrb[47].mxu0  ;;  %v14089_v42 = vpop.eup %14088  ;;  %v1327_v43 = vld [vmem:[%s16330_s18 + $0x68] sm:$0xff]  }
 0x27b   : > { %v1956_v45 = vmul.f32 %v14089_v42, %v16265_v3  ;;  %v1307_v3 = vld [vmem:[%s16330_s18 + $0x18] sm:$0xff]  }
 0x27c   : > { %12963 = vmatmul.mubr.msk.f32.gmra.mrb[28].mxu1 %vm1957_vm2, %v1954_v7  ;;  %v1329_v7 = vld [vmem:[%s16330_s18 + $0x70] sm:$0xff]  }
 0x27d   : > { %12965 = vmatprep.mubr.msk.f32.mxu1 %vm1957_vm2, %v1955_v44 }
 0x27f   : > { %v16351_v47 = vpop.f32.mrb[48].mxu0 }
 0x280   : > { %12966 = vmatmul.mubr.msk.f32.gmra.mrb[30].mxu1 %vm1957_vm2, %v1956_v45  ;;  %v16354_v17 = vpop.f32.mrb[49].mxu0  ;;  %v1331_v45 = vld [vmem:[%s16330_s18 + $0x78] sm:$0xff]  }
 0x281   : > { %12976 = vmatprep.mubr.msk.bf16.mxu1 %vm1523_vm0, %v1301_v41  ;;  %v16357_v38 = vpop.f32.mrb[50].mxu0 }
 0x282   : > { %v16359_v60 = vpop.f32.mrb[51].mxu0 }
 0x284   : > { %12977 = vmatmul.mubr.msk.bf16.vlgmr.msra.gmra.mrb[32].mxu1 %vm1523_vm0, %v1303_v4 }
 0x285   : > { %12980 = vmatprep.mubr.msk.bf16.mxu1 %vm1523_vm0, %v1305_v46 }
 0x287   : > { %v16365_v49 = vpop.f32.mrb[52].mxu0 }
 0x288   : > { %v16367_v50 = vpop.f32.mrb[53].mxu0 }
 0x289   : > { %v16369_v51 = vpop.f32.mrb[54].mxu0 }
 0x28a   : > { %v16371_v5 = vpop.f32.mrb[55].mxu0 }
 0x28c   : > { %12981 = vmatmul.mubr.msk.bf16.gmra.mrb[36].mxu1 %vm1523_vm0, %v1307_v3 }
 0x28d   : > { %12984 = vmatprep.mubr.msk.bf16.mxu1 %vm1523_vm0, %v1309_v48 }
 0x28f   : > { %v16377_v40 = vpop.f32.mrb[56].mxu0 }
 0x290   : > { %v16379_v58 = vpop.f32.mrb[57].mxu0 }
 0x291   : > { %21309 = vst [vmem:[#allocation41_spill] sm:$0xff] %v16379_v58  ;;  %v16381_v63 = vpop.f32.mrb[58].mxu0 }
 0x292   : > { %21310 = vst [vmem:[#allocation42_spill] sm:$0xff] %v16381_v63  ;;  %v16383_v1 = vpop.f32.mrb[59].mxu0 }
 0x293   : > { %21311 = vst [vmem:[#allocation43_spill] sm:$0xff] %v16383_v1 }
 0x294   : > { %12985 = vmatmul.mubr.msk.bf16.gmra.mrb[40].mxu1 %vm1523_vm0, %v1311_v53 }
 0x295   : > { %12988 = vmatprep.mubr.msk.bf16.mxu1 %vm1523_vm0, %v1313_v22 }
 0x297   : > { %v16389_v8 = vpop.f32.mrb[60].mxu0 }
 0x298   : > { %21312 = vst [vmem:[#allocation44_spill] sm:$0xff] %v16389_v8  ;;  %v16391_v19 = vpop.f32.mrb[61].mxu0 }
 0x299   : > { %21313 = vst [vmem:[#allocation45_spill] sm:$0xff] %v16391_v19  ;;  %v16393_v11 = vpop.f32.mrb[62].mxu0 }
 0x29a   : > { %21314 = vst [vmem:[#allocation46_spill] sm:$0xff] %v16393_v11  ;;  %v16395_v10 = vpop.f32.mrb[63].mxu0 }
 0x29b   : > { %21315 = vst [vmem:[#allocation47_spill] sm:$0xff] %v16395_v10 }
 0x29c   : > { %12989 = vmatmul.mubr.msk.bf16.gmra.mrb[44].mxu1 %vm1523_vm0, %v1315_v62 }
 0x29d   : > { %12992 = vmatprep.mubr.msk.bf16.mxu1 %vm1523_vm0, %v1317_v14 }
 0x29f   : > { %v16401_v15 = vpop.f32.mrb[64].mxu0 }
 0x2a0   : > { %21316 = vst [vmem:[#allocation48_spill] sm:$0xff] %v16401_v15  ;;  %v16403_v52 = vpop.f32.mrb[65].mxu0 }
 0x2a1   : > { %21317 = vst [vmem:[#allocation49_spill] sm:$0xff] %v16403_v52  ;;  %v16405_v21 = vpop.f32.mrb[66].mxu0 }
 0x2a2   : > { %21318 = vst [vmem:[#allocation50_spill] sm:$0xff] %v16405_v21  ;;  %v16407_v6 = vpop.f32.mrb[67].mxu0 }
 0x2a3   : > { %21319 = vst [vmem:[#allocation51_spill] sm:$0xff] %v16407_v6 }
 0x2a4   : > { %12993 = vmatmul.mubr.msk.bf16.gmra.mrb[48].mxu1 %vm1523_vm0, %v1319_v12 }
 0x2a5   : > { %12996 = vmatprep.mubr.msk.bf16.mxu1 %vm1523_vm0, %v1321_v13 }
 0x2a7   : > { %v16413_v2 = vpop.f32.mrb[68].mxu0 }
 0x2a8   : > { %21320 = vst [vmem:[#allocation52_spill] sm:$0xff] %v16413_v2  ;;  %v16415_v28 = vpop.f32.mrb[69].mxu0 }
 0x2a9   : > { %21321 = vst [vmem:[#allocation53_spill] sm:$0xff] %v16415_v28  ;;  %v16417_v29 = vpop.f32.mrb[70].mxu0 }
 0x2aa   : > { %21322 = vst [vmem:[#allocation54_spill] sm:$0xff] %v16417_v29  ;;  %v16419_v26 = vpop.f32.mrb[71].mxu0 }
 0x2ab   : > { %21323 = vst [vmem:[#allocation55_spill] sm:$0xff] %v16419_v26 }
 0x2ac   : > { %12997 = vmatmul.mubr.msk.bf16.gmra.mrb[52].mxu1 %vm1523_vm0, %v1323_v25 }
 0x2ad   : > { %13000 = vmatprep.mubr.msk.bf16.mxu1 %vm1523_vm0, %v1325_v9 }
 0x2af   : > { %v16425_v41 = vpop.f32.mrb[72].mxu0 }
 0x2b0   : > { %21324 = vst [vmem:[#allocation56_spill] sm:$0xff] %v16425_v41  ;;  %v16427_v42 = vpop.f32.mrb[73].mxu0 }
 0x2b1   : > { %21325 = vst [vmem:[#allocation57_spill] sm:$0xff] %v16427_v42  ;;  %v16429_v44 = vpop.f32.mrb[74].mxu0 }
 0x2b2   : > { %21326 = vst [vmem:[#allocation58_spill] sm:$0xff] %v16429_v44  ;;  %v16431_v4 = vpop.f32.mrb[75].mxu0 }
 0x2b3   : > { %21327 = vst [vmem:[#allocation59_spill] sm:$0xff] %v16431_v4 }
 0x2b4   : > { %13001 = vmatmul.mubr.msk.bf16.gmra.mrb[56].mxu1 %vm1523_vm0, %v1327_v43 }
 0x2b5   : > { %13004 = vmatprep.mubr.msk.bf16.mxu1 %vm1523_vm0, %v1329_v7 }
 0x2b7   : > { %v16436_v46 = vpop.f32.mrb[76].mxu0 }
 0x2b8   : > { %21328 = vst [vmem:[#allocation60_spill] sm:$0xff] %v16436_v46  ;;  %v16438_v3 = vpop.f32.mrb[77].mxu0 }
 0x2b9   : > { %21329 = vst [vmem:[#allocation61_spill] sm:$0xff] %v16438_v3  ;;  %v16440_v48 = vpop.f32.mrb[78].mxu0 }
 0x2ba   : > { %21330 = vst [vmem:[#allocation62_spill] sm:$0xff] %v16440_v48  ;;  %v16442_v53 = vpop.f32.mrb[79].mxu0 }
 0x2bb   : > { %21331 = vst [vmem:[#allocation63_spill] sm:$0xff] %v16442_v53 }
 0x2bc   : > { %13005 = vmatmul.mubr.msk.bf16.gmra.mrb[60].mxu1 %vm1523_vm0, %v1331_v45 }
 0x2bf   : > { %v16445_v22 = vpop.f32.mrb[80].mxu0 }
 0x2c0   : > { %21332 = vst [vmem:[#allocation64_spill] sm:$0xff] %v16445_v22  ;;  %v16447_v62 = vpop.f32.mrb[81].mxu0 }
 0x2c1   : > { %21333 = vst [vmem:[#allocation65_spill] sm:$0xff] %v16447_v62  ;;  %v16449_v14 = vpop.f32.mrb[82].mxu0 }
 0x2c2   : > { %21334 = vst [vmem:[#allocation66_spill] sm:$0xff] %v16449_v14  ;;  %v16451_v12 = vpop.f32.mrb[83].mxu0 }
 0x2c3   : > { %21335 = vst [vmem:[#allocation67_spill] sm:$0xff] %v16451_v12 }
 0x2c7   : > { %v16453_v13 = vpop.f32.mrb[84].mxu0 }
 0x2c8   : > { %21336 = vst [vmem:[#allocation68_spill] sm:$0xff] %v16453_v13  ;;  %v16455_v25 = vpop.f32.mrb[85].mxu0 }
 0x2c9   : > { %21337 = vst [vmem:[#allocation69_spill] sm:$0xff] %v16455_v25  ;;  %v16457_v9 = vpop.f32.mrb[86].mxu0 }
 0x2ca   : > { %21338 = vst [vmem:[#allocation70_spill] sm:$0xff] %v16457_v9  ;;  %v16459_v43 = vpop.f32.mrb[87].mxu0 }
 0x2cb   : > { %21339 = vst [vmem:[#allocation71_spill] sm:$0xff] %v16459_v43 }
 0x2cf   : > { %v16461_v7 = vpop.f32.mrb[88].mxu0 }
 0x2d0   : > { %21340 = vst [vmem:[#allocation72_spill] sm:$0xff] %v16461_v7  ;;  %v16463_v35 = vpop.f32.mrb[89].mxu0 }
 0x2d1   : > { %21341 = vst [vmem:[#allocation73_spill] sm:$0xff] %v16463_v35  ;;  %v16465_v45 = vpop.f32.mrb[90].mxu0 }
 0x2d2   : > { %21342 = vst [vmem:[#allocation74_spill] sm:$0xff] %v16465_v45  ;;  %v16467_v22 = vpop.f32.mrb[91].mxu0 }
 0x2d3   : > { %21343 = vst [vmem:[#allocation75_spill] sm:$0xff] %v16467_v22 }
 0x2d7   : > { %v16469_v62 = vpop.f32.mrb[92].mxu0 }
 0x2d8   : > { %21344 = vst [vmem:[#allocation76_spill] sm:$0xff] %v16469_v62  ;;  %v16471_v14 = vpop.f32.mrb[93].mxu0 }
 0x2d9   : > { %21345 = vst [vmem:[#allocation77_spill] sm:$0xff] %v16471_v14  ;;  %v16473_v12 = vpop.f32.mrb[94].mxu0 }
 0x2da   : > { %21346 = vst [vmem:[#allocation78_spill] sm:$0xff] %v16473_v12  ;;  %v16475_v13 = vpop.f32.mrb[95].mxu0 }
 0x2db   : > { %21347 = vst [vmem:[#allocation79_spill] sm:$0xff] %v16475_v13 }
 0x2df   : > { %v6296_v25 = vpop.f32.mrb[96].mxu0 }
 0x2e0   : > { %v6297_v9 = vadd.f32 %v16094_v0, %v6296_v25  ;;  %v13248_v43 = vpop.f32.mrb[97].mxu0  ;;  %v1265_v25 = vld [vmem:[%s21303_s17 + $0x8] sm:$0xff] }
 0x2e1   : > { %v6299_v48 = vpop.f32.mrb[98].mxu0  ;;  %13008 = vmatprep.subr.mxu1 %v1265_v25 }
 0x2e2   : > { %v12349_v7 = vmul.f32 -1.442695, %v6297_v9  ;;  %v6300_v35 = vadd.f32 %v16094_v0, %v6299_v48  ;;  %v13249_v46 = vpop.f32.mrb[99].mxu0  ;;  %13009 = vmatpush3.msra.mxu1 %v1265_v25  ;;  %v21348_v48 = vmov 0.0  }
 0x2e4   : > { %14090 = vpow2.f32 %v12349_v7  ;;  %v12350_v45 = vmul.f32 -1.442695, %v6300_v35 }
 0x2e6   : > { %14092 = vpow2.f32 %v12350_v45 }
 0x2ee   : > { %v14091_v22 = vpop.eup %14090 }
 0x2ef   : > { %v6309_v62 = vadd.f32 1.0, %v14091_v22 }
 0x2f0   : > { %v14093_v14 = vpop.eup %14092 }
 0x2f1   : > { %14094 = vrcp.f32 %v6309_v62  ;;  %v6310_v53 = vadd.f32 1.0, %v14093_v14 }
 0x2f3   : > { %14096 = vrcp.f32 %v6310_v53 }
 0x2fb   : > { %v14095_v43 = vpop.eup %14094 }
 0x2fc   : > { %v6315_v12 = vmul.f32 %v14095_v43, %v6297_v9 }
 0x2fd   : > { %v14097_v0 = vpop.eup %14096 }
 0x2fe   : > { %13252 = vmatprep.mubr.msk.f32.mxu0 %vm1957_vm2, %v6315_v12  ;;  %v6316_v46 = vmul.f32 %v14097_v0, %v6300_v35  ;;  %v1399_v35 = vld [vmem:[%s16495_s19] sm:$0xff]  }
 0x300   : > { %13253 = vmatmul.mubr.msk.f32.vlgmr.msra.gmra.mrb[100].mxu0 %vm1957_vm2, %v6316_v46 }
 0x301   : > { %13256 = vmatpush3.bf16.msra.mxu0 %v16064_v59  ;;  %13263 = vmatprep.mubr.msk.bf16.mxu0 %vm15273_vm1, %v21348_v48  ;;  %v16506_v59 = vld [vmem:[%s21303_s17 + $0x10] sm:$0xff] }
 0x302   : > { %13257 = vmatprep.subr.bf16.mxu0 %v21348_v48  ;;  %13098 = vmatprep.subr.mxu1 %v16506_v59 }
 0x305   : > { %13258 = vmatpush3.bf16.msra.mxu0 %v16166_v18  ;;  %v16512_v18 = vld [vmem:[%s21306_s6 + $0x2] ss:$0 sm:$0xff] }
 0x306   : > { %13259 = vmatprep.subr.bf16.mxu0 %v21348_v48  ;;  %v16521_v53 = vadd.f32 %v16279_v36, %v16512_v18  ;;  %v16528_v14 = vadd.f32 %v16512_v18, %v16281_v33  ;;  %v16535_v7 = vadd.f32 %v16285_v37, %v16512_v18  ;;  %v16543_v43 = vadd.f32 %v16512_v18, %v16288_v27 }
 0x307   : > { %v16605_v11 = vadd.f32 %v16512_v18, %v16297_v57 }
 0x308   : > { %21350 = vst [vmem:[#allocation80_spill] sm:$0xff] %v16535_v7  ;;  %v12184_v46 = vmul.f32 -1.442695, %v16521_v53  ;;  %v12183_v27 = vmul.f32 -1.442695, %v16543_v43 }
 0x309   : > { %13260 = vmatpush3.bf16.msra.mxu0 %v16191_v39  ;;  %v16517_v39 = vld [vmem:[%s21306_s6 + $0x1] ss:$0 sm:$0xff]  ;;  %21352 = vst [vmem:[#allocation82_spill] sm:$0xff] %v16605_v11 }
 0x30a   : > { %13261 = vmatprep.subr.bf16.mxu0 %v21348_v48 }
 0x30d   : > { %13262 = vmatpush3.bf16.msra.mxu0 %v16204_v16 }
 0x30e   : > { %13267 = vmatprep.subr.mxu0 %v1265_v25 }
 0x310   : > { %13264 = vmatmul.mubr.msk.bf16.vlgmr.msra.gmra.mrb[104].mxu0 %vm1523_vm0, %v1399_v35  ;;  %v12182_v35 = vmul.f32 -1.442695, %v16528_v14 }
 0x311   : > { %13268 = vmatpush3.msra.mxu0 %v1265_v25 }
 0x312   : > { %13272 = vmatprep.subr.bf16.mxu0 %v21348_v48 }
 0x357   : > { %v12978_v16 = vpop.f32.mrb[32].mxu1 }
 0x358   : > { %v16524_v22 = vadd.f32 %v12978_v16, %v16517_v39  ;;  %v2509_v62 = vpop.f32.mrb[33].mxu1 }
 0x359   : > { %v16531_v12 = vadd.f32 %v16517_v39, %v2509_v62  ;;  %v12979_v9 = vpop.f32.mrb[34].mxu1  ;;  %v12185_v62 = vmul.f32 -1.442695, %v16535_v7 }
 0x35a   : > { %v12083_v45 = vmul.f32 -1.442695, %v16524_v22  ;;  %v16539_v36 = vadd.f32 %v12979_v9, %v16517_v39  ;;  %v2512_v25 = vpop.f32.mrb[35].mxu1 }
 0x35b   : > { %v12081_v33 = vmul.f32 -1.442695, %v16531_v12  ;;  %v16547_v0 = vadd.f32 %v16517_v39, %v2512_v25  ;;  %v16557_v25 = vadd.f32 %v16295_v54, %v16512_v18 }
 0x35c   : > { %14098 = vpow2.f32 %v12083_v45  ;;  %v12084_v37 = vmul.f32 -1.442695, %v16539_v36 }
 0x35d   : > { %14100 = vpow2.f32 %v12081_v33  ;;  %v12082_v16 = vmul.f32 -1.442695, %v16547_v0  ;;  %21351 = vst [vmem:[#allocation81_spill] sm:$0xff] %v16557_v25 }
 0x35e   : > { %14102 = vpow2.f32 %v12084_v37 }
 0x35f   : > { %14104 = vpow2.f32 %v12082_v16  ;;  %v12982_v9 = vpop.f32.mrb[36].mxu1 }
 0x360   : > { %14106 = vpow2.f32 %v12184_v46  ;;  %v16560_v45 = vadd.f32 %v12982_v9, %v16517_v39  ;;  %v2525_v13 = vpop.f32.mrb[37].mxu1  ;;  %v12188_v9 = vmul.f32 -1.442695, %v16557_v25 }
 0x361   : > { %14108 = vpow2.f32 %v12182_v35  ;;  %v16563_v33 = vadd.f32 %v16517_v39, %v2525_v13  ;;  %v12983_v3 = vpop.f32.mrb[38].mxu1 }
 0x362   : > { %14110 = vpow2.f32 %v12185_v62  ;;  %v12087_v37 = vmul.f32 -1.442695, %v16560_v45  ;;  %v16567_v16 = vadd.f32 %v12983_v3, %v16517_v39  ;;  %v2528_v46 = vpop.f32.mrb[39].mxu1 }
 0x363   : > { %14112 = vpow2.f32 %v12183_v27  ;;  %v12085_v54 = vmul.f32 -1.442695, %v16563_v33  ;;  %v16571_v4 = vadd.f32 %v16517_v39, %v2528_v46 }
 0x364   : > { %14114 = vpow2.f32 %v12087_v37  ;;  %v12088_v13 = vmul.f32 -1.442695, %v16567_v16 }
 0x365   : > { %14116 = vpow2.f32 %v12085_v54  ;;  %v12086_v35 = vmul.f32 -1.442695, %v16571_v4 }
 0x366   : > { %v14099_v62 = vpop.eup %14098  ;;  %14118 = vpow2.f32 %v12088_v13 }
 0x367   : > { %v14101_v44 = vpop.eup %14100  ;;  %v2734_v3 = vadd.f32 1.0, %v14099_v62  ;;  %14120 = vpow2.f32 %v12086_v35  ;;  %v12986_v42 = vpop.f32.mrb[40].mxu1 }
 0x368   : > { %v14103_v27 = vpop.eup %14102  ;;  %14122 = vpow2.f32 %v12188_v9  ;;  %v2732_v41 = vadd.f32 1.0, %v14101_v44  ;;  %v16577_v46 = vadd.f32 %v12986_v42, %v16517_v39  ;;  %v2541_v26 = vpop.f32.mrb[41].mxu1 }
 0x369   : > { %v14105_v29 = vpop.eup %14104  ;;  %14124 = vrcp.f32 %v2734_v3  ;;  %v2735_v37 = vadd.f32 1.0, %v14103_v27  ;;  %v16580_v54 = vadd.f32 %v16517_v39, %v2541_v26  ;;  %v12987_v28 = vpop.f32.mrb[42].mxu1 }
 0x36a   : > { %v16582_v2 = vpop.eup %14106  ;;  %14126 = vrcp.f32 %v2732_v41  ;;  %v2733_v13 = vadd.f32 1.0, %v14105_v29  ;;  %v12091_v35 = vmul.f32 -1.442695, %v16577_v46  ;;  %v16586_v9 = vadd.f32 %v12987_v28, %v16517_v39  ;;  %v2544_v44 = vpop.f32.mrb[43].mxu1 }
 0x36b   : > { %v16588_v42 = vpop.eup %14108  ;;  %14128 = vrcp.f32 %v2735_v37  ;;  %v12089_v62 = vmul.f32 -1.442695, %v16580_v54  ;;  %v16592_v3 = vadd.f32 %v16517_v39, %v2544_v44 }
 0x36c   : > { %v16594_v26 = vpop.eup %14110  ;;  %14130 = vrcp.f32 %v2733_v13  ;;  %v12092_v41 = vmul.f32 -1.442695, %v16586_v9 }
 0x36d   : > { %v16597_v29 = vpop.eup %14112  ;;  %14132 = vpow2.f32 %v12091_v35  ;;  %v12090_v28 = vmul.f32 -1.442695, %v16592_v3 }
 0x36e   : > { %v14115_v27 = vpop.eup %14114  ;;  %14134 = vpow2.f32 %v12089_v62 }
 0x36f   : > { %v14117_v6 = vpop.eup %14116  ;;  %v2738_v21 = vadd.f32 1.0, %v14115_v27  ;;  %14136 = vpow2.f32 %v12092_v41  ;;  %v12990_v37 = vpop.f32.mrb[44].mxu1 }
 0x370   : > { %v14119_v52 = vpop.eup %14118  ;;  %v2736_v15 = vadd.f32 1.0, %v14117_v6  ;;  %14138 = vpow2.f32 %v12090_v28  ;;  %v16601_v44 = vadd.f32 %v12990_v37, %v16517_v39  ;;  %v2557_v13 = vpop.f32.mrb[45].mxu1 }
 0x371   : > { %v14121_v10 = vpop.eup %14120  ;;  %14140 = vrcp.f32 %v2738_v21  ;;  %v2739_v35 = vadd.f32 1.0, %v14119_v52  ;;  %v16608_v62 = vadd.f32 %v16517_v39, %v2557_v13  ;;  %v12991_v27 = vpop.f32.mrb[46].mxu1 }
 0x372   : > { %v16610_v41 = vpop.eup %14122  ;;  %14142 = vrcp.f32 %v2736_v15  ;;  %v2737_v6 = vadd.f32 1.0, %v14121_v10  ;;  %v12095_v28 = vmul.f32 -1.442695, %v16601_v44  ;;  %v16614_v37 = vadd.f32 %v12991_v27, %v16517_v39  ;;  %v2560_v19 = vpop.f32.mrb[47].mxu1 }
 0x373   : > { %v14125_v8 = vpop.eup %14124  ;;  %14144 = vrcp.f32 %v2739_v35  ;;  %v12093_v57 = vmul.f32 -1.442695, %v16608_v62  ;;  %v16618_v52 = vadd.f32 %v16517_v39, %v2560_v19  ;;  %v12186_v10 = vmul.f32 -1.442695, %v16605_v11 }
 0x374   : > { %v14127_v21 = vpop.eup %14126  ;;  %14146 = vrcp.f32 %v2737_v6  ;;  %v12096_v13 = vmul.f32 -1.442695, %v16614_v37  ;;  %v2830_v35 = vmul.f32 %v14125_v8, %v16524_v22 }
 0x375   : > { %v14129_v25 = vpop.eup %14128  ;;  %v2828_v15 = vmul.f32 %v14127_v21, %v16531_v12  ;;  %14148 = vpow2.f32 %v12095_v28  ;;  %v12094_v27 = vmul.f32 -1.442695, %v16618_v52 }
 0x376   : > { %v14131_v1 = vpop.eup %14130  ;;  %14150 = vpow2.f32 %v12093_v57  ;;  %v2831_v21 = vmul.f32 %v14129_v25, %v16539_v36  ;;  %v16644_v36 = vld [vmem:[%s21303_s17 + $0x18] sm:$0xff] }
 0x377   : > { %v14133_v63 = vpop.eup %14132  ;;  %v2829_v19 = vmul.f32 %v14131_v1, %v16547_v0  ;;  %14152 = vpow2.f32 %v12096_v13  ;;  %v12994_v48 = vpop.f32.mrb[48].mxu1  ;;  %13010 = vmatprep.mubr.msk.f32.mxu1 %vm1957_vm2, %v2828_v15 }
 0x378   : > { %v14135_v6 = vpop.eup %14134  ;;  %v2742_v58 = vadd.f32 1.0, %v14133_v63  ;;  %14154 = vpow2.f32 %v12094_v27  ;;  %v16628_v11 = vadd.f32 %v12994_v48, %v16517_v39  ;;  %v2573_v12 = vpop.f32.mrb[49].mxu1 }
 0x379   : > { %v14137_v28 = vpop.eup %14136  ;;  %14156 = vpow2.f32 %v12186_v10  ;;  %v2740_v8 = vadd.f32 1.0, %v14135_v6  ;;  %v16632_v22 = vadd.f32 %v16517_v39, %v2573_v12  ;;  %v12995_v1 = vpop.f32.mrb[50].mxu1  ;;  %13011 = vmatmul.mubr.msk.f32.vlgmr.msra.gmra.mrb[0].mxu1 %vm1957_vm2, %v2829_v19 }
 0x37a   : > { %v14139_v0 = vpop.eup %14138  ;;  %14158 = vrcp.f32 %v2742_v58  ;;  %v2743_v57 = vadd.f32 1.0, %v14137_v28  ;;  %v12099_v63 = vmul.f32 -1.442695, %v16628_v11  ;;  %v16637_v48 = vadd.f32 %v12995_v1, %v16517_v39  ;;  %v2576_v13 = vpop.f32.mrb[51].mxu1  ;;  %13013 = vmatprep.mubr.msk.f32.mxu1 %vm1957_vm2, %v2830_v35  ;;  %13099 = vmatpush3.msra.mxu1 %v16506_v59 }
 0x37b   : > { %v14141_v25 = vpop.eup %14140  ;;  %14160 = vrcp.f32 %v2740_v8  ;;  %v2741_v10 = vadd.f32 1.0, %v14139_v0  ;;  %v12097_v58 = vmul.f32 -1.442695, %v16632_v22  ;;  %v16648_v15 = vadd.f32 %v16517_v39, %v2576_v13  ;;  %13188 = vmatprep.subr.mxu1 %v16644_v36 }
 0x37c   : > { %v14143_v27 = vpop.eup %14142  ;;  %14162 = vrcp.f32 %v2743_v57  ;;  %v12100_v35 = vmul.f32 -1.442695, %v16637_v48  ;;  %v2834_v28 = vmul.f32 %v14141_v25, %v16560_v45 }
 0x37d   : > { %v14145_v59 = vpop.eup %14144  ;;  %v2832_v19 = vmul.f32 %v14143_v27, %v16563_v33  ;;  %14164 = vrcp.f32 %v2741_v10  ;;  %v12098_v6 = vmul.f32 -1.442695, %v16648_v15  ;;  %13014 = vmatmul.mubr.msk.f32.gmra.mrb[2].mxu1 %vm1957_vm2, %v2831_v21  ;;  %v16660_v33 = vadd.f32 %v16301_v32, %v16512_v18 }
 0x37e   : > { %v14147_v12 = vpop.eup %14146  ;;  %14166 = vpow2.f32 %v12099_v63  ;;  %v2835_v63 = vmul.f32 %v14145_v59, %v16567_v16 }
 0x37f   : > { %v14149_v8 = vpop.eup %14148  ;;  %v2833_v1 = vmul.f32 %v14147_v12, %v16571_v4  ;;  %14168 = vpow2.f32 %v12097_v58  ;;  %v12998_v0 = vpop.f32.mrb[52].mxu1  ;;  %13016 = vmatprep.mubr.msk.f32.mxu1 %vm1957_vm2, %v2832_v19  ;;  %21353 = vst [vmem:[#allocation83_spill] sm:$0xff] %v16660_v33 }
 0x380   : > { %v14151_v57 = vpop.eup %14150  ;;  %v2746_v13 = vadd.f32 1.0, %v14149_v8  ;;  %14170 = vpow2.f32 %v12100_v35  ;;  %v16663_v21 = vadd.f32 %v12998_v0, %v16517_v39  ;;  %v2589_v10 = vpop.f32.mrb[53].mxu1 }
 0x381   : > { %v14153_v45 = vpop.eup %14152  ;;  %v2744_v25 = vadd.f32 1.0, %v14151_v57  ;;  %14172 = vpow2.f32 %v12098_v6  ;;  %v16667_v4 = vadd.f32 %v16517_v39, %v2589_v10  ;;  %v12999_v58 = vpop.f32.mrb[54].mxu1  ;;  %13017 = vmatmul.mubr.msk.f32.gmra.mrb[4].mxu1 %vm1957_vm2, %v2833_v1  ;;  %v12189_v10 = vmul.f32 -1.442695, %v16660_v33 }
 0x382   : > { %v14155_v27 = vpop.eup %14154  ;;  %14174 = vrcp.f32 %v2746_v13  ;;  %v2747_v32 = vadd.f32 1.0, %v14153_v45  ;;  %v12103_v35 = vmul.f32 -1.442695, %v16663_v21  ;;  %v16672_v19 = vadd.f32 %v12999_v58, %v16517_v39  ;;  %v2592_v12 = vpop.f32.mrb[55].mxu1  ;;  %13019 = vmatprep.mubr.msk.f32.mxu1 %vm1957_vm2, %v2834_v28 }
 0x383   : > { %v16675_v16 = vpop.eup %14156  ;;  %14176 = vrcp.f32 %v2744_v25  ;;  %v2745_v59 = vadd.f32 1.0, %v14155_v27  ;;  %v12101_v6 = vmul.f32 -1.442695, %v16667_v4  ;;  %v16679_v8 = vadd.f32 %v16517_v39, %v2592_v12 }
 0x384   : > { %v14159_v1 = vpop.eup %14158  ;;  %14178 = vrcp.f32 %v2747_v32  ;;  %v12104_v0 = vmul.f32 -1.442695, %v16672_v19 }
 0x385   : > { %v14161_v57 = vpop.eup %14160  ;;  %14180 = vrcp.f32 %v2745_v59  ;;  %v12102_v13 = vmul.f32 -1.442695, %v16679_v8  ;;  %13020 = vmatmul.mubr.msk.f32.gmra.mrb[6].mxu1 %vm1957_vm2, %v2835_v63  ;;  %v2838_v58 = vmul.f32 %v14159_v1, %v16577_v46 }
 0x386   : > { %v14163_v28 = vpop.eup %14162  ;;  %v2836_v45 = vmul.f32 %v14161_v57, %v16580_v54  ;;  %14182 = vpow2.f32 %v12103_v35 }
 0x387   : > { %v14165_v25 = vpop.eup %14164  ;;  %14184 = vpow2.f32 %v12101_v6  ;;  %v13002_v27 = vpop.f32.mrb[56].mxu1  ;;  %v2839_v6 = vmul.f32 %v14163_v28, %v16586_v9 }
 0x388   : > { %v14167_v32 = vpop.eup %14166  ;;  %v2837_v12 = vmul.f32 %v14165_v25, %v16592_v3  ;;  %14186 = vpow2.f32 %v12104_v0  ;;  %v16689_v59 = vadd.f32 %v13002_v27, %v16517_v39  ;;  %v2605_v7 = vpop.f32.mrb[57].mxu1  ;;  %13022 = vmatprep.mubr.msk.f32.mxu1 %vm1957_vm2, %v2836_v45 }
 0x389   : > { %v14169_v63 = vpop.eup %14168  ;;  %v2750_v33 = vadd.f32 1.0, %v14167_v32  ;;  %14188 = vpow2.f32 %v12102_v13  ;;  %v16693_v54 = vadd.f32 %v16517_v39, %v2605_v7  ;;  %v13003_v35 = vpop.f32.mrb[58].mxu1 }
 0x38a   : > { %v14171_v46 = vpop.eup %14170  ;;  %14190 = vpow2.f32 %v12189_v10  ;;  %v2748_v1 = vadd.f32 1.0, %v14169_v63  ;;  %v16697_v3 = vadd.f32 %v13003_v35, %v16517_v39  ;;  %13023 = vmatmul.mubr.msk.f32.gmra.mrb[8].mxu1 %vm1957_vm2, %v2837_v12  ;;  %v2608_v0 = vpop.f32.mrb[59].mxu1  ;;  %v12107_v13 = vmul.f32 -1.442695, %v16689_v59 }
 0x38b   : > { %v14173_v57 = vpop.eup %14172  ;;  %14192 = vrcp.f32 %v2750_v33  ;;  %v2751_v45 = vadd.f32 1.0, %v14171_v46  ;;  %v16702_v7 = vadd.f32 %v16517_v39, %v2608_v0  ;;  %13025 = vmatprep.mubr.msk.f32.mxu1 %vm1957_vm2, %v2838_v58  ;;  %v12105_v28 = vmul.f32 -1.442695, %v16693_v54 }
 0x38c   : > { %v14175_v10 = vpop.eup %14174  ;;  %14194 = vrcp.f32 %v2748_v1  ;;  %v2749_v9 = vadd.f32 1.0, %v14173_v57  ;;  %v12108_v27 = vmul.f32 -1.442695, %v16697_v3 }
 0x38d   : > { %v14177_v25 = vpop.eup %14176  ;;  %14196 = vrcp.f32 %v2751_v45  ;;  %v12106_v12 = vmul.f32 -1.442695, %v16702_v7  ;;  %v2842_v58 = vmul.f32 %v14175_v10, %v16601_v44  ;;  %v16718_v45 = vadd.f32 %v16512_v18, %v16304_v56 }
 0x38e   : > { %v14179_v32 = vpop.eup %14178  ;;  %v2840_v33 = vmul.f32 %v14177_v25, %v16608_v62  ;;  %14198 = vrcp.f32 %v2749_v9  ;;  %13026 = vmatmul.mubr.msk.f32.gmra.mrb[10].mxu1 %vm1957_vm2, %v2839_v6 }
 0x38f   : > { %v14181_v63 = vpop.eup %14180  ;;  %14200 = vpow2.f32 %v12107_v13  ;;  %v13006_v35 = vpop.f32.mrb[60].mxu1 }
 0x390   : > { %v14183_v46 = vpop.eup %14182  ;;  %v2841_v1 = vmul.f32 %v14181_v63, %v16618_v52  ;;  %14202 = vpow2.f32 %v12105_v28  ;;  %v16713_v0 = vadd.f32 %v13006_v35, %v16517_v39  ;;  %v2621_v57 = vpop.f32.mrb[61].mxu1  ;;  %13028 = vmatprep.mubr.msk.f32.mxu1 %vm1957_vm2, %v2840_v33  ;;  %v2843_v52 = vmul.f32 %v14179_v32, %v16614_v37 }
 0x391   : > { %v14185_v62 = vpop.eup %14184  ;;  %v2754_v6 = vadd.f32 1.0, %v14183_v46  ;;  %14204 = vpow2.f32 %v12108_v27  ;;  %v16721_v44 = vadd.f32 %v16517_v39, %v2621_v57  ;;  %v13007_v13 = vpop.f32.mrb[62].mxu1 }
 0x392   : > { %v14187_v10 = vpop.eup %14186  ;;  %v2752_v9 = vadd.f32 1.0, %v14185_v62  ;;  %14206 = vpow2.f32 %v12106_v12  ;;  %v16725_v28 = vadd.f32 %v13007_v13, %v16517_v39  ;;  %13029 = vmatmul.mubr.msk.f32.gmra.mrb[12].mxu1 %vm1957_vm2, %v2841_v1  ;;  %v2624_v25 = vpop.f32.mrb[63].mxu1  ;;  %v12111_v27 = vmul.f32 -1.442695, %v16713_v0 }
 0x393   : > { %v14189_v33 = vpop.eup %14188  ;;  %14208 = vrcp.f32 %v2754_v6  ;;  %v2755_v56 = vadd.f32 1.0, %v14187_v10  ;;  %v16730_v63 = vadd.f32 %v16517_v39, %v2624_v25  ;;  %13031 = vmatprep.mubr.msk.f32.mxu1 %vm1957_vm2, %v2842_v58  ;;  %v12109_v32 = vmul.f32 -1.442695, %v16721_v44 }
 0x394   : > { %v16733_v35 = vpop.eup %14190  ;;  %14210 = vrcp.f32 %v2752_v9  ;;  %v2753_v37 = vadd.f32 1.0, %v14189_v33  ;;  %v12112_v46 = vmul.f32 -1.442695, %v16725_v28  ;;  %v12187_v62 = vmul.f32 -1.442695, %v16718_v45 }
 0x395   : > { %v14193_v12 = vpop.eup %14192  ;;  %14212 = vrcp.f32 %v2755_v56  ;;  %v12110_v57 = vmul.f32 -1.442695, %v16730_v63  ;;  %v16743_v13 = vadd.f32 %v16310_v55, %v16512_v18 }
 0x396   : > { %v14195_v1 = vpop.eup %14194  ;;  %14214 = vrcp.f32 %v2753_v37  ;;  %13032 = vmatmul.mubr.msk.f32.gmra.mrb[14].mxu1 %vm1957_vm2, %v2843_v52  ;;  %v2846_v10 = vmul.f32 %v14193_v12, %v16628_v11  ;;  %v3630_v12 = vadd.f32 1.0, %v16582_v2 }
 0x397   : > { %v14197_v39 = vpop.eup %14196  ;;  %v2844_v58 = vmul.f32 %v14195_v1, %v16632_v22  ;;  %14216 = vpow2.f32 %v12111_v27  ;;  %v16750_v22 = vadd.f32 %v16512_v18, %v16313_v20  ;;  %v3628_v20 = vadd.f32 1.0, %v16588_v42 }
 0x398   : > { %v14199_v6 = vpop.eup %14198  ;;  %14218 = vpow2.f32 %v12109_v32  ;;  %v2847_v55 = vmul.f32 %v14197_v39, %v16637_v48 }
 0x399   : > { %v14201_v9 = vpop.eup %14200  ;;  %v2845_v25 = vmul.f32 %v14199_v6, %v16648_v15  ;;  %14220 = vpow2.f32 %v12112_v46  ;;  %13034 = vmatprep.mubr.msk.f32.mxu1 %vm1957_vm2, %v2844_v58  ;;  %v12192_v15 = vmul.f32 -1.442695, %v16743_v13  ;;  %v16763_v58 = vadd.f32 %v16315_v23, %v16512_v18 }
 0x39a   : > { %v14203_v52 = vpop.eup %14202  ;;  %v2758_v33 = vadd.f32 1.0, %v14201_v9  ;;  %14222 = vpow2.f32 %v12110_v57  ;;  %v12190_v57 = vmul.f32 -1.442695, %v16750_v22 }
 0x39b   : > { %v14205_v56 = vpop.eup %14204  ;;  %14224 = vpow2.f32 %v12187_v62  ;;  %v2756_v27 = vadd.f32 1.0, %v14203_v52  ;;  %13035 = vmatmul.mubr.msk.f32.gmra.mrb[16].mxu1 %vm1957_vm2, %v2845_v25 }
 0x39c   : > { %v14207_v11 = vpop.eup %14206  ;;  %14226 = vrcp.f32 %v2758_v33  ;;  %v2759_v37 = vadd.f32 1.0, %v14205_v56  ;;  %13037 = vmatprep.mubr.msk.f32.mxu1 %vm1957_vm2, %v2846_v10  ;;  %v12193_v33 = vmul.f32 -1.442695, %v16763_v58 }
 0x39d   : > { %v14209_v32 = vpop.eup %14208  ;;  %14228 = vrcp.f32 %v2756_v27  ;;  %v2757_v46 = vadd.f32 1.0, %v14207_v11 }
 0x39e   : > { %v14211_v1 = vpop.eup %14210  ;;  %14230 = vrcp.f32 %v2759_v37  ;;  %v2850_v2 = vmul.f32 %v14209_v32, %v16663_v21  ;;  %v16789_v32 = vadd.f32 %v16338_v61, %v16512_v18 }
 0x39f   : > { %v14213_v48 = vpop.eup %14212  ;;  %v2848_v39 = vmul.f32 %v14211_v1, %v16667_v4  ;;  %14232 = vrcp.f32 %v2757_v46  ;;  %13038 = vmatmul.mubr.msk.f32.gmra.mrb[18].mxu1 %vm1957_vm2, %v2847_v55  ;;  %v16770_v4 = vadd.f32 %v16512_v18, %v16319_v24  ;;  %v3631_v55 = vadd.f32 1.0, %v16594_v26 }
 0x3a0   : > { %v14215_v62 = vpop.eup %14214  ;;  %14234 = vpow2.f32 %v12192_v15  ;;  %v2851_v23 = vmul.f32 %v14213_v48, %v16672_v19  ;;  %v16784_v15 = vadd.f32 %v16512_v18, %v16336_v31  ;;  %v16795_v46 = vadd.f32 %v16512_v18, %v16342_v34 }
 0x3a1   : > { %v14217_v6 = vpop.eup %14216  ;;  %14236 = vrcp.f32 %v3630_v12  ;;  %v2849_v42 = vmul.f32 %v14215_v62, %v16679_v8  ;;  %13040 = vmatprep.mubr.msk.f32.mxu1 %vm1957_vm2, %v2848_v39  ;;  %v16777_v8 = vadd.f32 %v16332_v30, %v16512_v18  ;;  %v12191_v11 = vmul.f32 -1.442695, %v16770_v4 }
 0x3a2   : > { %v14219_v10 = vpop.eup %14218  ;;  %14238 = vrcp.f32 %v3628_v20  ;;  %v2762_v9 = vadd.f32 1.0, %v14217_v6  ;;  %v3629_v30 = vadd.f32 1.0, %v16597_v29  ;;  %v3634_v29 = vadd.f32 1.0, %v16610_v41 }
 0x3a3   : > { %v14221_v25 = vpop.eup %14220  ;;  %14240 = vpow2.f32 %v12190_v57  ;;  %v2760_v52 = vadd.f32 1.0, %v14219_v10  ;;  %13041 = vmatmul.mubr.msk.f32.gmra.mrb[20].mxu1 %vm1957_vm2, %v2849_v42  ;;  %v12196_v12 = vmul.f32 -1.442695, %v16777_v8  ;;  %v12194_v48 = vmul.f32 -1.442695, %v16784_v15 }
 0x3a4   : > { %v14223_v21 = vpop.eup %14222  ;;  %14242 = vrcp.f32 %v2762_v9  ;;  %v2763_v56 = vadd.f32 1.0, %v14221_v25  ;;  %13043 = vmatprep.mubr.msk.f32.mxu1 %vm1957_vm2, %v2850_v2  ;;  %v12197_v34 = vmul.f32 -1.442695, %v16789_v32  ;;  %v12195_v62 = vmul.f32 -1.442695, %v16795_v46 }
 0x3a5   : > { %v14225_v24 = vpop.eup %14224  ;;  %14244 = vrcp.f32 %v2760_v52  ;;  %v2761_v27 = vadd.f32 1.0, %v14223_v21  ;;  %v16809_v41 = vadd.f32 %v16351_v47, %v16512_v18  ;;  %v3632_v2 = vadd.f32 1.0, %v16675_v16 }
 0x3a6   : > { %v14227_v19 = vpop.eup %14226  ;;  %14246 = vrcp.f32 %v2763_v56  ;;  %v3635_v42 = vadd.f32 1.0, %v16733_v35  ;;  %v16818_v10 = vadd.f32 %v16512_v18, %v16354_v17  ;;  %v3633_v9 = vadd.f32 1.0, %v14225_v24 }
 0x3a7   : > { %v14229_v37 = vpop.eup %14228  ;;  %14248 = vrcp.f32 %v2761_v27  ;;  %13044 = vmatmul.mubr.msk.f32.gmra.mrb[22].mxu1 %vm1957_vm2, %v2851_v23  ;;  %v2854_v61 = vmul.f32 %v14227_v19, %v16689_v59  ;;  %v12200_v16 = vmul.f32 -1.442695, %v16809_v41 }
 0x3a8   : > { %v14231_v26 = vpop.eup %14230  ;;  %14250 = vpow2.f32 %v12193_v33  ;;  %v2852_v31 = vmul.f32 %v14229_v37, %v16693_v54  ;;  %v12198_v33 = vmul.f32 -1.442695, %v16818_v10 }
 0x3a9   : > { %v14233_v1 = vpop.eup %14232  ;;  %14252 = vrcp.f32 %v3631_v55  ;;  %v2855_v59 = vmul.f32 %v14231_v26, %v16697_v3  ;;  %v16822_v3 = vadd.f32 %v16357_v38, %v16512_v18  ;;  %v16831_v38 = vadd.f32 %v16512_v18, %v16359_v60 }
 0x3aa   : > { %v14235_v20 = vpop.eup %14234  ;;  %14254 = vpow2.f32 %v12191_v11  ;;  %v2853_v57 = vmul.f32 %v14233_v1, %v16702_v7  ;;  %13046 = vmatprep.mubr.msk.f32.mxu1 %vm1957_vm2, %v2852_v31  ;;  %v16844_v11 = vadd.f32 %v16512_v18, %v16367_v50 }
 0x3ab   : > { %v16803_v39 = vpop.eup %14236  ;;  %14256 = vrcp.f32 %v3629_v30  ;;  %v3638_v52 = vadd.f32 1.0, %v14235_v20  ;;  %v12201_v24 = vmul.f32 -1.442695, %v16822_v3  ;;  %v12199_v30 = vmul.f32 -1.442695, %v16831_v38 }
 0x3ac   : > { %v14239_v54 = vpop.eup %14238  ;;  %14258 = vpow2.f32 %v12196_v12  ;;  %13047 = vmatmul.mubr.msk.f32.gmra.mrb[24].mxu1 %vm1957_vm2, %v2853_v57  ;;  %v12202_v50 = vmul.f32 -1.442695, %v16844_v11  ;;  %v3726_v57 = vmul.f32 %v16803_v39, %v16521_v53  ;;  %v21354_v39 = vld [vmem:[#allocation80_spill] sm:$0xff] }
 0x3ad   : > { %v14241_v7 = vpop.eup %14240  ;;  %14260 = vrcp.f32 %v3634_v29  ;;  %13049 = vmatprep.mubr.msk.f32.mxu1 %vm1957_vm2, %v2854_v61 }
 0x3ae   : > { %v14243_v6 = vpop.eup %14242  ;;  %14262 = vpow2.f32 %v12194_v48  ;;  %v3636_v27 = vadd.f32 1.0, %v14241_v7 }
 0x3af   : > { %v14245_v47 = vpop.eup %14244  ;;  %14264 = vpow2.f32 %v12197_v34  ;;  %v2858_v17 = vmul.f32 %v14243_v6, %v16713_v0  ;;  %v16838_v0 = vadd.f32 %v16365_v49, %v16512_v18  ;;  %v3724_v49 = vmul.f32 %v14239_v54, %v16528_v14  ;;  %v21355_v6 = vld [vmem:[#allocation41_spill] sm:$0xff] }
 0x3b0   : > { %v14247_v25 = vpop.eup %14246  ;;  %14266 = vpow2.f32 %v12195_v62  ;;  %v2856_v23 = vmul.f32 %v14245_v47, %v16721_v44  ;;  %13050 = vmatmul.mubr.msk.f32.gmra.mrb[26].mxu1 %vm1957_vm2, %v2855_v59  ;;  %v16856_v14 = vadd.f32 %v16369_v51, %v16512_v18  ;;  %v16862_v54 = vadd.f32 %v16512_v18, %v16371_v5 }
 0x3b1   : > { %v14249_v35 = vpop.eup %14248  ;;  %14268 = vrcp.f32 %v3632_v2  ;;  %v2859_v19 = vmul.f32 %v14247_v25, %v16725_v28  ;;  %v12204_v31 = vmul.f32 -1.442695, %v16838_v0 }
 0x3b2   : > { %v14251_v21 = vpop.eup %14250  ;;  %14270 = vrcp.f32 %v3635_v42  ;;  %v2857_v56 = vmul.f32 %v14249_v35, %v16730_v63  ;;  %13052 = vmatprep.mubr.msk.f32.mxu1 %vm1957_vm2, %v2856_v23  ;;  %v12205_v2 = vmul.f32 -1.442695, %v16856_v14  ;;  %v16875_v42 = vadd.f32 %v16512_v18, %v21355_v6 }
 0x3b3   : > { %v14253_v44 = vpop.eup %14252  ;;  %14272 = vrcp.f32 %v3633_v9  ;;  %v3639_v63 = vadd.f32 1.0, %v14251_v21  ;;  %v21357_v9 = vld [vmem:[#allocation82_spill] sm:$0xff] }
 0x3b4   : > { %v14255_v55 = vpop.eup %14254  ;;  %14274 = vpow2.f32 %v12200_v16  ;;  %13053 = vmatmul.mubr.msk.f32.gmra.mrb[28].mxu1 %vm1957_vm2, %v2857_v56  ;;  %v3727_v5 = vmul.f32 %v14253_v44, %v21354_v39  ;;  %v12203_v16 = vmul.f32 -1.442695, %v16862_v54  ;;  %v12206_v44 = vmul.f32 -1.442695, %v16875_v42  ;;  %v21365_v39 = vld [vmem:[#allocation47_spill] sm:$0xff] }
 0x3b5   : > { %v14257_v60 = vpop.eup %14256  ;;  %14276 = vrcp.f32 %v3638_v52  ;;  %13055 = vmatprep.mubr.msk.f32.mxu1 %vm1957_vm2, %v2858_v17  ;;  %v3637_v12 = vadd.f32 1.0, %v14255_v55  ;;  %v21358_v17 = vld [vmem:[#allocation42_spill] sm:$0xff] }
 0x3b6   : > { %v14259_v37 = vpop.eup %14258  ;;  %14278 = vpow2.f32 %v12198_v33  ;;  %v3725_v61 = vmul.f32 %v14257_v60, %v16543_v43  ;;  %v16866_v43 = vadd.f32 %v16377_v40, %v16512_v18  ;;  %v21356_v40 = vmov 0.0  }
 0x3b7   : > { %v14261_v26 = vpop.eup %14260  ;;  %14280 = vpow2.f32 %v12201_v24  ;;  %v3642_v20 = vadd.f32 1.0, %v14259_v37  ;;  %v16884_v21 = vadd.f32 %v21358_v17, %v16512_v18  ;;  %v21359_v24 = vld [vmem:[#allocation43_spill] sm:$0xff] }
 0x3b8   : > { %v14263_v28 = vpop.eup %14262  ;;  %14282 = vrcp.f32 %v3636_v27  ;;  %13056 = vmatmul.mubr.msk.f32.gmra.mrb[30].mxu1 %vm1957_vm2, %v2859_v19  ;;  %v16891_v55 = vadd.f32 %v16512_v18, %v21359_v24  ;;  %v21360_v19 = vld [vmem:[#allocation81_spill] sm:$0xff] }
 0x3b9   : > { %v14265_v1 = vpop.eup %14264  ;;  %14284 = vrcp.f32 %v3639_v63  ;;  %13100 = vmatprep.mubr.msk.f32.mxu1 %vm1957_vm2, %v3724_v49  ;;  %v3640_v34 = vadd.f32 1.0, %v14263_v28  ;;  %v3730_v60 = vmul.f32 %v14261_v26, %v21360_v19  ;;  %v21361_v49 = vld [vmem:[#allocation44_spill] sm:$0xff]  ;;  %v12209_v28 = vmul.f32 -1.442695, %v16884_v21 }
 0x3ba   : > { %v14267_v29 = vpop.eup %14266  ;;  %14286 = vpow2.f32 %v12199_v30  ;;  %v3643_v59 = vadd.f32 1.0, %v14265_v1  ;;  %v21362_v1 = vld [vmem:[#allocation83_spill] sm:$0xff] }
 0x3bb   : > { %v14269_v48 = vpop.eup %14268  ;;  %14288 = vrcp.f32 %v3637_v12  ;;  %v3641_v7 = vadd.f32 1.0, %v14267_v29  ;;  %v16896_v12 = vadd.f32 %v21361_v49, %v16512_v18 }
 0x3bc   : > { %v14271_v62 = vpop.eup %14270  ;;  %14290 = vpow2.f32 %v12204_v31  ;;  %13101 = vmatmul.mubr.msk.f32.vlgmr.msra.gmra.mrb[0].mxu1 %vm1957_vm2, %v3725_v61  ;;  %v3728_v25 = vmul.f32 %v14269_v48, %v21357_v9  ;;  %v21363_v48 = vld [vmem:[#allocation45_spill] sm:$0xff] }
 0x3bd   : > { %v14273_v51 = vpop.eup %14272  ;;  %14292 = vpow2.f32 %v12202_v50  ;;  %13103 = vmatprep.mubr.msk.f32.mxu1 %vm1957_vm2, %v3726_v57  ;;  %13189 = vmatpush3.msra.mxu1 %v16644_v36  ;;  %v12208_v36 = vmul.f32 -1.442695, %v16866_v43  ;;  %v3731_v26 = vmul.f32 %v14271_v62, %v21362_v1  ;;  %v12207_v50 = vmul.f32 -1.442695, %v16891_v55 }
 0x3be   : > { %v14275_v53 = vpop.eup %14274  ;;  %14294 = vrcp.f32 %v3642_v20  ;;  %13323 = vmatprep.subr.bf16.mxu1 %v21356_v40  ;;  %v3729_v56 = vmul.f32 %v14273_v51, %v16718_v45  ;;  %v16906_v57 = vadd.f32 %v16512_v18, %v21363_v48  ;;  %v12212_v62 = vmul.f32 -1.442695, %v16896_v12  ;;  %v21364_v51 = vld [vmem:[#allocation46_spill] sm:$0xff]  ;;  %v21370_v48 = vld [vmem:[#allocation52_spill] sm:$0xff] }
 0x3bf   : > { %v14277_v47 = vpop.eup %14276  ;;  %14296 = vrcp.f32 %v3640_v34  ;;  %v3646_v52 = vadd.f32 1.0, %v14275_v53  ;;  %v16911_v34 = vld [vmem:[%s21306_s6 + $0x3] ss:$0 sm:$0xff] }
 0x3c0   : > { %v14279_v23 = vpop.eup %14278  ;;  %14298 = vrcp.f32 %v3643_v59  ;;  %13104 = vmatmul.mubr.msk.f32.gmra.mrb[2].mxu1 %vm1957_vm2, %v3727_v5  ;;  %v16921_v5 = vadd.f32 %v16512_v18, %v21365_v39 }
 0x3c1   : > { %v14281_v35 = vpop.eup %14280  ;;  %14300 = vrcp.f32 %v3641_v7  ;;  %13106 = vmatprep.mubr.msk.f32.mxu1 %vm1957_vm2, %v3728_v25  ;;  %v3644_v63 = vadd.f32 1.0, %v14279_v23  ;;  %v16916_v7 = vadd.f32 %v21364_v51, %v16512_v18  ;;  %v21366_v25 = vld [vmem:[#allocation48_spill] sm:$0xff] }
 0x3c2   : > { %v14283_v33 = vpop.eup %14282  ;;  %14302 = vpow2.f32 %v12205_v2  ;;  %v3647_v30 = vadd.f32 1.0, %v14281_v35  ;;  %v12210_v35 = vmul.f32 -1.442695, %v16906_v57 }
 0x3c3   : > { %v14285_v27 = vpop.eup %14284  ;;  %14304 = vpow2.f32 %v12203_v16  ;;  %v3732_v61 = vmul.f32 %v14283_v33, %v16750_v22  ;;  %v16927_v16 = vadd.f32 %v21366_v25, %v16911_v34  ;;  %v12213_v18 = vmul.f32 -1.442695, %v16916_v7 }
 0x3c4   : > { %v14287_v37 = vpop.eup %14286  ;;  %14306 = vpow2.f32 %v12208_v36  ;;  %13107 = vmatmul.mubr.msk.f32.gmra.mrb[4].mxu1 %vm1957_vm2, %v3729_v56  ;;  %v3734_v36 = vmul.f32 %v14277_v47, %v16743_v13  ;;  %v3735_v56 = vmul.f32 %v14285_v27, %v16763_v58  ;;  %v21367_v47 = vld [vmem:[#allocation49_spill] sm:$0xff] }
 0x3c5   : > { %v14289_v45 = vpop.eup %14288  ;;  %14308 = vrcp.f32 %v3646_v52  ;;  %13109 = vmatprep.mubr.msk.f32.mxu1 %vm1957_vm2, %v3730_v60  ;;  %v3645_v20 = vadd.f32 1.0, %v14287_v37  ;;  %v12285_v13 = vmul.f32 -1.442695, %v16927_v16 }
 0x3c6   : > { %v14291_v31 = vpop.eup %14290  ;;  %14310 = vpow2.f32 %v12206_v44  ;;  %v3733_v6 = vmul.f32 %v14289_v45, %v16770_v4  ;;  %v12211_v4 = vmul.f32 -1.442695, %v16921_v5  ;;  %v16939_v44 = vadd.f32 %v16911_v34, %v21367_v47  ;;  %v21369_v45 = vld [vmem:[#allocation51_spill] sm:$0xff] }
 0x3c7   : > { %v14293_v29 = vpop.eup %14292  ;;  %14312 = vrcp.f32 %v3644_v63  ;;  %v3650_v53 = vadd.f32 1.0, %v14291_v31  ;;  %v21368_v63 = vld [vmem:[#allocation50_spill] sm:$0xff] }
 0x3c8   : > { %v14295_v59 = vpop.eup %14294  ;;  %14314 = vrcp.f32 %v3647_v30  ;;  %13110 = vmatmul.mubr.msk.f32.gmra.mrb[6].mxu1 %vm1957_vm2, %v3731_v26  ;;  %v3648_v9 = vadd.f32 1.0, %v14293_v29  ;;  %v16944_v37 = vadd.f32 %v21368_v63, %v16911_v34  ;;  %v12283_v1 = vmul.f32 -1.442695, %v16939_v44 }
 0x3c9   : > { %v14297_v22 = vpop.eup %14296  ;;  %14316 = vpow2.f32 %v12209_v28  ;;  %13112 = vmatprep.mubr.msk.f32.mxu1 %vm1957_vm2, %v3732_v61  ;;  %v16949_v28 = vadd.f32 %v16911_v34, %v21369_v45 }
 0x3ca   : > { %v14299_v2 = vpop.eup %14298  ;;  %14318 = vpow2.f32 %v12207_v50  ;;  %v3736_v19 = vmul.f32 %v14297_v22, %v16784_v15  ;;  %v3738_v50 = vmul.f32 %v14295_v59, %v16777_v8  ;;  %v12286_v29 = vmul.f32 -1.442695, %v16944_v37 }
 0x3cb   : > { %v14301_v23 = vpop.eup %14300  ;;  %14320 = vrcp.f32 %v3645_v20  ;;  %v3739_v8 = vmul.f32 %v14299_v2, %v16789_v32 }
 0x3cc   : > { %v14303_v52 = vpop.eup %14302  ;;  %14322 = vpow2.f32 %v12212_v62  ;;  %13113 = vmatmul.mubr.msk.f32.gmra.mrb[8].mxu1 %vm1957_vm2, %v3733_v6  ;;  %v3737_v31 = vmul.f32 %v14301_v23, %v16795_v46  ;;  %v16958_v62 = vadd.f32 %v21370_v48, %v16911_v34  ;;  %v12284_v46 = vmul.f32 -1.442695, %v16949_v28  ;;  %v21372_v23 = vld [vmem:[#allocation54_spill] sm:$0xff] }
 0x3cd   : > { %v14305_v17 = vpop.eup %14304  ;;  %14324 = vrcp.f32 %v3650_v53  ;;  %13115 = vmatprep.mubr.msk.f32.mxu1 %vm1957_vm2, %v3734_v36  ;;  %v3651_v60 = vadd.f32 1.0, %v14303_v52  ;;  %v21371_v53 = vld [vmem:[#allocation53_spill] sm:$0xff]  ;;  %v16971_v36 = vadd.f32 %v21372_v23, %v16911_v34 }
 0x3ce   : > { %v14307_v33 = vpop.eup %14306  ;;  %14326 = vrcp.f32 %v3648_v9  ;;  %v3649_v49 = vadd.f32 1.0, %v14305_v17  ;;  %v16966_v39 = vadd.f32 %v16911_v34, %v21371_v53  ;;  %v12289_v52 = vmul.f32 -1.442695, %v16958_v62 }
 0x3cf   : > { %v14309_v24 = vpop.eup %14308  ;;  %14328 = vpow2.f32 %v12210_v35  ;;  %v3654_v27 = vadd.f32 1.0, %v14307_v33 }
 0x3d0   : > { %v14311_v30 = vpop.eup %14310  ;;  %14330 = vpow2.f32 %v12213_v18  ;;  %13116 = vmatmul.mubr.msk.f32.gmra.mrb[10].mxu1 %vm1957_vm2, %v3735_v56  ;;  %v12287_v17 = vmul.f32 -1.442695, %v16966_v39  ;;  %v3742_v33 = vmul.f32 %v14309_v24, %v16809_v41  ;;  %v12290_v56 = vmul.f32 -1.442695, %v16971_v36 }
 0x3d1   : > { %v14313_v58 = vpop.eup %14312  ;;  %14332 = vpow2.f32 %v12211_v4  ;;  %13118 = vmatprep.mubr.msk.f32.mxu1 %vm1957_vm2, %v3736_v19  ;;  %v3652_v20 = vadd.f32 1.0, %v14311_v30  ;;  %v21373_v19 = vld [vmem:[#allocation55_spill] sm:$0xff]  ;;  %v21374_v30 = vld [vmem:[#allocation56_spill] sm:$0xff] }
 0x3d2   : > { %v14315_v15 = vpop.eup %14314  ;;  %14334 = vpow2.f32 %v12285_v13  ;;  %v3740_v9 = vmul.f32 %v14313_v58, %v16818_v10 }
 0x3d3   : > { %v14317_v26 = vpop.eup %14316  ;;  %14336 = vrcp.f32 %v3651_v60  ;;  %v16982_v60 = vadd.f32 %v16911_v34, %v21373_v19  ;;  %v3743_v24 = vmul.f32 %v14315_v15, %v16822_v3  ;;  %v21376_v15 = vld [vmem:[#allocation58_spill] sm:$0xff] }
 0x3d4   : > { %v14319_v61 = vpop.eup %14318  ;;  %14338 = vrcp.f32 %v3649_v49  ;;  %13119 = vmatmul.mubr.msk.f32.gmra.mrb[12].mxu1 %vm1957_vm2, %v3737_v31  ;;  %v3655_v59 = vadd.f32 1.0, %v14317_v26  ;;  %v16987_v49 = vadd.f32 %v21374_v30, %v16911_v34 }
 0x3d5   : > { %v14321_v51 = vpop.eup %14320  ;;  %14340 = vrcp.f32 %v3654_v27  ;;  %13121 = vmatprep.mubr.msk.f32.mxu1 %vm1957_vm2, %v3738_v50  ;;  %v3653_v25 = vadd.f32 1.0, %v14319_v61  ;;  %v21375_v27 = vld [vmem:[#allocation57_spill] sm:$0xff] }
 0x3d6   : > { %v14323_v22 = vpop.eup %14322  ;;  %14342 = vpow2.f32 %v12283_v1  ;;  %v3741_v10 = vmul.f32 %v14321_v51, %v16831_v38  ;;  %v16993_v45 = vadd.f32 %v16911_v34, %v21375_v27  ;;  %v12293_v3 = vmul.f32 -1.442695, %v16987_v49 }
 0x3d7   : > { %v14325_v6 = vpop.eup %14324  ;;  %14344 = vpow2.f32 %v12286_v29  ;;  %v3658_v2 = vadd.f32 1.0, %v14323_v22  ;;  %v12288_v29 = vmul.f32 -1.442695, %v16982_v60 }
 0x3d8   : > { %v14327_v35 = vpop.eup %14326  ;;  %14346 = vrcp.f32 %v3652_v20  ;;  %13122 = vmatmul.mubr.msk.f32.gmra.mrb[14].mxu1 %vm1957_vm2, %v3739_v8  ;;  %v17001_v20 = vadd.f32 %v21376_v15, %v16911_v34  ;;  %v12291_v51 = vmul.f32 -1.442695, %v16993_v45  ;;  %v3746_v22 = vmul.f32 %v14325_v6, %v16838_v0 }
 0x3d9   : > { %v14329_v32 = vpop.eup %14328  ;;  %14348 = vpow2.f32 %v12284_v46  ;;  %13124 = vmatprep.mubr.msk.f32.mxu1 %vm1957_vm2, %v3740_v9  ;;  %v3744_v1 = vmul.f32 %v14327_v35, %v16844_v11 }
 0x3da   : > { %v14331_v18 = vpop.eup %14330  ;;  %14350 = vrcp.f32 %v3655_v59  ;;  %v3656_v47 = vadd.f32 1.0, %v14329_v32  ;;  %v21377_v59 = vld [vmem:[#allocation59_spill] sm:$0xff] }
 0x3db   : > { %v14333_v4 = vpop.eup %14332  ;;  %14352 = vrcp.f32 %v3653_v25  ;;  %v3659_v38 = vadd.f32 1.0, %v14331_v18  ;;  %v17009_v53 = vadd.f32 %v16911_v34, %v21377_v59 }
 0x3dc   : > { %v14335_v13 = vpop.eup %14334  ;;  %14354 = vpow2.f32 %v12289_v52  ;;  %13125 = vmatmul.mubr.msk.f32.gmra.mrb[16].mxu1 %vm1957_vm2, %v3741_v10  ;;  %v3657_v58 = vadd.f32 1.0, %v14333_v4 }
 0x3dd   : > { %v14337_v63 = vpop.eup %14336  ;;  %14356 = vrcp.f32 %v3658_v2  ;;  %13127 = vmatprep.mubr.msk.f32.mxu1 %vm1957_vm2, %v3742_v33  ;;  %v4526_v26 = vadd.f32 1.0, %v14335_v13  ;;  %v12292_v2 = vmul.f32 -1.442695, %v17009_v53 }
 0x3de   : > { %v14339_v41 = vpop.eup %14338  ;;  %14358 = vpow2.f32 %v12287_v17  ;;  %v3747_v0 = vmul.f32 %v14337_v63, %v16856_v14  ;;  %v14810_v17 = vld [vmem:[%s21306_s6 + $0x1] ss:$0 sm:$0xff] }
 0x3df   : > { %v14341_v31 = vpop.eup %14340  ;;  %14360 = vpow2.f32 %v12290_v56  ;;  %v3745_v11 = vmul.f32 %v14339_v41, %v16862_v54  ;;  %v12294_v54 = vmul.f32 -1.442695, %v17001_v20 }
 0x3e0   : > { %v14343_v50 = vpop.eup %14342  ;;  %14362 = vrcp.f32 %v3656_v47  ;;  %13128 = vmatmul.mubr.msk.f32.gmra.mrb[18].mxu1 %vm1957_vm2, %v3743_v24  ;;  %v3750_v27 = vmul.f32 %v14341_v31, %v16866_v43 }
 0x3e1   : > { %v14345_v61 = vpop.eup %14344  ;;  %14364 = vrcp.f32 %v3659_v38  ;;  %13130 = vmatprep.mubr.msk.f32.mxu1 %vm1957_vm2, %v3744_v1  ;;  %v4524_v8 = vadd.f32 1.0, %v14343_v50  ;;  %v21379_v38 = vld [vmem:[#allocation63_spill] sm:$0xff] }
 0x3e2   : > { %v14347_v48 = vpop.eup %14346  ;;  %14366 = vrcp.f32 %v3657_v58  ;;  %v4527_v25 = vadd.f32 1.0, %v14345_v61  ;;  %v17031_v30 = vadd.f32 %v16911_v34, %v21379_v38 }
 0x3e3   : > { %v14349_v46 = vpop.eup %14348  ;;  %14368 = vrcp.f32 %v4526_v26  ;;  %v3748_v32 = vmul.f32 %v14347_v48, %v16875_v42  ;;  %v6442_v18 = vpop.f32.mrb[104].mxu0  ;;  %v21378_v42 = vld [vmem:[#allocation61_spill] sm:$0xff]  ;;  %v21380_v26 = vld [vmem:[#allocation60_spill] sm:$0xff] }
 0x3e4   : > { %v14351_v9 = vpop.eup %14350  ;;  %14370 = vpow2.f32 %v12288_v29  ;;  %13131 = vmatmul.mubr.msk.f32.gmra.mrb[20].mxu1 %vm1957_vm2, %v3745_v11  ;;  %v4525_v6 = vadd.f32 1.0, %v14349_v46  ;;  %v17021_v4 = vadd.f32 %v14810_v17, %v6442_v18  ;;  %v13265_v14 = vpop.f32.mrb[105].mxu0  ;;  %v17026_v47 = vadd.f32 %v16911_v34, %v21378_v42 }
 0x3e5   : > { %v14353_v23 = vpop.eup %14352  ;;  %14372 = vpow2.f32 %v12293_v3  ;;  %13133 = vmatprep.mubr.msk.f32.mxu1 %vm1957_vm2, %v3746_v22  ;;  %v6445_v19 = vpop.f32.mrb[106].mxu0  ;;  %v17039_v50 = vadd.f32 %v21380_v26, %v16911_v34  ;;  %v21381_v3 = vld [vmem:[#allocation62_spill] sm:$0xff]  ;;  %v12296_v46 = vmul.f32 -1.442695, %v17031_v30 }
 0x3e6   : > { %v14355_v35 = vpop.eup %14354  ;;  %14374 = vpow2.f32 %v12291_v51  ;;  %v3749_v56 = vmul.f32 %v14353_v23, %v16891_v55  ;;  %v12355_v41 = vmul.f32 -1.442695, %v17021_v4  ;;  %v17034_v24 = vadd.f32 %v14810_v17, %v6445_v19  ;;  %v13266_v55 = vpop.f32.mrb[107].mxu0 }
 0x3e7   : > { %v14357_v52 = vpop.eup %14356  ;;  %14376 = vrcp.f32 %v4524_v8  ;;  %v4530_v13 = vadd.f32 1.0, %v14355_v35  ;;  %v17043_v15 = vadd.f32 %v21381_v3, %v16911_v34  ;;  %v12295_v43 = vmul.f32 -1.442695, %v17026_v47 }
 0x3e8   : > { %v14359_v10 = vpop.eup %14358  ;;  %14378 = vrcp.f32 %v4527_v25  ;;  %13134 = vmatmul.mubr.msk.f32.gmra.mrb[22].mxu1 %vm1957_vm2, %v3747_v0  ;;  %v12356_v48 = vmul.f32 -1.442695, %v17034_v24  ;;  %v3751_v51 = vmul.f32 %v14351_v9, %v16884_v21  ;;  %v12297_v59 = vmul.f32 -1.442695, %v17039_v50 }
 0x3e9   : > { %v14361_v33 = vpop.eup %14360  ;;  %14380 = vpow2.f32 %v12294_v54  ;;  %13136 = vmatprep.mubr.msk.f32.mxu1 %vm1957_vm2, %v3748_v32  ;;  %v4528_v1 = vadd.f32 1.0, %v14359_v10  ;;  %v12298_v23 = vmul.f32 -1.442695, %v17043_v15  ;;  %v21382_v54 = vld [vmem:[#allocation65_spill] sm:$0xff]  ;;  %v21383_v32 = vld [vmem:[#allocation67_spill] sm:$0xff]  ;;  %v3754_v10 = vmul.f32 %v14357_v52, %v16896_v12  ;;  %v21385_v12 = vld [vmem:[#allocation66_spill] sm:$0xff] }
 0x3ea   : > { %v14363_v63 = vpop.eup %14362  ;;  %14382 = vrcp.f32 %v4525_v6  ;;  %v4531_v61 = vadd.f32 1.0, %v14361_v33  ;;  %v17056_v35 = vadd.f32 %v16911_v34, %v21382_v54  ;;  %v21384_v33 = vld [vmem:[#allocation64_spill] sm:$0xff]  ;;  %v17076_v52 = vadd.f32 %v21385_v12, %v16911_v34 }
 0x3eb   : > { %v14365_v58 = vpop.eup %14364  ;;  %14384 = vpow2.f32 %v12292_v2  ;;  %v3752_v8 = vmul.f32 %v14363_v63, %v16906_v57  ;;  %v17063_v2 = vadd.f32 %v16911_v34, %v21383_v32 }
 0x3ec   : > { %v14367_v29 = vpop.eup %14366  ;;  %14386 = vpow2.f32 %v12355_v41  ;;  %13137 = vmatmul.mubr.msk.f32.gmra.mrb[24].mxu1 %vm1957_vm2, %v3749_v56  ;;  %v17068_v56 = vadd.f32 %v21384_v33, %v16911_v34  ;;  %v3755_v19 = vmul.f32 %v14365_v58, %v16916_v7  ;;  %v21386_v58 = vld [vmem:[#allocation69_spill] sm:$0xff] }
 0x3ed   : > { %v14369_v11 = vpop.eup %14368  ;;  %14388 = vrcp.f32 %v4530_v13  ;;  %13139 = vmatprep.mubr.msk.f32.mxu1 %vm1957_vm2, %v3750_v27  ;;  %v3753_v57 = vmul.f32 %v14367_v29, %v16921_v5  ;;  %v12299_v13 = vmul.f32 -1.442695, %v17056_v35  ;;  %v12300_v63 = vmul.f32 -1.442695, %v17063_v2 }
 0x3ee   : > { %v14371_v31 = vpop.eup %14370  ;;  %14390 = vpow2.f32 %v12356_v48  ;;  %v17084_v29 = vadd.f32 %v16911_v34, %v21386_v58  ;;  %v12302_v48 = vmul.f32 -1.442695, %v17076_v52 }
 0x3ef   : > { %v14373_v22 = vpop.eup %14372  ;;  %14392 = vrcp.f32 %v4528_v1  ;;  %v4529_v9 = vadd.f32 1.0, %v14371_v31  ;;  %v12301_v1 = vmul.f32 -1.442695, %v17068_v56  ;;  %v4622_v31 = vmul.f32 %v14369_v11, %v16927_v16  ;;  %v14811_v16 = vld [vmem:[%s21300_s3 + $0x20] sm:$0xff]  }
 0x3f0   : > { %v14375_v25 = vpop.eup %14374  ;;  %14394 = vrcp.f32 %v4531_v61  ;;  %13140 = vmatmul.mubr.msk.f32.gmra.mrb[26].mxu1 %vm1957_vm2, %v3751_v51  ;;  %v4534_v6 = vadd.f32 1.0, %v14373_v22  ;;  %v21387_v22 = vld [vmem:[#allocation71_spill] sm:$0xff] }
 0x3f1   : > { %v14377_v21 = vpop.eup %14376  ;;  %14396 = vpow2.f32 %v12295_v43  ;;  %13142 = vmatprep.mubr.msk.f32.mxu1 %vm1957_vm2, %v3752_v8  ;;  %v4532_v17 = vadd.f32 1.0, %v14375_v25  ;;  %v17092_v8 = vadd.f32 %v16911_v34, %v21387_v22  ;;  %v21393_v22 = vld [vmem:[#allocation74_spill] sm:$0xff] }
 0x3f2   : > { %v14379_v0 = vpop.eup %14378  ;;  %14398 = vpow2.f32 %v12296_v46  ;;  %v4620_v41 = vmul.f32 %v14377_v21, %v16939_v44 }
 0x3f3   : > { %v14381_v18 = vpop.eup %14380  ;;  %14400 = vpow2.f32 %v12297_v59  ;;  %v4623_v54 = vmul.f32 %v14379_v0, %v16944_v37 }
 0x3f4   : > { %v14383_v14 = vpop.eup %14382  ;;  %14402 = vpow2.f32 %v12298_v23  ;;  %13143 = vmatmul.mubr.msk.f32.gmra.mrb[28].mxu1 %vm1957_vm2, %v3753_v57  ;;  %v4535_v46 = vadd.f32 1.0, %v14381_v18  ;;  %v12303_v23 = vmul.f32 -1.442695, %v17084_v29  ;;  %v21389_v18 = vld [vmem:[#allocation70_spill] sm:$0xff] }
 0x3f5   : > { %v14385_v5 = vpop.eup %14384  ;;  %14404 = vrcp.f32 %v4529_v9  ;;  %13145 = vmatprep.mubr.msk.f32.mxu1 %vm1957_vm2, %v3754_v10  ;;  %v4621_v44 = vmul.f32 %v14383_v14, %v16949_v28  ;;  %v21388_v28 = vld [vmem:[#allocation68_spill] sm:$0xff]  ;;  %v17111_v10 = vadd.f32 %v21389_v18, %v16911_v34  ;;  %v21390_v14 = vld [vmem:[#allocation73_spill] sm:$0xff] }
 0x3f6   : > { %v14387_v42 = vpop.eup %14386  ;;  %14406 = vrcp.f32 %v4534_v6  ;;  %v4533_v7 = vadd.f32 1.0, %v14385_v5  ;;  %v17097_v25 = vadd.f32 %v21388_v28, %v16911_v34  ;;  %v17118_v33 = vadd.f32 %v16911_v34, %v21390_v14  ;;  %v14814_v28 = vld [vmem:[%s21300_s3 + $0x40] sm:$0xff]   ;;  %v14816_v14 = vld [vmem:[%s21300_s3 + $0x48] sm:$0xff]  }
 0x3f7   : > { %v14389_v38 = vpop.eup %14388  ;;  %14408 = vrcp.f32 %v4532_v17  ;;  %v6455_v55 = vadd.f32 1.0, %v14387_v42  ;;  %v12304_v17 = vmul.f32 -1.442695, %v17092_v8 }
 0x3f8   : > { %v14391_v27 = vpop.eup %14390  ;;  %14410 = vpow2.f32 %v12299_v13  ;;  %13146 = vmatmul.mubr.msk.f32.gmra.mrb[30].mxu1 %vm1957_vm2, %v3755_v19  ;;  %v12305_v0 = vmul.f32 -1.442695, %v17097_v25  ;;  %v4626_v12 = vmul.f32 %v14389_v38, %v16958_v62  ;;  %v12307_v62 = vmul.f32 -1.442695, %v17118_v33  ;;  %v14813_v38 = vld [vmem:[%s21300_s3 + $0x30] sm:$0xff]  }
 0x3f9   : > { %v14393_v26 = vpop.eup %14392  ;;  %14412 = vrcp.f32 %v6455_v55  ;;  %v6456_v61 = vadd.f32 1.0, %v14391_v27  ;;  %13190 = vmatprep.mubr.msk.f32.mxu1 %vm1957_vm2, %v4620_v41  ;;  %v12306_v55 = vmul.f32 -1.442695, %v17111_v10  ;;  %v21391_v27 = vld [vmem:[#allocation75_spill] sm:$0xff] }
 0x3fa   : > { %v14395_v3 = vpop.eup %14394  ;;  %14414 = vpow2.f32 %v12300_v63  ;;  %v4624_v57 = vmul.f32 %v14393_v26, %v16966_v39  ;;  %v14812_v39 = vld [vmem:[%s21300_s3 + $0x28] sm:$0xff]  }
 0x3fb   : > { %v14397_v43 = vpop.eup %14396  ;;  %14416 = vrcp.f32 %v6456_v61 }
 0x3fc   : > { %v14399_v51 = vpop.eup %14398  ;;  %14418 = vpow2.f32 %v12301_v1  ;;  %13191 = vmatmul.mubr.msk.f32.vlgmr.msra.gmra.mrb[0].mxu1 %vm1957_vm2, %v4621_v44  ;;  %v4536_v21 = vadd.f32 1.0, %v14397_v43  ;;  %v17130_v1 = vadd.f32 %v16911_v34, %v21391_v27 }
 0x3fd   : > { %v14401_v59 = vpop.eup %14400  ;;  %14420 = vrcp.f32 %v4533_v7  ;;  %13193 = vmatprep.mubr.msk.f32.mxu1 %vm1957_vm2, %v4622_v31  ;;  %13324 = vmatpush3.bf16.msra.mxu1 %v14811_v16  ;;  %v4537_v6 = vadd.f32 1.0, %v14399_v51  ;;  %v21392_v7 = vld [vmem:[#allocation72_spill] sm:$0xff] }
 0x3fe   : > { %v14403_v11 = vpop.eup %14402  ;;  %14422 = vpow2.f32 %v12302_v48  ;;  %13325 = vmatprep.subr.bf16.mxu1 %v21356_v40  ;;  %v4538_v42 = vadd.f32 1.0, %v14401_v59  ;;  %v17136_v58 = vadd.f32 %v21392_v7, %v16911_v34  ;;  %v17150_v59 = vadd.f32 %v21393_v22, %v16911_v34 }
 0x3ff   : > { %v14405_v9 = vpop.eup %14404  ;;  %14424 = vrcp.f32 %v4535_v46  ;;  %v4539_v63 = vadd.f32 1.0, %v14403_v11 }
 0x400   : > { %v17107_v32 = vpop.eup %14406  ;;  %13194 = vmatmul.mubr.msk.f32.gmra.mrb[2].mxu1 %vm1957_vm2, %v4623_v54  ;;  %14426 = vpow2.f32 %v12303_v23  ;;  %v4625_v5 = vmul.f32 %v14405_v9, %v16982_v60 }
 0x401   : > { %v14409_v37 = vpop.eup %14408  ;;  %13196 = vmatprep.mubr.msk.f32.mxu1 %vm1957_vm2, %v4624_v57  ;;  %13326 = vmatpush3.bf16.msra.mxu1 %v14812_v39  ;;  %14428 = vrcp.f32 %v4536_v21  ;;  %v4630_v21 = vmul.f32 %v17107_v32, %v16987_v49  ;;  %v21395_v57 = vld [vmem:[#allocation76_spill] sm:$0xff] }
 0x402   : > { %v14411_v13 = vpop.eup %14410  ;;  %13327 = vmatprep.subr.bf16.mxu1 %v21356_v40  ;;  %14430 = vrcp.f32 %v4537_v6  ;;  %v4628_v31 = vmul.f32 %v14409_v37, %v16993_v45  ;;  %v17172_v6 = vadd.f32 %v21395_v57, %v16911_v34  ;;  %v21396_v37 = vld [vmem:[#allocation79_spill] sm:$0xff] }
 0x403   : > { %v14413_v19 = vpop.eup %14412  ;;  %14432 = vpow2.f32 %v12304_v17  ;;  %v4540_v44 = vadd.f32 1.0, %v14411_v13  ;;  %v12310_v17 = vmul.f32 -1.442695, %v17150_v59 }
 0x404   : > { %v14415_v41 = vpop.eup %14414  ;;  %v6461_v26 = vmul.f32 %v14413_v19, %v17021_v4  ;;  %13197 = vmatmul.mubr.msk.f32.gmra.mrb[4].mxu1 %vm1957_vm2, %v4625_v5  ;;  %14434 = vpow2.f32 %v12305_v0  ;;  %v4627_v4 = vmul.f32 %v14395_v3, %v16971_v36  ;;  %v12308_v36 = vmul.f32 -1.442695, %v17130_v1  ;;  %v21394_v3 = vld [vmem:[#allocation77_spill] sm:$0xff] }
 0x405   : > { %v14417_v60 = vpop.eup %14416  ;;  %13199 = vmatprep.mubr.msk.f32.mxu1 %vm1957_vm2, %v4626_v12  ;;  %13328 = vmatpush3.bf16.msra.mxu1 %v14813_v38  ;;  %14436 = vrcp.f32 %v4538_v42  ;;  %v4541_v51 = vadd.f32 1.0, %v14415_v41  ;;  %v17158_v45 = vadd.f32 %v16911_v34, %v21394_v3  ;;  %v17180_v0 = vadd.f32 %v16911_v34, %v21396_v37  ;;  %v21397_v41 = vld [vmem:[#allocation78_spill] sm:$0xff] }
 0x406   : > { %v14419_v61 = vpop.eup %14418  ;;  %v6462_v48 = vmul.f32 %v14417_v60, %v17034_v24  ;;  %13269 = vmatprep.mubr.msk.f32.mxu0 %vm1957_vm2, %v6461_v26  ;;  %13329 = vmatprep.subr.bf16.mxu1 %v21356_v40  ;;  %14438 = vrcp.f32 %v4539_v63  ;;  %v12309_v24 = vmul.f32 -1.442695, %v17136_v58  ;;  %v12313_v12 = vmul.f32 -1.442695, %v17172_v6  ;;  %v1401_v60 = vld [vmem:[%s21398_s16] sm:$0xff]   ;;  %s21399_s16 = sld [smem:[#allocation193_spill]] }
 0x407   : > { %v14421_v43 = vpop.eup %14420  ;;  %14440 = vpow2.f32 %v12306_v55  ;;  %v4542_v11 = vadd.f32 1.0, %v14419_v61  ;;  %v12311_v32 = vmul.f32 -1.442695, %v17158_v45  ;;  %v17195_v55 = vadd.f32 %v21397_v41, %v16911_v34 }
 0x408   : > { %v14423_v46 = vpop.eup %14422  ;;  %13200 = vmatmul.mubr.msk.f32.gmra.mrb[6].mxu1 %vm1957_vm2, %v4627_v4  ;;  %13270 = vmatmul.mubr.msk.f32.vlgmr.msra.gmra.mrb[100].mxu0 %vm1957_vm2, %v6462_v48  ;;  %14442 = vpow2.f32 %v12307_v62  ;;  %v4629_v16 = vmul.f32 %v14421_v43, %v17009_v53  ;;  %v14815_v53 = vld [vmem:[%s21300_s3 + $0x38] sm:$0xff]   ;;  %v12312_v27 = vmul.f32 -1.442695, %v17180_v0 }
 0x409   : > { %13202 = vmatprep.mubr.msk.f32.mxu1 %vm1957_vm2, %v4628_v31  ;;  %13273 = vmatpush3.bf16.msra.mxu0 %v14814_v28  ;;  %v14425_v23 = vpop.eup %14424  ;;  %14444 = vrcp.f32 %v4540_v44  ;;  %v4543_v9 = vadd.f32 1.0, %v14423_v46  ;;  %v12314_v44 = vmul.f32 -1.442695, %v17195_v55  ;;  %v14819_v46 = vld [vmem:[%s21303_s17 + $0x10] sm:$0xff] }
 0x40a   : > { %13274 = vmatprep.subr.bf16.mxu0 %v21356_v40  ;;  %13280 = vmatprep.mubr.msk.bf16.mxu0 %vm15273_vm1, %v21356_v40  ;;  %v14427_v54 = vpop.eup %14426  ;;  %14446 = vrcp.f32 %v4541_v51  ;;  %v4631_v13 = vmul.f32 %v14425_v23, %v17001_v20 }
 0x40b   : > { %13330 = vmatpush3.bf16.msra.mxu1 %v14815_v53  ;;  %v14429_v18 = vpop.eup %14428  ;;  %14448 = vpow2.f32 %v12308_v36  ;;  %v4544_v5 = vadd.f32 1.0, %v14427_v54 }
 0x40c   : > { %13203 = vmatmul.mubr.msk.f32.gmra.mrb[8].mxu1 %vm1957_vm2, %v4629_v16  ;;  %13357 = vmatprep.subr.bf16.mxu1 %v21356_v40  ;;  %v14431_v49 = vpop.eup %14430  ;;  %14450 = vpow2.f32 %v12309_v24  ;;  %v4632_v19 = vmul.f32 %v14429_v18, %v17026_v47  ;;  %v14817_v47 = vld [vmem:[%s21300_s3 + $0x50] sm:$0xff]  }
 0x40d   : > { %13205 = vmatprep.mubr.msk.f32.mxu1 %vm1957_vm2, %v4630_v21  ;;  %13275 = vmatpush3.bf16.msra.mxu0 %v14816_v14  ;;  %v14433_v39 = vpop.eup %14432  ;;  %14452 = vrcp.f32 %v4542_v11  ;;  %v4633_v34 = vmul.f32 %v14431_v49, %v17031_v30  ;;  %v14818_v30 = vld [vmem:[%s21300_s3 + $0x58] sm:$0xff]  }
 0x40e   : > { %13276 = vmatprep.subr.bf16.mxu0 %v21356_v40  ;;  %v14435_v42 = vpop.eup %14434  ;;  %14454 = vrcp.f32 %v4543_v9  ;;  %v4545_v26 = vadd.f32 1.0, %v14433_v39 }
 0x40f   : > { %v14437_v63 = vpop.eup %14436  ;;  %14456 = vpow2.f32 %v12310_v17  ;;  %v4546_v62 = vadd.f32 1.0, %v14435_v42 }
 0x410   : > { %13206 = vmatmul.mubr.msk.f32.gmra.mrb[10].mxu1 %vm1957_vm2, %v4631_v13  ;;  %v14439_v20 = vpop.eup %14438  ;;  %14458 = vpow2.f32 %v12311_v32  ;;  %v4634_v61 = vmul.f32 %v14437_v63, %v17039_v50 }
 0x411   : > { %13208 = vmatprep.mubr.msk.f32.mxu1 %vm1957_vm2, %v4632_v19  ;;  %13277 = vmatpush3.bf16.msra.mxu0 %v14817_v47  ;;  %v14441_v7 = vpop.eup %14440  ;;  %14460 = vrcp.f32 %v4544_v5  ;;  %v4635_v50 = vmul.f32 %v14439_v20, %v17043_v15 }
 0x412   : > { %13278 = vmatprep.subr.bf16.mxu0 %v21356_v40  ;;  %v14443_v38 = vpop.eup %14442  ;;  %14462 = vpow2.f32 %v12313_v12  ;;  %v4547_v43 = vadd.f32 1.0, %v14441_v7 }
 0x413   : > { %v14445_v4 = vpop.eup %14444  ;;  %14464 = vpow2.f32 %v12312_v27  ;;  %v4548_v51 = vadd.f32 1.0, %v14443_v38 }
 0x414   : > { %13209 = vmatmul.mubr.msk.f32.gmra.mrb[12].mxu1 %vm1957_vm2, %v4633_v34  ;;  %v14447_v48 = vpop.eup %14446  ;;  %14466 = vrcp.f32 %v4545_v26  ;;  %v4636_v36 = vmul.f32 %v14445_v4, %v17056_v35 }
 0x415   : > { %13211 = vmatprep.mubr.msk.f32.mxu1 %vm1957_vm2, %v4634_v61  ;;  %13279 = vmatpush3.bf16.msra.mxu0 %v14818_v30  ;;  %v14449_v31 = vpop.eup %14448  ;;  %14468 = vrcp.f32 %v4546_v62  ;;  %v4637_v23 = vmul.f32 %v14447_v48, %v17063_v2 }
 0x416   : > { %13284 = vmatprep.subr.mxu0 %v14819_v46  ;;  %v14451_v22 = vpop.eup %14450  ;;  %14470 = vpow2.f32 %v12314_v44  ;;  %v4549_v28 = vadd.f32 1.0, %v14449_v31 }
 0x417   : > { %v14453_v24 = vpop.eup %14452  ;;  %14472 = vrcp.f32 %v4547_v43  ;;  %v4550_v16 = vadd.f32 1.0, %v14451_v22 }
 0x418   : > { %13212 = vmatmul.mubr.msk.f32.gmra.mrb[14].mxu1 %vm1957_vm2, %v4635_v50  ;;  %13281 = vmatmul.mubr.msk.bf16.vlgmr.msra.gmra.mrb[108].mxu0 %vm1523_vm0, %v1401_v60  ;;  %v14455_v3 = vpop.eup %14454  ;;  %14474 = vrcp.f32 %v4548_v51  ;;  %v4638_v11 = vmul.f32 %v14453_v24, %v17068_v56 }
 0x419   : > { %13214 = vmatprep.mubr.msk.f32.mxu1 %vm1957_vm2, %v4636_v36  ;;  %13285 = vmatpush3.msra.mxu0 %v14819_v46  ;;  %v14457_v15 = vpop.eup %14456  ;;  %14476 = vrcp.f32 %v4549_v28  ;;  %v4639_v53 = vmul.f32 %v14455_v3, %v17076_v52 }
 0x41a   : > { %13289 = vmatprep.subr.bf16.mxu0 %v21356_v40  ;;  %v14459_v35 = vpop.eup %14458  ;;  %v4551_v9 = vadd.f32 1.0, %v14457_v15  ;;  %14478 = vrcp.f32 %v4550_v16 }
 0x41b   : > { %v14461_v54 = vpop.eup %14460  ;;  %v4552_v2 = vadd.f32 1.0, %v14459_v35 }
 0x41c   : > { %13215 = vmatmul.mubr.msk.f32.gmra.mrb[16].mxu1 %vm1957_vm2, %v4637_v23  ;;  %v14463_v21 = vpop.eup %14462  ;;  %v4640_v17 = vmul.f32 %v14461_v54, %v17084_v29  ;;  %14480 = vrcp.f32 %v4551_v9 }
 0x41d   : > { %13217 = vmatprep.mubr.msk.f32.mxu1 %vm1957_vm2, %v4638_v11  ;;  %v14465_v57 = vpop.eup %14464  ;;  %v4554_v14 = vadd.f32 1.0, %v14463_v21  ;;  %14482 = vrcp.f32 %v4552_v2 }
 0x41e   : > { %v14467_v18 = vpop.eup %14466  ;;  %v4553_v56 = vadd.f32 1.0, %v14465_v57 }
 0x41f   : > { %v14469_v37 = vpop.eup %14468  ;;  %v4641_v32 = vmul.f32 %v14467_v18, %v17092_v8 }
 0x420   : > { %13218 = vmatmul.mubr.msk.f32.gmra.mrb[18].mxu1 %vm1957_vm2, %v4639_v53  ;;  %v14471_v49 = vpop.eup %14470  ;;  %v4642_v52 = vmul.f32 %v14469_v37, %v17097_v25  ;;  %14484 = vrcp.f32 %v4553_v56 }
 0x421   : > { %13220 = vmatprep.mubr.msk.f32.mxu1 %vm1957_vm2, %v4640_v17  ;;  %v14473_v39 = vpop.eup %14472  ;;  %v4555_v5 = vadd.f32 1.0, %v14471_v49  ;;  %14486 = vrcp.f32 %v4554_v14 }
 0x422   : > { %v14475_v13 = vpop.eup %14474  ;;  %v4643_v29 = vmul.f32 %v14473_v39, %v17111_v10 }
 0x423   : > { %v14477_v42 = vpop.eup %14476  ;;  %v4644_v19 = vmul.f32 %v14475_v13, %v17118_v33  ;;  %14488 = vrcp.f32 %v4555_v5 }
 0x424   : > { %13221 = vmatmul.mubr.msk.f32.gmra.mrb[20].mxu1 %vm1957_vm2, %v4641_v32  ;;  %v14479_v12 = vpop.eup %14478  ;;  %v4645_v8 = vmul.f32 %v14477_v42, %v17130_v1 }
 0x425   : > { %13223 = vmatprep.mubr.msk.f32.mxu1 %vm1957_vm2, %v4642_v52  ;;  %v4646_v63 = vmul.f32 %v14479_v12, %v17136_v58  ;;  %v14820_v52 = vld [vmem:[%s21306_s6 + $0x2] ss:$0 sm:$0xff] }
 0x426   : > { %v14481_v25 = vpop.eup %14480 }
 0x427   : > { %v14483_v41 = vpop.eup %14482  ;;  %v4647_v10 = vmul.f32 %v14481_v25, %v17150_v59  ;;  %v17258_v59 = vld [vmem:[%s21399_s16] ss:$0 sm:$0xff] }
 0x428   : > { %13224 = vmatmul.mubr.msk.f32.gmra.mrb[22].mxu1 %vm1957_vm2, %v4643_v29  ;;  %v4648_v33 = vmul.f32 %v14483_v41, %v17158_v45 }
 0x429   : > { %13226 = vmatprep.mubr.msk.f32.mxu1 %vm1957_vm2, %v4644_v19 }
 0x42a   : > { %v14485_v27 = vpop.eup %14484 }
 0x42b   : > { %v14487_v20 = vpop.eup %14486  ;;  %v4649_v1 = vmul.f32 %v14485_v27, %v17180_v0 }
 0x42c   : > { %13227 = vmatmul.mubr.msk.f32.gmra.mrb[24].mxu1 %vm1957_vm2, %v4645_v8  ;;  %v4650_v58 = vmul.f32 %v14487_v20, %v17172_v6 }
 0x42d   : > { %13229 = vmatprep.mubr.msk.f32.mxu1 %vm1957_vm2, %v4646_v63  ;;  %v14489_v26 = vpop.eup %14488 }
 0x42e   : > { %v4651_v47 = vmul.f32 %v14489_v26, %v17195_v55 }
 0x430   : > { %13230 = vmatmul.mubr.msk.f32.gmra.mrb[26].mxu1 %vm1957_vm2, %v4647_v10 }
 0x431   : > { %13232 = vmatprep.mubr.msk.f32.mxu1 %vm1957_vm2, %v4648_v33 }
 0x434   : > { %13233 = vmatmul.mubr.msk.f32.gmra.mrb[28].mxu1 %vm1957_vm2, %v4649_v1 }
 0x435   : > { %13235 = vmatprep.mubr.msk.f32.mxu1 %vm1957_vm2, %v4650_v58 }
 0x438   : > { %13236 = vmatmul.mubr.msk.f32.gmra.mrb[30].mxu1 %vm1957_vm2, %v4651_v47 }
 0x439   : > { %13331 = vmatprep.mubr.msk.bf16.mxu1 %vm15273_vm1, %v21356_v40 }
 0x4cf   : > { %v13192_v45 = vpop.f32.mrb[0].mxu1 }
 0x4d0   : > { %v17261_v6 = vadd.f32 %v13192_v45, %v17258_v59  ;;  %v4814_v0 = vpop.f32.mrb[1].mxu1 }
 0x4d1   : > { %v17264_v60 = vadd.f32 %v17258_v59, %v4814_v0 }
 0x4d2   : > { %v5009_v55 = vsel %vm5005_vm3, %v17261_v6, -inf }
 0x4d3   : > { %5010 = vmax.xlane.f32.xlu0 %v5009_v55  ;;  %v13195_v7 = vpop.f32.mrb[2].mxu1  ;;  %v5006_v61 = vsel %vm5005_vm3, %v17264_v60, -inf }
 0x4d4   : > { %v17269_v34 = vadd.f32 %v13195_v7, %v17258_v59  ;;  %v4824_v62 = vpop.f32.mrb[3].mxu1 }
 0x4d5   : > { %v17272_v38 = vadd.f32 %v17258_v59, %v4824_v62 }
 0x4d6   : > { %v5015_v4 = vsel %vm5005_vm3, %v17269_v34, -inf }
 0x4d7   : > { %5007 = vmax.xlane.f32.xlu0 %v5006_v61  ;;  %5016 = vmax.xlane.f32.xlu1 %v5015_v4  ;;  %v13198_v44 = vpop.f32.mrb[4].mxu1  ;;  %v5012_v31 = vsel %vm5005_vm3, %v17272_v38, -inf }
 0x4d8   : > { %v4834_v48 = vpop.f32.mrb[5].mxu1  ;;  %v17282_v30 = vadd.f32 %v13198_v44, %v17258_v59 }
 0x4d9   : > { %v17279_v43 = vadd.f32 %v17258_v59, %v4834_v48 }
 0x4da   : > { %v5021_v24 = vsel %vm5005_vm3, %v17282_v30, -inf }
 0x4db   : > { %5013 = vmax.xlane.f32.xlu1 %v5012_v31  ;;  %v13201_v50 = vpop.f32.mrb[6].mxu1  ;;  %v5018_v51 = vsel %vm5005_vm3, %v17279_v43, -inf }
 0x4dc   : > { %5019 = vmax.xlane.f32.xlu0 %v5018_v51  ;;  %v4844_v46 = vpop.f32.mrb[7].mxu1  ;;  %v17292_v36 = vadd.f32 %v13201_v50, %v17258_v59 }
 0x4dd   : > { %v17289_v22 = vadd.f32 %v17258_v59, %v4844_v46 }
 0x4de   : > { %v5027_v35 = vsel %vm5005_vm3, %v17292_v36, -inf }
 0x4df   : > { %5022 = vmax.xlane.f32.xlu1 %v5021_v24  ;;  %v13204_v3 = vpop.f32.mrb[8].mxu1  ;;  %v5024_v28 = vsel %vm5005_vm3, %v17289_v22, -inf }
 0x4e0   : > { %5025 = vmax.xlane.f32.xlu0 %v5024_v28  ;;  %v4854_v15 = vpop.f32.mrb[9].mxu1  ;;  %v17302_v16 = vadd.f32 %v13204_v3, %v17258_v59 }
 0x4e1   : > { %v17299_v23 = vadd.f32 %v17258_v59, %v4854_v15 }
 0x4e2   : > { %v5033_v53 = vsel %vm5005_vm3, %v17302_v16, -inf }
 0x4e3   : > { %5028 = vmax.xlane.f32.xlu1 %v5027_v35  ;;  %v13207_v11 = vpop.f32.mrb[10].mxu1  ;;  %v5030_v54 = vsel %vm5005_vm3, %v17299_v23, -inf }
 0x4e4   : > { %5031 = vmax.xlane.f32.xlu0 %v5030_v54  ;;  %v4864_v21 = vpop.f32.mrb[11].mxu1  ;;  %v17312_v57 = vadd.f32 %v13207_v11, %v17258_v59 }
 0x4e5   : > { %v17309_v9 = vadd.f32 %v17258_v59, %v4864_v21 }
 0x4e6   : > { %v5039_v49 = vsel %vm5005_vm3, %v17312_v57, -inf }
 0x4e7   : > { %5034 = vmax.xlane.f32.xlu1 %v5033_v53  ;;  %v13210_v2 = vpop.f32.mrb[12].mxu1  ;;  %v5036_v18 = vsel %vm5005_vm3, %v17309_v9, -inf }
 0x4e8   : > { %5037 = vmax.xlane.f32.xlu0 %v5036_v18  ;;  %v4874_v17 = vpop.f32.mrb[13].mxu1  ;;  %v17322_v56 = vadd.f32 %v13210_v2, %v17258_v59 }
 0x4e9   : > { %v17319_v37 = vadd.f32 %v17258_v59, %v4874_v17 }
 0x4ea   : > { %v5045_v41 = vsel %vm5005_vm3, %v17322_v56, -inf }
 0x4eb   : > { %v6588_v32 = vpop.f32.mrb[108].mxu0  ;;  %5040 = vmax.xlane.f32.xlu1 %v5039_v49  ;;  %v13213_v14 = vpop.f32.mrb[14].mxu1  ;;  %v5042_v39 = vsel %vm5005_vm3, %v17319_v37, -inf }
 0x4ec   : > { %v17331_v13 = vadd.f32 %v14820_v52, %v6588_v32  ;;  %v13282_v5 = vpop.f32.mrb[109].mxu0  ;;  %5043 = vmax.xlane.f32.xlu0 %v5042_v39  ;;  %v4884_v29 = vpop.f32.mrb[15].mxu1  ;;  %v17338_v8 = vadd.f32 %v13213_v14, %v17258_v59 }
 0x4ed   : > { %v17334_v42 = vadd.f32 %v17258_v59, %v4884_v29  ;;  %v6591_v19 = vpop.f32.mrb[110].mxu0 }
 0x4ee   : > { %v12361_v12 = vmul.f32 -1.442695, %v17331_v13  ;;  %v17340_v25 = vadd.f32 %v14820_v52, %v6591_v19  ;;  %v13283_v63 = vpop.f32.mrb[111].mxu0  ;;  %v5051_v58 = vsel %vm5005_vm3, %v17338_v8, -inf }
 0x4ef   : > { %5046 = vmax.xlane.f32.xlu1 %v5045_v41  ;;  %v13216_v10 = vpop.f32.mrb[16].mxu1  ;;  %v5048_v27 = vsel %vm5005_vm3, %v17334_v42, -inf }
 0x4f0   : > { %14490 = vpow2.f32 %v12361_v12  ;;  %v12362_v33 = vmul.f32 -1.442695, %v17340_v25  ;;  %5049 = vmax.xlane.f32.xlu0 %v5048_v27  ;;  %v4894_v20 = vpop.f32.mrb[17].mxu1  ;;  %v17351_v26 = vadd.f32 %v13216_v10, %v17258_v59 }
 0x4f1   : > { %v17348_v1 = vadd.f32 %v17258_v59, %v4894_v20 }
 0x4f2   : > { %14492 = vpow2.f32 %v12362_v33  ;;  %v5057_v62 = vsel %vm5005_vm3, %v17351_v26, -inf }
 0x4f3   : > { %5052 = vmax.xlane.f32.xlu1 %v5051_v58  ;;  %v13219_v47 = vpop.f32.mrb[18].mxu1  ;;  %v5054_v45 = vsel %vm5005_vm3, %v17348_v1, -inf }
 0x4f4   : > { %5055 = vmax.xlane.f32.xlu0 %v5054_v45  ;;  %v4904_v0 = vpop.f32.mrb[19].mxu1  ;;  %v17361_v7 = vadd.f32 %v13219_v47, %v17258_v59 }
 0x4f5   : > { %v17358_v55 = vadd.f32 %v17258_v59, %v4904_v0 }
 0x4f6   : > { %v5063_v51 = vsel %vm5005_vm3, %v17361_v7, -inf }
 0x4f7   : > { %5058 = vmax.xlane.f32.xlu1 %v5057_v62  ;;  %v13222_v61 = vpop.f32.mrb[20].mxu1  ;;  %v5060_v4 = vsel %vm5005_vm3, %v17358_v55, -inf }
 0x4f8   : > { %5061 = vmax.xlane.f32.xlu0 %v5060_v4  ;;  %v4914_v44 = vpop.f32.mrb[21].mxu1  ;;  %v17371_v50 = vadd.f32 %v13222_v61, %v17258_v59 }
 0x4f9   : > { %v17368_v48 = vadd.f32 %v17258_v59, %v4914_v44 }
 0x4fa   : > { %v14491_v31 = vpop.eup %14490  ;;  %v5069_v21 = vsel %vm5005_vm3, %v17371_v50, -inf }
 0x4fb   : > { %v6601_v46 = vadd.f32 1.0, %v14491_v31  ;;  %5064 = vmax.xlane.f32.xlu1 %v5063_v51  ;;  %v13225_v24 = vpop.f32.mrb[22].mxu1  ;;  %v5066_v3 = vsel %vm5005_vm3, %v17368_v48, -inf  ;;  %v17443_v51 = vld [vmem:[%s21300_s3 + $0x68] sm:$0xff]  }
 0x4fc   : > { %v14493_v28 = vpop.eup %14492  ;;  %5067 = vmax.xlane.f32.xlu0 %v5066_v3  ;;  %v4924_v15 = vpop.f32.mrb[23].mxu1  ;;  %v17381_v54 = vadd.f32 %v13225_v24, %v17258_v59  ;;  %v1403_v24 = vld [vmem:[%s21400_s15] sm:$0xff]   ;;  %s17542_s15 = sshll.u32 %s1188_s5, 2  ;;  %s21441_s5 = scalar_lea.vmem [#allocation11], %s15877_s12 }
 0x4fd   : > { %14494 = vrcp.f32 %v6601_v46  ;;  %v6602_v35 = vadd.f32 1.0, %v14493_v28  ;;  %v17378_v11 = vadd.f32 %v17258_v59, %v4924_v15  ;;  %v17452_v46 = vld [vmem:[%s21300_s3 + $0x70] sm:$0xff]   ;;  %v17461_v3 = vld [vmem:[%s21300_s3 + $0x78] sm:$0xff]   ;;  %s17552_s7 = scalar_lea.vmem %s21402_s24, %s17542_s15  ;;  %s17699_s30 = scalar_lea.vmem %s21411_s9, %s17542_s15 }
 0x4fe   : > { %v5075_v32 = vsel %vm5005_vm3, %v17381_v54, -inf  ;;  %v14825_v28 = vld [vmem:[%s21303_s17 + $0x18] sm:$0xff]  ;;  %s21455_s15 = sld [smem:[#allocation194_spill]]  ;;  %s12601_s9 = sshll.u32 %s21298_s1, 5 }
 0x4ff   : > { %14496 = vrcp.f32 %v6602_v35  ;;  %5070 = vmax.xlane.f32.xlu1 %v5069_v21  ;;  %v13228_v53 = vpop.f32.mrb[24].mxu1  ;;  %v5072_v2 = vsel %vm5005_vm3, %v17378_v11, -inf  ;;  %s21900_s24 = sld [smem:[#allocation196_spill]] }
 0x500   : > { %5073 = vmax.xlane.f32.xlu0 %v5072_v2  ;;  %v4934_v18 = vpop.f32.mrb[25].mxu1  ;;  %v17391_v49 = vadd.f32 %v13228_v53, %v17258_v59 }
 0x501   : > { %v17388_v17 = vadd.f32 %v17258_v59, %v4934_v18 }
 0x502   : > { %v5081_v19 = vsel %vm5005_vm3, %v17391_v49, -inf }
 0x503   : > { %5076 = vmax.xlane.f32.xlu1 %v5075_v32  ;;  %v13231_v14 = vpop.f32.mrb[26].mxu1  ;;  %v5078_v39 = vsel %vm5005_vm3, %v17388_v17, -inf }
 0x504   : > { %5079 = vmax.xlane.f32.xlu0 %v5078_v39  ;;  %v4944_v52 = vpop.f32.mrb[27].mxu1  ;;  %v17401_v29 = vadd.f32 %v13231_v14, %v17258_v59 }
 0x505   : > { %v17398_v5 = vadd.f32 %v17258_v59, %v4944_v52 }
 0x506   : > { %v5087_v45 = vsel %vm5005_vm3, %v17401_v29, -inf }
 0x507   : > { %v14495_v12 = vpop.eup %14494  ;;  %5082 = vmax.xlane.f32.xlu1 %v5081_v19  ;;  %v13234_v63 = vpop.f32.mrb[28].mxu1  ;;  %v5084_v41 = vsel %vm5005_vm3, %v17398_v5, -inf }
 0x508   : > { %v6607_v10 = vmul.f32 %v14495_v12, %v17331_v13  ;;  %5085 = vmax.xlane.f32.xlu0 %v5084_v41  ;;  %v4954_v27 = vpop.f32.mrb[29].mxu1  ;;  %v17413_v47 = vadd.f32 %v13234_v63, %v17258_v59 }
 0x509   : > { %v14497_v33 = vpop.eup %14496  ;;  %v17409_v20 = vadd.f32 %v17258_v59, %v4954_v27 }
 0x50a   : > { %v6608_v58 = vmul.f32 %v14497_v33, %v17340_v25  ;;  %13286 = vmatprep.mubr.msk.f32.mxu0 %vm1957_vm2, %v6607_v10  ;;  %v17424_v25 = vld [vmem:[%s21300_s3 + $0x60] sm:$0xff]   ;;  %v5093_v44 = vsel %vm5005_vm3, %v17413_v47, -inf }
 0x50b   : > { %5088 = vmax.xlane.f32.xlu1 %v5087_v45  ;;  %v13237_v0 = vpop.f32.mrb[30].mxu1  ;;  %v5090_v13 = vsel %vm5005_vm3, %v17409_v20, -inf }
 0x50c   : > { %13287 = vmatmul.mubr.msk.f32.vlgmr.msra.gmra.mrb[100].mxu0 %vm1957_vm2, %v6608_v58  ;;  %5091 = vmax.xlane.f32.xlu0 %v5090_v13  ;;  %v4964_v62 = vpop.f32.mrb[31].mxu1  ;;  %v17433_v4 = vadd.f32 %v13237_v0, %v17258_v59 }
 0x50d   : > { %13290 = vmatpush3.bf16.msra.mxu0 %v17424_v25  ;;  %v17428_v61 = vadd.f32 %v17258_v59, %v4964_v62  ;;  %13297 = vmatprep.mubr.msk.bf16.mxu0 %vm15273_vm1, %v21356_v40 }
 0x50e   : > { %13291 = vmatprep.subr.bf16.mxu0 %v21356_v40  ;;  %v5099_v59 = vsel %vm5005_vm3, %v17433_v4, -inf }
 0x50f   : > { %5094 = vmax.xlane.f32.xlu1 %v5093_v44  ;;  %v5096_v31 = vsel %vm5005_vm3, %v17428_v61, -inf }
 0x510   : > { %5097 = vmax.xlane.f32.xlu0 %v5096_v31 }
 0x511   : > { %13292 = vmatpush3.bf16.msra.mxu0 %v17443_v51 }
 0x512   : > { %13293 = vmatprep.subr.bf16.mxu0 %v21356_v40 }
 0x513   : > { %5100 = vmax.xlane.f32.xlu1 %v5099_v59 }
 0x515   : > { %13294 = vmatpush3.bf16.msra.mxu0 %v17452_v46 }
 0x516   : > { %13295 = vmatprep.subr.bf16.mxu0 %v21356_v40 }
 0x519   : > { %13296 = vmatpush3.bf16.msra.mxu0 %v17461_v3 }
 0x51a   : > { %13301 = vmatprep.subr.mxu0 %v14825_v28 }
 0x51c   : > { %13298 = vmatmul.mubr.msk.bf16.vlgmr.msra.gmra.mrb[112].mxu0 %vm1523_vm0, %v1403_v24 }
 0x51d   : > { %13302 = vmatpush3.msra.mxu0 %v14825_v28 }
 0x51e   : > { %13306 = vmatprep.subr.bf16.mxu0 %v21356_v40 }
 0x560   : > { %v5011_v15 = vpop.xlane.xlu0 %5010 }
 0x561   : > { %v5103_v35 = vsub.f32 %v17261_v6, %v5011_v15 }
 0x563   : > { %v5136_v21 = vmul.f32 1.442695, %v5103_v35 }
 0x564   : > { %v5008_v53 = vpop.xlane.xlu0 %5007  ;;  %v5017_v2 = vpop.xlane.xlu1 %5016 }
 0x565   : > { %14498 = vpow2.f32 %v5136_v21  ;;  %v5102_v18 = vsub.f32 %v17264_v60, %v5008_v53  ;;  %v5105_v32 = vsub.f32 %v17269_v34, %v5017_v2 }
 0x567   : > { %v5134_v14 = vmul.f32 1.442695, %v5102_v18  ;;  %v5140_v39 = vmul.f32 1.442695, %v5105_v32 }
 0x568   : > { %v5014_v52 = vpop.xlane.xlu1 %5013 }
 0x569   : > { %14500 = vpow2.f32 %v5134_v14  ;;  %v5104_v19 = vsub.f32 %v17272_v38, %v5014_v52  ;;  %v5020_v12 = vpop.xlane.xlu0 %5019 }
 0x56a   : > { %14502 = vpow2.f32 %v5140_v39  ;;  %v5106_v63 = vsub.f32 %v17279_v43, %v5020_v12 }
 0x56b   : > { %v5138_v41 = vmul.f32 1.442695, %v5104_v19 }
 0x56c   : > { %v5142_v6 = vmul.f32 1.442695, %v5106_v63  ;;  %v5023_v10 = vpop.xlane.xlu1 %5022 }
 0x56d   : > { %14504 = vpow2.f32 %v5138_v41  ;;  %v5107_v27 = vsub.f32 %v17282_v30, %v5023_v10  ;;  %v5026_v33 = vpop.xlane.xlu0 %5025 }
 0x56e   : > { %v5108_v60 = vsub.f32 %v17289_v22, %v5026_v33  ;;  %14506 = vpow2.f32 %v5142_v6 }
 0x56f   : > { %v17476_v34 = vpop.eup %14498  ;;  %v5144_v58 = vmul.f32 1.442695, %v5107_v27 }
 0x570   : > { %v5146_v45 = vmul.f32 1.442695, %v5108_v60  ;;  %v5029_v0 = vpop.xlane.xlu1 %5028  ;;  %v5201_v38 = vsel %vm5005_vm3, %v17476_v34, 0.0 }
 0x571   : > { %14508 = vpow2.f32 %v5144_v58  ;;  %v5109_v43 = vsub.f32 %v17292_v36, %v5029_v0  ;;  %v5032_v13 = vpop.xlane.xlu0 %5031  ;;  %5202 = vadd.xlane.f32.xlu1 %v5201_v38 }
 0x572   : > { %v5110_v62 = vsub.f32 %v17299_v23, %v5032_v13  ;;  %14510 = vpow2.f32 %v5146_v45 }
 0x573   : > { %v17482_v30 = vpop.eup %14500  ;;  %v5148_v22 = vmul.f32 1.442695, %v5109_v43 }
 0x574   : > { %v17484_v44 = vpop.eup %14502  ;;  %v5150_v31 = vmul.f32 1.442695, %v5110_v62  ;;  %v5035_v59 = vpop.xlane.xlu1 %5034  ;;  %v5198_v24 = vsel %vm5005_vm3, %v17482_v30, 0.0 }
 0x575   : > { %14512 = vpow2.f32 %v5148_v22  ;;  %v5111_v28 = vsub.f32 %v17302_v16, %v5035_v59  ;;  %v5038_v15 = vpop.xlane.xlu0 %5037  ;;  %v5207_v36 = vsel %vm5005_vm3, %v17484_v44, 0.0  ;;  %5199 = vadd.xlane.f32.xlu0 %v5198_v24 }
 0x576   : > { %v5112_v23 = vsub.f32 %v17309_v9, %v5038_v15  ;;  %5208 = vadd.xlane.f32.xlu1 %v5207_v36  ;;  %14514 = vpow2.f32 %v5150_v31 }
 0x577   : > { %v17492_v35 = vpop.eup %14504  ;;  %v5152_v21 = vmul.f32 1.442695, %v5111_v28 }
 0x578   : > { %v5154_v53 = vmul.f32 1.442695, %v5112_v23  ;;  %v5041_v2 = vpop.xlane.xlu1 %5040  ;;  %v5204_v18 = vsel %vm5005_vm3, %v17492_v35, 0.0  ;;  %v17496_v32 = vpop.eup %14506 }
 0x579   : > { %14516 = vpow2.f32 %v5152_v21  ;;  %v5113_v16 = vsub.f32 %v17312_v57, %v5041_v2  ;;  %v5044_v14 = vpop.xlane.xlu0 %5043  ;;  %5205 = vadd.xlane.f32.xlu0 %v5204_v18  ;;  %v5210_v41 = vsel %vm5005_vm3, %v17496_v32, 0.0 }
 0x57a   : > { %v5114_v9 = vsub.f32 %v17319_v37, %v5044_v14  ;;  %14518 = vpow2.f32 %v5154_v53  ;;  %v1407_v14 = vld [vmem:[%s17552_s7] sm:$0xff]  }
 0x57b   : > { %v17500_v39 = vpop.eup %14508  ;;  %v5156_v52 = vmul.f32 1.442695, %v5113_v16  ;;  %13332 = vmatmul.mubr.msk.bf16.vlgmr.msra.gmra.mrb[64].mxu1 %vm1523_vm0, %v1407_v14 }
 0x57c   : > { %v5158_v19 = vmul.f32 1.442695, %v5114_v9  ;;  %v5047_v12 = vpop.xlane.xlu1 %5046  ;;  %v5213_v63 = vsel %vm5005_vm3, %v17500_v39, 0.0  ;;  %v17506_v6 = vpop.eup %14510  ;;  %13358 = vmatpush3.bf16.msra.mxu1 %v17424_v25  ;;  %13365 = vmatprep.mubr.msk.bf16.mxu1 %vm15273_vm1, %v21356_v40 }
 0x57d   : > { %14520 = vpow2.f32 %v5156_v52  ;;  %v5115_v57 = vsub.f32 %v17322_v56, %v5047_v12  ;;  %v5050_v10 = vpop.xlane.xlu0 %5049  ;;  %5214 = vadd.xlane.f32.xlu1 %v5213_v63  ;;  %5211 = vadd.xlane.f32.xlu0 %v5210_v41  ;;  %v5216_v45 = vsel %vm5005_vm3, %v17506_v6, 0.0 }
 0x57e   : > { %v5116_v37 = vsub.f32 %v17334_v42, %v5050_v10  ;;  %14522 = vpow2.f32 %v5158_v19  ;;  %13359 = vmatprep.subr.bf16.mxu1 %v21356_v40 }
 0x57f   : > { %v17511_v27 = vpop.eup %14512  ;;  %v5160_v33 = vmul.f32 1.442695, %v5115_v57 }
 0x580   : > { %v5162_v60 = vmul.f32 1.442695, %v5116_v37  ;;  %v5053_v58 = vpop.xlane.xlu1 %5052  ;;  %v5219_v56 = vsel %vm5005_vm3, %v17511_v27, 0.0  ;;  %v17521_v42 = vpop.eup %14514  ;;  %13360 = vmatpush3.bf16.msra.mxu1 %v17443_v51 }
 0x581   : > { %14524 = vpow2.f32 %v5160_v33  ;;  %v5117_v0 = vsub.f32 %v17338_v8, %v5053_v58  ;;  %v5056_v38 = vpop.xlane.xlu0 %5055  ;;  %5220 = vadd.xlane.f32.xlu1 %v5219_v56  ;;  %5217 = vadd.xlane.f32.xlu0 %v5216_v45  ;;  %v5222_v8 = vsel %vm5005_vm3, %v17521_v42, 0.0  ;;  %v21082_v33 = vmov 0  }
 0x582   : > { %v5118_v43 = vsub.f32 %v17348_v1, %v5056_v38  ;;  %14526 = vpow2.f32 %v5162_v60  ;;  %13688 = vset.pattern.permute.xlu1 %v21082_v33  ;;  %13361 = vmatprep.subr.bf16.mxu1 %v21356_v40 }
 0x583   : > { %v17527_v13 = vpop.eup %14516  ;;  %v5164_v62 = vmul.f32 1.442695, %v5117_v0 }
 0x584   : > { %v5166_v22 = vmul.f32 1.442695, %v5118_v43  ;;  %v5059_v31 = vpop.xlane.xlu1 %5058  ;;  %v5225_v59 = vsel %vm5005_vm3, %v17527_v13, 0.0  ;;  %v17535_v24 = vpop.eup %14518  ;;  %13362 = vmatpush3.bf16.msra.mxu1 %v17452_v46 }
 0x585   : > { %14528 = vpow2.f32 %v5164_v62  ;;  %v5119_v1 = vsub.f32 %v17351_v26, %v5059_v31  ;;  %v5062_v28 = vpop.xlane.xlu0 %5061  ;;  %5226 = vadd.xlane.f32.xlu1 %v5225_v59  ;;  %5223 = vadd.xlane.f32.xlu0 %v5222_v8  ;;  %v5228_v26 = vsel %vm5005_vm3, %v17535_v24, 0.0  ;;  %v21080_v62 = vmov 2  }
 0x586   : > { %v5120_v15 = vsub.f32 %v17358_v55, %v5062_v28  ;;  %14530 = vpow2.f32 %v5166_v22  ;;  %13691 = vset.pattern.permute.xlu0 %v21080_v62  ;;  %13363 = vmatprep.subr.bf16.mxu1 %v21356_v40 }
 0x587   : > { %v17540_v36 = vpop.eup %14520  ;;  %v5168_v23 = vmul.f32 1.442695, %v5119_v1 }
 0x588   : > { %v5170_v21 = vmul.f32 1.442695, %v5120_v15  ;;  %v5065_v53 = vpop.xlane.xlu1 %5064  ;;  %v5231_v2 = vsel %vm5005_vm3, %v17540_v36, 0.0  ;;  %v17554_v55 = vpop.eup %14522  ;;  %13364 = vmatpush3.bf16.msra.mxu1 %v17461_v3 }
 0x589   : > { %14532 = vpow2.f32 %v5168_v23  ;;  %v5121_v18 = vsub.f32 %v17361_v7, %v5065_v53  ;;  %v5068_v16 = vpop.xlane.xlu0 %5067  ;;  %5232 = vadd.xlane.f32.xlu1 %v5231_v2  ;;  %5229 = vadd.xlane.f32.xlu0 %v5228_v26  ;;  %v5234_v57 = vsel %vm5005_vm3, %v17554_v55, 0.0 }
 0x58a   : > { %v5122_v9 = vsub.f32 %v17368_v48, %v5068_v16  ;;  %14534 = vpow2.f32 %v5170_v21 }
 0x58b   : > { %v17559_v52 = vpop.eup %14524  ;;  %v5172_v19 = vmul.f32 1.442695, %v5121_v18 }
 0x58c   : > { %v5174_v12 = vmul.f32 1.442695, %v5122_v9  ;;  %v5071_v63 = vpop.xlane.xlu1 %5070  ;;  %v5237_v41 = vsel %vm5005_vm3, %v17559_v52, 0.0  ;;  %v17566_v7 = vpop.eup %14526 }
 0x58d   : > { %14536 = vpow2.f32 %v5172_v19  ;;  %v5123_v10 = vsub.f32 %v17371_v50, %v5071_v63  ;;  %v5074_v48 = vpop.xlane.xlu0 %5073  ;;  %5238 = vadd.xlane.f32.xlu1 %v5237_v41  ;;  %5235 = vadd.xlane.f32.xlu0 %v5234_v57 }
 0x58e   : > { %v5124_v37 = vsub.f32 %v17378_v11, %v5074_v48  ;;  %14538 = vpow2.f32 %v5174_v12  ;;  %v5240_v11 = vsel %vm5005_vm3, %v17566_v7, 0.0 }
 0x58f   : > { %v17572_v60 = vpop.eup %14528  ;;  %v5176_v58 = vmul.f32 1.442695, %v5123_v10 }
 0x590   : > { %v5178_v50 = vmul.f32 1.442695, %v5124_v37  ;;  %v5077_v56 = vpop.xlane.xlu1 %5076  ;;  %v5243_v45 = vsel %vm5005_vm3, %v17572_v60, 0.0  ;;  %v17581_v0 = vpop.eup %14530 }
 0x591   : > { %14540 = vpow2.f32 %v5176_v58  ;;  %v5125_v25 = vsub.f32 %v17381_v54, %v5077_v56  ;;  %v5080_v38 = vpop.xlane.xlu0 %5079  ;;  %5244 = vadd.xlane.f32.xlu1 %v5243_v45  ;;  %5241 = vadd.xlane.f32.xlu0 %v5240_v11  ;;  %v5246_v1 = vsel %vm5005_vm3, %v17581_v0, 0.0 }
 0x592   : > { %v5126_v43 = vsub.f32 %v17388_v17, %v5080_v38  ;;  %14542 = vpow2.f32 %v5178_v50 }
 0x593   : > { %v17587_v22 = vpop.eup %14532  ;;  %v5180_v31 = vmul.f32 1.442695, %v5125_v25 }
 0x594   : > { %v5182_v59 = vmul.f32 1.442695, %v5126_v43  ;;  %v5083_v8 = vpop.xlane.xlu1 %5082  ;;  %v5249_v54 = vsel %vm5005_vm3, %v17587_v22, 0.0  ;;  %v17594_v17 = vpop.eup %14534 }
 0x595   : > { %14544 = vpow2.f32 %v5180_v31  ;;  %v5127_v28 = vsub.f32 %v17391_v49, %v5083_v8  ;;  %v5086_v51 = vpop.xlane.xlu0 %5085  ;;  %5250 = vadd.xlane.f32.xlu1 %v5249_v54  ;;  %5247 = vadd.xlane.f32.xlu0 %v5246_v1  ;;  %v5252_v49 = vsel %vm5005_vm3, %v17594_v17, 0.0 }
 0x596   : > { %v5128_v15 = vsub.f32 %v17398_v5, %v5086_v51  ;;  %14546 = vpow2.f32 %v5182_v59 }
 0x597   : > { %v17599_v23 = vpop.eup %14536  ;;  %v5184_v21 = vmul.f32 1.442695, %v5127_v28 }
 0x598   : > { %v5186_v53 = vmul.f32 1.442695, %v5128_v15  ;;  %v5089_v2 = vpop.xlane.xlu1 %5088  ;;  %v5255_v26 = vsel %vm5005_vm3, %v17599_v23, 0.0  ;;  %v17606_v18 = vpop.eup %14538 }
 0x599   : > { %14548 = vpow2.f32 %v5184_v21  ;;  %v5129_v5 = vsub.f32 %v17401_v29, %v5089_v2  ;;  %v5092_v46 = vpop.xlane.xlu0 %5091  ;;  %5256 = vadd.xlane.f32.xlu1 %v5255_v26  ;;  %5253 = vadd.xlane.f32.xlu0 %v5252_v49  ;;  %v5258_v41 = vsel %vm5005_vm3, %v17606_v18, 0.0  ;;  %v17663_v26 = vld [vmem:[%s21306_s6 + $0x3] ss:$0 sm:$0xff] }
 0x59a   : > { %v5130_v16 = vsub.f32 %v17409_v20, %v5092_v46  ;;  %14550 = vpow2.f32 %v5186_v53 }
 0x59b   : > { %v17611_v14 = vpop.eup %14540  ;;  %v5188_v9 = vmul.f32 1.442695, %v5129_v5 }
 0x59c   : > { %v5190_v19 = vmul.f32 1.442695, %v5130_v16  ;;  %v5095_v12 = vpop.xlane.xlu1 %5094  ;;  %v5261_v63 = vsel %vm5005_vm3, %v17611_v14, 0.0  ;;  %v17617_v29 = vpop.eup %14542 }
 0x59d   : > { %14552 = vpow2.f32 %v5188_v9  ;;  %v5131_v57 = vsub.f32 %v17413_v47, %v5095_v12  ;;  %5262 = vadd.xlane.f32.xlu1 %v5261_v63  ;;  %5259 = vadd.xlane.f32.xlu0 %v5258_v41  ;;  %v5098_v20 = vpop.xlane.xlu0 %5097  ;;  %v5264_v56 = vsel %vm5005_vm3, %v17617_v29, 0.0 }
 0x59e   : > { %v5132_v3 = vsub.f32 %v17428_v61, %v5098_v20  ;;  %14554 = vpow2.f32 %v5190_v19 }
 0x59f   : > { %v17621_v10 = vpop.eup %14544  ;;  %v5192_v48 = vmul.f32 1.442695, %v5131_v57 }
 0x5a0   : > { %v5194_v37 = vmul.f32 1.442695, %v5132_v3  ;;  %v5101_v58 = vpop.xlane.xlu1 %5100  ;;  %v5267_v50 = vsel %vm5005_vm3, %v17621_v10, 0.0  ;;  %v17627_v45 = vpop.eup %14546 }
 0x5a1   : > { %21403 = vst [vmem:[#allocation80_spill] sm:$0xff] %v17627_v45  ;;  %14556 = vpow2.f32 %v5192_v48  ;;  %v5133_v47 = vsub.f32 %v17433_v4, %v5101_v58  ;;  %5268 = vadd.xlane.f32.xlu1 %v5267_v50  ;;  %5265 = vadd.xlane.f32.xlu0 %v5264_v56  ;;  %v5270_v38 = vsel %vm5005_vm3, %v17627_v45, 0.0 }
 0x5a2   : > { %14558 = vpow2.f32 %v5194_v37 }
 0x5a3   : > { %v17630_v61 = vpop.eup %14548  ;;  %v5196_v11 = vmul.f32 1.442695, %v5133_v47 }
 0x5a4   : > { %v5273_v25 = vsel %vm5005_vm3, %v17630_v61, 0.0  ;;  %v17636_v43 = vpop.eup %14550 }
 0x5a5   : > { %21404 = vst [vmem:[#allocation41_spill] sm:$0xff] %v17636_v43  ;;  %14560 = vpow2.f32 %v5196_v11  ;;  %5274 = vadd.xlane.f32.xlu1 %v5273_v25  ;;  %5271 = vadd.xlane.f32.xlu0 %v5270_v38  ;;  %v5276_v59 = vsel %vm5005_vm3, %v17636_v43, 0.0 }
 0x5a7   : > { %v17638_v31 = vpop.eup %14552 }
 0x5a8   : > { %21405 = vst [vmem:[#allocation82_spill] sm:$0xff] %v17638_v31  ;;  %v5279_v4 = vsel %vm5005_vm3, %v17638_v31, 0.0  ;;  %v17644_v8 = vpop.eup %14554 }
 0x5a9   : > { %21406 = vst [vmem:[#allocation42_spill] sm:$0xff] %v17644_v8  ;;  %5280 = vadd.xlane.f32.xlu1 %v5279_v4  ;;  %5277 = vadd.xlane.f32.xlu0 %v5276_v59  ;;  %v5282_v28 = vsel %vm5005_vm3, %v17644_v8, 0.0 }
 0x5ab   : > { %v17646_v54 = vpop.eup %14556 }
 0x5ac   : > { %21407 = vst [vmem:[#allocation43_spill] sm:$0xff] %v17646_v54  ;;  %v5285_v1 = vsel %vm5005_vm3, %v17646_v54, 0.0  ;;  %v17652_v51 = vpop.eup %14558 }
 0x5ad   : > { %21408 = vst [vmem:[#allocation81_spill] sm:$0xff] %v17652_v51  ;;  %5286 = vadd.xlane.f32.xlu1 %v5285_v1  ;;  %5283 = vadd.xlane.f32.xlu0 %v5282_v28  ;;  %v5288_v53 = vsel %vm5005_vm3, %v17652_v51, 0.0  ;;  %v21084_v28 = vmov 1  }
 0x5af   : > { %v17654_v15 = vpop.eup %14560 }
 0x5b0   : > { %21409 = vst [vmem:[#allocation44_spill] sm:$0xff] %v17654_v15  ;;  %v5291_v21 = vsel %vm5005_vm3, %v17654_v15, 0.0 }
 0x5b1   : > { %5292 = vadd.xlane.f32.xlu1 %v5291_v21  ;;  %5289 = vadd.xlane.f32.xlu0 %v5288_v53  ;;  %v14827_v21 = vld [vmem:[%s21300_s3] sm:$0xff]  }
 0x5ef   : > { %v6734_v2 = vpop.f32.mrb[112].mxu0 }
 0x5f0   : > { %v6735_v49 = vadd.f32 %v17663_v26, %v6734_v2  ;;  %v13299_v5 = vpop.f32.mrb[113].mxu0 }
 0x5f1   : > { %v6737_v46 = vpop.f32.mrb[114].mxu0 }
 0x5f2   : > { %v12367_v16 = vmul.f32 -1.442695, %v6735_v49  ;;  %v6738_v9 = vadd.f32 %v17663_v26, %v6737_v46  ;;  %v13300_v19 = vpop.f32.mrb[115].mxu0 }
 0x5f3   : > { %v1405_v19 = vld [vmem:[%s17699_s30] sm:$0xff]  }
 0x5f4   : > { %14562 = vpow2.f32 %v12367_v16  ;;  %v12368_v12 = vmul.f32 -1.442695, %v6738_v9  ;;  %v14829_v16 = vld [vmem:[%s21300_s3 + $0x10] sm:$0xff]  }
 0x5f6   : > { %14564 = vpow2.f32 %v12368_v12 }
 0x5fe   : > { %v14563_v63 = vpop.eup %14562  ;;  %v5203_v41 = vpop.xlane.xlu1 %5202 }
 0x5ff   : > { %v6747_v57 = vadd.f32 1.0, %v14563_v63  ;;  %14566 = vrcp.f32 %v5203_v41  ;;  %v14830_v41 = vld [vmem:[%s21300_s3 + $0x18] sm:$0xff]  }
 0x600   : > { %v14565_v20 = vpop.eup %14564 }
 0x601   : > { %14568 = vrcp.f32 %v6747_v57  ;;  %v6748_v3 = vadd.f32 1.0, %v14565_v20 }
 0x602   : > { %v5200_v48 = vpop.xlane.xlu0 %5199 }
 0x603   : > { %14570 = vrcp.f32 %v6748_v3  ;;  %v5209_v37 = vpop.xlane.xlu1 %5208  ;;  %v14831_v3 = vld [vmem:[%s21303_s17] sm:$0xff] }
 0x604   : > { %14572 = vrcp.f32 %v5200_v48 }
 0x605   : > { %14574 = vrcp.f32 %v5209_v37 }
 0x606   : > { %v5206_v38 = vpop.xlane.xlu0 %5205 }
 0x607   : > { %14576 = vrcp.f32 %v5206_v38 }
 0x609   : > { %v14567_v58 = vpop.eup %14566 }
 0x60a   : > { %v5215_v50 = vpop.xlane.xlu1 %5214  ;;  %v17668_v56 = vmul.f32 %v14567_v58, %v17476_v34  ;;  %v5212_v2 = vpop.xlane.xlu0 %5211  ;;  %v17728_v58 = vld [vmem:[%s21303_s17 + $0x8] sm:$0xff] }
 0x60b   : > { %v14569_v47 = vpop.eup %14568  ;;  %14578 = vrcp.f32 %v5215_v50 }
 0x60c   : > { %21410 = vst [vmem:[#allocation83_spill] sm:$0xff] %v17668_v56  ;;  %v6753_v11 = vmul.f32 %v14569_v47, %v6735_v49  ;;  %5397 = vperm.xlu1 %13688, %v17668_v56   ;;  %14580 = vrcp.f32 %v5212_v2 }
 0x60d   : > { %v14571_v25 = vpop.eup %14570 }
 0x60e   : > { %v6754_v4 = vmul.f32 %v14571_v25, %v6738_v9  ;;  %13303 = vmatprep.mubr.msk.f32.mxu0 %vm1957_vm2, %v6753_v11  ;;  %v5221_v59 = vpop.xlane.xlu1 %5220  ;;  %v14573_v1 = vpop.eup %14572 }
 0x60f   : > { %v17675_v34 = vmul.f32 %v14573_v1, %v17482_v30  ;;  %v14828_v30 = vld [vmem:[%s21300_s3 + $0x8] sm:$0xff]   ;;  %v14575_v49 = vpop.eup %14574  ;;  %v5218_v46 = vpop.xlane.xlu0 %5217  ;;  %14582 = vrcp.f32 %v5221_v59 }
 0x610   : > { %13304 = vmatmul.mubr.msk.f32.vlgmr.msra.gmra.mrb[100].mxu0 %vm1957_vm2, %v6754_v4  ;;  %13689 = vset.pattern.permute.xlu1 %v21084_v28  ;;  %v17705_v9 = vmul.f32 %v14575_v49, %v17484_v44 }
 0x611   : > { %13307 = vmatpush3.bf16.msra.mxu0 %v14827_v21  ;;  %5619 = vperm.xlu1 %13689, %v17668_v56   ;;  %v14577_v12 = vpop.eup %14576 }
 0x612   : > { %5839 = vperm.xlu0 %13691, %v17675_v34   ;;  %13308 = vmatprep.subr.bf16.mxu0 %v21356_v40  ;;  %v17683_v53 = vpop.xlane.xlu1 %5226  ;;  %21412 = vst [vmem:[#allocation45_spill] sm:$0xff] %v17705_v9  ;;  %v17715_v57 = vmul.f32 %v14577_v12, %v17492_v35 }
 0x613   : > { %13314 = vmatprep.mubr.msk.bf16.mxu0 %vm15273_vm1, %v21356_v40  ;;  %v5224_v48 = vpop.xlane.xlu0 %5223 }
 0x615   : > { %13309 = vmatpush3.bf16.msra.mxu0 %v14828_v30  ;;  %13690 = vset.pattern.permute.xlu1 %v21080_v62  ;;  %v14579_v44 = vpop.eup %14578 }
 0x616   : > { %13310 = vmatprep.subr.bf16.mxu0 %v21356_v40  ;;  %5843 = vperm.xlu1 %13690, %v17668_v56   ;;  %v17693_v5 = vpop.xlane.xlu1 %5232  ;;  %v17723_v37 = vmul.f32 %v14579_v44, %v17500_v39  ;;  %v14581_v35 = vpop.eup %14580 }
 0x617   : > { %v5230_v50 = vpop.xlane.xlu0 %5229  ;;  %v17733_v47 = vmul.f32 %v14581_v35, %v17496_v32 }
 0x618   : > { %21413 = vst [vmem:[#allocation46_spill] sm:$0xff] %v17723_v37 }
 0x619   : > { %13311 = vmatpush3.bf16.msra.mxu0 %v14829_v16  ;;  %21414 = vst [vmem:[#allocation47_spill] sm:$0xff] %v17733_v47  ;;  %v14583_v11 = vpop.eup %14582 }
 0x61a   : > { %13312 = vmatprep.subr.bf16.mxu0 %v21356_v40  ;;  %13692 = vset.pattern.permute.xlu1 %v21082_v33  ;;  %v5239_v63 = vpop.xlane.xlu1 %5238  ;;  %v17737_v25 = vmul.f32 %v14583_v11, %v17511_v27 }
 0x61b   : > { %5407 = vperm.xlu1 %13692, %v17705_v9   ;;  %v5236_v21 = vpop.xlane.xlu0 %5235 }
 0x61c   : > { %21415 = vst [vmem:[#allocation48_spill] sm:$0xff] %v17737_v25 }
 0x61d   : > { %13313 = vmatpush3.bf16.msra.mxu0 %v14830_v41 }
 0x61e   : > { %v5245_v20 = vpop.xlane.xlu1 %5244  ;;  %13318 = vmatprep.subr.mxu0 %v14831_v3 }
 0x61f   : > { %14584 = vrcp.f32 %v5245_v20  ;;  %5402 = vperm.xlu1 %13692, %v17715_v57  }
 0x620   : > { %14586 = vrcp.f32 %v5218_v46  ;;  %13315 = vmatmul.mubr.msk.bf16.vlgmr.msra.gmra.mrb[116].mxu0 %vm1523_vm0, %v1405_v19 }
 0x621   : > { %13319 = vmatpush3.msra.mxu0 %v14831_v3  ;;  %14588 = vrcp.f32 %v5224_v48 }
 0x622   : > { %13335 = vmatprep.subr.mxu0 %v17728_v58  ;;  %14590 = vrcp.f32 %v5230_v50 }
 0x623   : > { %5417 = vperm.xlu1 %13692, %v17723_v37   ;;  %14592 = vrcp.f32 %v5239_v63  ;;  %v5251_v63 = vpop.xlane.xlu1 %5250 }
 0x624   : > { %14594 = vrcp.f32 %v5236_v21 }
 0x627   : > { %5412 = vperm.xlu1 %13692, %v17733_v47   ;;  %v5257_v48 = vpop.xlane.xlu1 %5256 }
 0x629   : > { %v14585_v39 = vpop.eup %14584 }
 0x62a   : > { %v14587_v38 = vpop.eup %14586  ;;  %v17740_v4 = vmul.f32 %v14585_v39, %v17572_v60 }
 0x62b   : > { %5427 = vperm.xlu1 %13692, %v17737_v25   ;;  %v17745_v32 = vmul.f32 %v14587_v38, %v17506_v6  ;;  %v14589_v59 = vpop.eup %14588  ;;  %v5263_v35 = vpop.xlane.xlu1 %5262 }
 0x62c   : > { %5899 = vperm.xlu0 %13691, %v17740_v4   ;;  %v17749_v1 = vmul.f32 %v14589_v59, %v17521_v42  ;;  %v14591_v27 = vpop.eup %14590  ;;  %v21078_v42 = vmov 3  }
 0x62d   : > { %21416 = vst [vmem:[#allocation49_spill] sm:$0xff] %v17745_v32  ;;  %v17753_v60 = vmul.f32 %v14591_v27, %v17535_v24  ;;  %v14593_v2 = vpop.eup %14592 }
 0x62e   : > { %21417 = vst [vmem:[#allocation50_spill] sm:$0xff] %v17749_v1  ;;  %v17757_v6 = vmul.f32 %v14593_v2, %v17559_v52  ;;  %v14595_v30 = vpop.eup %14594  ;;  %v5242_v52 = vpop.xlane.xlu0 %5241 }
 0x62f   : > { %5422 = vperm.xlu1 %13692, %v17745_v32   ;;  %21418 = vst [vmem:[#allocation51_spill] sm:$0xff] %v17753_v60  ;;  %v5338_v24 = vmul.f32 %v14595_v30, %v17554_v55  ;;  %14596 = vrcp.f32 %v5242_v52  ;;  %v14833_v30 = vld [vmem:[%s21399_s16] ss:$0 sm:$0xff] }
 0x630   : > { %14598 = vrcp.f32 %v5251_v63 }
 0x632   : > { %v5248_v41 = vpop.xlane.xlu0 %5247 }
 0x633   : > { %5432 = vperm.xlu1 %13692, %v17749_v1   ;;  %14600 = vrcp.f32 %v5248_v41  ;;  %v14834_v41 = vld [vmem:[%s21306_s6 + $0x1] ss:$0 sm:$0xff] }
 0x637   : > { %5442 = vperm.xlu1 %13692, %v17753_v60  }
 0x639   : > { %v14597_v55 = vpop.eup %14596 }
 0x63a   : > { %v5340_v19 = vmul.f32 %v14597_v55, %v17566_v7  ;;  %v14599_v44 = vpop.eup %14598 }
 0x63b   : > { %13693 = vset.pattern.permute.xlu1 %v21080_v62  ;;  %v17778_v7 = vmul.f32 %v14599_v44, %v17587_v22  ;;  %v1411_v22 = vld [vmem:[%s21419_s23] sm:$0xff]   ;;  %s12567_s23 = sshll.u32 %s21299_s10, 6  ;;  %s11449_s10 = scalar_lea.sflag [#allocation5], %s15846_s22 }
 0x63c   : > { %5891 = vperm.xlu1 %13693, %v17757_v6   ;;  %13366 = vmatmul.mubr.msk.bf16.vlgmr.msra.gmra.mrb[68].mxu1 %vm1523_vm0, %v1411_v22  ;;  %s11462_s13 = sadd.s32 %s12601_s9, %s12567_s23 }
 0x63d   : > { %v14601_v20 = vpop.eup %14600  ;;  %8376 = vmatprep.mubr.bf16.mxu1 %v21082_v33 }
 0x63e   : > { %v5342_v3 = vmul.f32 %v14601_v20, %v17581_v0  ;;  %v17791_v0 = vpop.xlane.xlu1 %5268 }
 0x640   : > { %13694 = vset.pattern.permute.xlu1 %v21078_v42 }
 0x641   : > { %6115 = vperm.xlu1 %13694, %v17757_v6  }
 0x642   : > { %v17793_v50 = vpop.xlane.xlu1 %5274 }
 0x645   : > { %13695 = vset.pattern.permute.xlu1 %v21082_v33 }
 0x646   : > { %5452 = vperm.xlu1 %13695, %v5338_v24   ;;  %v17795_v11 = vpop.xlane.xlu1 %5280 }
 0x647   : > { %21420 = vst [vmem:[#allocation52_spill] sm:$0xff] %v17795_v11 }
 0x64a   : > { %13696 = vset.pattern.permute.xlu1 %v21084_v28  ;;  %v17797_v39 = vpop.xlane.xlu1 %5286 }
 0x64b   : > { %5663 = vperm.xlu1 %13696, %v5338_v24   ;;  %21421 = vst [vmem:[#allocation53_spill] sm:$0xff] %v17797_v39 }
 0x64e   : > { %v7104_v49 = vpop.f32.mrb[64].mxu1  ;;  %v17799_v38 = vpop.xlane.xlu1 %5292 }
 0x64f   : > { %13697 = vset.pattern.permute.xlu1 %v21080_v62  ;;  %v13333_v46 = vpop.f32.mrb[65].mxu1  ;;  %21422 = vst [vmem:[#allocation54_spill] sm:$0xff] %v17799_v38  ;;  %v17825_v44 = vadd.f32 %v14834_v41, %v7104_v49  ;;  %v5254_v49 = vpop.xlane.xlu0 %5253  ;;  %v21433_v38 = vmov 0  }
 0x650   : > { %5887 = vperm.xlu1 %13697, %v5338_v24   ;;  %v7107_v16 = vpop.f32.mrb[66].mxu1 }
 0x651   : > { %v13334_v12 = vpop.f32.mrb[67].mxu1  ;;  %v12379_v20 = vmul.f32 -1.442695, %v17825_v44 }
 0x653   : > { %14602 = vpow2.f32 %v12379_v20 }
 0x654   : > { %13698 = vset.pattern.permute.xlu1 %v21078_v42  ;;  %14604 = vrcp.f32 %v5257_v48 }
 0x655   : > { %6111 = vperm.xlu1 %13698, %v5338_v24  }
 0x659   : > { %13699 = vset.pattern.permute.xlu1 %v21084_v28 }
 0x65a   : > { %5675 = vperm.xlu1 %13699, %v17740_v4  }
 0x65e   : > { %13700 = vset.pattern.permute.xlu1 %v21078_v42 }
 0x65f   : > { %6123 = vperm.xlu1 %13700, %v17740_v4  }
 0x663   : > { %13701 = vset.pattern.permute.xlu1 %v21082_v33 }
 0x664   : > { %5462 = vperm.xlu1 %13701, %v5340_v19  }
 0x668   : > { %13702 = vset.pattern.permute.xlu1 %v21084_v28 }
 0x669   : > { %5671 = vperm.xlu1 %13702, %v5340_v19  }
 0x66d   : > { %13703 = vset.pattern.permute.xlu1 %v21080_v62 }
 0x66e   : > { %5895 = vperm.xlu1 %13703, %v5340_v19  }
 0x672   : > { %13704 = vset.pattern.permute.xlu1 %v21078_v42 }
 0x673   : > { %6119 = vperm.xlu1 %13704, %v5340_v19  }
 0x677   : > { %13705 = vset.pattern.permute.xlu1 %v21084_v28 }
 0x678   : > { %5683 = vperm.xlu1 %13705, %v17778_v7  }
 0x67c   : > { %13706 = vset.pattern.permute.xlu1 %v21082_v33 }
 0x67d   : > { %5472 = vperm.xlu1 %13706, %v5342_v3  }
 0x681   : > { %13707 = vset.pattern.permute.xlu1 %v21084_v28 }
 0x682   : > { %5679 = vperm.xlu1 %13707, %v5342_v3  }
 0x686   : > { %13708 = vset.pattern.permute.xlu1 %v21080_v62 }
 0x687   : > { %5903 = vperm.xlu1 %13708, %v5342_v3  }
 0x68b   : > { %13709 = vset.pattern.permute.xlu1 %v21078_v42  ;;  %v17801_v59 = vpop.permute.xlu1 %5397 }
 0x68c   : > { %21423 = vst [vmem:[#allocation55_spill] sm:$0xff] %v17801_v59 }
 0x690   : > { %v17803_v27 = vpop.permute.xlu1 %5619 }
 0x691   : > { %21424 = vst [vmem:[#allocation56_spill] sm:$0xff] %v17803_v27 }
 0x695   : > { %v17805_v21 = vpop.permute.xlu1 %5843 }
 0x696   : > { %21425 = vst [vmem:[#allocation57_spill] sm:$0xff] %v17805_v21 }
 0x69a   : > { %v17814_v46 = vpop.permute.xlu1 %5407 }
 0x69b   : > { %21426 = vst [vmem:[#allocation58_spill] sm:$0xff] %v17814_v46 }
 0x69e   : > { %v17820_v63 = vpop.permute.xlu1 %5402 }
 0x69f   : > { %21427 = vst [vmem:[#allocation59_spill] sm:$0xff] %v17820_v63 }
 0x6a2   : > { %v17828_v22 = vpop.permute.xlu1 %5417 }
 0x6a3   : > { %21428 = vst [vmem:[#allocation61_spill] sm:$0xff] %v17828_v22 }
 0x6a6   : > { %v17835_v51 = vpop.permute.xlu1 %5412 }
 0x6a7   : > { %21429 = vst [vmem:[#allocation63_spill] sm:$0xff] %v17835_v51 }
 0x6e3   : > { %v13305_v2 = vpop.f32.mrb[100].mxu0 }
 0x6e4   : > { %v17810_v24 = vadd.f32 %v14833_v30, %v13305_v2  ;;  %v6827_v52 = vpop.f32.mrb[101].mxu0 }
 0x6e5   : > { %v17812_v55 = vadd.f32 %v14833_v30, %v6827_v52  ;;  %v17830_v30 = vadd.f32 %v14834_v41, %v7107_v16  ;;  %v14835_v52 = vld [vmem:[%s21306_s6] ss:$0 sm:$0xff]  ;;  %v17839_v41 = vpop.permute.xlu1 %5427 }
 0x6e6   : > { %v6841_v19 = vsel %vm5005_vm3, %v17810_v24, -inf  ;;  %21430 = vst [vmem:[#allocation60_spill] sm:$0xff] %v17839_v41 }
 0x6e7   : > { %6842 = vmax.xlane.f32.xlu1 %v6841_v19  ;;  %v6838_v12 = vsel %vm5005_vm3, %v17812_v55, -inf  ;;  %v12380_v15 = vmul.f32 -1.442695, %v17830_v30 }
 0x6e8   : > { %6839 = vmax.xlane.f32.xlu0 %v6838_v12 }
 0x6f3   : > { %v6958_v2 = vpop.f32.mrb[116].mxu0 }
 0x6f4   : > { %v6959_v19 = vadd.f32 %v14835_v52, %v6958_v2  ;;  %v13316_v12 = vpop.f32.mrb[117].mxu0 }
 0x6f5   : > { %v6961_v42 = vpop.f32.mrb[118].mxu0  ;;  %v21432_v12 = vmov 1  }
 0x6f6   : > { %v12373_v62 = vmul.f32 -1.442695, %v6959_v19  ;;  %v6962_v33 = vadd.f32 %v14835_v52, %v6961_v42  ;;  %v13317_v28 = vpop.f32.mrb[119].mxu0  ;;  %v14603_v42 = vpop.eup %14602 }
 0x6f7   : > { %v14605_v28 = vpop.eup %14604  ;;  %v7117_v20 = vadd.f32 1.0, %v14603_v42  ;;  %v17844_v52 = vpop.permute.xlu1 %5422 }
 0x6f8   : > { %14606 = vpow2.f32 %v12373_v62  ;;  %v12374_v16 = vmul.f32 -1.442695, %v6962_v33  ;;  %6063 = vperm.xlu1 %13709, %v17675_v34   ;;  %21431 = vst [vmem:[#allocation62_spill] sm:$0xff] %v17844_v52 }
 0x6fa   : > { %14608 = vpow2.f32 %v12374_v16 }
 0x6fb   : > { %14610 = vrcp.f32 %v5254_v49 }
 0x6fc   : > { %14612 = vpow2.f32 %v12380_v15  ;;  %6127 = vperm.xlu1 %13709, %v5342_v3   ;;  %v17848_v15 = vmul.f32 %v14605_v28, %v17599_v23  ;;  %v17855_v23 = vpop.permute.xlu1 %5432 }
 0x6fd   : > { %14614 = vrcp.f32 %v5263_v35  ;;  %21434 = vst [vmem:[#allocation65_spill] sm:$0xff] %v17855_v23 }
 0x6fe   : > { %5907 = vperm.xlu0 %13691, %v17778_v7  }
 0x700   : > { %6131 = vperm.xlu1 %13709, %v17778_v7  }
 0x702   : > { %v14607_v48 = vpop.eup %14606  ;;  %5847 = vperm.xlu0 %13691, %v17715_v57  }
 0x703   : > { %v6971_v62 = vadd.f32 1.0, %v14607_v48 }
 0x704   : > { %v14609_v2 = vpop.eup %14608  ;;  %13710 = vset.pattern.permute.xlu1 %v21432_v12 }
 0x705   : > { %v14611_v3 = vpop.eup %14610  ;;  %14616 = vrcp.f32 %v6971_v62  ;;  %v6972_v49 = vadd.f32 1.0, %v14609_v2  ;;  %5627 = vperm.xlu1 %13710, %v17705_v9  }
 0x706   : > { %v14613_v35 = vpop.eup %14612  ;;  %14618 = vrcp.f32 %v7117_v20  ;;  %5915 = vperm.xlu0 %13691, %v17848_v15   ;;  %v5344_v16 = vmul.f32 %v14611_v3, %v17594_v17  ;;  %v17864_v20 = vpop.permute.xlu1 %5442 }
 0x707   : > { %14620 = vrcp.f32 %v6972_v49  ;;  %v14615_v42 = vpop.eup %14614  ;;  %v7118_v48 = vadd.f32 1.0, %v14613_v35  ;;  %21435 = vst [vmem:[#allocation67_spill] sm:$0xff] %v17864_v20 }
 0x708   : > { %14622 = vrcp.f32 %v17683_v53  ;;  %v17860_v28 = vmul.f32 %v14615_v42, %v17611_v14 }
 0x709   : > { %13711 = vset.pattern.permute.xlu1 %v21433_v38  ;;  %14624 = vrcp.f32 %v17693_v5 }
 0x70a   : > { %5855 = vperm.xlu0 %13691, %v17733_v47   ;;  %5482 = vperm.xlu1 %13711, %v5344_v16   ;;  %14626 = vrcp.f32 %v7118_v48  ;;  %v14836_v48 = vld [vmem:[%s21300_s3 + $0x40] sm:$0xff]  }
 0x70e   : > { %5923 = vperm.xlu0 %13691, %v17860_v28   ;;  %13712 = vset.pattern.permute.xlu1 %v21432_v12 }
 0x70f   : > { %v14617_v17 = vpop.eup %14616  ;;  %5687 = vperm.xlu1 %13712, %v5344_v16   ;;  %v17963_v46 = vpop.f32.mrb[68].mxu1 }
 0x710   : > { %v14619_v53 = vpop.eup %14618  ;;  %v6977_v62 = vmul.f32 %v14617_v17, %v6959_v19  ;;  %v17877_v19 = vpop.permute.xlu1 %5891 }
 0x711   : > { %v14621_v2 = vpop.eup %14620  ;;  %v7123_v14 = vmul.f32 %v14619_v53, %v17825_v44  ;;  %v21437_v44 = vmov 2   ;;  %v14838_v53 = vld [vmem:[%s21300_s3 + $0x50] sm:$0xff]   ;;  %v13367_v63 = vpop.f32.mrb[69].mxu1 }
 0x712   : > { %v14623_v3 = vpop.eup %14622  ;;  %v6978_v49 = vmul.f32 %v14621_v2, %v6962_v33  ;;  %13320 = vmatprep.mubr.msk.f32.mxu0 %vm1957_vm2, %v6977_v62  ;;  %13719 = vset.pattern.permute.xlu0 %v21433_v38  ;;  %v1409_v62 = vld [vmem:[%s21441_s5] sm:$0xff]   ;;  %v17965_v21 = vpop.f32.mrb[70].mxu1  ;;  %s21899_s5 = sld [smem:[#allocation33_spill]] }
 0x713   : > { %5392 = vperm.xlu0 %13719, %v17675_v34   ;;  %5691 = vperm.xlu1 %13712, %v17848_v15   ;;  %v17875_v5 = vmul.f32 %v14623_v3, %v17527_v13  ;;  %v14625_v33 = vpop.eup %14624  ;;  %v14839_v3 = vld [vmem:[%s21300_s3 + $0x58] sm:$0xff]   ;;  %v13368_v27 = vpop.f32.mrb[71].mxu1 }
 0x714   : > { %13321 = vmatmul.mubr.msk.f32.vlgmr.msra.gmra.mrb[102].mxu0 %vm1957_vm2, %v6978_v49  ;;  %v14627_v35 = vpop.eup %14626  ;;  %v17884_v42 = vmul.f32 %v14625_v33, %v17540_v36  ;;  %v17888_v13 = vpop.permute.xlu1 %6115  ;;  %v21440_v36 = vmov 3   ;;  %v14840_v49 = vld [vmem:[%s21303_s17 + $0x10] sm:$0xff] }
 0x715   : > { %13336 = vmatpush3.msra.mxu0 %v17728_v58  ;;  %13337 = vmatprep.mubr.msk.f32.mxu0 %vm1957_vm2, %v7123_v14  ;;  %21436 = vst [vmem:[#allocation64_spill] sm:$0xff] %v17875_v5  ;;  %v7124_v58 = vmul.f32 %v14627_v35, %v17830_v30  ;;  %21439 = vst [vmem:[#allocation69_spill] sm:$0xff] %v17888_v13  ;;  %v14837_v30 = vld [vmem:[%s21300_s3 + $0x48] sm:$0xff]  }
 0x716   : > { %13340 = vmatprep.subr.bf16.mxu0 %v21356_v40  ;;  %21438 = vst [vmem:[#allocation66_spill] sm:$0xff] %v17884_v42 }
 0x717   : > { %5437 = vperm.xlu0 %13719, %v17875_v5   ;;  %13713 = vset.pattern.permute.xlu1 %v21437_v44 }
 0x718   : > { %5851 = vperm.xlu1 %13713, %v17705_v9   ;;  %v17903_v17 = vpop.permute.xlu1 %5452  ;;  %p21902_p2 = scmp.ne.s32.totalorder %s21899_s5, 0 }
 0x71b   : > { %5447 = vperm.xlu0 %13719, %v17884_v42  }
 0x71c   : > { %13338 = vmatmul.mubr.msk.f32.vlgmr.msra.gmra.mrb[102].mxu0 %vm1957_vm2, %v7124_v58  ;;  %5911 = vperm.xlu1 %13713, %v5344_v16   ;;  %v17912_v2 = vpop.permute.xlu1 %5663 }
 0x71d   : > { %13341 = vmatpush3.bf16.msra.mxu0 %v14836_v48  ;;  %13348 = vmatprep.mubr.msk.bf16.mxu0 %vm15273_vm1, %v21356_v40  ;;  %v5260_v48 = vpop.xlane.xlu0 %5259 }
 0x71e   : > { %13342 = vmatprep.subr.bf16.mxu0 %v21356_v40 }
 0x71f   : > { %5457 = vperm.xlu0 %13719, %v17757_v6  }
 0x720   : > { %13714 = vset.pattern.permute.xlu1 %v21440_v36 }
 0x721   : > { %13343 = vmatpush3.bf16.msra.mxu0 %v14837_v30  ;;  %6071 = vperm.xlu1 %13714, %v17715_v57  }
 0x722   : > { %13344 = vmatprep.subr.bf16.mxu0 %v21356_v40 }
 0x725   : > { %13345 = vmatpush3.bf16.msra.mxu0 %v14838_v53  ;;  %6135 = vperm.xlu1 %13714, %v5344_v16   ;;  %v17929_v16 = vld [vmem:[%s21303_s17 + $0x18] sm:$0xff]  ;;  %v17943_v53 = vpop.xlane.xlu0 %5265 }
 0x726   : > { %13346 = vmatprep.subr.bf16.mxu0 %v21356_v40  ;;  %v17923_v40 = vpop.permute.xlu1 %5887 }
 0x727   : > { %21442 = vst [vmem:[#allocation71_spill] sm:$0xff] %v17923_v40 }
 0x729   : > { %13347 = vmatpush3.bf16.msra.mxu0 %v14839_v3  ;;  %6139 = vperm.xlu1 %13714, %v17848_v15   ;;  %v17947_v3 = vpop.xlane.xlu0 %5271 }
 0x72a   : > { %13352 = vmatprep.subr.mxu0 %v14840_v49  ;;  %v17933_v14 = vpop.permute.xlu1 %6111  ;;  %21444 = vst [vmem:[#allocation70_spill] sm:$0xff] %v17947_v3 }
 0x72b   : > { %21443 = vst [vmem:[#allocation68_spill] sm:$0xff] %v17933_v14  ;;  %v18170_v14 = vld [vmem:[%s16330_s18 + $0x30] sm:$0xff]  }
 0x72c   : > { %13349 = vmatmul.mubr.msk.bf16.vlgmr.msra.gmra.mrb[120].mxu0 %vm1523_vm0, %v1409_v62  ;;  %21477 = vst [vmem:[#allocation103_spill] sm:$0xff] %v18170_v14 }
 0x72d   : > { %13715 = vset.pattern.permute.xlu1 %v21432_v12  ;;  %13353 = vmatpush3.msra.mxu0 %v14840_v49  ;;  %v17951_v20 = vpop.xlane.xlu0 %5277 }
 0x72e   : > { %5635 = vperm.xlu1 %13715, %v17723_v37   ;;  %13369 = vmatprep.subr.mxu0 %v17929_v16  ;;  %v17935_v33 = vpop.permute.xlu1 %5675  ;;  %21445 = vst [vmem:[#allocation73_spill] sm:$0xff] %v17951_v20 }
 0x731   : > { %v17955_v52 = vpop.xlane.xlu0 %5283 }
 0x732   : > { %13716 = vset.pattern.permute.xlu1 %v21433_v38  ;;  %v17937_v35 = vpop.permute.xlu1 %6123  ;;  %21446 = vst [vmem:[#allocation75_spill] sm:$0xff] %v17955_v52 }
 0x735   : > { %v17959_v51 = vpop.xlane.xlu0 %5289 }
 0x736   : > { %v17939_v58 = vpop.permute.xlu1 %5462  ;;  %21447 = vst [vmem:[#allocation72_spill] sm:$0xff] %v17959_v51 }
 0x739   : > { %v17967_v59 = vpop.permute.xlu0 %5839 }
 0x73a   : > { %v17941_v30 = vpop.permute.xlu1 %5671  ;;  %21448 = vst [vmem:[#allocation74_spill] sm:$0xff] %v17967_v59 }
 0x73d   : > { %v17971_v8 = vpop.permute.xlu0 %5899 }
 0x73e   : > { %v17945_v62 = vpop.permute.xlu1 %5895 }
 0x742   : > { %v17949_v49 = vpop.permute.xlu1 %6119 }
 0x746   : > { %v17953_v23 = vpop.permute.xlu1 %5683 }
 0x74a   : > { %v17957_v41 = vpop.permute.xlu1 %5472 }
 0x74e   : > { %v17961_v22 = vpop.permute.xlu1 %5679 }
 0x752   : > { %v17969_v54 = vpop.permute.xlu1 %5903 }
 0x774   : > { %v6843_v43 = vpop.xlane.xlu1 %6842 }
 0x775   : > { %v6845_v42 = vsub.f32 %v17810_v24, %v6843_v43  ;;  %v6840_v39 = vpop.xlane.xlu0 %6839 }
 0x776   : > { %v6844_v51 = vsub.f32 %v17812_v55, %v6840_v39 }
 0x777   : > { %v6848_v52 = vmul.f32 1.442695, %v6845_v42 }
 0x778   : > { %v6846_v31 = vmul.f32 1.442695, %v6844_v51 }
 0x779   : > { %14628 = vpow2.f32 %v6848_v52  ;;  %v7618_v52 = vld [vmem:[#allocation2 + $0x90] sm:$0x1] }
 0x77a   : > { %14630 = vpow2.f32 %v6846_v31  ;;  %v7615_v31 = vld [vmem:[#allocation2 + $0x80] sm:$0x1]  ;;  %v7619_v42 = vsel %vm17988_vm6, 0, %v7618_v52  ;;  %v18059_v52 = vld [vmem:[%s21455_s15 + $0x10] ss:$8 sps:$4 sm:$0xff]  }
 0x77b   : > { %14632 = vrcp.f32 %v5260_v48  ;;  %7620 = vst [vmem:[#allocation2 + $0x90] sm:$0x1] %v7619_v42  ;;  %21458 = vst [vmem:[#allocation84_spill] sm:$0xff] %v18059_v52  ;;  %v18068_v42 = vld [vmem:[%s21455_s15 + $0x24] ss:$8 sps:$4 sm:$0xff]  }
 0x77c   : > { %14634 = vrcp.f32 %v17791_v0  ;;  %21459 = vst [vmem:[#allocation85_spill] sm:$0xff] %v18068_v42 }
 0x77d   : > { %14636 = vrcp.f32 %v17943_v53 }
 0x783   : > { %v17975_v63 = vpop.eup %14628 }
 0x784   : > { %v17977_v20 = vpop.eup %14630  ;;  %v6853_v27 = vsel %vm5005_vm3, %v17975_v63, 0.0 }
 0x785   : > { %6854 = vadd.xlane.f32.xlu1 %v6853_v27  ;;  %v6850_v59 = vsel %vm5005_vm3, %v17977_v20, 0.0  ;;  %v14633_v43 = vpop.eup %14632  ;;  %v7677_v27 = vld [vmem:[#allocation2 + $0xa8] sm:$0x1] }
 0x786   : > { %6851 = vadd.xlane.f32.xlu0 %v6850_v59  ;;  %v5346_v39 = vmul.f32 %v14633_v43, %v17606_v18  ;;  %v7671_v59 = vld [vmem:[#allocation2 + $0x88] sm:$0x1]  ;;  %v7616_v18 = vsel %vm17988_vm6, 0, %v7615_v31  ;;  %v14635_v24 = vpop.eup %14634  ;;  %v7621_v43 = vld [vmem:[#allocation2 + $0xa0] sm:$0x1] }
 0x787   : > { %7617 = vst [vmem:[#allocation2 + $0x80] sm:$0x1] %v7616_v18  ;;  %v7672_v0 = vsel %vm17996_vm8, 0, %v7671_v59  ;;  %v18011_v48 = vmul.f32 %v14635_v24, %v17621_v10  ;;  %v7622_v31 = vsel %vm17988_vm6, 0, %v7621_v43  ;;  %v7612_v10 = vld [vmem:[#allocation2 + $0x70] sm:$0x1]  ;;  %v18088_v43 = vpop.permute.xlu1 %6063 }
 0x788   : > { %7673 = vst [vmem:[#allocation2 + $0x88] sm:$0x1] %v7672_v0  ;;  %7623 = vst [vmem:[#allocation2 + $0xa0] sm:$0x1] %v7622_v31  ;;  %v7668_v59 = vld [vmem:[#allocation2 + $0x78] sm:$0x1] }
 0x789   : > { %21454 = vst [vmem:[#allocation76_spill] sm:$0xff] %v18011_v48  ;;  %v7613_v18 = vsel %vm17988_vm6, 0, %v7612_v10  ;;  %v7669_v0 = vsel %vm17996_vm8, 0, %v7668_v59  ;;  %21463 = vst [vmem:[#allocation89_spill] sm:$0xff] %v18088_v43 }
 0x78a   : > { %7614 = vst [vmem:[#allocation2 + $0x70] sm:$0x1] %v7613_v18  ;;  %7670 = vst [vmem:[#allocation2 + $0x78] sm:$0x1] %v7669_v0  ;;  %v18099_v0 = vpop.permute.xlu0 %5907 }
 0x78b   : > { %v18091_v31 = vpop.permute.xlu1 %6127 }
 0x78f   : > { %v18093_v10 = vpop.permute.xlu1 %6131 }
 0x793   : > { %v18095_v59 = vpop.permute.xlu1 %5627 }
 0x794   : > { %21464 = vst [vmem:[#allocation90_spill] sm:$0xff] %v18095_v59  ;;  %v18119_v59 = vadd.f32 %v17663_v26, %v17963_v46 }
 0x796   : > { %5492 = vperm.xlu1 %13716, %v5346_v39  }
 0x797   : > { %v18097_v18 = vpop.permute.xlu1 %5482 }
 0x79a   : > { %13717 = vset.pattern.permute.xlu1 %v21432_v12 }
 0x79b   : > { %5695 = vperm.xlu1 %13717, %v5346_v39  }
 0x79c   : > { %5467 = vperm.xlu0 %13719, %v17740_v4   ;;  %v21451_v4 = vmov 0 }
 0x79d   : > { %v21452_v4 = vsel %vm17996_vm8, 4294967295, %v21451_v4 }
 0x79e   : > { %21453 = vst [vmem:[#allocation77_spill] sm:$0xff] %v21452_v4 }
 0x79f   : > { %5699 = vperm.xlu1 %13717, %v17860_v28  }
 0x7a0   : > { %5477 = vperm.xlu0 %13719, %v17778_v7   ;;  %v7674_v7 = vld [vmem:[#allocation2 + $0x98] sm:$0x1] }
 0x7a1   : > { %v7675_v55 = vsel %vm17996_vm8, 0, %v7674_v7  ;;  %v7680_v7 = vld [vmem:[#allocation2 + $0xb8] sm:$0x1] }
 0x7a2   : > { %7676 = vst [vmem:[#allocation2 + $0x98] sm:$0x1] %v7675_v55  ;;  %v7681_v53 = vsel %vm17996_vm8, 0, %v7680_v7  ;;  %v18101_v7 = vpop.permute.xlu1 %5687 }
 0x7a3   : > { %13718 = vset.pattern.permute.xlu1 %v21437_v44  ;;  %7682 = vst [vmem:[#allocation2 + $0xb8] sm:$0x1] %v7681_v53  ;;  %v18103_v53 = vpop.permute.xlu0 %5847 }
 0x7a4   : > { %5859 = vperm.xlu1 %13718, %v17723_v37   ;;  %5487 = vperm.xlu0 %13719, %v17848_v15   ;;  %v7678_v15 = vsel %vm17996_vm8, 0, %v7677_v27  ;;  %v18080_v27 = vld [vmem:[%s21455_s15 + $0x30] ss:$8 sps:$4 sm:$0xff]   ;;  %21465 = vst [vmem:[#allocation91_spill] sm:$0xff] %v18103_v53  ;;  %v12391_v53 = vmul.f32 -1.442695, %v18119_v59 }
 0x7a5   : > { %7679 = vst [vmem:[#allocation2 + $0xa8] sm:$0x1] %v7678_v15  ;;  %21461 = vst [vmem:[#allocation87_spill] sm:$0xff] %v18080_v27  ;;  %v18085_v15 = vld [vmem:[%s21455_s15 + $0x34] ss:$8 sps:$4 sm:$0xff]  }
 0x7a6   : > { %21462 = vst [vmem:[#allocation88_spill] sm:$0xff] %v18085_v15  ;;  %14638 = vpow2.f32 %v12391_v53 }
 0x7a8   : > { %5919 = vperm.xlu1 %13718, %v5346_v39   ;;  %5497 = vperm.xlu0 %13719, %v17860_v28  }
 0x7ac   : > { %13720 = vset.pattern.permute.xlu1 %v21440_v36  ;;  %5507 = vperm.xlu0 %13719, %v18011_v48   ;;  %v14852_v36 = vld [vmem:[%s15917_s8 + $0x40] sm:$0xff]  }
 0x7ad   : > { %6079 = vperm.xlu1 %13720, %v17733_v47  }
 0x7b0   : > { %13723 = vset.pattern.permute.xlu0 %v21432_v12 }
 0x7b1   : > { %6143 = vperm.xlu1 %13720, %v5346_v39   ;;  %5667 = vperm.xlu0 %13723, %v17757_v6   ;;  %v18034_v6 = vld [vmem:[%s21455_s15 + $0x4] ss:$8 sps:$4 sm:$0xff]   ;;  %v14637_v39 = vpop.eup %14636 }
 0x7b2   : > { %13374 = vmatprep.subr.bf16.mxu1 %v18034_v6  ;;  %v18054_v55 = vmul.f32 %v14637_v39, %v17617_v29  ;;  %v18073_v29 = vld [vmem:[%s21455_s15 + $0x20] ss:$8 sps:$4 sm:$0xff]   ;;  %v18107_v39 = vpop.permute.xlu0 %5915 }
 0x7b3   : > { %21460 = vst [vmem:[#allocation86_spill] sm:$0xff] %v18073_v29 }
 0x7b4   : > { %21457 = vst [vmem:[#allocation78_spill] sm:$0xff] %v18054_v55 }
 0x7b5   : > { %6147 = vperm.xlu1 %13720, %v17860_v28   ;;  %5615 = vperm.xlu0 %13723, %v17675_v34   ;;  %v7624_v34 = vld [vmem:[#allocation2 + $0xb0] sm:$0x1]  ;;  %v18041_v28 = vld [vmem:[%s21455_s15] ss:$8 sps:$4 sm:$0xff]  }
 0x7b6   : > { %v7625_v24 = vsel %vm17988_vm6, 0, %v7624_v34  ;;  %13378 = vmatpush1.bf16.msra.mxu1 %v18041_v28  ;;  %v18105_v34 = vpop.permute.xlu1 %5691  ;;  %v18111_v43 = vpop.permute.xlu0 %5855 }
 0x7b7   : > { %7626 = vst [vmem:[#allocation2 + $0xb0] sm:$0x1] %v7625_v24  ;;  %21467 = vst [vmem:[#allocation93_spill] sm:$0xff] %v18111_v43  ;;  %v14842_v43 = vld [vmem:[%s21306_s6 + $0x2] ss:$0 sm:$0xff] }
 0x7b9   : > { %13721 = vset.pattern.permute.xlu1 %v21432_v12  ;;  %5623 = vperm.xlu0 %13723, %v17715_v57   ;;  %v18051_v57 = vld [vmem:[%s21455_s15 + $0x14] ss:$8 sps:$4 sm:$0xff]   ;;  %v5594_v12 = vunpack.c.l.bf16 %v18170_v14  ;;  %v5374_v14 = vunpack.c.l.bf16 %v14852_v36 }
 0x7ba   : > { %5643 = vperm.xlu1 %13721, %v17737_v25   ;;  %21456 = vst [vmem:[#allocation79_spill] sm:$0xff] %v18051_v57  ;;  %13375 = vmatprep.subr.bf16.mxu1 %v18051_v57  ;;  %v18109_v24 = vpop.permute.xlu1 %5851  ;;  %v18115_v60 = vpop.permute.xlu0 %5923 }
 0x7bb   : > { %13379 = vmatpush1.bf16.msra.mxu1 %v18059_v52  ;;  %21466 = vst [vmem:[#allocation92_spill] sm:$0xff] %v18109_v24  ;;  %21468 = vst [vmem:[#allocation94_spill] sm:$0xff] %v18115_v60  ;;  %v18128_v24 = vadd.f32 %v17663_v26, %v17965_v21 }
 0x7bc   : > { %13376 = vmatprep.subr.bf16.mxu1 %v18068_v42 }
 0x7bd   : > { %v12392_v9 = vmul.f32 -1.442695, %v18128_v24 }
 0x7be   : > { %13722 = vset.pattern.permute.xlu1 %v21433_v38  ;;  %v18113_v11 = vpop.permute.xlu1 %5911  ;;  %v18124_v45 = vpop.permute.xlu0 %5392 }
 0x7bf   : > { %5502 = vperm.xlu1 %13722, %v18054_v55   ;;  %13380 = vmatpush1.bf16.msra.mxu1 %v18073_v29  ;;  %21470 = vst [vmem:[#allocation96_spill] sm:$0xff] %v18124_v45  ;;  %v18157_v55 = vld [vmem:[%s15850_s4 + $0x30] sm:$0xff]   ;;  %v14848_v29 = vld [vmem:[%s15857_s2 + $0x38] sm:$0xff]  }
 0x7c0   : > { %13377 = vmatprep.subr.bf16.mxu1 %v18085_v15  ;;  %21475 = vst [vmem:[#allocation101_spill] sm:$0xff] %v18157_v55  ;;  %v5819_v13 = vunpack.c.h.bf16 %v18157_v55  ;;  %v6044_v60 = vunpack.c.l.bf16 %v14848_v29 }
 0x7c2   : > { %v18121_v1 = vpop.permute.xlu1 %6071  ;;  %v18142_v21 = vpop.permute.xlu0 %5437  ;;  %v6204_v57 = vmul.f32 %v17949_v49, %v6044_v60 }
 0x7c3   : > { %13381 = vmatpush1.bf16.msra.mxu1 %v18080_v27  ;;  %21469 = vst [vmem:[#allocation95_spill] sm:$0xff] %v18121_v1  ;;  %21471 = vst [vmem:[#allocation97_spill] sm:$0xff] %v18142_v21  ;;  %v14843_v21 = vld [vmem:[%s16330_s18 + $0x38] sm:$0xff]  }
 0x7c4   : > { %v14844_v27 = vld [vmem:[%s15917_s8 + $0x38] sm:$0xff]  }
 0x7c5   : > { %v5372_v4 = vunpack.c.l.bf16 %v14844_v27 }
 0x7c6   : > { %v18135_v32 = vpop.permute.xlu1 %6135  ;;  %v18147_v53 = vpop.permute.xlu0 %5447 }
 0x7c7   : > { %21472 = vst [vmem:[#allocation98_spill] sm:$0xff] %v18147_v53 }
 0x7ca   : > { %v18152_v48 = vpop.permute.xlu0 %5457 }
 0x7cb   : > { %21474 = vst [vmem:[#allocation100_spill] sm:$0xff] %v18152_v48  ;;  %v18175_v48 = vld [vmem:[%s15857_s2 + $0x30] sm:$0xff]  }
 0x7cc   : > { %21478 = vst [vmem:[#allocation104_spill] sm:$0xff] %v18175_v48 }
 0x7ff   : > { %v7250_v47 = vpop.f32.mrb[120].mxu0 }
 0x800   : > { %v18133_v5 = vadd.f32 %v14842_v43, %v7250_v47  ;;  %v13350_v3 = vpop.f32.mrb[121].mxu0  ;;  %v18145_v47 = vpop.permute.xlu1 %6139 }
 0x801   : > { %v7253_v46 = vpop.f32.mrb[122].mxu0  ;;  %v14639_v3 = vpop.eup %14638 }
 0x802   : > { %v12385_v1 = vmul.f32 -1.442695, %v18133_v5  ;;  %v18138_v37 = vadd.f32 %v14842_v43, %v7253_v46  ;;  %v13351_v45 = vpop.f32.mrb[123].mxu0  ;;  %v7409_v46 = vadd.f32 1.0, %v14639_v3 }
 0x804   : > { %14640 = vpow2.f32 %v12385_v1  ;;  %v12386_v26 = vmul.f32 -1.442695, %v18138_v37  ;;  %v18149_v45 = vpop.permute.xlu1 %5635 }
 0x805   : > { %21473 = vst [vmem:[#allocation99_spill] sm:$0xff] %v18149_v45  ;;  %v14845_v45 = vld [vmem:[%s15850_s4 + $0x38] sm:$0xff]  }
 0x806   : > { %14642 = vpow2.f32 %v12386_v26  ;;  %v5596_v26 = vunpack.c.l.bf16 %v14843_v21  ;;  %v5820_v3 = vunpack.c.l.bf16 %v14845_v45 }
 0x807   : > { %14644 = vrcp.f32 %v17793_v50 }
 0x808   : > { %14646 = vpow2.f32 %v12392_v9  ;;  %v5756_v15 = vmul.f32 %v17941_v30, %v5596_v26  ;;  %v5597_v30 = vunpack.c.h.bf16 %v14843_v21  ;;  %v6045_v26 = vunpack.c.h.bf16 %v14848_v29 }
 0x809   : > { %v5980_v52 = vmul.f32 %v17945_v62, %v5820_v3  ;;  %v18188_v29 = vmul.f32 %v17877_v19, %v5819_v13  ;;  %v5566_v19 = vmul.f32 %v17957_v41, %v5374_v14  ;;  %v14855_v14 = vld [vmem:[%s16330_s18 + $0x48] sm:$0xff]  }
 0x80a   : > { %v5757_v60 = vmul.f32 %v17935_v33, %v5597_v30 }
 0x80e   : > { %v14641_v43 = vpop.eup %14640 }
 0x80f   : > { %v7263_v1 = vadd.f32 1.0, %v14641_v43  ;;  %v5821_v43 = vunpack.c.h.bf16 %v14845_v45 }
 0x810   : > { %v14643_v25 = vpop.eup %14642 }
 0x811   : > { %v14645_v56 = vpop.eup %14644  ;;  %14648 = vrcp.f32 %v7263_v1  ;;  %v7264_v9 = vadd.f32 1.0, %v14643_v25  ;;  %v18164_v1 = vld [vmem:[%s15917_s8 + $0x30] sm:$0xff]  }
 0x812   : > { %v14647_v50 = vpop.eup %14646  ;;  %14650 = vrcp.f32 %v7409_v46  ;;  %v6855_v53 = vpop.xlane.xlu1 %6854  ;;  %v18161_v25 = vmul.f32 %v14645_v56, %v17630_v61  ;;  %v5370_v46 = vunpack.c.l.bf16 %v18164_v1  ;;  %v14851_v56 = vld [vmem:[%s16330_s18 + $0x40] sm:$0xff]  }
 0x813   : > { %14652 = vrcp.f32 %v7264_v9  ;;  %v7410_v9 = vadd.f32 1.0, %v14647_v50  ;;  %v6852_v45 = vpop.xlane.xlu0 %6851  ;;  %v5564_v50 = vmul.f32 %v17939_v58, %v5372_v4  ;;  %v5599_v40 = vunpack.c.h.bf16 %v14851_v56  ;;  %v14853_v61 = vld [vmem:[%s15850_s4 + $0x40] sm:$0xff]  }
 0x814   : > { %14654 = vrcp.f32 %v6855_v53  ;;  %21476 = vst [vmem:[#allocation102_spill] sm:$0xff] %v18161_v25  ;;  %v5598_v25 = vunpack.c.l.bf16 %v14851_v56  ;;  %v5373_v53 = vunpack.c.h.bf16 %v14844_v27  ;;  %v5822_v48 = vunpack.c.l.bf16 %v14853_v61 }
 0x815   : > { %14656 = vrcp.f32 %v6852_v45  ;;  %v5788_v55 = vadd.f32 %v5756_v15, %v5564_v50  ;;  %v18191_v58 = vmul.f32 %v17903_v17, %v5370_v46  ;;  %v18197_v27 = vmul.f32 %v17912_v2, %v5594_v12  ;;  %v14854_v15 = vld [vmem:[%s15857_s2 + $0x40] sm:$0xff]  }
 0x816   : > { %v18179_v42 = vpop.permute.xlu1 %5492  ;;  %14658 = vrcp.f32 %v7410_v9  ;;  %v5758_v62 = vmul.f32 %v17961_v22, %v5598_v25  ;;  %v6046_v3 = vunpack.c.l.bf16 %v14854_v15  ;;  %v5375_v22 = vunpack.c.h.bf16 %v14852_v36 }
 0x817   : > { %21479 = vst [vmem:[#allocation105_spill] sm:$0xff] %v18179_v42  ;;  %v5981_v42 = vmul.f32 %v17971_v8, %v5821_v43  ;;  %v6012_v49 = vadd.f32 %v5980_v52, %v5788_v55  ;;  %v6205_v46 = vmul.f32 %v17937_v35, %v6045_v26  ;;  %v5759_v12 = vmul.f32 %v17953_v23, %v5599_v40 }
 0x818   : > { %v5982_v2 = vmul.f32 %v17969_v54, %v5822_v48  ;;  %v5790_v55 = vadd.f32 %v5758_v62, %v5566_v19  ;;  %v5823_v52 = vunpack.c.h.bf16 %v14853_v61  ;;  %v6206_v36 = vmul.f32 %v18091_v31, %v6046_v3  ;;  %v14857_v31 = vld [vmem:[%s15850_s4 + $0x48] sm:$0xff]  }
 0x819   : > { %v6236_v9 = vadd.f32 %v6204_v57, %v6012_v49  ;;  %v5600_v35 = vunpack.c.l.bf16 %v14855_v14  ;;  %v6047_v48 = vunpack.c.h.bf16 %v14854_v15  ;;  %v5601_v26 = vunpack.c.h.bf16 %v14855_v14  ;;  %v14858_v3 = vld [vmem:[%s15857_s2 + $0x48] sm:$0xff]  }
 0x81a   : > { %v18194_v4 = vpop.permute.xlu1 %5695  ;;  %v6014_v56 = vadd.f32 %v5982_v2, %v5790_v55  ;;  %v5824_v50 = vunpack.c.l.bf16 %v14857_v31  ;;  %v5825_v62 = vunpack.c.h.bf16 %v14857_v31 }
 0x81b   : > { %v14649_v21 = vpop.eup %14648  ;;  %v5468_v8 = vpop.permute.xlu0 %5467  ;;  %v5760_v15 = vmul.f32 %v18101_v7, %v5600_v35  ;;  %v14860_v35 = vld [vmem:[%s16330_s18 + $0x50] sm:$0xff]  }
 0x81c   : > { %v14651_v43 = vpop.eup %14650  ;;  %v7269_v13 = vmul.f32 %v14649_v21, %v18133_v5  ;;  %v5565_v17 = vmul.f32 %v5468_v8, %v5373_v53  ;;  %v14856_v53 = vld [vmem:[%s15917_s8 + $0x48] sm:$0xff]   ;;  %v6238_v49 = vadd.f32 %v6206_v36, %v6014_v56  ;;  %v6048_v8 = vunpack.c.l.bf16 %v14858_v3 }
 0x81d   : > { %v14653_v25 = vpop.eup %14652  ;;  %v7415_v23 = vmul.f32 %v14651_v43, %v18119_v59  ;;  %v5377_v61 = vunpack.c.h.bf16 %v14856_v53  ;;  %v5376_v30 = vunpack.c.l.bf16 %v14856_v53  ;;  %v6049_v43 = vunpack.c.h.bf16 %v14858_v3 }
 0x81e   : > { %v14655_v33 = vpop.eup %14654  ;;  %v7270_v45 = vmul.f32 %v14653_v25, %v18138_v37  ;;  %v5789_v41 = vadd.f32 %v5757_v60, %v5565_v17  ;;  %13354 = vmatprep.mubr.msk.f32.mxu0 %vm1957_vm2, %v7269_v13  ;;  %v18208_v5 = vpop.permute.xlu1 %5699  ;;  %v5985_v2 = vmul.f32 %v18107_v39, %v5825_v62 }
 0x81f   : > { %v5478_v40 = vpop.permute.xlu0 %5477  ;;  %v18214_v54 = vmul.f32 %v14655_v33, %v17975_v63  ;;  %v14657_v59 = vpop.eup %14656  ;;  %v5983_v63 = vmul.f32 %v18099_v0, %v5823_v52  ;;  %v6207_v0 = vmul.f32 %v18093_v10, %v6047_v48  ;;  %v5568_v25 = vmul.f32 %v18097_v18, %v5376_v30 }
 0x820   : > { %v6013_v57 = vadd.f32 %v5981_v42, %v5789_v41  ;;  %13355 = vmatmul.mubr.msk.f32.vlgmr.msra.gmra.mrb[102].mxu0 %vm1957_vm2, %v7270_v45  ;;  %v5567_v37 = vmul.f32 %v5478_v40, %v5375_v22  ;;  %v14659_v60 = vpop.eup %14658  ;;  %v18234_v7 = vmul.f32 %v14657_v59, %v17977_v20  ;;  %v5371_v18 = vunpack.c.h.bf16 %v18164_v1  ;;  %v14859_v41 = vld [vmem:[%s15917_s8 + $0x50] sm:$0xff]   ;;  %v7922_v40 = vld [vmem:[#allocation2 + $0x80] sm:$0xff] }
 0x821   : > { %13370 = vmatpush3.msra.mxu0 %v17929_v16  ;;  %13371 = vmatprep.mubr.msk.f32.mxu0 %vm1957_vm2, %v7415_v23  ;;  %v7416_v33 = vmul.f32 %v14659_v60, %v18128_v24  ;;  %v5792_v10 = vadd.f32 %v5760_v15, %v5568_v25  ;;  %v5379_v36 = vunpack.c.h.bf16 %v14859_v41  ;;  %v6209_v1 = vmul.f32 %v18145_v47, %v6049_v43  ;;  %v21484_v15 = vld [vmem:[#allocation101_spill] sm:$0xff]  ;;  %v21488_v25 = vld [vmem:[#allocation84_spill] sm:$0xff] }
 0x822   : > { %v6237_v42 = vadd.f32 %v6205_v46, %v6013_v57  ;;  %v5791_v21 = vadd.f32 %v5759_v12, %v5567_v37  ;;  %6869 = vperm.xlu1 %13722, %v18214_v54   ;;  %6881 = vperm.xlu0 %13723, %v18214_v54   ;;  %v5761_v46 = vmul.f32 %v18105_v34, %v5601_v26  ;;  %v7925_v34 = vld [vmem:[#allocation2 + $0x88] sm:$0x1]  ;;  %v5603_v47 = vunpack.c.h.bf16 %v14860_v35  ;;  %v7931_v26 = vld [vmem:[#allocation2 + $0x98] sm:$0x1] }
 0x823   : > { %v18226_v16 = vpop.permute.xlu1 %5859  ;;  %v5488_v19 = vpop.permute.xlu0 %5487  ;;  %8208 = vmatprep.subr.bf16.mxu0 %v18034_v6  ;;  %v5984_v12 = vmul.f32 %v18113_v11, %v5824_v50  ;;  %v6208_v11 = vmul.f32 %v18135_v32, %v6048_v8  ;;  %v5602_v32 = vunpack.c.l.bf16 %v14860_v35  ;;  %v5378_v30 = vunpack.c.l.bf16 %v14859_v41  ;;  %v14861_v50 = vld [vmem:[%s15850_s4 + $0x50] sm:$0xff]  }
 0x824   : > { %v7726_v13 = vpack.c.bf16 %v6237_v42, %v6236_v9  ;;  %v6015_v17 = vadd.f32 %v5983_v63, %v5791_v21  ;;  %v5569_v22 = vmul.f32 %v5488_v19, %v5377_v61  ;;  %v21482_v61 = vld [vmem:[#allocation79_spill] sm:$0xff]  ;;  %v5826_v59 = vunpack.c.l.bf16 %v14861_v50 }
 0x825   : > { %v6016_v14 = vadd.f32 %v5984_v12, %v5792_v10  ;;  %v21483_v63 = vmov 3   ;;  %v21485_v3 = vunpack.c.l.bf16 %v21484_v15  ;;  %v21486_v8 = vld [vmem:[#allocation71_spill] sm:$0xff]  ;;  %v5827_v19 = vunpack.c.h.bf16 %v14861_v50  ;;  %v21491_v10 = vld [vmem:[#allocation105_spill] sm:$0xff] }
 0x826   : > { %v7785_v55 = vshrl.u32 %v7726_v13, 16  ;;  %v6239_v6 = vadd.f32 %v6207_v0, %v6015_v17  ;;  %13724 = vset.pattern.permute.xlu1 %v21437_v44  ;;  %13726 = vset.pattern.permute.xlu0 %v21433_v38  ;;  %v5793_v20 = vadd.f32 %v5761_v46, %v5569_v22  ;;  %v7788_v52 = vshll.u32 %v7726_v13, 16  ;;  %v7928_v0 = vld [vmem:[#allocation2 + $0x90] sm:$0xff] }
 0x827   : > { %6895 = vperm.xlu1 %13724, %v18214_v54   ;;  %6864 = vperm.xlu0 %13726, %v18234_v7   ;;  %v5920_v39 = vpop.permute.xlu1 %5919  ;;  %v5498_v24 = vpop.permute.xlu0 %5497  ;;  %v6240_v56 = vadd.f32 %v6208_v11, %v6016_v14  ;;  %v5978_v43 = vmul.f32 %v21486_v8, %v21485_v3  ;;  %v21487_v17 = vld [vmem:[#allocation103_spill] sm:$0xff]  ;;  %v5763_v46 = vmul.f32 %v18208_v5, %v5603_v47  ;;  %v7937_v5 = vld [vmem:[#allocation2 + $0xa8] sm:$0x1] }
 0x828   : > { %v7787_v9 = vrot.slane %v7785_v55, 7  ;;  %v7727_v45 = vpack.c.bf16 %v6239_v6, %v6238_v49  ;;  %13372 = vmatmul.mubr.msk.f32.vlgmr.msra.gmra.mrb[102].mxu0 %vm1957_vm2, %v7416_v33  ;;  %v6017_v48 = vadd.f32 %v5985_v2, %v5793_v20  ;;  %v5571_v60 = vmul.f32 %v5498_v24, %v5379_v36  ;;  %v21489_v33 = vld [vmem:[#allocation85_spill] sm:$0xff]  ;;  %v21490_v55 = vld [vmem:[#allocation100_spill] sm:$0xff]  ;;  %v14862_v20 = vld [vmem:[%s15857_s2 + $0x50] sm:$0xff]  }
 0x829   : > { %8209 = vmatpush1.bf16.msra.mxu0 %v18041_v28  ;;  %8240 = vmatprep.mubr.bf16.mxu0 %v21433_v38  ;;  %v5595_v22 = vunpack.c.h.bf16 %v21487_v17  ;;  %v5563_v6 = vmul.f32 %v21490_v55, %v5371_v18  ;;  %v5570_v11 = vmul.f32 %v21491_v10, %v5378_v30  ;;  %v6050_v24 = vunpack.c.l.bf16 %v14862_v20  ;;  %v21496_v47 = vld [vmem:[#allocation94_spill] sm:$0xff]  ;;  %v21504_v10 = vld [vmem:[#allocation76_spill] sm:$0xff] }
 0x82a   : > { %v7790_v57 = vor.u32 %v7788_v52, %v7787_v9  ;;  %v7926_v37 = vsel %vm17988_vm6, %v7787_v9, %v7925_v34  ;;  %v7792_v53 = vshrl.u32 %v7727_v45, 16  ;;  %8210 = vmatprep.subr.bf16.mxu0 %v21482_v61  ;;  %v6241_v31 = vadd.f32 %v6209_v1, %v6017_v48  ;;  %v21492_v9 = vld [vmem:[#allocation104_spill] sm:$0xff]  ;;  %v21497_v30 = vld [vmem:[#allocation86_spill] sm:$0xff] }
 0x82b   : > { %7927 = vst [vmem:[#allocation2 + $0x88] sm:$0x1] %v7926_v37  ;;  %13725 = vset.pattern.permute.xlu1 %v21483_v63  ;;  %13732 = vset.pattern.permute.xlu0 %v21437_v44  ;;  %v18262_v28 = vpop.permute.xlu0 %5507  ;;  %v7795_v21 = vshll.u32 %v7727_v45, 16  ;;  %v6043_v52 = vunpack.c.h.bf16 %v21492_v9  ;;  %v5986_v45 = vmul.f32 %v5920_v39, %v5826_v59  ;;  %v5795_v41 = vadd.f32 %v5763_v46, %v5571_v60  ;;  %v21498_v59 = vld [vmem:[#allocation88_spill] sm:$0xff]  ;;  %v7647_v17 = vld [vmem:[#allocation2 + $0x8] sm:$0x1] }
 0x82c   : > { %v18266_v62 = vsel %vm18250_vm9, %v7790_v57, %v7922_v40  ;;  %v7794_v42 = vrot.slane %v7792_v53, 7  ;;  %6909 = vperm.xlu1 %13725, %v18214_v54   ;;  %6891 = vperm.xlu0 %13732, %v18234_v7   ;;  %v18270_v49 = vpop.permute.xlu1 %6079  ;;  %v7728_v13 = vpack.c.bf16 %v6241_v31, %v6240_v56  ;;  %v5762_v54 = vmul.f32 %v18194_v4, %v5602_v32  ;;  %v21495_v57 = vld [vmem:[#allocation68_spill] sm:$0xff]  ;;  %v7934_v56 = vld [vmem:[#allocation2 + $0xa0] sm:$0xff]  ;;  %v21503_v46 = vld [vmem:[#allocation87_spill] sm:$0xff] }
 0x82d   : > { %7924 = vst [vmem:[#allocation2 + $0x80] sm:$0xff] %v18266_v62  ;;  %8211 = vmatpush1.bf16.msra.mxu0 %v21488_v25  ;;  %v21493_v36 = vmov 1   ;;  %v6051_v40 = vunpack.c.h.bf16 %v14862_v20  ;;  %v5786_v39 = vadd.f32 %v18197_v27, %v18191_v58  ;;  %v21494_v48 = vunpack.c.l.bf16 %v21492_v9 }
 0x82e   : > { %v7797_v12 = vor.u32 %v7795_v21, %v7794_v42  ;;  %v7932_v2 = vsel %vm17988_vm6, %v7794_v42, %v7931_v26  ;;  %8212 = vmatprep.subr.bf16.mxu0 %v21489_v33  ;;  %v7799_v34 = vshrl.u32 %v7728_v13, 16  ;;  %v7802_v35 = vshll.u32 %v7728_v13, 16  ;;  %v21499_v42 = vld [vmem:[#allocation69_spill] sm:$0xff] }
 0x82f   : > { %7933 = vst [vmem:[#allocation2 + $0x98] sm:$0x1] %v7932_v2  ;;  %v6202_v37 = vmul.f32 %v21495_v57, %v21494_v48  ;;  %v5987_v53 = vmul.f32 %v21496_v47, %v5827_v19  ;;  %v5794_v61 = vadd.f32 %v5762_v54, %v5570_v11  ;;  %v6203_v58 = vmul.f32 %v21499_v42, %v6043_v52  ;;  %v21500_v19 = vld [vmem:[#allocation78_spill] sm:$0xff]  ;;  %v7591_v13 = vld [vmem:[#allocation2] sm:$0x1] }
 0x830   : > { %v18289_v4 = vsel %vm18250_vm9, %v7797_v12, %v7928_v0  ;;  %13727 = vset.pattern.permute.xlu1 %v21493_v36  ;;  %13733 = vset.pattern.permute.xlu0 %v21483_v63  ;;  %v6144_v18 = vpop.permute.xlu1 %6143  ;;  %v5668_v14 = vpop.permute.xlu0 %5667  ;;  %v7801_v1 = vrot.slane %v7799_v34, 7  ;;  %v6010_v27 = vadd.f32 %v5978_v43, %v5786_v39  ;;  %v21501_v43 = vld [vmem:[#allocation102_spill] sm:$0xff]  ;;  %v7648_v54 = vsel %vm17996_vm8, 0, %v7647_v17  ;;  %v7919_v11 = vld [vmem:[#allocation2 + $0x78] sm:$0x1] }
 0x831   : > { %7930 = vst [vmem:[#allocation2 + $0x90] sm:$0xff] %v18289_v4  ;;  %6877 = vperm.xlu1 %13727, %v18234_v7   ;;  %6905 = vperm.xlu0 %13733, %v18234_v7   ;;  %v5755_v32 = vmul.f32 %v5668_v14, %v5595_v22  ;;  %v6210_v7 = vmul.f32 %v6144_v18, %v6050_v24  ;;  %v7592_v22 = vsel %vm17988_vm6, 0, %v7591_v13  ;;  %7649 = vst [vmem:[#allocation2 + $0x8] sm:$0x1] %v7648_v54  ;;  %v21505_v24 = vld [vmem:[#allocation83_spill] sm:$0xff]  ;;  %v21513_v13 = vld [vmem:[#allocation80_spill] sm:$0xff] }
 0x832   : > { %8213 = vmatpush1.bf16.msra.mxu0 %v21497_v30  ;;  %v7804_v26 = vor.u32 %v7802_v35, %v7801_v1  ;;  %v7938_v31 = vsel %vm17988_vm6, %v7801_v1, %v7937_v5  ;;  %v6018_v21 = vadd.f32 %v5986_v45, %v5794_v61  ;;  %v6019_v15 = vadd.f32 %v5987_v53, %v5795_v41  ;;  %v7943_v52 = vld [vmem:[#allocation2 + $0xb8] sm:$0x1]  ;;  %v7594_v14 = vld [vmem:[#allocation2 + $0x10] sm:$0x1]  ;;  %v21507_v53 = vld [vmem:[#allocation45_spill] sm:$0xff] }
 0x833   : > { %v5787_v50 = vadd.f32 %v5755_v32, %v5563_v6  ;;  %8214 = vmatprep.subr.bf16.mxu0 %v21498_v59  ;;  %7939 = vst [vmem:[#allocation2 + $0xa8] sm:$0x1] %v7938_v31  ;;  %7593 = vst [vmem:[#allocation2] sm:$0x1] %v7592_v22  ;;  %v7650_v5 = vld [vmem:[#allocation2 + $0x18] sm:$0x1] }
 0x834   : > { %v6148_v60 = vpop.permute.xlu1 %6147  ;;  %v18309_v3 = vsel %vm18250_vm9, %v7804_v26, %v7934_v56  ;;  %v6242_v12 = vadd.f32 %v6210_v7, %v6018_v21  ;;  %v7651_v1 = vsel %vm17996_vm8, 0, %v7650_v5  ;;  %v7916_v35 = vld [vmem:[#allocation2 + $0x70] sm:$0xff]  ;;  %v7595_v39 = vsel %vm17988_vm6, 0, %v7594_v14  ;;  %v7653_v61 = vld [vmem:[#allocation2 + $0x28] sm:$0x1]  ;;  %v21509_v59 = vld [vmem:[#allocation49_spill] sm:$0xff] }
 0x835   : > { %v6011_v8 = vadd.f32 %v18188_v29, %v5787_v50  ;;  %5703 = vperm.xlu1 %13727, %v21500_v19   ;;  %13734 = vset.pattern.permute.xlu0 %v21433_v38  ;;  %v6211_v0 = vmul.f32 %v6148_v60, %v6051_v40  ;;  %7936 = vst [vmem:[#allocation2 + $0xa0] sm:$0xff] %v18309_v3  ;;  %v7940_v32 = vld [vmem:[#allocation2 + $0xb0] sm:$0xff]  ;;  %v21506_v40 = vld [vmem:[#allocation48_spill] sm:$0xff]  ;;  %7652 = vst [vmem:[#allocation2 + $0x18] sm:$0x1] %v7651_v1  ;;  %v7654_v56 = vsel %vm17996_vm8, 0, %v7653_v61 }
 0x836   : > { %5517 = vperm.xlu0 %13734, %v21501_v43   ;;  %8215 = vmatpush1.bf16.msra.mxu0 %v21503_v46  ;;  %v6234_v29 = vadd.f32 %v6202_v37, %v6010_v27  ;;  %7596 = vst [vmem:[#allocation2 + $0x10] sm:$0x1] %v7595_v39  ;;  %v7597_v31 = vld [vmem:[#allocation2 + $0x20] sm:$0x1]  ;;  %7655 = vst [vmem:[#allocation2 + $0x28] sm:$0x1] %v7654_v56 }
 0x837   : > { %v6235_v2 = vadd.f32 %v6203_v58, %v6011_v8  ;;  %v6243_v33 = vadd.f32 %v6211_v0, %v6019_v15  ;;  %v7598_v7 = vsel %vm17988_vm6, 0, %v7597_v31  ;;  %v21508_v50 = vld [vmem:[#allocation46_spill] sm:$0xff]  ;;  %v21511_v27 = vld [vmem:[#allocation64_spill] sm:$0xff]  ;;  %v7600_v21 = vld [vmem:[#allocation2 + $0x30] sm:$0x1] }
 0x838   : > { %7599 = vst [vmem:[#allocation2 + $0x20] sm:$0x1] %v7598_v7  ;;  %v21510_v58 = vld [vmem:[#allocation70_spill] sm:$0xff]  ;;  %v7656_v60 = vld [vmem:[#allocation2 + $0x38] sm:$0x1]  ;;  %v21512_v15 = vld [vmem:[#allocation47_spill] sm:$0xff] }
 0x839   : > { %v7725_v55 = vpack.c.bf16 %v6235_v2, %v6234_v29  ;;  %v7729_v6 = vpack.c.bf16 %v6243_v33, %v6242_v12  ;;  %5707 = vperm.xlu1 %13727, %v21504_v10   ;;  %14660 = vrcp.f32 %v21510_v58  ;;  %v7601_v8 = vsel %vm17988_vm6, 0, %v7600_v21  ;;  %v8049_v22 = vld [vmem:[#allocation2 + $0x88] sm:$0xff]  ;;  %v21515_v54 = vld [vmem:[#allocation51_spill] sm:$0xff]  ;;  %v7603_v46 = vld [vmem:[#allocation2 + $0x40] sm:$0x1] }
 0x83a   : > { %13735 = vset.pattern.permute.xlu0 %v21483_v63  ;;  %v7657_v0 = vsel %vm17996_vm8, 0, %v7656_v60  ;;  %7602 = vst [vmem:[#allocation2 + $0x30] sm:$0x1] %v7601_v8  ;;  %v7659_v29 = vld [vmem:[#allocation2 + $0x48] sm:$0x1]  ;;  %v7604_v12 = vsel %vm17988_vm6, 0, %v7603_v46 }
 0x83b   : > { %v7778_v34 = vshrl.u32 %v7725_v55, 16  ;;  %v7806_v20 = vshrl.u32 %v7729_v6, 16  ;;  %6067 = vperm.xlu0 %13735, %v21505_v24   ;;  %v7781_v9 = vshll.u32 %v7725_v55, 16  ;;  %v7809_v18 = vshll.u32 %v7729_v6, 16  ;;  %7658 = vst [vmem:[#allocation2 + $0x38] sm:$0x1] %v7657_v0 }
 0x83c   : > { %v7660_v2 = vsel %vm17996_vm8, 0, %v7659_v29  ;;  %7605 = vst [vmem:[#allocation2 + $0x40] sm:$0x1] %v7604_v12  ;;  %v21516_v33 = vld [vmem:[#allocation52_spill] sm:$0xff]  ;;  %v7683_v55 = vld [vmem:[#allocation2 + $0xc8] sm:$0x1] }
 0x83d   : > { %v7780_v45 = vrot.slane %v7778_v34, 7  ;;  %v7808_v41 = vrot.slane %v7806_v20, 7  ;;  %13728 = vset.pattern.permute.xlu1 %v21437_v44  ;;  %7661 = vst [vmem:[#allocation2 + $0x48] sm:$0x1] %v7660_v2  ;;  %14662 = vrcp.f32 %v21516_v33  ;;  %v7684_v6 = vsel %vm17996_vm8, 0, %v7683_v55  ;;  %v21520_v14 = vld [vmem:[#allocation53_spill] sm:$0xff] }
 0x83e   : > { %5867 = vperm.xlu1 %13728, %v21506_v40   ;;  %7685 = vst [vmem:[#allocation2 + $0xc8] sm:$0x1] %v7684_v6  ;;  %v7662_v20 = vld [vmem:[#allocation2 + $0x58] sm:$0x1]  ;;  %v21524_v56 = vld [vmem:[#allocation43_spill] sm:$0xff]  ;;  %v14864_v46 = vld [vmem:[%s16495_s19] sm:$0xff]  }
 0x83f   : > { %v7783_v48 = vor.u32 %v7781_v9, %v7780_v45  ;;  %v7920_v57 = vsel %vm17988_vm6, %v7780_v45, %v7919_v11  ;;  %v7811_v37 = vor.u32 %v7809_v18, %v7808_v41  ;;  %v7944_v47 = vsel %vm17988_vm6, %v7808_v41, %v7943_v52  ;;  %6075 = vperm.xlu0 %13735, %v21507_v53   ;;  %v7627_v11 = vld [vmem:[#allocation2 + $0xc0] sm:$0x1]  ;;  %v21518_v52 = vld [vmem:[#allocation82_spill] sm:$0xff]  ;;  %v7606_v45 = vld [vmem:[#allocation2 + $0x50] sm:$0x1] }
 0x840   : > { %7921 = vst [vmem:[#allocation2 + $0x78] sm:$0x1] %v7920_v57  ;;  %7945 = vst [vmem:[#allocation2 + $0xb8] sm:$0x1] %v7944_v47  ;;  %v7663_v24 = vsel %vm17996_vm8, 0, %v7662_v20  ;;  %v21517_v9 = vld [vmem:[#allocation73_spill] sm:$0xff]  ;;  %v6875_v29 = vunpack.c.h.bf16 %v14864_v46 }
 0x841   : > { %v7917_v30 = vsel %vm18250_vm9, %v7783_v48, %v7916_v35  ;;  %v18341_v26 = vsel %vm18250_vm9, %v7811_v37, %v7940_v32  ;;  %14664 = vrcp.f32 %v21517_v9  ;;  %7664 = vst [vmem:[#allocation2 + $0x58] sm:$0x1] %v7663_v24  ;;  %v21519_v41 = vld [vmem:[#allocation75_spill] sm:$0xff]  ;;  %v7607_v18 = vsel %vm17988_vm6, 0, %v7606_v45  ;;  %v7686_v1 = vld [vmem:[#allocation2 + $0xd8] sm:$0x1] }
 0x842   : > { %7918 = vst [vmem:[#allocation2 + $0x70] sm:$0xff] %v7917_v30  ;;  %7942 = vst [vmem:[#allocation2 + $0xb0] sm:$0xff] %v18341_v26  ;;  %5927 = vperm.xlu1 %13728, %v21500_v19   ;;  %14666 = vrcp.f32 %v21519_v41  ;;  %v21521_v35 = vld [vmem:[#allocation66_spill] sm:$0xff]  ;;  %v7687_v32 = vsel %vm17996_vm8, 0, %v7686_v1  ;;  %v21522_v57 = vld [vmem:[#allocation41_spill] sm:$0xff] }
 0x843   : > { %6083 = vperm.xlu0 %13735, %v21508_v50   ;;  %7608 = vst [vmem:[#allocation2 + $0x50] sm:$0x1] %v7607_v18  ;;  %14668 = vrcp.f32 %v21520_v14  ;;  %7688 = vst [vmem:[#allocation2 + $0xd8] sm:$0x1] %v7687_v32  ;;  %v21523_v47 = vld [vmem:[#allocation42_spill] sm:$0xff]  ;;  %v5616_v50 = vpop.permute.xlu0 %5615  ;;  %v14866_v55 = vld [vmem:[%s16330_s18] sm:$0xff]  }
 0x844   : > { %v7609_v31 = vld [vmem:[#allocation2 + $0x60] sm:$0x1]  ;;  %v7665_v7 = vld [vmem:[#allocation2 + $0x68] sm:$0x1]  ;;  %v5583_v6 = vunpack.c.h.bf16 %v14866_v55  ;;  %v21527_v32 = vld [vmem:[#allocation56_spill] sm:$0xff] }
 0x845   : > { %v7666_v58 = vsel %vm17996_vm8, 0, %v7665_v7  ;;  %v7689_v8 = vld [vmem:[#allocation2 + $0xe8] sm:$0x1]  ;;  %v14868_v45 = vld [vmem:[%s15917_s8] sm:$0xff]  }
 0x846   : > { %13729 = vset.pattern.permute.xlu1 %v21483_v63  ;;  %7667 = vst [vmem:[#allocation2 + $0x68] sm:$0x1] %v7666_v58  ;;  %v7690_v0 = vsel %vm17996_vm8, 0, %v7689_v8  ;;  %v14865_v12 = vld [vmem:[%s21525_s0] sm:$0xff]   ;;  %v5359_v41 = vunpack.c.h.bf16 %v14868_v45  ;;  %v5358_v18 = vunpack.c.l.bf16 %v14868_v45  ;;  %v7636_v45 = vld [vmem:[#allocation2 + $0xf0] sm:$0x1] }
 0x847   : > { %6087 = vperm.xlu1 %13729, %v21509_v59   ;;  %6091 = vperm.xlu0 %13735, %v21506_v40   ;;  %v8047_v42 = vld [vmem:[#allocation2 + $0x78] sm:$0xff]  ;;  %v7630_v40 = vld [vmem:[#allocation2 + $0xd0] sm:$0x1]  ;;  %7691 = vst [vmem:[#allocation2 + $0xe8] sm:$0x1] %v7690_v0  ;;  %v6889_v2 = vunpack.c.h.bf16 %v14865_v12  ;;  %v6888_v14 = vunpack.c.l.bf16 %v14865_v12  ;;  %v14869_v1 = vld [vmem:[%s15850_s4] sm:$0xff]  }
 0x848   : > { %12419 = vmatmul.mubr.msk.bf16.vlgmr.msra.gmra.mrb[72].mxu1 %vm1523_vm0, %v8047_v42  ;;  %v7610_v42 = vsel %vm17988_vm6, 0, %v7609_v31  ;;  %v5807_v7 = vunpack.c.h.bf16 %v14869_v1  ;;  %s12568_s0 = sshll.u32 %s11462_s13, 7 }
 0x849   : > { %8384 = vmatprep.mubr.bf16.mxu1 %v21433_v38  ;;  %7611 = vst [vmem:[#allocation2 + $0x60] sm:$0x1] %v7610_v42  ;;  %v14870_v42 = vld [vmem:[%s15917_s8 + $0x8] sm:$0xff]   ;;  %s20926_s1 = scalar_lea.hbm %s21900_s24, %s12568_s0 }
 0x84a   : > { %v5360_v58 = vunpack.c.l.bf16 %v14870_v42 }
 0x84b   : > { %6151 = vperm.xlu1 %13729, %v21500_v19   ;;  %6099 = vperm.xlu0 %13735, %v21511_v27   ;;  %v14661_v19 = vpop.eup %14660 }
 0x84c   : > { %v5350_v17 = vmul.f32 %v14661_v19, %v21513_v13  ;;  %v14663_v34 = vpop.eup %14662  ;;  %v7633_v19 = vld [vmem:[#allocation2 + $0xe0] sm:$0x1] }
 0x84d   : > { %v18408_v5 = vmul.f32 %v14663_v34, %v21518_v52  ;;  %v14665_v39 = vpop.eup %14664  ;;  %v7634_v13 = vsel %vm17988_vm6, 0, %v7633_v19  ;;  %v6874_v52 = vunpack.c.l.bf16 %v14864_v46 }
 0x84e   : > { %v14667_v48 = vpop.eup %14666  ;;  %v5352_v37 = vmul.f32 %v14665_v39, %v21522_v57  ;;  %7635 = vst [vmem:[#allocation2 + $0xe0] sm:$0x1] %v7634_v13  ;;  %v21530_v13 = vld [vmem:[#allocation74_spill] sm:$0xff] }
 0x84f   : > { %6155 = vperm.xlu1 %13729, %v21504_v10   ;;  %13739 = vset.pattern.permute.xlu0 %v21493_v36  ;;  %v18433_v53 = vmul.f32 %v14667_v48, %v21523_v47  ;;  %v14669_v61 = vpop.eup %14668 }
 0x850   : > { %5631 = vperm.xlu0 %13739, %v21512_v15   ;;  %12420 = vmatmul.mubr.msk.bf16.gmra.mrb[76].mxu1 %vm1523_vm0, %v18266_v62  ;;  %v21514_v62 = vld [vmem:[#allocation50_spill] sm:$0xff]  ;;  %v18439_v30 = vmul.f32 %v14669_v61, %v21524_v56 }
 0x851   : > { %8394 = vmatprep.mubr.bf16.mxu1 %v21433_v38 }
 0x853   : > { %13730 = vset.pattern.permute.xlu1 %v21493_v36 }
 0x854   : > { %5651 = vperm.xlu1 %13730, %v21511_v27   ;;  %5639 = vperm.xlu0 %13739, %v21509_v59  }
 0x858   : > { %13731 = vset.pattern.permute.xlu1 %v21433_v38  ;;  %5647 = vperm.xlu0 %13739, %v21514_v62  }
 0x859   : > { %5512 = vperm.xlu1 %13731, %v5350_v17   ;;  %12421 = vmatmul.mubr.msk.bf16.gmra.mrb[80].mxu1 %vm1523_vm0, %v8049_v22  ;;  %v14863_v22 = vld [vmem:[%s16083_s27] sm:$0xff]   ;;  %s21526_s27 = scalar_lea.vmem [#allocation9], %s15864_s14 }
 0x85a   : > { %8402 = vmatprep.mubr.bf16.mxu1 %v21433_v38  ;;  %v14867_v24 = vld [vmem:[%s21526_s27] sm:$0xff]   ;;  %s18493_s14 = scalar_select %p7578_p10, 1.0, 0.0 }
 0x85b   : > { %v6903_v9 = vunpack.c.h.bf16 %v14867_v24  ;;  %v6902_v48 = vunpack.c.l.bf16 %v14867_v24  ;;  %v14872_v24 = vld [vmem:[%s15857_s2] sm:$0xff]  }
 0x85c   : > { %5655 = vperm.xlu0 %13739, %v21515_v54  }
 0x85d   : > { %13736 = vset.pattern.permute.xlu1 %v21493_v36 }
 0x85e   : > { %5711 = vperm.xlu1 %13736, %v5350_v17  }
 0x860   : > { %13740 = vset.pattern.permute.xlu0 %v21437_v44 }
 0x861   : > { %5863 = vperm.xlu0 %13740, %v21509_v59   ;;  %12422 = vmatmul.mubr.msk.bf16.gmra.mrb[84].mxu1 %vm1523_vm0, %v18289_v4  ;;  %v8051_v4 = vld [vmem:[#allocation2 + $0x98] sm:$0xff]  ;;  %v18451_v59 = vpop.permute.xlu1 %5643 }
 0x862   : > { %5715 = vperm.xlu1 %13736, %v21501_v43   ;;  %8412 = vmatprep.mubr.bf16.mxu1 %v21433_v38 }
 0x865   : > { %5931 = vperm.xlu0 %13740, %v21504_v10   ;;  %v7628_v10 = vsel %vm17988_vm6, 0, %v7627_v11  ;;  %v18461_v21 = vpop.permute.xlu1 %5502  ;;  %v5582_v11 = vunpack.c.l.bf16 %v14866_v55  ;;  %v21531_v55 = vld [vmem:[#allocation57_spill] sm:$0xff] }
 0x866   : > { %13737 = vset.pattern.permute.xlu1 %v21437_v44  ;;  %7629 = vst [vmem:[#allocation2 + $0xc0] sm:$0x1] %v7628_v10  ;;  %v6860_v10 = vunpack.c.l.bf16 %v14863_v22 }
 0x867   : > { %5875 = vperm.xlu1 %13737, %v21511_v27   ;;  %v18459_v27 = vpop.permute.xlu0 %5623 }
 0x869   : > { %5871 = vperm.xlu0 %13740, %v21514_v62   ;;  %12423 = vmatmul.mubr.msk.bf16.gmra.mrb[88].mxu1 %vm1523_vm0, %v8051_v4 }
 0x86a   : > { %8420 = vmatprep.mubr.bf16.mxu1 %v21433_v38 }
 0x86b   : > { %5935 = vperm.xlu1 %13737, %v5350_v17  }
 0x86d   : > { %5939 = vperm.xlu0 %13740, %v21501_v43  }
 0x86f   : > { %13738 = vset.pattern.permute.xlu1 %v21483_v63 }
 0x870   : > { %6095 = vperm.xlu1 %13738, %v21514_v62  }
 0x871   : > { %5879 = vperm.xlu0 %13740, %v21515_v54   ;;  %12424 = vmatmul.mubr.msk.bf16.gmra.mrb[92].mxu1 %vm1523_vm0, %v18309_v3  ;;  %v8053_v3 = vld [vmem:[#allocation2 + $0xa8] sm:$0xff] }
 0x872   : > { %8430 = vmatprep.mubr.bf16.mxu1 %v21433_v38 }
 0x874   : > { %6159 = vperm.xlu1 %13738, %v5350_v17  }
 0x875   : > { %5947 = vperm.xlu0 %13740, %v18408_v5  }
 0x878   : > { %6163 = vperm.xlu1 %13738, %v21501_v43   ;;  %v7631_v43 = vsel %vm17988_vm6, 0, %v7630_v40  ;;  %v5743_v40 = vmul.f32 %v21527_v32, %v5583_v6  ;;  %v5967_v6 = vmul.f32 %v21531_v55, %v5807_v7  ;;  %v14874_v7 = vld [vmem:[%s15857_s2 + $0x8] sm:$0xff]  }
 0x879   : > { %13746 = vset.pattern.permute.xlu0 %v21483_v63  ;;  %12425 = vmatmul.mubr.msk.bf16.gmra.mrb[96].mxu1 %vm1523_vm0, %v8053_v3  ;;  %7632 = vst [vmem:[#allocation2 + $0xd0] sm:$0x1] %v7631_v43  ;;  %v5742_v43 = vmul.f32 %v5616_v50, %v5582_v11  ;;  %v21529_v50 = vld [vmem:[#allocation96_spill] sm:$0xff] }
 0x87a   : > { %6107 = vperm.xlu0 %13746, %v21521_v35   ;;  %8438 = vmatprep.mubr.bf16.mxu1 %v21433_v38  ;;  %v5550_v8 = vmul.f32 %v21529_v50, %v5358_v18  ;;  %v14873_v18 = vld [vmem:[%s15850_s4 + $0x8] sm:$0xff]  }
 0x87c   : > { %13741 = vset.pattern.permute.xlu1 %v21493_v36  ;;  %v5774_v46 = vadd.f32 %v5742_v43, %v5550_v8  ;;  %v21537_v8 = vld [vmem:[#allocation92_spill] sm:$0xff] }
 0x87d   : > { %5659 = vperm.xlu1 %13741, %v21521_v35  }
 0x87e   : > { %13747 = vset.pattern.permute.xlu0 %v21433_v38 }
 0x87f   : > { %5527 = vperm.xlu0 %13747, %v18408_v5  }
 0x881   : > { %13742 = vset.pattern.permute.xlu1 %v21433_v38  ;;  %12426 = vmatmul.mubr.msk.bf16.gmra.mrb[100].mxu1 %vm1523_vm0, %v18341_v26  ;;  %v8055_v26 = vld [vmem:[#allocation2 + $0xb8] sm:$0xff] }
 0x882   : > { %5522 = vperm.xlu1 %13742, %v5352_v37   ;;  %8448 = vmatprep.mubr.bf16.mxu1 %v21433_v38 }
 0x883   : > { %5532 = vperm.xlu0 %13747, %v18433_v53  }
 0x886   : > { %13743 = vset.pattern.permute.xlu1 %v21493_v36 }
 0x887   : > { %5719 = vperm.xlu1 %13743, %v5352_v37   ;;  %13750 = vset.pattern.permute.xlu0 %v21493_v36 }
 0x888   : > { %5731 = vperm.xlu0 %13750, %v18439_v30  }
 0x889   : > { %12427 = vmatmul.mubr.msk.bf16.gmra.mrb[104].mxu1 %vm1523_vm0, %v8055_v26  ;;  %v21528_v26 = vld [vmem:[#allocation55_spill] sm:$0xff] }
 0x88a   : > { %8456 = vmatprep.mubr.bf16.mxu1 %v21433_v38  ;;  %v5551_v31 = vmul.f32 %v21528_v26, %v5359_v41  ;;  %v7692_v41 = vld [vmem:[#allocation2 + $0xf8] sm:$0x1] }
 0x88b   : > { %5723 = vperm.xlu1 %13743, %v18408_v5  }
 0x88c   : > { %13752 = vset.pattern.permute.xlu0 %v21483_v63 }
 0x88d   : > { %6175 = vperm.xlu0 %13752, %v18433_v53  }
 0x88f   : > { %13744 = vset.pattern.permute.xlu1 %v21437_v44 }
 0x890   : > { %5883 = vperm.xlu1 %13744, %v21521_v35   ;;  %v5806_v35 = vunpack.c.l.bf16 %v14869_v1 }
 0x891   : > { %13754 = vset.pattern.permute.xlu0 %v21433_v38 }
 0x894   : > { %5943 = vperm.xlu1 %13744, %v5352_v37  }
 0x898   : > { %13745 = vset.pattern.permute.xlu1 %v21483_v63 }
 0x899   : > { %6103 = vperm.xlu1 %13745, %v21515_v54   ;;  %v6861_v54 = vunpack.c.h.bf16 %v14863_v22  ;;  %v5361_v22 = vunpack.c.h.bf16 %v14870_v42  ;;  %v6033_v42 = vunpack.c.h.bf16 %v14874_v7 }
 0x89d   : > { %6167 = vperm.xlu1 %13745, %v5352_v37  }
 0x8a1   : > { %v6870_v60 = vpop.permute.xlu1 %6869  ;;  %6171 = vperm.xlu1 %13745, %v18408_v5   ;;  %v6882_v15 = vpop.permute.xlu0 %6881  ;;  %v13868_v5 = vld [vmem:[%s21455_s15 + $0x44] ss:$8 sps:$4 sm:$0xff]  }
 0x8a2   : > { %v6873_v34 = vmul.f32 %v6870_v60, %v6861_v54  ;;  %v6885_v20 = vmul.f32 %v6882_v15, %v6875_v29  ;;  %9252 = vmatprep.subr.bf16.mxu0 %v13868_v5  ;;  %v14871_v60 = vld [vmem:[%s16330_s18 + $0x8] sm:$0xff]   ;;  %v6031_v5 = vunpack.c.h.bf16 %v14872_v24 }
 0x8a3   : > { %v5584_v15 = vunpack.c.l.bf16 %v14871_v60 }
 0x8a4   : > { %v6887_v37 = vadd.f32 %v6885_v20, %v6873_v34  ;;  %v21532_v34 = vld [vmem:[#allocation59_spill] sm:$0xff] }
 0x8a5   : > { %13748 = vset.pattern.permute.xlu1 %v21433_v38  ;;  %v5744_v11 = vmul.f32 %v18459_v27, %v5584_v15  ;;  %v5552_v20 = vmul.f32 %v21532_v34, %v5360_v58  ;;  %v7637_v27 = vsel %vm17988_vm6, 0, %v7636_v45  ;;  %v21535_v58 = vld [vmem:[#allocation58_spill] sm:$0xff]  ;;  %v21536_v15 = vld [vmem:[#allocation91_spill] sm:$0xff]  ;;  %v7713_v34 = vld [vmem:[#allocation2] sm:$0xff] }
 0x8a6   : > { %v6896_v17 = vpop.permute.xlu1 %6895  ;;  %5537 = vperm.xlu1 %13748, %v18439_v30   ;;  %v6865_v62 = vpop.permute.xlu0 %6864  ;;  %7638 = vst [vmem:[#allocation2 + $0xf0] sm:$0x1] %v7637_v27  ;;  %v7883_v45 = vld [vmem:[#allocation2 + $0x18] sm:$0x1] }
 0x8a7   : > { %v6899_v3 = vmul.f32 %v6896_v17, %v6889_v2  ;;  %v6872_v47 = vmul.f32 %v6865_v62, %v6860_v10  ;;  %v5966_v17 = vmul.f32 %v21530_v13, %v5806_v35  ;;  %v5775_v62 = vadd.f32 %v5743_v40, %v5551_v31 }
 0x8a8   : > { %v7580_v10 = vstv %s18493_s14  ;;  %v7693_v35 = vsel %vm17996_vm8, 0, %v7692_v41 }
 0x8a9   : > { %v5998_v32 = vadd.f32 %v5966_v17, %v5774_v46  ;;  %7694 = vst [vmem:[#allocation2 + $0xf8] sm:$0x1] %v7693_v35 }
 0x8aa   : > { %13749 = vset.pattern.permute.xlu1 %v21493_v36 }
 0x8ab   : > { %v6910_v33 = vpop.permute.xlu1 %6909  ;;  %5727 = vperm.xlu1 %13749, %v18433_v53   ;;  %v6892_v4 = vpop.permute.xlu0 %6891 }
 0x8ac   : > { %v6913_v61 = vmul.f32 %v6910_v33, %v6903_v9  ;;  %v6898_v0 = vmul.f32 %v6892_v4, %v6888_v14  ;;  %v5585_v4 = vunpack.c.h.bf16 %v14871_v60  ;;  %v6030_v9 = vunpack.c.l.bf16 %v14872_v24 }
 0x8ad   : > { %v5809_v14 = vunpack.c.h.bf16 %v14873_v18  ;;  %v5553_v60 = vmul.f32 %v21535_v58, %v5361_v22 }
 0x8af   : > { %13751 = vset.pattern.permute.xlu1 %v21437_v44 }
 0x8b0   : > { %5951 = vperm.xlu1 %13751, %v18433_v53   ;;  %v6878_v39 = vpop.permute.xlu1 %6877  ;;  %v6906_v57 = vpop.permute.xlu0 %6905  ;;  %v6901_v53 = vadd.f32 %v6899_v3, %v6887_v37  ;;  %v5808_v3 = vunpack.c.l.bf16 %v14873_v18  ;;  %v5776_v37 = vadd.f32 %v5744_v11, %v5552_v20  ;;  %v21538_v11 = vld [vmem:[#allocation95_spill] sm:$0xff] }
 0x8b1   : > { %v6884_v56 = vmul.f32 %v6878_v39, %v6874_v52  ;;  %v6912_v2 = vmul.f32 %v6906_v57, %v6902_v48  ;;  %v5999_v39 = vadd.f32 %v5967_v6, %v5775_v62  ;;  %v21533_v48 = vld [vmem:[#allocation90_spill] sm:$0xff] }
 0x8b2   : > { %v6915_v29 = vadd.f32 %v6913_v61, %v6901_v53  ;;  %v5745_v57 = vmul.f32 %v21533_v48, %v5585_v4  ;;  %v21534_v61 = vld [vmem:[#allocation89_spill] sm:$0xff]  ;;  %v5968_v50 = vmul.f32 %v21536_v15, %v5808_v3  ;;  %v5969_v53 = vmul.f32 %v21537_v8, %v5809_v14  ;;  %v13871_v14 = vld [vmem:[%s21455_s15 + $0x54] ss:$8 sps:$4 sm:$0xff]  }
 0x8b3   : > { %v6886_v19 = vadd.f32 %v6884_v56, %v6872_v47  ;;  %v6190_v56 = vmul.f32 %v21534_v61, %v6030_v9  ;;  %v7886_v15 = vld [vmem:[#allocation2 + $0x20] sm:$0xff]  ;;  %v13883_v8 = vld [vmem:[%s21455_s15 + $0x94] ss:$8 sps:$4 sm:$0xff]  }
 0x8b4   : > { %5955 = vperm.xlu1 %13751, %v18439_v30   ;;  %v18498_v54 = vpop.permute.xlu1 %5703  ;;  %v7582_v40 = vmul.f32 %v7580_v10, %v6915_v29  ;;  %v5777_v62 = vadd.f32 %v5745_v57, %v5553_v60  ;;  %v6000_v46 = vadd.f32 %v5968_v50, %v5776_v37  ;;  %v7716_v29 = vld [vmem:[#allocation2 + $0x8] sm:$0x1]  ;;  %v13869_v57 = vld [vmem:[%s21455_s15 + $0x50] ss:$8 sps:$4 sm:$0xff]   ;;  %v13880_v37 = vld [vmem:[%s21455_s15 + $0x84] ss:$8 sps:$4 sm:$0xff]  }
 0x8b5   : > { %v6900_v12 = vadd.f32 %v6898_v0, %v6886_v19  ;;  %v18500_v33 = vpop.permute.xlu0 %5517  ;;  %v6222_v19 = vadd.f32 %v6190_v56, %v5998_v32  ;;  %10295 = vmatprep.subr.bf16.mxu1 %v13880_v37  ;;  %v13872_v50 = vld [vmem:[%s21455_s15 + $0x60] ss:$8 sps:$4 sm:$0xff]   ;;  %v13889_v37 = vld [vmem:[%s21455_s15 + $0xb4] ss:$8 sps:$4 sm:$0xff]  }
 0x8b6   : > { %v6001_v4 = vadd.f32 %v5969_v53, %v5777_v62  ;;  %v14875_v53 = vld [vmem:[%s16330_s18 + $0x10] sm:$0xff]  }
 0x8b7   : > { %v6914_v52 = vadd.f32 %v6912_v2, %v6900_v12 }
 0x8b8   : > { %13753 = vset.pattern.permute.xlu1 %v21483_v63  ;;  %v18509_v1 = vpop.permute.xlu1 %5707 }
 0x8b9   : > { %v7581_v43 = vmul.f32 %v7580_v10, %v6914_v52  ;;  %6179 = vperm.xlu1 %13753, %v18439_v30   ;;  %v6032_v30 = vunpack.c.l.bf16 %v14874_v7 }
 0x8ba   : > { %v6068_v47 = vpop.permute.xlu0 %6067 }
 0x8bb   : > { %v7701_v26 = vpack.c.bf16 %v7582_v40, %v7581_v43  ;;  %v6191_v31 = vmul.f32 %v6068_v47, %v6031_v5  ;;  %v6192_v10 = vmul.f32 %v21538_v11, %v6032_v30  ;;  %v13866_v5 = vld [vmem:[%s21455_s15 + $0x40] ss:$8 sps:$4 sm:$0xff]   ;;  %v7880_v40 = vld [vmem:[#allocation2 + $0x10] sm:$0xff]  ;;  %v5587_v30 = vunpack.c.h.bf16 %v14875_v53 }
 0x8bd   : > { %v7703_v0 = vshrl.u32 %v7701_v26, 16  ;;  %v6223_v13 = vadd.f32 %v6191_v31, %v5999_v39  ;;  %v18522_v17 = vpop.permute.xlu1 %5867  ;;  %13755 = vset.pattern.permute.xlu1 %v21433_v38  ;;  %v7706_v55 = vshll.u32 %v7701_v26, 16  ;;  %v6224_v41 = vadd.f32 %v6192_v10, %v6000_v46  ;;  %v13874_v26 = vld [vmem:[%s21455_s15 + $0x64] ss:$8 sps:$4 sm:$0xff]   ;;  %v13878_v31 = vld [vmem:[%s21455_s15 + $0x80] ss:$8 sps:$4 sm:$0xff]  }
 0x8be   : > { %v6076_v12 = vpop.permute.xlu0 %6075  ;;  %10296 = vmatpush1.bf16.msra.mxu1 %v13878_v31  ;;  %v13877_v46 = vld [vmem:[%s21455_s15 + $0x74] ss:$8 sps:$4 sm:$0xff]   ;;  %v5586_v10 = vunpack.c.l.bf16 %v14875_v53 }
 0x8bf   : > { %v7705_v2 = vrot.slane %v7703_v0, 7  ;;  %v7719_v6 = vpack.c.bf16 %v6223_v13, %v6222_v19  ;;  %v6193_v22 = vmul.f32 %v6076_v12, %v6033_v42  ;;  %v7889_v42 = vld [vmem:[#allocation2 + $0x28] sm:$0x1]  ;;  %v14876_v12 = vld [vmem:[%s15917_s8 + $0x10] sm:$0xff]   ;;  %10297 = vmatprep.subr.bf16.mxu1 %v13883_v8 }
 0x8c1   : > { %v7708_v20 = vor.u32 %v7706_v55, %v7705_v2  ;;  %v7717_v24 = vsel %vm17988_vm6, %v7705_v2, %v7716_v29  ;;  %v7736_v9 = vshrl.u32 %v7719_v6, 16  ;;  %v18528_v52 = vpop.permute.xlu1 %5927  ;;  %v6225_v18 = vadd.f32 %v6193_v22, %v6001_v4  ;;  %v13881_v29 = vld [vmem:[%s21455_s15 + $0x90] ss:$8 sps:$4 sm:$0xff]  }
 0x8c2   : > { %7718 = vst [vmem:[#allocation2 + $0x8] sm:$0x1] %v7717_v24  ;;  %v18533_v3 = vpop.permute.xlu0 %6083  ;;  %v7739_v32 = vshll.u32 %v7719_v6, 16  ;;  %v5363_v2 = vunpack.c.h.bf16 %v14876_v12  ;;  %v5362_v6 = vunpack.c.l.bf16 %v14876_v12  ;;  %v14877_v22 = vld [vmem:[%s15850_s4 + $0x10] sm:$0xff]   ;;  %10298 = vmatpush1.bf16.msra.mxu1 %v13881_v29 }
 0x8c3   : > { %v7714_v27 = vsel %vm18250_vm9, %v7708_v20, %v7713_v34  ;;  %v7738_v35 = vrot.slane %v7736_v9, 7  ;;  %v7720_v43 = vpack.c.bf16 %v6225_v18, %v6224_v41  ;;  %v5811_v4 = vunpack.c.h.bf16 %v14877_v22  ;;  %v13875_v34 = vld [vmem:[%s21455_s15 + $0x70] ss:$8 sps:$4 sm:$0xff]   ;;  %v13886_v20 = vld [vmem:[%s21455_s15 + $0xa4] ss:$8 sps:$4 sm:$0xff]  }
 0x8c4   : > { %7715 = vst [vmem:[#allocation2] sm:$0xff] %v7714_v27  ;;  %12404 = vmatmul.mubr.msk.bf16.vlgmr.msra.gmra.mrb[124].mxu0 %vm1523_vm0, %v7714_v27  ;;  %v5810_v24 = vunpack.c.l.bf16 %v14877_v22  ;;  %v21539_v9 = vld [vmem:[#allocation99_spill] sm:$0xff]  ;;  %v21540_v27 = vld [vmem:[#allocation61_spill] sm:$0xff]  ;;  %10299 = vmatprep.subr.bf16.mxu1 %v13886_v20  ;;  %v14881_v20 = vld [vmem:[%s15850_s4 + $0x18] sm:$0xff]  }
 0x8c5   : > { %v7741_v39 = vor.u32 %v7739_v32, %v7738_v35  ;;  %v7884_v48 = vsel %vm17988_vm6, %v7738_v35, %v7883_v45  ;;  %8250 = vmatprep.mubr.bf16.mxu0 %v21433_v38  ;;  %9253 = vmatpush1.bf16.msra.mxu0 %v13866_v5  ;;  %v7743_v47 = vshrl.u32 %v7720_v43, 16  ;;  %v7746_v60 = vshll.u32 %v7720_v43, 16  ;;  %v14878_v45 = vld [vmem:[%s15857_s2 + $0x10] sm:$0xff]  }
 0x8c6   : > { %7885 = vst [vmem:[#allocation2 + $0x18] sm:$0x1] %v7884_v48  ;;  %v18550_v61 = vpop.permute.xlu1 %6087  ;;  %v18552_v56 = vpop.permute.xlu0 %6091  ;;  %9254 = vmatprep.subr.bf16.mxu0 %v13871_v14  ;;  %v5747_v5 = vmul.f32 %v21539_v9, %v5587_v30  ;;  %v6035_v41 = vunpack.c.h.bf16 %v14878_v45  ;;  %v13884_v14 = vld [vmem:[%s21455_s15 + $0xa0] ss:$8 sps:$4 sm:$0xff]   ;;  %v5555_v35 = vmul.f32 %v21540_v27, %v5363_v2  ;;  %v6034_v48 = vunpack.c.l.bf16 %v14878_v45  ;;  %v7895_v9 = vld [vmem:[#allocation2 + $0x38] sm:$0x1] }
 0x8c7   : > { %v18562_v7 = vsel %vm18250_vm9, %v7741_v39, %v7880_v40  ;;  %v7745_v58 = vrot.slane %v7743_v47, 7  ;;  %v21541_v40 = vld [vmem:[#allocation63_spill] sm:$0xff]  ;;  %v5971_v39 = vmul.f32 %v18226_v16, %v5811_v4  ;;  %10300 = vmatpush1.bf16.msra.mxu1 %v13884_v14  ;;  %v21542_v47 = vld [vmem:[#allocation93_spill] sm:$0xff]  ;;  %v21543_v4 = vld [vmem:[#allocation60_spill] sm:$0xff] }
 0x8c8   : > { %7882 = vst [vmem:[#allocation2 + $0x10] sm:$0xff] %v18562_v7  ;;  %v5554_v43 = vmul.f32 %v21541_v40, %v5362_v6  ;;  %v5779_v31 = vadd.f32 %v5747_v5, %v5555_v35  ;;  %v13887_v16 = vld [vmem:[%s21455_s15 + $0xb0] ss:$8 sps:$4 sm:$0xff]   ;;  %10301 = vmatprep.subr.bf16.mxu1 %v13889_v37  ;;  %v6194_v8 = vmul.f32 %v18270_v49, %v6034_v48  ;;  %v21544_v40 = vld [vmem:[#allocation62_spill] sm:$0xff] }
 0x8c9   : > { %9255 = vmatpush1.bf16.msra.mxu0 %v13869_v57  ;;  %v7748_v0 = vor.u32 %v7746_v60, %v7745_v58  ;;  %v7890_v19 = vsel %vm17988_vm6, %v7745_v58, %v7889_v42  ;;  %v8033_v55 = vld [vmem:[#allocation2 + $0x8] sm:$0xff]  ;;  %v6195_v42 = vmul.f32 %v18533_v3, %v6035_v41  ;;  %v14882_v41 = vld [vmem:[%s16330_s18 + $0x58] sm:$0xff]   ;;  %v7892_v48 = vld [vmem:[#allocation2 + $0x30] sm:$0xff] }
 0x8ca   : > { %v18574_v13 = vpop.permute.xlu1 %6151  ;;  %v18576_v62 = vpop.permute.xlu0 %6099  ;;  %9256 = vmatprep.subr.bf16.mxu0 %v13874_v26  ;;  %7891 = vst [vmem:[#allocation2 + $0x28] sm:$0x1] %v7890_v19  ;;  %v5970_v26 = vmul.f32 %v21542_v47, %v5810_v24  ;;  %v5813_v24 = vunpack.c.h.bf16 %v14881_v20  ;;  %v5604_v14 = vunpack.c.l.bf16 %v14882_v41  ;;  %v5605_v27 = vunpack.c.h.bf16 %v14882_v41 }
 0x8cb   : > { %v18588_v11 = vsel %vm18250_vm9, %v7748_v0, %v7886_v15  ;;  %10302 = vmatpush1.bf16.msra.mxu1 %v13887_v16  ;;  %v14879_v0 = vld [vmem:[%s15917_s8 + $0x18] sm:$0xff]   ;;  %v5812_v47 = vunpack.c.l.bf16 %v14881_v20 }
 0x8cc   : > { %12405 = vmatmul.mubr.msk.bf16.gmra.mrb[128].mxu0 %vm1523_vm0, %v8033_v55  ;;  %7888 = vst [vmem:[#allocation2 + $0x20] sm:$0xff] %v18588_v11  ;;  %v5365_v19 = vunpack.c.h.bf16 %v14879_v0  ;;  %v5364_v49 = vunpack.c.l.bf16 %v14879_v0  ;;  %v5765_v0 = vmul.f32 %v18509_v1, %v5605_v27 }
 0x8cd   : > { %8258 = vmatprep.mubr.bf16.mxu0 %v21433_v38  ;;  %9257 = vmatpush1.bf16.msra.mxu0 %v13872_v50  ;;  %v6003_v50 = vadd.f32 %v5971_v39, %v5779_v31  ;;  %v18634_v45 = vld [vmem:[#allocation2 + $0x18] sm:$0xff] }
 0x8ce   : > { %v18601_v18 = vpop.permute.xlu1 %6155  ;;  %9258 = vmatprep.subr.bf16.mxu0 %v13877_v46  ;;  %v14880_v46 = vld [vmem:[%s16330_s18 + $0x18] sm:$0xff]  }
 0x8cf   : > { %v5632_v32 = vpop.permute.xlu0 %5631  ;;  %v6227_v3 = vadd.f32 %v6195_v42, %v6003_v50  ;;  %v5589_v29 = vunpack.c.h.bf16 %v14880_v46  ;;  %v5588_v6 = vunpack.c.l.bf16 %v14880_v46 }
 0x8d0   : > { %v5746_v57 = vmul.f32 %v5632_v32, %v5586_v10  ;;  %v5557_v10 = vmul.f32 %v21543_v4, %v5365_v19  ;;  %v14886_v19 = vld [vmem:[%s15857_s2 + $0x58] sm:$0xff]  }
 0x8d1   : > { %9259 = vmatpush1.bf16.msra.mxu0 %v13875_v34  ;;  %v5749_v34 = vmul.f32 %v18451_v59, %v5589_v29  ;;  %v14883_v59 = vld [vmem:[%s15857_s2 + $0x18] sm:$0xff]   ;;  %v6052_v46 = vunpack.c.l.bf16 %v14886_v19 }
 0x8d2   : > { %v5778_v58 = vadd.f32 %v5746_v57, %v5554_v43  ;;  %v5556_v43 = vmul.f32 %v21544_v40, %v5364_v49  ;;  %v6037_v39 = vunpack.c.h.bf16 %v14883_v59 }
 0x8d3   : > { %v18617_v60 = vpop.permute.xlu1 %5651  ;;  %v5640_v15 = vpop.permute.xlu0 %5639  ;;  %v5781_v50 = vadd.f32 %v5749_v34, %v5557_v10  ;;  %v6053_v10 = vunpack.c.h.bf16 %v14886_v19 }
 0x8d4   : > { %v6002_v53 = vadd.f32 %v5970_v26, %v5778_v58  ;;  %12406 = vmatmul.mubr.msk.bf16.gmra.mrb[132].mxu0 %vm1523_vm0, %v18562_v7  ;;  %v5748_v57 = vmul.f32 %v5640_v15, %v5588_v6  ;;  %v14884_v26 = vld [vmem:[%s15917_s8 + $0x58] sm:$0xff]   ;;  %v5764_v15 = vmul.f32 %v18498_v54, %v5604_v14  ;;  %v6197_v49 = vmul.f32 %v18552_v56, %v6037_v39  ;;  %v14887_v14 = vld [vmem:[%s16330_s18 + $0x20] sm:$0xff]  }
 0x8d5   : > { %8268 = vmatprep.mubr.bf16.mxu0 %v21433_v38  ;;  %v5381_v31 = vunpack.c.h.bf16 %v14884_v26  ;;  %v5380_v42 = vunpack.c.l.bf16 %v14884_v26  ;;  %v5591_v27 = vunpack.c.h.bf16 %v14887_v14  ;;  %v14889_v39 = vld [vmem:[%s15850_s4 + $0x20] sm:$0xff]   ;;  %v6213_v26 = vmul.f32 %v18601_v18, %v6053_v10 }
 0x8d6   : > { %v6226_v30 = vadd.f32 %v6194_v8, %v6002_v53  ;;  %v5973_v8 = vmul.f32 %v18522_v17, %v5813_v24  ;;  %v14885_v53 = vld [vmem:[%s15850_s4 + $0x58] sm:$0xff]   ;;  %v5780_v17 = vadd.f32 %v5748_v57, %v5556_v43 }
 0x8d7   : > { %v18625_v12 = vpop.permute.xlu0 %5647  ;;  %v5829_v4 = vunpack.c.h.bf16 %v14885_v53  ;;  %v5573_v54 = vmul.f32 %v18262_v28, %v5381_v31  ;;  %v5572_v1 = vmul.f32 %v18461_v21, %v5380_v42  ;;  %v6212_v21 = vmul.f32 %v18574_v13, %v6052_v46  ;;  %v7901_v46 = vld [vmem:[#allocation2 + $0x48] sm:$0x1] }
 0x8d8   : > { %v7721_v2 = vpack.c.bf16 %v6227_v3, %v6226_v30  ;;  %v18627_v55 = vpop.permute.xlu1 %5512  ;;  %v5828_v3 = vunpack.c.l.bf16 %v14885_v53  ;;  %v6036_v30 = vunpack.c.l.bf16 %v14883_v59  ;;  %v6005_v34 = vadd.f32 %v5973_v8, %v5781_v50 }
 0x8d9   : > { %v5796_v56 = vadd.f32 %v5764_v15, %v5572_v1  ;;  %v5797_v41 = vadd.f32 %v5765_v0, %v5573_v54  ;;  %v5590_v59 = vunpack.c.l.bf16 %v14887_v14  ;;  %v5814_v13 = vunpack.c.l.bf16 %v14889_v39  ;;  %v21546_v15 = vld [vmem:[#allocation97_spill] sm:$0xff]  ;;  %v18677_v54 = vld [vmem:[#allocation2 + $0x28] sm:$0xff] }
 0x8da   : > { %v7750_v22 = vshrl.u32 %v7721_v2, 16  ;;  %v7753_v32 = vshll.u32 %v7721_v2, 16  ;;  %v5988_v20 = vmul.f32 %v18528_v52, %v5828_v3  ;;  %v6196_v24 = vmul.f32 %v18550_v61, %v6036_v30  ;;  %v14888_v52 = vld [vmem:[%s15917_s8 + $0x20] sm:$0xff]  }
 0x8db   : > { %v18632_v5 = vpop.permute.xlu0 %5655  ;;  %v6229_v28 = vadd.f32 %v6197_v49, %v6005_v34  ;;  %v5366_v43 = vunpack.c.l.bf16 %v14888_v52  ;;  %v5367_v61 = vunpack.c.h.bf16 %v14888_v52  ;;  %v21545_v3 = vld [vmem:[#allocation65_spill] sm:$0xff]  ;;  %v5750_v19 = vmul.f32 %v18625_v12, %v5590_v59 }
 0x8dc   : > { %v7752_v35 = vrot.slane %v7750_v22, 7  ;;  %12407 = vmatmul.mubr.msk.bf16.gmra.mrb[136].mxu0 %vm1523_vm0, %v18634_v45  ;;  %v14890_v49 = vld [vmem:[%s15917_s8 + $0x60] sm:$0xff]  }
 0x8dd   : > { %v18641_v37 = vpop.permute.xlu1 %5711  ;;  %8276 = vmatprep.mubr.bf16.mxu0 %v21433_v38  ;;  %v5558_v30 = vmul.f32 %v21545_v3, %v5366_v43  ;;  %v5559_v0 = vmul.f32 %v21546_v15, %v5367_v61  ;;  %v14891_v1 = vld [vmem:[%s15857_s2 + $0x20] sm:$0xff]  }
 0x8de   : > { %v7755_v58 = vor.u32 %v7753_v32, %v7752_v35  ;;  %v7896_v16 = vsel %vm17988_vm6, %v7752_v35, %v7895_v9  ;;  %v6039_v10 = vunpack.c.h.bf16 %v14891_v1  ;;  %v14892_v12 = vld [vmem:[%s16330_s18 + $0x60] sm:$0xff]  }
 0x8df   : > { %7897 = vst [vmem:[#allocation2 + $0x38] sm:$0x1] %v7896_v16  ;;  %v14893_v59 = vld [vmem:[%s15850_s4 + $0x60] sm:$0xff]  }
 0x8e0   : > { %v18654_v29 = vsel %vm18250_vm9, %v7755_v58, %v7892_v48  ;;  %v5864_v2 = vpop.permute.xlu0 %5863  ;;  %v5815_v48 = vunpack.c.h.bf16 %v14889_v39  ;;  %v5751_v58 = vmul.f32 %v18617_v60, %v5591_v27  ;;  %v5830_v39 = vunpack.c.l.bf16 %v14893_v59 }
 0x8e1   : > { %7894 = vst [vmem:[#allocation2 + $0x30] sm:$0xff] %v18654_v29  ;;  %v5972_v6 = vmul.f32 %v5864_v2, %v5812_v47  ;;  %v18658_v22 = vpop.permute.xlu1 %5715  ;;  %v6020_v47 = vadd.f32 %v5988_v20, %v5796_v56  ;;  %v7898_v20 = vld [vmem:[#allocation2 + $0x40] sm:$0xff]  ;;  %v5606_v56 = vunpack.c.l.bf16 %v14892_v12 }
 0x8e2   : > { %v5783_v34 = vadd.f32 %v5751_v58, %v5559_v0 }
 0x8e3   : > { %v6004_v9 = vadd.f32 %v5972_v6, %v5780_v17  ;;  %v6244_v16 = vadd.f32 %v6212_v21, %v6020_v47  ;;  %v5383_v17 = vunpack.c.h.bf16 %v14890_v49  ;;  %v5607_v21 = vunpack.c.h.bf16 %v14892_v12  ;;  %v7946_v47 = vld [vmem:[#allocation2 + $0xc0] sm:$0xff] }
 0x8e4   : > { %v5932_v35 = vpop.permute.xlu0 %5931  ;;  %12408 = vmatmul.mubr.msk.bf16.gmra.mrb[140].mxu0 %vm1523_vm0, %v18588_v11  ;;  %v5766_v58 = vmul.f32 %v18641_v37, %v5606_v56 }
 0x8e5   : > { %v6228_v32 = vadd.f32 %v6196_v24, %v6004_v9  ;;  %v5989_v40 = vmul.f32 %v5932_v35, %v5829_v4  ;;  %8286 = vmatprep.mubr.bf16.mxu0 %v21433_v38  ;;  %v6038_v9 = vunpack.c.l.bf16 %v14891_v1  ;;  %v5782_v35 = vadd.f32 %v5750_v19, %v5558_v30  ;;  %v14894_v30 = vld [vmem:[%s15857_s2 + $0x60] sm:$0xff]   ;;  %v7907_v1 = vld [vmem:[#allocation2 + $0x58] sm:$0x1] }
 0x8e6   : > { %v5876_v57 = vpop.permute.xlu1 %5875  ;;  %v5575_v37 = vmul.f32 %v18500_v33, %v5383_v17 }
 0x8e7   : > { %v7722_v31 = vpack.c.bf16 %v6229_v28, %v6228_v32  ;;  %v6021_v42 = vadd.f32 %v5989_v40, %v5797_v41  ;;  %v5975_v2 = vmul.f32 %v5876_v57, %v5815_v48  ;;  %v5382_v28 = vunpack.c.l.bf16 %v14890_v49  ;;  %v7949_v32 = vld [vmem:[#allocation2 + $0xc8] sm:$0x1] }
 0x8e8   : > { %v5872_v53 = vpop.permute.xlu0 %5871  ;;  %v6199_v57 = vmul.f32 %v18576_v62, %v6039_v10  ;;  %v6054_v62 = vunpack.c.l.bf16 %v14894_v30 }
 0x8e9   : > { %v7757_v50 = vshrl.u32 %v7722_v31, 16  ;;  %v6245_v8 = vadd.f32 %v6213_v26, %v6021_v42  ;;  %v7760_v60 = vshll.u32 %v7722_v31, 16  ;;  %v5974_v24 = vmul.f32 %v5872_v53, %v5814_v13 }
 0x8ea   : > { %v5936_v18 = vpop.permute.xlu1 %5935  ;;  %v6007_v40 = vadd.f32 %v5975_v2, %v5783_v34  ;;  %v5831_v31 = vunpack.c.h.bf16 %v14893_v59  ;;  %v5574_v15 = vmul.f32 %v18627_v55, %v5382_v28 }
 0x8eb   : > { %v7759_v6 = vrot.slane %v7757_v50, 7  ;;  %v7730_v4 = vpack.c.bf16 %v6245_v8, %v6244_v16  ;;  %v6006_v26 = vadd.f32 %v5974_v24, %v5782_v35  ;;  %v5767_v8 = vmul.f32 %v18658_v22, %v5607_v21  ;;  %v7904_v24 = vld [vmem:[#allocation2 + $0x50] sm:$0xff] }
 0x8ec   : > { %12409 = vmatmul.mubr.msk.bf16.gmra.mrb[144].mxu0 %vm1523_vm0, %v18677_v54  ;;  %v5940_v50 = vpop.permute.xlu0 %5939  ;;  %v6231_v53 = vadd.f32 %v6199_v57, %v6007_v40  ;;  %v5990_v19 = vmul.f32 %v5936_v18, %v5830_v39  ;;  %v5798_v22 = vadd.f32 %v5766_v58, %v5574_v15  ;;  %v7955_v57 = vld [vmem:[#allocation2 + $0xd8] sm:$0x1] }
 0x8ed   : > { %v7762_v41 = vor.u32 %v7760_v60, %v7759_v6  ;;  %v7902_v14 = vsel %vm17988_vm6, %v7759_v6, %v7901_v46  ;;  %v7813_v27 = vshrl.u32 %v7730_v4, 16  ;;  %8294 = vmatprep.mubr.bf16.mxu0 %v21433_v38  ;;  %v7816_v61 = vshll.u32 %v7730_v4, 16 }
 0x8ee   : > { %7903 = vst [vmem:[#allocation2 + $0x48] sm:$0x1] %v7902_v14  ;;  %v5991_v2 = vmul.f32 %v5940_v50, %v5831_v31  ;;  %v6055_v6 = vunpack.c.h.bf16 %v14894_v30  ;;  %v5799_v55 = vadd.f32 %v5767_v8, %v5575_v37  ;;  %v6022_v4 = vadd.f32 %v5990_v19, %v5798_v22 }
 0x8ef   : > { %v18688_v52 = vsel %vm18250_vm9, %v7762_v41, %v7898_v20  ;;  %v7815_v43 = vrot.slane %v7813_v27, 7  ;;  %v6096_v48 = vpop.permute.xlu1 %6095  ;;  %v18709_v27 = vld [vmem:[#allocation2 + $0x38] sm:$0xff] }
 0x8f0   : > { %7900 = vst [vmem:[#allocation2 + $0x40] sm:$0xff] %v18688_v52  ;;  %v6198_v42 = vmul.f32 %v6096_v48, %v6038_v9  ;;  %v6023_v17 = vadd.f32 %v5991_v2, %v5799_v55  ;;  %v5880_v8 = vpop.permute.xlu0 %5879 }
 0x8f1   : > { %v7818_v13 = vor.u32 %v7816_v61, %v7815_v43  ;;  %v7950_v16 = vsel %vm17988_vm6, %v7815_v43, %v7949_v32  ;;  %v14895_v32 = vld [vmem:[%s21399_s16] ss:$0 sm:$0xff] }
 0x8f2   : > { %7951 = vst [vmem:[#allocation2 + $0xc8] sm:$0x1] %v7950_v16  ;;  %v6230_v3 = vadd.f32 %v6198_v42, %v6006_v26  ;;  %v7952_v42 = vld [vmem:[#allocation2 + $0xd0] sm:$0xff] }
 0x8f3   : > { %v7947_v0 = vsel %vm18250_vm9, %v7818_v13, %v7946_v47  ;;  %v6160_v46 = vpop.permute.xlu1 %6159 }
 0x8f4   : > { %7948 = vst [vmem:[#allocation2 + $0xc0] sm:$0xff] %v7947_v0  ;;  %v7723_v49 = vpack.c.bf16 %v6231_v53, %v6230_v3  ;;  %12410 = vmatmul.mubr.msk.bf16.gmra.mrb[148].mxu0 %vm1523_vm0, %v18654_v29  ;;  %12428 = vmatmul.mubr.msk.bf16.gmra.mrb[108].mxu1 %vm1523_vm0, %v7947_v0  ;;  %v6214_v18 = vmul.f32 %v6160_v46, %v6054_v62  ;;  %v18743_v30 = vpop.permute.xlu0 %5947  ;;  %v14896_v0 = vld [vmem:[%s16330_s18 + $0x28] sm:$0xff]  }
 0x8f5   : > { %8304 = vmatprep.mubr.bf16.mxu0 %v21433_v38  ;;  %8466 = vmatprep.mubr.bf16.mxu1 %v21433_v38  ;;  %v18745_v62 = vld [vmem:[#allocation2 + $0x48] sm:$0xff]  ;;  %v5593_v19 = vunpack.c.h.bf16 %v14896_v0  ;;  %v5592_v2 = vunpack.c.l.bf16 %v14896_v0 }
 0x8f6   : > { %v7764_v60 = vshrl.u32 %v7723_v49, 16  ;;  %v7767_v34 = vshll.u32 %v7723_v49, 16  ;;  %v6246_v56 = vadd.f32 %v6214_v18, %v6022_v4  ;;  %v14897_v46 = vld [vmem:[%s15917_s8 + $0x28] sm:$0xff]  }
 0x8f7   : > { %v6164_v33 = vpop.permute.xlu1 %6163  ;;  %v5369_v37 = vunpack.c.h.bf16 %v14897_v46  ;;  %v14898_v49 = vld [vmem:[%s15850_s4 + $0x28] sm:$0xff]   ;;  %v5368_v55 = vunpack.c.l.bf16 %v14897_v46 }
 0x8f8   : > { %v7766_v10 = vrot.slane %v7764_v60, 7  ;;  %v6215_v20 = vmul.f32 %v6164_v33, %v6055_v6  ;;  %v5817_v6 = vunpack.c.h.bf16 %v14898_v49  ;;  %v5816_v60 = vunpack.c.l.bf16 %v14898_v49 }
 0x8f9   : > { %v8057_v35 = vld [vmem:[#allocation2 + $0xc8] sm:$0xff]  ;;  %v6108_v18 = vpop.permute.xlu0 %6107 }
 0x8fa   : > { %v7769_v9 = vor.u32 %v7767_v34, %v7766_v10  ;;  %v7908_v12 = vsel %vm17988_vm6, %v7766_v10, %v7907_v1  ;;  %v6247_v41 = vadd.f32 %v6215_v20, %v6023_v17  ;;  %v21547_v1 = vld [vmem:[#allocation98_spill] sm:$0xff]  ;;  %v5752_v17 = vmul.f32 %v18632_v5, %v5592_v2  ;;  %v21548_v20 = vld [vmem:[#allocation67_spill] sm:$0xff] }
 0x8fb   : > { %7909 = vst [vmem:[#allocation2 + $0x58] sm:$0x1] %v7908_v12  ;;  %v13373_v14 = vpop.f32.mrb[102].mxu0  ;;  %v5561_v33 = vmul.f32 %v21547_v1, %v5369_v37  ;;  %v14903_v37 = vld [vmem:[%s15857_s2 + $0x68] sm:$0xff]  }
 0x8fc   : > { %v18713_v28 = vsel %vm18250_vm9, %v7769_v9, %v7904_v24  ;;  %v7731_v21 = vpack.c.bf16 %v6247_v41, %v6246_v56  ;;  %v18718_v40 = vadd.f32 %v14895_v32, %v13373_v14  ;;  %v7489_v43 = vpop.f32.mrb[103].mxu0  ;;  %v5660_v61 = vpop.permute.xlu1 %5659  ;;  %12411 = vmatmul.mubr.msk.bf16.gmra.mrb[152].mxu0 %vm1523_vm0, %v18709_v27  ;;  %12429 = vmatmul.mubr.msk.bf16.gmra.mrb[112].mxu1 %vm1523_vm0, %v8057_v35  ;;  %v14899_v9 = vld [vmem:[%s16330_s18 + $0x68] sm:$0xff]   ;;  %v6056_v2 = vunpack.c.l.bf16 %v14903_v37 }
 0x8fd   : > { %7906 = vst [vmem:[#allocation2 + $0x50] sm:$0xff] %v18713_v28  ;;  %v18724_v59 = vadd.f32 %v14895_v32, %v7489_v43  ;;  %8312 = vmatprep.mubr.bf16.mxu0 %v21433_v38  ;;  %8474 = vmatprep.mubr.bf16.mxu1 %v21433_v38  ;;  %v5753_v4 = vmul.f32 %v5660_v61, %v5593_v19  ;;  %v5609_v12 = vunpack.c.h.bf16 %v14899_v9  ;;  %v14900_v41 = vld [vmem:[%s15857_s2 + $0x28] sm:$0xff]   ;;  %v6057_v1 = vunpack.c.h.bf16 %v14903_v37 }
 0x8fe   : > { %v7820_v39 = vshrl.u32 %v7731_v21, 16  ;;  %v7503_v48 = vsel %vm5005_vm3, %v18718_v40, -inf  ;;  %v7823_v31 = vshll.u32 %v7731_v21, 16  ;;  %v5560_v24 = vmul.f32 %v21548_v20, %v5368_v55  ;;  %v14901_v32 = vld [vmem:[%s15917_s8 + $0x68] sm:$0xff]   ;;  %v5528_v61 = vpop.permute.xlu0 %5527 }
 0x8ff   : > { %7504 = vmax.xlane.f32.xlu0 %v7503_v48  ;;  %v7500_v47 = vsel %vm5005_vm3, %v18724_v59, -inf  ;;  %v5976_v56 = vmul.f32 %v5880_v8, %v5816_v60  ;;  %v6041_v14 = vunpack.c.h.bf16 %v14900_v41  ;;  %v5785_v35 = vadd.f32 %v5753_v4, %v5561_v33 }
 0x900   : > { %v7822_v26 = vrot.slane %v7820_v39, 7  ;;  %7501 = vmax.xlane.f32.xlu1 %v7500_v47  ;;  %v6040_v21 = vunpack.c.l.bf16 %v14900_v41  ;;  %v5385_v43 = vunpack.c.h.bf16 %v14901_v32  ;;  %v5784_v5 = vadd.f32 %v5752_v17, %v5560_v24 }
 0x901   : > { %v18732_v58 = vpop.permute.xlu1 %5522  ;;  %v5608_v39 = vunpack.c.l.bf16 %v14899_v9  ;;  %v7913_v9 = vld [vmem:[#allocation2 + $0x68] sm:$0x1] }
 0x902   : > { %v7825_v13 = vor.u32 %v7823_v31, %v7822_v26  ;;  %v7956_v16 = vsel %vm17988_vm6, %v7822_v26, %v7955_v57  ;;  %v5384_v57 = vunpack.c.l.bf16 %v14901_v32  ;;  %v6008_v31 = vadd.f32 %v5976_v56, %v5784_v5  ;;  %v5533_v37 = vpop.permute.xlu0 %5532 }
 0x903   : > { %7957 = vst [vmem:[#allocation2 + $0xd8] sm:$0x1] %v7956_v16 }
 0x904   : > { %v7953_v50 = vsel %vm18250_vm9, %v7825_v13, %v7952_v42  ;;  %12412 = vmatmul.mubr.msk.bf16.gmra.mrb[156].mxu0 %vm1523_vm0, %v18688_v52  ;;  %v6201_v42 = vmul.f32 %v6108_v18, %v6041_v14  ;;  %v14902_v13 = vld [vmem:[%s15850_s4 + $0x68] sm:$0xff]   ;;  %v5576_v60 = vmul.f32 %v18732_v58, %v5384_v57  ;;  %v7910_v58 = vld [vmem:[#allocation2 + $0x60] sm:$0xff] }
 0x905   : > { %7954 = vst [vmem:[#allocation2 + $0xd0] sm:$0xff] %v7953_v50  ;;  %12430 = vmatmul.mubr.msk.bf16.gmra.mrb[116].mxu1 %vm1523_vm0, %v7953_v50  ;;  %8322 = vmatprep.mubr.bf16.mxu0 %v21433_v38  ;;  %v5832_v16 = vunpack.c.l.bf16 %v14902_v13  ;;  %v5833_v8 = vunpack.c.h.bf16 %v14902_v13 }
 0x906   : > { %v5720_v53 = vpop.permute.xlu1 %5719  ;;  %8484 = vmatprep.mubr.bf16.mxu1 %v21433_v38 }
 0x907   : > { %v5768_v0 = vmul.f32 %v5720_v53, %v5608_v39  ;;  %v5993_v33 = vmul.f32 %v18743_v30, %v5833_v8  ;;  %v7961_v8 = vld [vmem:[#allocation2 + $0xe8] sm:$0x1] }
 0x90a   : > { %v5724_v3 = vpop.permute.xlu1 %5723  ;;  %v8059_v15 = vld [vmem:[#allocation2 + $0xd8] sm:$0xff] }
 0x90b   : > { %v5769_v47 = vmul.f32 %v5724_v3, %v5609_v12 }
 0x90c   : > { %12413 = vmatmul.mubr.msk.bf16.gmra.mrb[160].mxu0 %vm1523_vm0, %v18745_v62 }
 0x90d   : > { %12431 = vmatmul.mubr.msk.bf16.gmra.mrb[120].mxu1 %vm1523_vm0, %v8059_v15  ;;  %8330 = vmatprep.mubr.bf16.mxu0 %v21433_v38  ;;  %v5577_v15 = vmul.f32 %v5528_v61, %v5385_v43 }
 0x90e   : > { %8492 = vmatprep.mubr.bf16.mxu1 %v21433_v38 }
 0x90f   : > { %v5884_v22 = vpop.permute.xlu1 %5883 }
 0x910   : > { %v5977_v10 = vmul.f32 %v5884_v22, %v5817_v6  ;;  %v18768_v6 = vld [vmem:[#allocation2 + $0x58] sm:$0xff]  ;;  %v5801_v22 = vadd.f32 %v5769_v47, %v5577_v15 }
 0x912   : > { %v6009_v48 = vadd.f32 %v5977_v10, %v5785_v35  ;;  %v5800_v10 = vadd.f32 %v5768_v0, %v5576_v60  ;;  %v6025_v56 = vadd.f32 %v5993_v33, %v5801_v22 }
 0x913   : > { %v5944_v34 = vpop.permute.xlu1 %5943 }
 0x914   : > { %12414 = vmatmul.mubr.msk.bf16.gmra.mrb[164].mxu0 %vm1523_vm0, %v18713_v28  ;;  %v6233_v19 = vadd.f32 %v6201_v42, %v6009_v48  ;;  %v5992_v18 = vmul.f32 %v5944_v34, %v5832_v16 }
 0x915   : > { %8340 = vmatprep.mubr.bf16.mxu0 %v21433_v38 }
 0x916   : > { %v6024_v41 = vadd.f32 %v5992_v18, %v5800_v10 }
 0x918   : > { %v6104_v26 = vpop.permute.xlu1 %6103 }
 0x919   : > { %v6200_v50 = vmul.f32 %v6104_v26, %v6040_v21 }
 0x91b   : > { %v6232_v46 = vadd.f32 %v6200_v50, %v6008_v31  ;;  %v18766_v49 = vpop.f32.mrb[72].mxu1 }
 0x91c   : > { %v6168_v55 = vpop.permute.xlu1 %6167  ;;  %v18770_v3 = vpop.f32.mrb[73].mxu1  ;;  %12415 = vmatmul.mubr.msk.bf16.gmra.mrb[168].mxu0 %vm1523_vm0, %v18768_v6 }
 0x91d   : > { %v7724_v4 = vpack.c.bf16 %v6233_v19, %v6232_v46  ;;  %v8382_v53 = vpop.f32.mrb[74].mxu1  ;;  %8348 = vmatprep.mubr.bf16.mxu0 %v21433_v38  ;;  %v6216_v24 = vmul.f32 %v6168_v55, %v6056_v2  ;;  %v7958_v2 = vld [vmem:[#allocation2 + $0xe0] sm:$0xff] }
 0x91e   : > { %v8383_v17 = vpop.f32.mrb[75].mxu1  ;;  %v14904_v53 = vld [vmem:[%s16330_s18 + $0x70] sm:$0xff]  }
 0x91f   : > { %v7771_v20 = vshrl.u32 %v7724_v4, 16  ;;  %v7774_v35 = vshll.u32 %v7724_v4, 16  ;;  %v6248_v43 = vadd.f32 %v6216_v24, %v6024_v41  ;;  %v14906_v41 = vld [vmem:[%s15850_s4 + $0x70] sm:$0xff]  }
 0x920   : > { %v6172_v12 = vpop.permute.xlu1 %6171 }
 0x921   : > { %v7773_v14 = vrot.slane %v7771_v20, 7  ;;  %v6217_v21 = vmul.f32 %v6172_v12, %v6057_v1  ;;  %v5610_v1 = vunpack.c.l.bf16 %v14904_v53 }
 0x923   : > { %v7776_v34 = vor.u32 %v7774_v35, %v7773_v14  ;;  %v7914_v32 = vsel %vm17988_vm6, %v7773_v14, %v7913_v9  ;;  %v6249_v5 = vadd.f32 %v6217_v21, %v6025_v56  ;;  %v18779_v61 = vpop.f32.mrb[76].mxu1  ;;  %v14905_v9 = vld [vmem:[%s15917_s8 + $0x70] sm:$0xff]   ;;  %v5834_v14 = vunpack.c.l.bf16 %v14906_v41 }
 0x924   : > { %21549 = vst [vmem:[#allocation79_spill] sm:$0xff] %v18779_v61  ;;  %7915 = vst [vmem:[#allocation2 + $0x68] sm:$0x1] %v7914_v32  ;;  %v8388_v30 = vpop.f32.mrb[77].mxu1  ;;  %v8650_v26 = vrot.slane %v18779_v61, 1  ;;  %v5386_v12 = vunpack.c.l.bf16 %v14905_v9  ;;  %v5387_v56 = vunpack.c.h.bf16 %v14905_v9 }
 0x925   : > { %v18783_v39 = vsel %vm18250_vm9, %v7776_v34, %v7910_v58  ;;  %v7732_v48 = vpack.c.bf16 %v6249_v5, %v6248_v43  ;;  %v5538_v57 = vpop.permute.xlu1 %5537  ;;  %v18785_v47 = vpop.f32.mrb[78].mxu1  ;;  %v8907_v16 = vrot.slane %v8388_v30, 2  ;;  %v5611_v43 = vunpack.c.h.bf16 %v14904_v53 }
 0x926   : > { %21550 = vst [vmem:[#allocation101_spill] sm:$0xff] %v18785_v47  ;;  %7912 = vst [vmem:[#allocation2 + $0x60] sm:$0xff] %v18783_v39  ;;  %v8651_v31 = vrot.slane %v18785_v47, 1  ;;  %v8392_v42 = vpop.f32.mrb[79].mxu1  ;;  %12416 = vmatmul.mubr.msk.bf16.gmra.mrb[172].mxu0 %vm1523_vm0, %v18783_v39  ;;  %v5732_v34 = vpop.permute.xlu0 %5731  ;;  %v5835_v30 = vunpack.c.h.bf16 %v14906_v41 }
 0x927   : > { %v7827_v13 = vshrl.u32 %v7732_v48, 16  ;;  %v8908_v50 = vrot.slane %v8392_v42, 2  ;;  %8358 = vmatprep.mubr.bf16.mxu0 %v21433_v38  ;;  %v7830_v19 = vshll.u32 %v7732_v48, 16  ;;  %v5578_v48 = vmul.f32 %v5533_v37, %v5386_v12 }
 0x928   : > { %v18794_v15 = vsel %vm8609_vm10, %v8650_v26, %v8651_v31  ;;  %v5579_v26 = vmul.f32 %v5538_v57, %v5387_v56 }
 0x929   : > { %v7829_v0 = vrot.slane %v7827_v13, 7  ;;  %v18797_v46 = vsel %vm8866_vm11, %v8907_v16, %v8908_v50  ;;  %v14907_v16 = vld [vmem:[%s15857_s2 + $0x70] sm:$0xff]  }
 0x92a   : > { %21551 = vst [vmem:[#allocation71_spill] sm:$0xff] %v18797_v46  ;;  %v5728_v22 = vpop.permute.xlu1 %5727  ;;  %v6176_v53 = vpop.permute.xlu0 %6175 }
 0x92b   : > { %v7832_v55 = vor.u32 %v7830_v19, %v7829_v0  ;;  %v7962_v60 = vsel %vm17988_vm6, %v7829_v0, %v7961_v8  ;;  %v18806_v10 = vld [vmem:[#allocation2 + $0x68] sm:$0xff]  ;;  %v5770_v5 = vmul.f32 %v5728_v22, %v5610_v1  ;;  %v6058_v8 = vunpack.c.l.bf16 %v14907_v16 }
 0x92c   : > { %7963 = vst [vmem:[#allocation2 + $0xe8] sm:$0x1] %v7962_v60  ;;  %v8396_v18 = vpop.f32.mrb[80].mxu1  ;;  %v5771_v19 = vmul.f32 %v5732_v34, %v5611_v43  ;;  %v6059_v60 = vunpack.c.h.bf16 %v14907_v16 }
 0x92d   : > { %v18803_v4 = vsel %vm18250_vm9, %v7832_v55, %v7958_v2  ;;  %v8653_v33 = vrot.slane %v8396_v18, 1  ;;  %v8398_v17 = vpop.f32.mrb[81].mxu1  ;;  %v5802_v2 = vadd.f32 %v5770_v5, %v5578_v48  ;;  %v18826_v18 = vld [vmem:[#allocation2 + $0x70] sm:$0xff]  ;;  %v6218_v12 = vmul.f32 %v6176_v53, %v6058_v8 }
 0x92e   : > { %7960 = vst [vmem:[#allocation2 + $0xe0] sm:$0xff] %v18803_v4  ;;  %v8910_v20 = vrot.slane %v8398_v17, 2  ;;  %v8400_v24 = vpop.f32.mrb[82].mxu1  ;;  %12417 = vmatmul.mubr.msk.bf16.gmra.mrb[176].mxu0 %vm1523_vm0, %v18806_v10  ;;  %12432 = vmatmul.mubr.msk.bf16.gmra.mrb[124].mxu1 %vm1523_vm0, %v18803_v4  ;;  %v5803_v57 = vadd.f32 %v5771_v19, %v5579_v26  ;;  %v7967_v19 = vld [vmem:[#allocation2 + $0xf8] sm:$0x1] }
 0x92f   : > { %v5952_v35 = vpop.permute.xlu1 %5951  ;;  %v8401_v21 = vpop.f32.mrb[83].mxu1  ;;  %8366 = vmatprep.mubr.bf16.mxu0 %v21433_v38  ;;  %8502 = vmatprep.mubr.bf16.mxu1 %v21433_v38  ;;  %v18818_v58 = vsel %vm8609_vm10, %v8651_v31, %v8653_v33 }
 0x930   : > { %v18821_v32 = vsel %vm8866_vm11, %v8908_v50, %v8910_v20  ;;  %v5994_v42 = vmul.f32 %v5952_v35, %v5834_v14 }
 0x931   : > { %21552 = vst [vmem:[#allocation103_spill] sm:$0xff] %v18821_v32 }
 0x932   : > { %v6026_v37 = vadd.f32 %v5994_v42, %v5802_v2 }
 0x933   : > { %v5956_v13 = vpop.permute.xlu1 %5955  ;;  %v18828_v50 = vld [vmem:[#allocation2 + $0xe8] sm:$0xff] }
 0x934   : > { %v18824_v0 = vpop.f32.mrb[84].mxu1  ;;  %v5995_v55 = vmul.f32 %v5956_v13, %v5835_v30  ;;  %v6250_v21 = vadd.f32 %v6218_v12, %v6026_v37 }
 0x935   : > { %21553 = vst [vmem:[#allocation84_spill] sm:$0xff] %v18824_v0  ;;  %v8406_v31 = vpop.f32.mrb[85].mxu1  ;;  %v8655_v1 = vrot.slane %v18824_v0, 1 }
 0x936   : > { %v18830_v22 = vpop.f32.mrb[86].mxu1  ;;  %12418 = vmatmul.mubr.msk.bf16.gmra.mrb[180].mxu0 %vm1523_vm0, %v18826_v18  ;;  %12433 = vmatmul.mubr.msk.bf16.gmra.mrb[128].mxu1 %vm1523_vm0, %v18828_v50  ;;  %v8912_v20 = vrot.slane %v8406_v31, 2  ;;  %v6027_v56 = vadd.f32 %v5995_v55, %v5803_v57 }
 0x937   : > { %21554 = vst [vmem:[#allocation85_spill] sm:$0xff] %v18830_v22  ;;  %v8656_v33 = vrot.slane %v18830_v22, 1  ;;  %v8410_v17 = vpop.f32.mrb[87].mxu1  ;;  %9284 = vmatprep.mubr.bf16.mxu0 %v21433_v38  ;;  %8510 = vmatprep.mubr.bf16.mxu1 %v21433_v38 }
 0x938   : > { %v6180_v24 = vpop.permute.xlu1 %6179  ;;  %v8913_v9 = vrot.slane %v8410_v17, 2 }
 0x939   : > { %v6219_v41 = vmul.f32 %v6180_v24, %v6059_v60  ;;  %v18841_v14 = vsel %vm8609_vm10, %v8655_v1, %v8656_v33  ;;  %v7964_v60 = vld [vmem:[#allocation2 + $0xf0] sm:$0xff] }
 0x93a   : > { %v18844_v35 = vsel %vm8866_vm11, %v8912_v20, %v8913_v9 }
 0x93b   : > { %21555 = vst [vmem:[#allocation100_spill] sm:$0xff] %v18844_v35  ;;  %v6251_v34 = vadd.f32 %v6219_v41, %v6027_v56 }
 0x93c   : > { %v8414_v43 = vpop.f32.mrb[88].mxu1 }
 0x93d   : > { %v7733_v5 = vpack.c.bf16 %v6251_v34, %v6250_v21  ;;  %v8658_v30 = vrot.slane %v8414_v43, 1  ;;  %v8416_v48 = vpop.f32.mrb[89].mxu1 }
 0x93e   : > { %v8915_v26 = vrot.slane %v8416_v48, 2  ;;  %v8418_v42 = vpop.f32.mrb[90].mxu1  ;;  %12452 = vmatmul.mubr.msk.bf16.vlgmr.msra.gmra.mrb[184].mxu0 %vm1523_vm0, %v18562_v7 }
 0x93f   : > { %v7834_v13 = vshrl.u32 %v7733_v5, 16  ;;  %v8419_v16 = vpop.f32.mrb[91].mxu1  ;;  %9294 = vmatprep.mubr.bf16.mxu0 %v21433_v38  ;;  %v18850_v8 = vsel %vm8609_vm10, %v8656_v33, %v8658_v30  ;;  %v7837_v31 = vshll.u32 %v7733_v5, 16 }
 0x940   : > { %v18853_v2 = vsel %vm8866_vm11, %v8913_v9, %v8915_v26 }
 0x941   : > { %21556 = vst [vmem:[#allocation105_spill] sm:$0xff] %v18853_v2  ;;  %v7836_v55 = vrot.slane %v7834_v13, 7 }
 0x943   : > { %v7839_v53 = vor.u32 %v7837_v31, %v7836_v55  ;;  %v7968_v57 = vsel %vm17988_vm6, %v7836_v55, %v7967_v19  ;;  %v10118_v19 = vld [vmem:[#allocation2 + $0x20] sm:$0xff] }
 0x944   : > { %7969 = vst [vmem:[#allocation2 + $0xf8] sm:$0x1] %v7968_v57  ;;  %v18857_v7 = vpop.f32.mrb[92].mxu1 }
 0x945   : > { %21557 = vst [vmem:[#allocation104_spill] sm:$0xff] %v18857_v7  ;;  %v18861_v37 = vsel %vm18250_vm9, %v7839_v53, %v7964_v60  ;;  %v8424_v1 = vpop.f32.mrb[93].mxu1  ;;  %v8660_v17 = vrot.slane %v18857_v7, 1 }
 0x946   : > { %7966 = vst [vmem:[#allocation2 + $0xf0] sm:$0xff] %v18861_v37  ;;  %v18864_v33 = vpop.f32.mrb[94].mxu1  ;;  %12434 = vmatmul.mubr.msk.bf16.gmra.mrb[132].mxu1 %vm1523_vm0, %v18861_v37  ;;  %12453 = vmatmul.mubr.msk.bf16.gmra.mrb[188].mxu0 %vm1523_vm0, %v18634_v45  ;;  %v8917_v9 = vrot.slane %v8424_v1, 2 }
 0x947   : > { %21558 = vst [vmem:[#allocation68_spill] sm:$0xff] %v18864_v33  ;;  %v8661_v20 = vrot.slane %v18864_v33, 1  ;;  %v8428_v24 = vpop.f32.mrb[95].mxu1  ;;  %8520 = vmatprep.mubr.bf16.mxu1 %v21433_v38  ;;  %9302 = vmatprep.mubr.bf16.mxu0 %v21433_v38 }
 0x948   : > { %v8918_v12 = vrot.slane %v8428_v24, 2 }
 0x949   : > { %v18875_v56 = vsel %vm8609_vm10, %v8660_v17, %v8661_v20 }
 0x94a   : > { %v18878_v41 = vsel %vm8866_vm11, %v8917_v9, %v8918_v12 }
 0x94b   : > { %21559 = vst [vmem:[#allocation94_spill] sm:$0xff] %v18878_v41  ;;  %v18880_v43 = vld [vmem:[#allocation2 + $0xf8] sm:$0xff] }
 0x94c   : > { %v8432_v21 = vpop.f32.mrb[96].mxu1 }
 0x94d   : > { %v8663_v34 = vrot.slane %v8432_v21, 1  ;;  %v8434_v45 = vpop.f32.mrb[97].mxu1 }
 0x94e   : > { %v8920_v5 = vrot.slane %v8434_v45, 2  ;;  %v8436_v30 = vpop.f32.mrb[98].mxu1  ;;  %12435 = vmatmul.mubr.msk.bf16.gmra.mrb[136].mxu1 %vm1523_vm0, %v18880_v43  ;;  %12454 = vmatmul.mubr.msk.bf16.gmra.mrb[192].mxu0 %vm1523_vm0, %v18588_v11 }
 0x94f   : > { %v8437_v48 = vpop.f32.mrb[99].mxu1  ;;  %9312 = vmatprep.mubr.bf16.mxu0 %v21433_v38  ;;  %10327 = vmatprep.mubr.bf16.mxu1 %v21433_v38  ;;  %v18889_v26 = vsel %vm8609_vm10, %v8661_v20, %v8663_v34 }
 0x950   : > { %v18892_v42 = vsel %vm8866_vm11, %v8918_v12, %v8920_v5 }
 0x951   : > { %21560 = vst [vmem:[#allocation86_spill] sm:$0xff] %v18892_v42 }
 0x954   : > { %v18894_v13 = vpop.f32.mrb[100].mxu1 }
 0x955   : > { %21561 = vst [vmem:[#allocation88_spill] sm:$0xff] %v18894_v13  ;;  %v8442_v16 = vpop.f32.mrb[101].mxu1  ;;  %v8665_v11 = vrot.slane %v18894_v13, 1 }
 0x956   : > { %v18896_v55 = vpop.f32.mrb[102].mxu1  ;;  %12455 = vmatmul.mubr.msk.bf16.gmra.mrb[196].mxu0 %vm1523_vm0, %v18677_v54  ;;  %12500 = vmatmul.mubr.msk.bf16.vlgmr.msra.gmra.mrb[140].mxu1 %vm1523_vm0, %v10118_v19  ;;  %v8922_v53 = vrot.slane %v8442_v16, 2 }
 0x957   : > { %21562 = vst [vmem:[#allocation69_spill] sm:$0xff] %v18896_v55  ;;  %v8666_v31 = vrot.slane %v18896_v55, 1  ;;  %v8446_v60 = vpop.f32.mrb[103].mxu1  ;;  %9320 = vmatprep.mubr.bf16.mxu0 %v21433_v38  ;;  %10337 = vmatprep.mubr.bf16.mxu1 %v21433_v38 }
 0x958   : > { %v8923_v57 = vrot.slane %v8446_v60, 2 }
 0x959   : > { %v18906_v1 = vsel %vm8609_vm10, %v8665_v11, %v8666_v31 }
 0x95a   : > { %v18909_v17 = vsel %vm8866_vm11, %v8922_v53, %v8923_v57 }
 0x95b   : > { %21563 = vst [vmem:[#allocation78_spill] sm:$0xff] %v18909_v17  ;;  %v9090_v17 = vld [vmem:[#allocation2 + $0x88] sm:$0xff] }
 0x95c   : > { %v8450_v20 = vpop.f32.mrb[104].mxu1 }
 0x95d   : > { %v8668_v24 = vrot.slane %v8450_v20, 1  ;;  %v8452_v9 = vpop.f32.mrb[105].mxu1 }
 0x95e   : > { %v8925_v12 = vrot.slane %v8452_v9, 2  ;;  %v8454_v21 = vpop.f32.mrb[106].mxu1  ;;  %12456 = vmatmul.mubr.msk.bf16.gmra.mrb[200].mxu0 %vm1523_vm0, %v18654_v29  ;;  %12501 = vmatmul.mubr.msk.bf16.gmra.mrb[144].mxu1 %vm1523_vm0, %v18677_v54 }
 0x95f   : > { %v8455_v34 = vpop.f32.mrb[107].mxu1  ;;  %9330 = vmatprep.mubr.bf16.mxu0 %v21433_v38  ;;  %10345 = vmatprep.mubr.bf16.mxu1 %v21433_v38  ;;  %v18918_v45 = vsel %vm8609_vm10, %v8666_v31, %v8668_v24  ;;  %v21568_v24 = vld [vmem:[#allocation54_spill] sm:$0xff] }
 0x960   : > { %v18921_v5 = vsel %vm8866_vm11, %v8923_v57, %v8925_v12 }
 0x961   : > { %21564 = vst [vmem:[#allocation102_spill] sm:$0xff] %v18921_v5 }
 0x966   : > { %12457 = vmatmul.mubr.msk.bf16.gmra.mrb[204].mxu0 %vm1523_vm0, %v18709_v27  ;;  %12502 = vmatmul.mubr.msk.bf16.gmra.mrb[148].mxu1 %vm1523_vm0, %v18654_v29 }
 0x967   : > { %9338 = vmatprep.mubr.bf16.mxu0 %v21433_v38  ;;  %10355 = vmatprep.mubr.bf16.mxu1 %v21433_v38 }
 0x96e   : > { %12458 = vmatmul.mubr.msk.bf16.gmra.mrb[208].mxu0 %vm1523_vm0, %v18688_v52  ;;  %12503 = vmatmul.mubr.msk.bf16.gmra.mrb[152].mxu1 %vm1523_vm0, %v18709_v27 }
 0x96f   : > { %9348 = vmatprep.mubr.bf16.mxu0 %v21433_v38  ;;  %10363 = vmatprep.mubr.bf16.mxu1 %v21433_v38 }
 0x976   : > { %12459 = vmatmul.mubr.msk.bf16.gmra.mrb[212].mxu0 %vm1523_vm0, %v18745_v62  ;;  %12504 = vmatmul.mubr.msk.bf16.gmra.mrb[156].mxu1 %vm1523_vm0, %v18688_v52 }
 0x977   : > { %9356 = vmatprep.mubr.bf16.mxu0 %v21433_v38  ;;  %10373 = vmatprep.mubr.bf16.mxu1 %v21433_v38 }
 0x97e   : > { %12460 = vmatmul.mubr.msk.bf16.gmra.mrb[216].mxu0 %vm1523_vm0, %v18713_v28  ;;  %12505 = vmatmul.mubr.msk.bf16.gmra.mrb[160].mxu1 %vm1523_vm0, %v18745_v62 }
 0x97f   : > { %9366 = vmatprep.mubr.bf16.mxu0 %v21433_v38  ;;  %10381 = vmatprep.mubr.bf16.mxu1 %v21433_v38 }
 0x986   : > { %12461 = vmatmul.mubr.msk.bf16.gmra.mrb[220].mxu0 %vm1523_vm0, %v18768_v6  ;;  %12506 = vmatmul.mubr.msk.bf16.gmra.mrb[164].mxu1 %vm1523_vm0, %v18713_v28 }
 0x987   : > { %9374 = vmatprep.mubr.bf16.mxu0 %v21433_v38  ;;  %10391 = vmatprep.mubr.bf16.mxu1 %v21433_v38 }
 0x98c   : > { %v7505_v29 = vpop.xlane.xlu0 %7504 }
 0x98d   : > { %v7507_v54 = vsub.f32 %v18718_v40, %v7505_v29  ;;  %v7502_v52 = vpop.xlane.xlu1 %7501 }
 0x98e   : > { %v7506_v27 = vsub.f32 %v18724_v59, %v7502_v52  ;;  %12462 = vmatmul.mubr.msk.bf16.gmra.mrb[224].mxu0 %vm1523_vm0, %v18783_v39  ;;  %12507 = vmatmul.mubr.msk.bf16.gmra.mrb[168].mxu1 %vm1523_vm0, %v18768_v6 }
 0x98f   : > { %v7510_v62 = vmul.f32 1.442695, %v7507_v54  ;;  %9384 = vmatprep.mubr.bf16.mxu0 %v21433_v38  ;;  %10399 = vmatprep.mubr.bf16.mxu1 %v21433_v38 }
 0x990   : > { %v7508_v28 = vmul.f32 1.442695, %v7506_v27 }
 0x991   : > { %14670 = vpow2.f32 %v7510_v62  ;;  %v21570_v62 = vld [vmem:[#allocation72_spill] sm:$0xff] }
 0x992   : > { %14672 = vpow2.f32 %v7508_v28  ;;  %v9088_v28 = vld [vmem:[#allocation2 + $0x78] sm:$0xff] }
 0x993   : > { %14674 = vrcp.f32 %v21568_v24  ;;  %v21573_v24 = vld [vmem:[#allocation44_spill] sm:$0xff] }
 0x994   : > { %14676 = vrcp.f32 %v21570_v62 }
 0x996   : > { %12463 = vmatmul.mubr.msk.bf16.gmra.mrb[228].mxu0 %vm1523_vm0, %v18806_v10  ;;  %12508 = vmatmul.mubr.msk.bf16.gmra.mrb[172].mxu1 %vm1523_vm0, %v18783_v39 }
 0x997   : > { %v18965_v40 = vpop.f32.mrb[124].mxu0  ;;  %9392 = vmatprep.mubr.bf16.mxu0 %v21433_v38  ;;  %10409 = vmatprep.mubr.bf16.mxu1 %v21433_v38 }
 0x998   : > { %21565 = vst [vmem:[#allocation77_spill] sm:$0xff] %v18965_v40  ;;  %v8244_v59 = vpop.f32.mrb[125].mxu0  ;;  %v8610_v30 = vrot.slane %v18965_v40, 1 }
 0x999   : > { %v18969_v6 = vpop.f32.mrb[126].mxu0  ;;  %v8867_v11 = vrot.slane %v8244_v59, 2 }
 0x99a   : > { %21566 = vst [vmem:[#allocation87_spill] sm:$0xff] %v18969_v6  ;;  %v8611_v48 = vrot.slane %v18969_v6, 1  ;;  %v8248_v16 = vpop.f32.mrb[127].mxu0 }
 0x99b   : > { %v18973_v19 = vpop.eup %14670  ;;  %v8868_v31 = vrot.slane %v8248_v16, 2 }
 0x99c   : > { %v18975_v60 = vpop.eup %14672  ;;  %v7515_v39 = vsel %vm5005_vm3, %v18973_v19, 0.0  ;;  %v18980_v53 = vsel %vm8609_vm10, %v8610_v30, %v8611_v48 }
 0x99d   : > { %7516 = vadd.xlane.f32.xlu1 %v7515_v39  ;;  %v7512_v57 = vsel %vm5005_vm3, %v18975_v60, 0.0  ;;  %v18985_v20 = vsel %vm8866_vm11, %v8867_v11, %v8868_v31  ;;  %v14675_v30 = vpop.eup %14674 }
 0x99e   : > { %21567 = vst [vmem:[#allocation76_spill] sm:$0xff] %v18985_v20  ;;  %7513 = vadd.xlane.f32.xlu0 %v7512_v57  ;;  %12464 = vmatmul.mubr.msk.bf16.gmra.mrb[232].mxu0 %vm1523_vm0, %v18826_v18 }
 0x99f   : > { %12509 = vmatmul.mubr.msk.bf16.gmra.mrb[176].mxu1 %vm1523_vm0, %v18806_v10  ;;  %v8252_v9 = vpop.f32.mrb[128].mxu0  ;;  %9402 = vmatprep.mubr.bf16.mxu0 %v21433_v38 }
 0x9a0   : > { %v8613_v12 = vrot.slane %v8252_v9, 1  ;;  %v8254_v21 = vpop.f32.mrb[129].mxu0  ;;  %10417 = vmatprep.mubr.bf16.mxu1 %v21433_v38  ;;  %v19013_v9 = vmul.f32 %v14675_v30, %v21573_v24 }
 0x9a1   : > { %v8870_v34 = vrot.slane %v8254_v21, 2  ;;  %v8256_v29 = vpop.f32.mrb[130].mxu0 }
 0x9a2   : > { %v8257_v54 = vpop.f32.mrb[131].mxu0  ;;  %v18995_v52 = vsel %vm8609_vm10, %v8611_v48, %v8613_v12  ;;  %v9089_v12 = vld [vmem:[#allocation2 + $0x80] sm:$0xff] }
 0x9a3   : > { %v18998_v27 = vsel %vm8866_vm11, %v8868_v31, %v8870_v34  ;;  %v14677_v34 = vpop.eup %14676 }
 0x9a4   : > { %21569 = vst [vmem:[#allocation83_spill] sm:$0xff] %v18998_v27 }
 0x9a6   : > { %12465 = vmatmul.mubr.msk.bf16.gmra.mrb[236].mxu0 %vm1523_vm0, %v9088_v28 }
 0x9a7   : > { %12510 = vmatmul.mubr.msk.bf16.gmra.mrb[180].mxu1 %vm1523_vm0, %v18826_v18  ;;  %v19004_v10 = vpop.f32.mrb[132].mxu0  ;;  %9410 = vmatprep.mubr.bf16.mxu0 %v21433_v38 }
 0x9a8   : > { %21571 = vst [vmem:[#allocation48_spill] sm:$0xff] %v19004_v10  ;;  %v8262_v59 = vpop.f32.mrb[133].mxu0  ;;  %10427 = vmatprep.mubr.bf16.mxu1 %v21433_v38  ;;  %v8615_v16 = vrot.slane %v19004_v10, 1 }
 0x9a9   : > { %v19008_v48 = vpop.f32.mrb[134].mxu0  ;;  %v8872_v39 = vrot.slane %v8262_v59, 2  ;;  %v21575_v59 = vld [vmem:[#allocation81_spill] sm:$0xff] }
 0x9aa   : > { %21572 = vst [vmem:[#allocation45_spill] sm:$0xff] %v19008_v48  ;;  %v8616_v11 = vrot.slane %v19008_v48, 1  ;;  %v8266_v31 = vpop.f32.mrb[135].mxu0  ;;  %v5356_v30 = vmul.f32 %v14677_v34, %v21575_v59 }
 0x9ab   : > { %v8873_v57 = vrot.slane %v8266_v31, 2 }
 0x9ac   : > { %v19016_v18 = vsel %vm8609_vm10, %v8615_v16, %v8616_v11 }
 0x9ad   : > { %v19019_v21 = vsel %vm8866_vm11, %v8872_v39, %v8873_v57 }
 0x9ae   : > { %21574 = vst [vmem:[#allocation46_spill] sm:$0xff] %v19019_v21  ;;  %5547 = vperm.xlu1 %13755, %v19013_v9   ;;  %12466 = vmatmul.mubr.msk.bf16.gmra.mrb[240].mxu0 %vm1523_vm0, %v9089_v12 }
 0x9af   : > { %12511 = vmatmul.mubr.msk.bf16.gmra.mrb[184].mxu1 %vm1523_vm0, %v9088_v28  ;;  %v8270_v29 = vpop.f32.mrb[136].mxu0  ;;  %9420 = vmatprep.mubr.bf16.mxu0 %v21433_v38 }
 0x9b0   : > { %v8618_v54 = vrot.slane %v8270_v29, 1  ;;  %v8272_v62 = vpop.f32.mrb[137].mxu0  ;;  %10435 = vmatprep.mubr.bf16.mxu1 %v21433_v38 }
 0x9b1   : > { %v8875_v16 = vrot.slane %v8272_v62, 2  ;;  %v8274_v31 = vpop.f32.mrb[138].mxu0 }
 0x9b2   : > { %13756 = vset.pattern.permute.xlu1 %v21493_v36  ;;  %v8275_v39 = vpop.f32.mrb[139].mxu0  ;;  %v19029_v24 = vsel %vm8609_vm10, %v8616_v11, %v8618_v54  ;;  %v9091_v31 = vld [vmem:[#allocation2 + $0x90] sm:$0xff] }
 0x9b3   : > { %5735 = vperm.xlu1 %13756, %v5356_v30   ;;  %v19032_v28 = vsel %vm8866_vm11, %v8873_v57, %v8875_v16 }
 0x9b4   : > { %21576 = vst [vmem:[#allocation49_spill] sm:$0xff] %v19032_v28  ;;  %5542 = vperm.xlu0 %13754, %v5356_v30  }
 0x9b6   : > { %12467 = vmatmul.mubr.msk.bf16.gmra.mrb[244].mxu0 %vm1523_vm0, %v9090_v17 }
 0x9b7   : > { %5739 = vperm.xlu1 %13756, %v19013_v9   ;;  %12512 = vmatmul.mubr.msk.bf16.gmra.mrb[188].mxu1 %vm1523_vm0, %v9089_v12  ;;  %v19037_v34 = vpop.f32.mrb[140].mxu0 }
 0x9b8   : > { %21577 = vst [vmem:[#allocation70_spill] sm:$0xff] %v19037_v34  ;;  %v8280_v29 = vpop.f32.mrb[141].mxu0  ;;  %9428 = vmatprep.mubr.bf16.mxu0 %v21433_v38  ;;  %10445 = vmatprep.mubr.bf16.mxu1 %v21433_v38  ;;  %v8620_v57 = vrot.slane %v19037_v34, 1  ;;  %v9095_v34 = vld [vmem:[#allocation2 + $0xb0] sm:$0xff] }
 0x9b9   : > { %v19041_v11 = vpop.f32.mrb[142].mxu0  ;;  %v8877_v59 = vrot.slane %v8280_v29, 2 }
 0x9ba   : > { %21578 = vst [vmem:[#allocation64_spill] sm:$0xff] %v19041_v11  ;;  %v8621_v54 = vrot.slane %v19041_v11, 1  ;;  %v8284_v62 = vpop.f32.mrb[143].mxu0  ;;  %v8905_v11 = vrot.slane %v18770_v3, 2 }
 0x9bb   : > { %13757 = vset.pattern.permute.xlu1 %v21437_v44  ;;  %v8878_v16 = vrot.slane %v8284_v62, 2 }
 0x9bc   : > { %5959 = vperm.xlu1 %13757, %v5356_v30   ;;  %v19047_v12 = vsel %vm8609_vm10, %v8620_v57, %v8621_v54 }
 0x9bd   : > { %v19050_v39 = vsel %vm8866_vm11, %v8877_v59, %v8878_v16 }
 0x9be   : > { %21579 = vst [vmem:[#allocation47_spill] sm:$0xff] %v19050_v39  ;;  %12468 = vmatmul.mubr.msk.bf16.gmra.mrb[248].mxu0 %vm1523_vm0, %v9091_v31 }
 0x9bf   : > { %12513 = vmatmul.mubr.msk.bf16.gmra.mrb[192].mxu1 %vm1523_vm0, %v9090_v17  ;;  %v8288_v13 = vpop.f32.mrb[144].mxu0  ;;  %9438 = vmatprep.mubr.bf16.mxu0 %v21433_v38  ;;  %v9092_v17 = vld [vmem:[#allocation2 + $0x98] sm:$0xff] }
 0x9c0   : > { %5963 = vperm.xlu1 %13757, %v19013_v9   ;;  %v8623_v41 = vrot.slane %v8288_v13, 1  ;;  %v8290_v29 = vpop.f32.mrb[145].mxu0  ;;  %10453 = vmatprep.mubr.bf16.mxu1 %v21433_v38 }
 0x9c1   : > { %v8880_v62 = vrot.slane %v8290_v29, 2  ;;  %v8292_v57 = vpop.f32.mrb[146].mxu0 }
 0x9c2   : > { %v8293_v7 = vpop.f32.mrb[147].mxu0  ;;  %v19058_v35 = vsel %vm8609_vm10, %v8621_v54, %v8623_v41  ;;  %v7695_v41 = vld [vmem:[#allocation2 + $0x108] sm:$0x1] }
 0x9c3   : > { %v19061_v59 = vsel %vm8866_vm11, %v8878_v16, %v8880_v62  ;;  %v7639_v7 = vld [vmem:[#allocation2 + $0x100] sm:$0x1]  ;;  %v7696_v16 = vsel %vm17996_vm8, 0, %v7695_v41 }
 0x9c4   : > { %21580 = vst [vmem:[#allocation80_spill] sm:$0xff] %v19061_v59  ;;  %13758 = vset.pattern.permute.xlu1 %v21483_v63  ;;  %7697 = vst [vmem:[#allocation2 + $0x108] sm:$0x1] %v7696_v16  ;;  %v9093_v16 = vld [vmem:[#allocation2 + $0xa0] sm:$0xff]  ;;  %v9100_v59 = vld [vmem:[#allocation2 + $0xd8] sm:$0xff] }
 0x9c5   : > { %6183 = vperm.xlu1 %13758, %v5356_v30   ;;  %v7640_v30 = vsel %vm17988_vm6, 0, %v7639_v7 }
 0x9c6   : > { %12469 = vmatmul.mubr.msk.bf16.gmra.mrb[252].mxu0 %vm1523_vm0, %v9092_v17  ;;  %7641 = vst [vmem:[#allocation2 + $0x100] sm:$0x1] %v7640_v30 }
 0x9c7   : > { %12514 = vmatmul.mubr.msk.bf16.gmra.mrb[196].mxu1 %vm1523_vm0, %v9091_v31  ;;  %v19066_v13 = vpop.f32.mrb[148].mxu0  ;;  %v19068_v0 = vpop.f32.mrb[108].mxu1  ;;  %9446 = vmatprep.mubr.bf16.mxu0 %v21433_v38 }
 0x9c8   : > { %21581 = vst [vmem:[#allocation50_spill] sm:$0xff] %v19066_v13  ;;  %21582 = vst [vmem:[#allocation51_spill] sm:$0xff] %v19068_v0  ;;  %v8298_v54 = vpop.f32.mrb[149].mxu0  ;;  %v8460_v29 = vpop.f32.mrb[109].mxu1  ;;  %10463 = vmatprep.mubr.bf16.mxu1 %v21433_v38  ;;  %v8625_v57 = vrot.slane %v19066_v13, 1  ;;  %v8670_v5 = vrot.slane %v19068_v0, 1 }
 0x9c9   : > { %6187 = vperm.xlu1 %13758, %v19013_v9   ;;  %v19077_v31 = vpop.f32.mrb[150].mxu0  ;;  %v19079_v62 = vpop.f32.mrb[110].mxu1  ;;  %v8882_v42 = vrot.slane %v8298_v54, 2  ;;  %v8927_v41 = vrot.slane %v8460_v29, 2 }
 0x9ca   : > { %21583 = vst [vmem:[#allocation52_spill] sm:$0xff] %v19077_v31  ;;  %21584 = vst [vmem:[#allocation73_spill] sm:$0xff] %v19079_v62  ;;  %v8626_v55 = vrot.slane %v19077_v31, 1  ;;  %v8671_v46 = vrot.slane %v19079_v62, 1  ;;  %v8302_v7 = vpop.f32.mrb[151].mxu0  ;;  %v8464_v61 = vpop.f32.mrb[111].mxu1 }
 0x9cb   : > { %v8883_v33 = vrot.slane %v8302_v7, 2  ;;  %v8928_v9 = vrot.slane %v8464_v61, 2 }
 0x9cc   : > { %v19086_v2 = vsel %vm8609_vm10, %v8625_v57, %v8626_v55  ;;  %v19089_v30 = vsel %vm8609_vm10, %v8670_v5, %v8671_v46 }
 0x9cd   : > { %21585 = vst [vmem:[#allocation82_spill] sm:$0xff] %v19089_v30  ;;  %13760 = vset.pattern.permute.xlu1 %v21437_v44  ;;  %v19093_v0 = vsel %vm8866_vm11, %v8882_v42, %v8883_v33  ;;  %v19096_v62 = vsel %vm8866_vm11, %v8927_v41, %v8928_v9 }
 0x9ce   : > { %21586 = vst [vmem:[#allocation75_spill] sm:$0xff] %v19093_v0  ;;  %21587 = vst [vmem:[#allocation53_spill] sm:$0xff] %v19096_v62  ;;  %12470 = vmatmul.mubr.msk.bf16.gmra.mrb[0].mxu0 %vm1523_vm0, %v9093_v16 }
 0x9cf   : > { %12515 = vmatmul.mubr.msk.bf16.gmra.mrb[200].mxu1 %vm1523_vm0, %v9092_v17  ;;  %v8306_v61 = vpop.f32.mrb[152].mxu0  ;;  %v8468_v54 = vpop.f32.mrb[112].mxu1  ;;  %9456 = vmatprep.mubr.bf16.mxu0 %v21433_v38 }
 0x9d0   : > { %v8628_v29 = vrot.slane %v8306_v61, 1  ;;  %v8673_v5 = vrot.slane %v8468_v54, 1  ;;  %v8308_v57 = vpop.f32.mrb[153].mxu0  ;;  %v8470_v7 = vpop.f32.mrb[113].mxu1  ;;  %10471 = vmatprep.mubr.bf16.mxu1 %v21433_v38  ;;  %v9094_v54 = vld [vmem:[#allocation2 + $0xa8] sm:$0xff] }
 0x9d1   : > { %v8885_v22 = vrot.slane %v8308_v57, 2  ;;  %v8930_v42 = vrot.slane %v8470_v7, 2  ;;  %v8310_v32 = vpop.f32.mrb[154].mxu0  ;;  %v8472_v47 = vpop.f32.mrb[114].mxu1 }
 0x9d2   : > { %v8311_v41 = vpop.f32.mrb[155].mxu0  ;;  %v8473_v62 = vpop.f32.mrb[115].mxu1  ;;  %v19103_v0 = vsel %vm8609_vm10, %v8626_v55, %v8628_v29  ;;  %v19106_v17 = vsel %vm8609_vm10, %v8671_v46, %v8673_v5 }
 0x9d3   : > { %v19109_v13 = vsel %vm8866_vm11, %v8883_v33, %v8885_v22  ;;  %v19112_v61 = vsel %vm8866_vm11, %v8928_v9, %v8930_v42 }
 0x9d4   : > { %21588 = vst [vmem:[#allocation66_spill] sm:$0xff] %v19109_v13  ;;  %21589 = vst [vmem:[#allocation41_spill] sm:$0xff] %v19112_v61 }
 0x9d6   : > { %12471 = vmatmul.mubr.msk.bf16.gmra.mrb[4].mxu0 %vm1523_vm0, %v9094_v54 }
 0x9d7   : > { %12516 = vmatmul.mubr.msk.bf16.gmra.mrb[204].mxu1 %vm1523_vm0, %v9093_v16  ;;  %v19116_v47 = vpop.f32.mrb[156].mxu0  ;;  %9464 = vmatprep.mubr.bf16.mxu0 %v21433_v38 }
 0x9d8   : > { %21590 = vst [vmem:[#allocation42_spill] sm:$0xff] %v19116_v47  ;;  %v8316_v32 = vpop.f32.mrb[157].mxu0  ;;  %v19119_v55 = vpop.f32.mrb[116].mxu1  ;;  %10481 = vmatprep.mubr.bf16.mxu1 %v21433_v38  ;;  %v8630_v33 = vrot.slane %v19116_v47, 1 }
 0x9d9   : > { %21591 = vst [vmem:[#allocation43_spill] sm:$0xff] %v19119_v55  ;;  %v19122_v46 = vpop.f32.mrb[158].mxu0  ;;  %v8478_v22 = vpop.f32.mrb[117].mxu1  ;;  %v8887_v16 = vrot.slane %v8316_v32, 2  ;;  %v8675_v5 = vrot.slane %v19119_v55, 1 }
 0x9da   : > { %21592 = vst [vmem:[#allocation56_spill] sm:$0xff] %v19122_v46  ;;  %v8631_v62 = vrot.slane %v19122_v46, 1  ;;  %v8320_v9 = vpop.f32.mrb[159].mxu0  ;;  %v19126_v29 = vpop.f32.mrb[118].mxu1  ;;  %v8932_v41 = vrot.slane %v8478_v22, 2 }
 0x9db   : > { %21593 = vst [vmem:[#allocation55_spill] sm:$0xff] %v19126_v29  ;;  %v8888_v57 = vrot.slane %v8320_v9, 2  ;;  %v8676_v7 = vrot.slane %v19126_v29, 1  ;;  %v8482_v42 = vpop.f32.mrb[119].mxu1 }
 0x9dc   : > { %v8933_v61 = vrot.slane %v8482_v42, 2  ;;  %v19131_v39 = vsel %vm8609_vm10, %v8630_v33, %v8631_v62 }
 0x9dd   : > { %v19134_v47 = vsel %vm8609_vm10, %v8675_v5, %v8676_v7  ;;  %v19137_v21 = vsel %vm8866_vm11, %v8887_v16, %v8888_v57 }
 0x9de   : > { %21594 = vst [vmem:[#allocation96_spill] sm:$0xff] %v19134_v47  ;;  %21595 = vst [vmem:[#allocation74_spill] sm:$0xff] %v19137_v21  ;;  %12472 = vmatmul.mubr.msk.bf16.gmra.mrb[8].mxu0 %vm1523_vm0, %v9095_v34  ;;  %v19141_v32 = vsel %vm8866_vm11, %v8932_v41, %v8933_v61 }
 0x9df   : > { %21596 = vst [vmem:[#allocation57_spill] sm:$0xff] %v19141_v32  ;;  %12517 = vmatmul.mubr.msk.bf16.gmra.mrb[208].mxu1 %vm1523_vm0, %v9094_v54  ;;  %v8324_v9 = vpop.f32.mrb[160].mxu0  ;;  %9474 = vmatprep.mubr.bf16.mxu0 %v21433_v38 }
 0x9e0   : > { %v8633_v22 = vrot.slane %v8324_v9, 1  ;;  %v8326_v33 = vpop.f32.mrb[161].mxu0  ;;  %v8486_v42 = vpop.f32.mrb[120].mxu1  ;;  %10489 = vmatprep.mubr.bf16.mxu1 %v21433_v38 }
 0x9e1   : > { %v8890_v5 = vrot.slane %v8326_v33, 2  ;;  %v8678_v55 = vrot.slane %v8486_v42, 1  ;;  %v8328_v29 = vpop.f32.mrb[162].mxu0  ;;  %v8488_v16 = vpop.f32.mrb[121].mxu1  ;;  %v9096_v33 = vld [vmem:[#allocation2 + $0xb8] sm:$0xff] }
 0x9e2   : > { %v8935_v21 = vrot.slane %v8488_v16, 2  ;;  %v8329_v46 = vpop.f32.mrb[163].mxu0  ;;  %v8490_v10 = vpop.f32.mrb[122].mxu1  ;;  %v19147_v41 = vsel %vm8609_vm10, %v8631_v62, %v8633_v22 }
 0x9e3   : > { %v8491_v32 = vpop.f32.mrb[123].mxu1  ;;  %v19150_v54 = vsel %vm8609_vm10, %v8676_v7, %v8678_v55  ;;  %v19153_v9 = vsel %vm8866_vm11, %v8888_v57, %v8890_v5 }
 0x9e4   : > { %21597 = vst [vmem:[#allocation59_spill] sm:$0xff] %v19153_v9  ;;  %v19156_v13 = vsel %vm8866_vm11, %v8933_v61, %v8935_v21 }
 0x9e5   : > { %21598 = vst [vmem:[#allocation90_spill] sm:$0xff] %v19156_v13  ;;  %v9098_v13 = vld [vmem:[#allocation2 + $0xc8] sm:$0xff] }
 0x9e6   : > { %12473 = vmatmul.mubr.msk.bf16.gmra.mrb[12].mxu0 %vm1523_vm0, %v9096_v33 }
 0x9e7   : > { %12518 = vmatmul.mubr.msk.bf16.gmra.mrb[212].mxu1 %vm1523_vm0, %v9095_v34  ;;  %v19160_v46 = vpop.f32.mrb[164].mxu0  ;;  %9482 = vmatprep.mubr.bf16.mxu0 %v21433_v38  ;;  %v9097_v34 = vld [vmem:[#allocation2 + $0xc0] sm:$0xff] }
 0x9e8   : > { %21599 = vst [vmem:[#allocation89_spill] sm:$0xff] %v19160_v46  ;;  %v8334_v10 = vpop.f32.mrb[165].mxu0  ;;  %10499 = vmatprep.mubr.bf16.mxu1 %v21433_v38  ;;  %v8635_v62 = vrot.slane %v19160_v46, 1 }
 0x9e9   : > { %v19164_v55 = vpop.f32.mrb[166].mxu0  ;;  %v8892_v61 = vrot.slane %v8334_v10, 2 }
 0x9ea   : > { %21600 = vst [vmem:[#allocation58_spill] sm:$0xff] %v19164_v55  ;;  %v8636_v29 = vrot.slane %v19164_v55, 1  ;;  %v8338_v21 = vpop.f32.mrb[167].mxu0 }
 0x9eb   : > { %v8893_v57 = vrot.slane %v8338_v21, 2 }
 0x9ec   : > { %v19169_v7 = vsel %vm8609_vm10, %v8635_v62, %v8636_v29 }
 0x9ed   : > { %v19172_v32 = vsel %vm8866_vm11, %v8892_v61, %v8893_v57 }
 0x9ee   : > { %21601 = vst [vmem:[#allocation91_spill] sm:$0xff] %v19172_v32  ;;  %12474 = vmatmul.mubr.msk.bf16.gmra.mrb[16].mxu0 %vm1523_vm0, %v9097_v34 }
 0x9ef   : > { %12519 = vmatmul.mubr.msk.bf16.gmra.mrb[216].mxu1 %vm1523_vm0, %v9096_v33  ;;  %v8342_v22 = vpop.f32.mrb[168].mxu0  ;;  %9492 = vmatprep.mubr.bf16.mxu0 %v21433_v38 }
 0x9f0   : > { %v8638_v42 = vrot.slane %v8342_v22, 1  ;;  %v8344_v5 = vpop.f32.mrb[169].mxu0  ;;  %10507 = vmatprep.mubr.bf16.mxu1 %v21433_v38 }
 0x9f1   : > { %v8895_v16 = vrot.slane %v8344_v5, 2  ;;  %v8346_v10 = vpop.f32.mrb[170].mxu0 }
 0x9f2   : > { %v8347_v21 = vpop.f32.mrb[171].mxu0  ;;  %v19179_v62 = vsel %vm8609_vm10, %v8636_v29, %v8638_v42 }
 0x9f3   : > { %v19182_v61 = vsel %vm8866_vm11, %v8893_v57, %v8895_v16  ;;  %v9099_v21 = vld [vmem:[#allocation2 + $0xd0] sm:$0xff] }
 0x9f4   : > { %21602 = vst [vmem:[#allocation92_spill] sm:$0xff] %v19182_v61 }
 0x9f6   : > { %12475 = vmatmul.mubr.msk.bf16.gmra.mrb[20].mxu0 %vm1523_vm0, %v9098_v13 }
 0x9f7   : > { %12520 = vmatmul.mubr.msk.bf16.gmra.mrb[220].mxu1 %vm1523_vm0, %v9097_v34  ;;  %9500 = vmatprep.mubr.bf16.mxu0 %v21433_v38 }
 0x9f8   : > { %10517 = vmatprep.mubr.bf16.mxu1 %v21433_v38 }
 0x9f9   : > { %v19188_v33 = vpop.f32.mrb[172].mxu0 }
 0x9fa   : > { %21603 = vst [vmem:[#allocation95_spill] sm:$0xff] %v19188_v33  ;;  %v8352_v22 = vpop.f32.mrb[173].mxu0  ;;  %v8640_v29 = vrot.slane %v19188_v33, 1 }
 0x9fb   : > { %v19190_v5 = vpop.f32.mrb[174].mxu0  ;;  %v8897_v16 = vrot.slane %v8352_v22, 2 }
 0x9fc   : > { %21604 = vst [vmem:[#allocation99_spill] sm:$0xff] %v19190_v5  ;;  %v8641_v42 = vrot.slane %v19190_v5, 1  ;;  %v8356_v57 = vpop.f32.mrb[175].mxu0 }
 0x9fd   : > { %v8898_v10 = vrot.slane %v8356_v57, 2 }
 0x9fe   : > { %12476 = vmatmul.mubr.msk.bf16.gmra.mrb[24].mxu0 %vm1523_vm0, %v9099_v21  ;;  %v19196_v34 = vsel %vm8609_vm10, %v8640_v29, %v8641_v42 }
 0x9ff   : > { %12521 = vmatmul.mubr.msk.bf16.gmra.mrb[224].mxu1 %vm1523_vm0, %v9098_v13  ;;  %9510 = vmatprep.mubr.bf16.mxu0 %v21433_v38  ;;  %v19201_v32 = vsel %vm8866_vm11, %v8897_v16, %v8898_v10 }
 0xa00   : > { %21605 = vst [vmem:[#allocation61_spill] sm:$0xff] %v19201_v32  ;;  %10525 = vmatprep.mubr.bf16.mxu1 %v21433_v38 }
 0xa01   : > { %v8360_v33 = vpop.f32.mrb[176].mxu0  ;;  %v19204_v46 = vpop.f32.mrb[124].mxu1 }
 0xa02   : > { %21606 = vst [vmem:[#allocation63_spill] sm:$0xff] %v19204_v46  ;;  %v8643_v22 = vrot.slane %v8360_v33, 1  ;;  %v8362_v57 = vpop.f32.mrb[177].mxu0  ;;  %v8496_v5 = vpop.f32.mrb[125].mxu1  ;;  %v8680_v29 = vrot.slane %v19204_v46, 1  ;;  %v8648_v46 = vrot.slane %v18766_v49, 1 }
 0xa03   : > { %v8900_v61 = vrot.slane %v8362_v57, 2  ;;  %v8364_v55 = vpop.f32.mrb[178].mxu0  ;;  %v19206_v9 = vpop.f32.mrb[126].mxu1  ;;  %v8937_v32 = vrot.slane %v8496_v5, 2 }
 0xa04   : > { %21607 = vst [vmem:[#allocation93_spill] sm:$0xff] %v19206_v9  ;;  %v8681_v13 = vrot.slane %v19206_v9, 1  ;;  %v8365_v31 = vpop.f32.mrb[179].mxu0  ;;  %v8500_v20 = vpop.f32.mrb[127].mxu1  ;;  %v19211_v16 = vsel %vm8609_vm10, %v8641_v42, %v8643_v22 }
 0xa05   : > { %v8938_v40 = vrot.slane %v8500_v20, 2  ;;  %v19214_v33 = vsel %vm8866_vm11, %v8898_v10, %v8900_v61 }
 0xa06   : > { %21608 = vst [vmem:[#allocation60_spill] sm:$0xff] %v19214_v33  ;;  %12477 = vmatmul.mubr.msk.bf16.gmra.mrb[28].mxu0 %vm1523_vm0, %v9100_v59  ;;  %v19218_v55 = vsel %vm8609_vm10, %v8680_v29, %v8681_v13 }
 0xa07   : > { %21609 = vst [vmem:[#allocation62_spill] sm:$0xff] %v19218_v55  ;;  %12522 = vmatmul.mubr.msk.bf16.gmra.mrb[228].mxu1 %vm1523_vm0, %v9099_v21  ;;  %9518 = vmatprep.mubr.bf16.mxu0 %v21433_v38  ;;  %v19223_v31 = vsel %vm8866_vm11, %v8937_v32, %v8938_v40 }
 0xa08   : > { %21610 = vst [vmem:[#allocation65_spill] sm:$0xff] %v19223_v31  ;;  %10535 = vmatprep.mubr.bf16.mxu1 %v21433_v38 }
 0xa09   : > { %v19226_v5 = vpop.f32.mrb[180].mxu0  ;;  %v8504_v20 = vpop.f32.mrb[128].mxu1 }
 0xa0a   : > { %21611 = vst [vmem:[#allocation97_spill] sm:$0xff] %v19226_v5  ;;  %v8683_v42 = vrot.slane %v8504_v20, 1  ;;  %v8370_v61 = vpop.f32.mrb[181].mxu0  ;;  %v8506_v10 = vpop.f32.mrb[129].mxu1  ;;  %v8645_v21 = vrot.slane %v19226_v5, 1 }
 0xa0b   : > { %v8940_v22 = vrot.slane %v8506_v10, 2  ;;  %v19228_v57 = vpop.f32.mrb[182].mxu0  ;;  %v8508_v29 = vpop.f32.mrb[130].mxu1  ;;  %v8902_v20 = vrot.slane %v8370_v61, 2 }
 0xa0c   : > { %21612 = vst [vmem:[#allocation98_spill] sm:$0xff] %v19228_v57  ;;  %v8646_v9 = vrot.slane %v19228_v57, 1  ;;  %v8374_v32 = vpop.f32.mrb[183].mxu0  ;;  %v8509_v31 = vpop.f32.mrb[131].mxu1  ;;  %v19234_v33 = vsel %vm8609_vm10, %v8681_v13, %v8683_v42 }
 0xa0d   : > { %21613 = vst [vmem:[#allocation67_spill] sm:$0xff] %v19234_v33  ;;  %v8903_v28 = vrot.slane %v8374_v32, 2  ;;  %v19238_v10 = vsel %vm8866_vm11, %v8938_v40, %v8940_v22 }
 0xa0e   : > { %21614 = vst [vmem:[#allocation54_spill] sm:$0xff] %v19238_v10  ;;  %12478 = vmatmul.mubr.msk.bf16.gmra.mrb[32].mxu0 %vm1523_vm0, %v18803_v4  ;;  %v19243_v49 = vsel %vm8609_vm10, %v8646_v9, %v8648_v46  ;;  %v19246_v29 = vsel %vm8609_vm10, %v8645_v21, %v8646_v9 }
 0xa0f   : > { %12523 = vmatmul.mubr.msk.bf16.gmra.mrb[232].mxu1 %vm1523_vm0, %v9100_v59  ;;  %9528 = vmatprep.mubr.bf16.mxu0 %v21433_v38  ;;  %v19251_v3 = vsel %vm8866_vm11, %v8903_v28, %v8905_v11  ;;  %v19254_v13 = vsel %vm8866_vm11, %v8902_v20, %v8903_v28 }
 0xa10   : > { %21615 = vst [vmem:[#allocation72_spill] sm:$0xff] %v19251_v3  ;;  %21616 = vst [vmem:[#allocation44_spill] sm:$0xff] %v19254_v13  ;;  %10543 = vmatprep.mubr.bf16.mxu1 %v21433_v38 }
 0xa11   : > { %v19257_v40 = vpop.f32.mrb[184].mxu0 }
 0xa12   : > { %21617 = vst [vmem:[#allocation81_spill] sm:$0xff] %v19257_v40  ;;  %v9288_v31 = vpop.f32.mrb[185].mxu0  ;;  %v9653_v9 = vrot.slane %v19257_v40, 1 }
 0xa13   : > { %v19259_v46 = vpop.f32.mrb[186].mxu0  ;;  %v9909_v61 = vrot.slane %v9288_v31, 2 }
 0xa14   : > { %21618 = vst [vmem:[#allocation106_spill] sm:$0xff] %v19259_v46  ;;  %v9654_v42 = vrot.slane %v19259_v46, 1  ;;  %v9292_v59 = vpop.f32.mrb[187].mxu0 }
 0xa15   : > { %v9910_v22 = vrot.slane %v9292_v59, 2 }
 0xa16   : > { %12479 = vmatmul.mubr.msk.bf16.gmra.mrb[36].mxu0 %vm1523_vm0, %v18828_v50  ;;  %v19266_v28 = vsel %vm8609_vm10, %v9653_v9, %v9654_v42 }
 0xa17   : > { %21619 = vst [vmem:[#allocation107_spill] sm:$0xff] %v19266_v28  ;;  %12524 = vmatmul.mubr.msk.bf16.gmra.mrb[236].mxu1 %vm1523_vm0, %v18803_v4  ;;  %9536 = vmatprep.mubr.bf16.mxu0 %v21433_v38  ;;  %v19272_v11 = vsel %vm8866_vm11, %v9909_v61, %v9910_v22 }
 0xa18   : > { %21620 = vst [vmem:[#allocation108_spill] sm:$0xff] %v19272_v11  ;;  %10553 = vmatprep.mubr.bf16.mxu1 %v21433_v38 }
 0xa19   : > { %v19275_v21 = vpop.f32.mrb[132].mxu1  ;;  %v9296_v32 = vpop.f32.mrb[188].mxu0 }
 0xa1a   : > { %21621 = vst [vmem:[#allocation109_spill] sm:$0xff] %v19275_v21  ;;  %v9656_v20 = vrot.slane %v9296_v32, 1  ;;  %v8514_v31 = vpop.f32.mrb[133].mxu1  ;;  %v9298_v59 = vpop.f32.mrb[189].mxu0  ;;  %v8685_v10 = vrot.slane %v19275_v21, 1 }
 0xa1b   : > { %v9912_v40 = vrot.slane %v9298_v59, 2  ;;  %v19277_v46 = vpop.f32.mrb[134].mxu1  ;;  %v9300_v9 = vpop.f32.mrb[190].mxu0  ;;  %v8942_v11 = vrot.slane %v8514_v31, 2 }
 0xa1c   : > { %21622 = vst [vmem:[#allocation110_spill] sm:$0xff] %v19277_v46  ;;  %v8686_v4 = vrot.slane %v19277_v46, 1  ;;  %v8518_v13 = vpop.f32.mrb[135].mxu1  ;;  %v9301_v5 = vpop.f32.mrb[191].mxu0  ;;  %v19282_v61 = vsel %vm8609_vm10, %v9654_v42, %v9656_v20 }
 0xa1d   : > { %21623 = vst [vmem:[#allocation111_spill] sm:$0xff] %v19282_v61  ;;  %v8943_v3 = vrot.slane %v8518_v13, 2  ;;  %v19285_v57 = vsel %vm8866_vm11, %v9910_v22, %v9912_v40 }
 0xa1e   : > { %21624 = vst [vmem:[#allocation112_spill] sm:$0xff] %v19285_v57  ;;  %12480 = vmatmul.mubr.msk.bf16.gmra.mrb[40].mxu0 %vm1523_vm0, %v18861_v37  ;;  %v19290_v32 = vsel %vm8609_vm10, %v8685_v10, %v8686_v4 }
 0xa1f   : > { %21625 = vst [vmem:[#allocation113_spill] sm:$0xff] %v19290_v32  ;;  %12525 = vmatmul.mubr.msk.bf16.gmra.mrb[240].mxu1 %vm1523_vm0, %v18828_v50  ;;  %9546 = vmatprep.mubr.bf16.mxu0 %v21433_v38  ;;  %v19296_v5 = vsel %vm8866_vm11, %v8942_v11, %v8943_v3 }
 0xa20   : > { %21626 = vst [vmem:[#allocation114_spill] sm:$0xff] %v19296_v5  ;;  %10561 = vmatprep.mubr.bf16.mxu1 %v21433_v38 }
 0xa21   : > { %v8522_v13 = vpop.f32.mrb[136].mxu1  ;;  %v19299_v42 = vpop.f32.mrb[192].mxu0 }
 0xa22   : > { %21627 = vst [vmem:[#allocation115_spill] sm:$0xff] %v19299_v42  ;;  %v8688_v40 = vrot.slane %v8522_v13, 1  ;;  %v8524_v22 = vpop.f32.mrb[137].mxu1  ;;  %v9306_v20 = vpop.f32.mrb[193].mxu0  ;;  %v9658_v9 = vrot.slane %v19299_v42, 1 }
 0xa23   : > { %v8945_v31 = vrot.slane %v8524_v22, 2  ;;  %v8526_v59 = vpop.f32.mrb[138].mxu1  ;;  %v19301_v10 = vpop.f32.mrb[194].mxu0  ;;  %v9914_v5 = vrot.slane %v9306_v20, 2 }
 0xa24   : > { %21628 = vst [vmem:[#allocation116_spill] sm:$0xff] %v19301_v10  ;;  %v9659_v50 = vrot.slane %v19301_v10, 1  ;;  %v8527_v21 = vpop.f32.mrb[139].mxu1  ;;  %v9310_v57 = vpop.f32.mrb[195].mxu0  ;;  %v19306_v11 = vsel %vm8609_vm10, %v8686_v4, %v8688_v40 }
 0xa25   : > { %21629 = vst [vmem:[#allocation117_spill] sm:$0xff] %v19306_v11  ;;  %v9915_v46 = vrot.slane %v9310_v57, 2  ;;  %v19309_v48 = vsel %vm8866_vm11, %v8943_v3, %v8945_v31 }
 0xa26   : > { %21630 = vst [vmem:[#allocation118_spill] sm:$0xff] %v19309_v48  ;;  %12481 = vmatmul.mubr.msk.bf16.gmra.mrb[44].mxu0 %vm1523_vm0, %v18880_v43  ;;  %v19314_v13 = vsel %vm8609_vm10, %v9658_v9, %v9659_v50 }
 0xa27   : > { %21631 = vst [vmem:[#allocation119_spill] sm:$0xff] %v19314_v13  ;;  %12526 = vmatmul.mubr.msk.bf16.gmra.mrb[244].mxu1 %vm1523_vm0, %v18861_v37  ;;  %9554 = vmatprep.mubr.bf16.mxu0 %v21433_v38  ;;  %v19320_v21 = vsel %vm8866_vm11, %v9914_v5, %v9915_v46 }
 0xa28   : > { %21632 = vst [vmem:[#allocation120_spill] sm:$0xff] %v19320_v21  ;;  %10571 = vmatprep.mubr.bf16.mxu1 %v21433_v38 }
 0xa29   : > { %v9314_v57 = vpop.f32.mrb[196].mxu0  ;;  %v19323_v4 = vpop.f32.mrb[140].mxu1 }
 0xa2a   : > { %21633 = vst [vmem:[#allocation121_spill] sm:$0xff] %v19323_v4  ;;  %v7517_v3 = vpop.xlane.xlu1 %7516  ;;  %v9661_v40 = vrot.slane %v9314_v57, 1  ;;  %v9316_v22 = vpop.f32.mrb[197].mxu0  ;;  %v10696_v5 = vrot.slane %v19323_v4, 1 }
 0xa2b   : > { %14678 = vrcp.f32 %v7517_v3  ;;  %v7514_v20 = vpop.xlane.xlu0 %7513  ;;  %v9917_v31 = vrot.slane %v9316_v22, 2  ;;  %v10331_v59 = vpop.f32.mrb[141].mxu1 }
 0xa2c   : > { %v9318_v9 = vpop.f32.mrb[198].mxu0  ;;  %v19325_v42 = vpop.f32.mrb[142].mxu1  ;;  %v19328_v37 = vsel %vm8609_vm10, %v9659_v50, %v9661_v40  ;;  %14680 = vrcp.f32 %v7514_v20  ;;  %v10952_v3 = vrot.slane %v10331_v59, 2 }
 0xa2d   : > { %21634 = vst [vmem:[#allocation122_spill] sm:$0xff] %v19325_v42  ;;  %21635 = vst [vmem:[#allocation123_spill] sm:$0xff] %v19328_v37  ;;  %v10697_v21 = vrot.slane %v19325_v42, 1  ;;  %v9319_v10 = vpop.f32.mrb[199].mxu0  ;;  %v10335_v48 = vpop.f32.mrb[143].mxu1  ;;  %v19333_v27 = vsel %vm8866_vm11, %v9915_v46, %v9917_v31  ;;  %v14910_v37 = vld [vmem:[%s15850_s4 + $0x78] sm:$0xff]  }
 0xa2e   : > { %21636 = vst [vmem:[#allocation124_spill] sm:$0xff] %v19333_v27  ;;  %v19335_v57 = vpop.permute.xlu1 %5547  ;;  %v10953_v22 = vrot.slane %v10335_v48, 2  ;;  %v5836_v55 = vunpack.c.l.bf16 %v14910_v37  ;;  %s11872_s4 = sshll.u32 %s15846_s22, 8 }
 0xa2f   : > { %12527 = vmatmul.mubr.msk.bf16.gmra.mrb[248].mxu1 %vm1523_vm0, %v18880_v43  ;;  %v19340_v50 = vsel %vm8609_vm10, %v10696_v5, %v10697_v21  ;;  %s19436_s14 = scalar_lea.vmem [#allocation14], %s11872_s4  ;;  %s21901_s4 = smov %s21900_s24 }
 0xa30   : > { %21637 = vst [vmem:[#allocation125_spill] sm:$0xff] %v19340_v50  ;;  %10579 = vmatprep.mubr.bf16.mxu1 %v21433_v38  ;;  %v19344_v40 = vsel %vm8866_vm11, %v10952_v3, %v10953_v22  ;;  %s11465_s3 = sshll.u32 %s19436_s14, 4  ;;  %s20921_s3 = int_to_ptr.vmem [resolvable:$true] %s11465_s3 }
 0xa31   : > { %21638 = vst [vmem:[#allocation126_spill] sm:$0xff] %v19344_v40  ;;  %v19346_v10 = vpop.f32.mrb[200].mxu0  ;;  %v10339_v46 = vpop.f32.mrb[144].mxu1 }
 0xa32   : > { %21639 = vst [vmem:[#allocation127_spill] sm:$0xff] %v19346_v10  ;;  %v19348_v31 = vpop.permute.xlu1 %5735  ;;  %v10699_v20 = vrot.slane %v10339_v46, 1  ;;  %v9324_v9 = vpop.f32.mrb[201].mxu0  ;;  %v9663_v27 = vrot.slane %v19346_v10, 1 }
 0xa33   : > { %v10341_v59 = vpop.f32.mrb[145].mxu1  ;;  %v19350_v4 = vpop.f32.mrb[202].mxu0  ;;  %v9919_v46 = vrot.slane %v9324_v9, 2 }
 0xa34   : > { %v10955_v48 = vrot.slane %v10341_v59, 2  ;;  %21640 = vst [vmem:[#allocation128_spill] sm:$0xff] %v19350_v4  ;;  %v10343_v43 = vpop.f32.mrb[146].mxu1  ;;  %v19353_v5 = vsel %vm8609_vm10, %v10697_v21, %v10699_v20  ;;  %v9664_v3 = vrot.slane %v19350_v4, 1  ;;  %v9328_v40 = vpop.f32.mrb[203].mxu0 }
 0xa35   : > { %21641 = vst [vmem:[#allocation129_spill] sm:$0xff] %v19353_v5  ;;  %v14679_v42 = vpop.eup %14678  ;;  %v10344_v6 = vpop.f32.mrb[147].mxu1  ;;  %v9920_v28 = vrot.slane %v9328_v40, 2 }
 0xa36   : > { %v5740_v50 = vpop.permute.xlu1 %5739  ;;  %v19358_v13 = vmul.f32 %v14679_v42, %v18973_v19  ;;  %v19361_v59 = vsel %vm8866_vm11, %v10953_v22, %v10955_v48  ;;  %v19364_v43 = vsel %vm8609_vm10, %v9663_v27, %v9664_v3  ;;  %v14681_v21 = vpop.eup %14680 }
 0xa37   : > { %21642 = vst [vmem:[#allocation130_spill] sm:$0xff] %v19361_v59  ;;  %21643 = vst [vmem:[#allocation131_spill] sm:$0xff] %v19364_v43  ;;  %v19369_v20 = vsel %vm8866_vm11, %v9919_v46, %v9920_v28  ;;  %v19374_v9 = vmul.f32 %v14681_v21, %v18975_v60 }
 0xa38   : > { %7557 = vperm.xlu1 %13760, %v19358_v13   ;;  %7531 = vperm.xlu0 %13754, %v19358_v13   ;;  %21644 = vst [vmem:[#allocation132_spill] sm:$0xff] %v19369_v20 }
 0xa39   : > { %v9332_v6 = vpop.f32.mrb[204].mxu0  ;;  %v19371_v10 = vpop.f32.mrb[148].mxu1 }
 0xa3a   : > { %21645 = vst [vmem:[#allocation133_spill] sm:$0xff] %v19371_v10  ;;  %v9666_v19 = vrot.slane %v9332_v6, 1  ;;  %v9334_v42 = vpop.f32.mrb[205].mxu0  ;;  %v10349_v40 = vpop.f32.mrb[149].mxu1  ;;  %v10701_v60 = vrot.slane %v19371_v10, 1 }
 0xa3b   : > { %v5960_v22 = vpop.permute.xlu1 %5959  ;;  %v9922_v27 = vrot.slane %v9334_v42, 2  ;;  %v9336_v48 = vpop.f32.mrb[206].mxu0 }
 0xa3c   : > { %13761 = vset.pattern.permute.xlu1 %v21433_v38  ;;  %13759 = vset.pattern.permute.xlu0 %v21493_v36  ;;  %v19378_v46 = vpop.f32.mrb[150].mxu1  ;;  %v9337_v20 = vpop.f32.mrb[207].mxu0  ;;  %v19381_v59 = vsel %vm8609_vm10, %v9664_v3, %v9666_v19  ;;  %v14908_v48 = vld [vmem:[%s15917_s8 + $0x78] sm:$0xff]   ;;  %v5996_v11 = vmul.f32 %v5960_v22, %v5836_v55  ;;  %s15279_s8 = smov [#allocation14]  }
 0xa3d   : > { %21646 = vst [vmem:[#allocation134_spill] sm:$0xff] %v19378_v46  ;;  %21647 = vst [vmem:[#allocation135_spill] sm:$0xff] %v19381_v59  ;;  %7543 = vperm.xlu0 %13759, %v19358_v13   ;;  %7526 = vperm.xlu1 %13761, %v19374_v9   ;;  %v10702_v21 = vrot.slane %v19378_v46, 1  ;;  %v19387_v6 = vpop.f32.mrb[151].mxu1  ;;  %v19390_v42 = vsel %vm8866_vm11, %v9920_v28, %v9922_v27  ;;  %v5389_v4 = vunpack.c.h.bf16 %v14908_v48  ;;  %v10957_v20 = vrot.slane %v10349_v40, 2  ;;  %v14909_v19 = vld [vmem:[%s16330_s18 + $0x78] sm:$0xff]   ;;  %v5543_v46 = vpop.permute.xlu0 %5542 }
 0xa3e   : > { %21648 = vst [vmem:[#allocation136_spill] sm:$0xff] %v19390_v42  ;;  %v21172_v3 = vrot.slane %v19387_v6, 2  ;;  %v5612_v43 = vunpack.c.l.bf16 %v14909_v19  ;;  %v5388_v5 = vunpack.c.l.bf16 %v14908_v48  ;;  %v5613_v59 = vunpack.c.h.bf16 %v14909_v19  ;;  %v19414_v19 = vld [vmem:[%s15857_s2 + $0x78] sm:$0xff]   ;;  %s21653_s18 = sld [smem:[#allocation195_spill]]  ;;  %s15096_s2 = scalar_lea.vmem %s20921_s3, 4096 }
 0xa3f   : > { %v5964_v32 = vpop.permute.xlu1 %5963  ;;  %v19396_v10 = vsel %vm8609_vm10, %v10701_v60, %v10702_v21  ;;  %v5837_v40 = vunpack.c.h.bf16 %v14910_v37  ;;  %v19409_v60 = vmul.f32 %v19335_v57, %v5389_v4  ;;  %p15097_p4 = scmp.ne.s32.totalorder %s20921_s3, %s15096_s2 }
 0xa40   : > { %21649 = vst [vmem:[#allocation137_spill] sm:$0xff] %v19396_v10  ;;  %v19402_v28 = vsel %vm8866_vm11, %v10957_v20, %v21172_v3  ;;  %v5772_v42 = vmul.f32 %v19348_v31, %v5612_v43  ;;  %v5580_v10 = vmul.f32 %v5543_v46, %v5388_v5  ;;  %v5773_v4 = vmul.f32 %v5740_v50, %v5613_v59 }
 0xa41   : > { %21650 = vst [vmem:[#allocation138_spill] sm:$0xff] %v19402_v28  ;;  %13764 = vset.pattern.permute.xlu0 %v21483_v63  ;;  %13762 = vset.pattern.permute.xlu1 %v21493_v36  ;;  %v19406_v27 = vpop.f32.mrb[208].mxu0  ;;  %v10357_v48 = vpop.f32.mrb[152].mxu1  ;;  %v5997_v50 = vmul.f32 %v5964_v32, %v5837_v40  ;;  %v21654_v32 = vrot.slane %v19387_v6, 2  ;;  %v21657_v40 = vunpack.c.h.bf16 %v19414_v19  ;;  %p15098_p6 = pnand %p15097_p4, %p21902_p2 }
 0xa42   : > { %21651 = vst [vmem:[#allocation139_spill] sm:$0xff] %v19406_v27  ;;  %7567 = vperm.xlu0 %13764, %v19374_v9   ;;  %7539 = vperm.xlu1 %13762, %v19374_v9   ;;  %v10704_v3 = vrot.slane %v10357_v48, 1  ;;  %v19418_v28 = vpop.f32.mrb[209].mxu0  ;;  %v10359_v36 = vpop.f32.mrb[153].mxu1  ;;  %v9668_v33 = vrot.slane %v19406_v27, 1  ;;  %v5804_v22 = vadd.f32 %v5772_v42, %v5580_v10  ;;  %v5805_v46 = vadd.f32 %v5773_v4, %v19409_v60 }
 0xa43   : > { %v10960_v57 = vrot.slane %v10359_v36, 2  ;;  %v19422_v61 = vpop.f32.mrb[210].mxu0  ;;  %v10361_v47 = vpop.f32.mrb[154].mxu1  ;;  %v9924_v5 = vrot.slane %v19418_v28, 2  ;;  %p15099_p3 = pneg %p15098_p6 }
 0xa44   : > { %21652 = vst [vmem:[#allocation140_spill] sm:$0xff] %v19422_v61  ;;  %v6184_v30 = vpop.permute.xlu1 %6183  ;;  %v9669_v20 = vrot.slane %v19422_v61, 1  ;;  %v19426_v37 = vpop.f32.mrb[211].mxu0  ;;  %v19429_v48 = vsel %vm8609_vm10, %v10702_v21, %v10704_v3  ;;  %v12395_v31 = vld [vmem:[%s21653_s18] ss:$0 sm:$0xff]  ;;  %v21655_v21 = vunpack.c.l.bf16 %v19414_v19  ;;  %v6029_v28 = vadd.f32 %v5997_v50, %v5805_v46  ;;  %s15100_s18 = sshll.u32 %s15279_s8, 4  ;;  %s15101_s18 = int_to_ptr.vmem [resolvable:$false] %s15100_s18 }
 0xa45   : > { %v9925_v47 = vrot.slane %v19426_v37, 2  ;;  %v10362_v55 = vpop.f32.mrb[155].mxu1  ;;  %8001 = vst.msk [vmem:[%s19436_s14 + $0x8] sm:$0xff] %vm1523_vm0, %v12395_v31  ;;  %8000 = vst.msk [vmem:[%s19436_s14] sm:$0xff] %vm1523_vm0, %v12395_v31  ;;  %v19505_v59 = vsel %vm8866_vm11, %v21654_v32, %v10960_v57  ;;  %p15103_p0 = scmp.lt.s32.totalorder %s20921_s3, %s15101_s18 }
 0xa46   : > { %8002 = vst.msk [vmem:[%s19436_s14 + $0x10] sm:$0xff] %vm1523_vm0, %v12395_v31  ;;  %8003 = vst.msk [vmem:[%s19436_s14 + $0x18] sm:$0xff] %vm1523_vm0, %v12395_v31  ;;  %8692 = vrot.lane.b32.xlu0 %v18995_v52, %s15278_s20  ;;  %13763 = vset.pattern.permute.xlu1 %v21437_v44  ;;  %v19513_v43 = vsel %vm8609_vm10, %v9668_v33, %v9669_v20  ;;  %v6220_v6 = vmul.f32 %v6184_v30, %v21655_v21 }
 0xa47   : > { %8004 = vst.msk [vmem:[%s19436_s14 + $0x20] sm:$0xff] %vm1523_vm0, %v12395_v31  ;;  %8005 = vst.msk [vmem:[%s19436_s14 + $0x28] sm:$0xff] %vm1523_vm0, %v12395_v31  ;;  %7553 = vperm.xlu1 %13763, %v19374_v9   ;;  %v19522_v3 = vsel %vm8866_vm11, %v9924_v5, %v9925_v47  ;;  %v6028_v44 = vadd.f32 %v5996_v11, %v5804_v22 }
 0xa48   : > { %8006 = vst.msk [vmem:[%s19436_s14 + $0x30] sm:$0xff] %vm1523_vm0, %v12395_v31  ;;  %8007 = vst.msk [vmem:[%s19436_s14 + $0x38] sm:$0xff] %vm1523_vm0, %v12395_v31  ;;  %v6188_v52 = vpop.permute.xlu1 %6187 }
 0xa49   : > { %8008 = vst.msk [vmem:[%s19436_s14 + $0x40] sm:$0xff] %vm1523_vm0, %v12395_v31  ;;  %8009 = vst.msk [vmem:[%s19436_s14 + $0x48] sm:$0xff] %vm1523_vm0, %v12395_v31  ;;  %v6221_v33 = vmul.f32 %v6188_v52, %v21657_v40  ;;  %v9350_v36 = vpop.f32.mrb[212].mxu0  ;;  %v19526_v10 = vpop.f32.mrb[156].mxu1  ;;  %v6252_v60 = vadd.f32 %v6220_v6, %v6028_v44  ;;  %v7642_v52 = vld [vmem:[#allocation2 + $0x110] sm:$0x1] }
 0xa4a   : > { %8010 = vst.msk [vmem:[%s19436_s14 + $0x50] sm:$0xff] %vm1523_vm0, %v12395_v31  ;;  %8011 = vst.msk [vmem:[%s19436_s14 + $0x58] sm:$0xff] %vm1523_vm0, %v12395_v31  ;;  %8696 = vrot.lane.b32.xlu0 %v19029_v24, %s15278_s20  ;;  %v9671_v30 = vrot.slane %v9350_v36, 1  ;;  %v9352_v42 = vpop.f32.mrb[213].mxu0  ;;  %v10367_v9 = vpop.f32.mrb[157].mxu1  ;;  %v10706_v19 = vrot.slane %v19526_v10, 1 }
 0xa4b   : > { %8012 = vst.msk [vmem:[%s19436_s14 + $0x60] sm:$0xff] %vm1523_vm0, %v12395_v31  ;;  %8013 = vst.msk [vmem:[%s19436_s14 + $0x68] sm:$0xff] %vm1523_vm0, %v12395_v31  ;;  %v6253_v4 = vadd.f32 %v6221_v33, %v6029_v28  ;;  %13765 = vset.pattern.permute.xlu1 %v21483_v63  ;;  %v9927_v57 = vrot.slane %v9352_v42, 2  ;;  %v19531_v11 = vpop.f32.mrb[158].mxu1  ;;  %v10962_v22 = vrot.slane %v10367_v9, 2  ;;  %v7970_v36 = vld [vmem:[#allocation2 + $0x100] sm:$0xff] }
 0xa4c   : > { %8014 = vst.msk [vmem:[%s19436_s14 + $0x70] sm:$0xff] %vm1523_vm0, %v12395_v31  ;;  %8015 = vst.msk [vmem:[%s19436_s14 + $0x78] sm:$0xff] %vm1523_vm0, %v12395_v31  ;;  %7571 = vperm.xlu1 %13765, %v19358_v13   ;;  %v10707_v50 = vrot.slane %v19531_v11, 1  ;;  %v10371_v55 = vpop.f32.mrb[159].mxu1  ;;  %v19539_v24 = vsel %vm8609_vm10, %v9669_v20, %v9671_v30  ;;  %v7973_v20 = vld [vmem:[#allocation2 + $0x108] sm:$0x1] }
 0xa4d   : > { %8016 = vst.msk [vmem:[%s19436_s14 + $0x80] sm:$0xff] %vm1523_vm0, %v12395_v31  ;;  %8017 = vst.msk [vmem:[%s19436_s14 + $0x88] sm:$0xff] %vm1523_vm0, %v12395_v31  ;;  %v7734_v32 = vpack.c.bf16 %v6253_v4, %v6252_v60  ;;  %v10963_v63 = vrot.slane %v10371_v55, 2  ;;  %v19544_v46 = vsel %vm8866_vm11, %v9925_v47, %v9927_v57  ;;  %v7698_v44 = vld [vmem:[#allocation2 + $0x118] sm:$0x1] }
 0xa4e   : > { %8018 = vst.msk [vmem:[%s19436_s14 + $0x90] sm:$0xff] %vm1523_vm0, %v12395_v31  ;;  %8019 = vst.msk [vmem:[%s19436_s14 + $0x98] sm:$0xff] %vm1523_vm0, %v12395_v31  ;;  %8700 = vrot.lane.b32.xlu0 %v19058_v35, %s15278_s20  ;;  %v19549_v13 = vsel %vm8609_vm10, %v10706_v19, %v10707_v50  ;;  %v7643_v35 = vsel %vm17988_vm6, 0, %v7642_v52  ;;  %v7699_v33 = vsel %vm17996_vm8, 0, %v7698_v44 }
 0xa4f   : > { %8020 = vst.msk [vmem:[%s19436_s14 + $0xa0] sm:$0xff] %vm1523_vm0, %v12395_v31  ;;  %8021 = vst.msk [vmem:[%s19436_s14 + $0xa8] sm:$0xff] %vm1523_vm0, %v12395_v31  ;;  %v7841_v21 = vshrl.u32 %v7734_v32, 16  ;;  %v19552_v6 = vsel %vm8866_vm11, %v10962_v22, %v10963_v63  ;;  %v7844_v28 = vshll.u32 %v7734_v32, 16 }
 0xa50   : > { %8022 = vst.msk [vmem:[%s19436_s14 + $0xb0] sm:$0xff] %vm1523_vm0, %v12395_v31  ;;  %8023 = vst.msk [vmem:[%s19436_s14 + $0xb8] sm:$0xff] %vm1523_vm0, %v12395_v31  ;;  %8690 = vrot.lane.b32.xlu1 %v18980_v53, %s15278_s20 }
 0xa51   : > { %8024 = vst.msk [vmem:[%s19436_s14 + $0xc0] sm:$0xff] %vm1523_vm0, %v12395_v31  ;;  %8025 = vst.msk [vmem:[%s19436_s14 + $0xc8] sm:$0xff] %vm1523_vm0, %v12395_v31  ;;  %v7843_v37 = vrot.slane %v7841_v21, 7  ;;  %v10375_v40 = vpop.f32.mrb[160].mxu1 }
 0xa52   : > { %8026 = vst.msk [vmem:[%s19436_s14 + $0xd0] sm:$0xff] %vm1523_vm0, %v12395_v31  ;;  %8027 = vst.msk [vmem:[%s19436_s14 + $0xd8] sm:$0xff] %vm1523_vm0, %v12395_v31  ;;  %8704 = vrot.lane.b32.xlu0 %v19103_v0, %s15278_s20  ;;  %v10709_v30 = vrot.slane %v10375_v40, 1  ;;  %v10377_v53 = vpop.f32.mrb[161].mxu1 }
 0xa53   : > { %8028 = vst.msk [vmem:[%s19436_s14 + $0xe0] sm:$0xff] %vm1523_vm0, %v12395_v31  ;;  %8029 = vst.msk [vmem:[%s19436_s14 + $0xe8] sm:$0xff] %vm1523_vm0, %v12395_v31  ;;  %v7846_v9 = vor.u32 %v7844_v28, %v7843_v37  ;;  %v7974_v60 = vsel %vm17988_vm6, %v7843_v37, %v7973_v20  ;;  %v10965_v4 = vrot.slane %v10377_v53, 2 }
 0xa54   : > { %8030 = vst.msk [vmem:[%s19436_s14 + $0xf0] sm:$0xff] %vm1523_vm0, %v12395_v31  ;;  %8031 = vst.msk [vmem:[%s19436_s14 + $0xf8] sm:$0xff] %vm1523_vm0, %v12395_v31  ;;  %v9354_v31 = vpop.f32.mrb[214].mxu0  ;;  %8694 = vrot.lane.b32.xlu1 %v19016_v18, %s15278_s20  ;;  %v19573_v55 = vsel %vm8609_vm10, %v10707_v50, %v10709_v30 }
 0xa55   : > { %21656 = vst [vmem:[#allocation141_spill] sm:$0xff] %v19522_v3  ;;  %v9355_v5 = vpop.f32.mrb[215].mxu0  ;;  %21658 = vst [vmem:[#allocation142_spill] sm:$0xff] %v19544_v46  ;;  %v10379_v31 = vpop.f32.mrb[162].mxu1  ;;  %v7971_v32 = vsel %vm18250_vm9, %v7846_v9, %v7970_v36  ;;  %v19578_v20 = vsel %vm8866_vm11, %v10963_v63, %v10965_v4 }
 0xa56   : > { %v19556_v47 = vpop.f32.mrb[216].mxu0  ;;  %7644 = vst [vmem:[#allocation2 + $0x110] sm:$0x1] %v7643_v35  ;;  %7700 = vst [vmem:[#allocation2 + $0x118] sm:$0x1] %v7699_v33  ;;  %v10380_v5 = vpop.f32.mrb[163].mxu1  ;;  %8708 = vrot.lane.b32.xlu0 %v19147_v41, %s15278_s20  ;;  %12482 = vmatmul.mubr.msk.bf16.gmra.mrb[48].mxu0 %vm1523_vm0, %v7971_v32 }
 0xa57   : > { %21659 = vst [vmem:[#allocation143_spill] sm:$0xff] %v19556_v47  ;;  %v9360_v42 = vpop.f32.mrb[217].mxu0  ;;  %7975 = vst [vmem:[#allocation2 + $0x108] sm:$0x1] %v7974_v60  ;;  %v9673_v25 = vrot.slane %v19556_v47, 1  ;;  %12528 = vmatmul.mubr.msk.bf16.gmra.mrb[252].mxu1 %vm1523_vm0, %v7971_v32  ;;  %9564 = vmatprep.mubr.bf16.mxu0 %v21433_v38 }
 0xa58   : > { %v19566_v57 = vpop.f32.mrb[218].mxu0  ;;  %v9929_v22 = vrot.slane %v9360_v42, 2  ;;  %7972 = vst [vmem:[#allocation2 + $0x100] sm:$0xff] %v7971_v32  ;;  %8698 = vrot.lane.b32.xlu1 %v19047_v12, %s15278_s20  ;;  %10589 = vmatprep.mubr.bf16.mxu1 %v21433_v38 }
 0xa59   : > { %21660 = vst [vmem:[#allocation144_spill] sm:$0xff] %v19566_v57  ;;  %v9674_v0 = vrot.slane %v19566_v57, 1  ;;  %v9364_v19 = vpop.f32.mrb[219].mxu0  ;;  %v19594_v52 = vpop.f32.mrb[164].mxu1  ;;  %v21693_v57 = vld [vmem:[#allocation129_spill] sm:$0xff] }
 0xa5a   : > { %v9930_v21 = vrot.slane %v9364_v19, 2  ;;  %v9368_v63 = vpop.f32.mrb[220].mxu0  ;;  %8712 = vrot.lane.b32.xlu0 %v19179_v62, %s15278_s20  ;;  %v10385_v37 = vpop.f32.mrb[165].mxu1  ;;  %v10711_v12 = vrot.slane %v19594_v52, 1 }
 0xa5b   : > { %v19584_v18 = vsel %vm8609_vm10, %v9673_v25, %v9674_v0  ;;  %v9676_v41 = vrot.slane %v9368_v63, 1  ;;  %v9370_v44 = vpop.f32.mrb[221].mxu0  ;;  %v19598_v35 = vpop.f32.mrb[166].mxu1  ;;  %v10967_v62 = vrot.slane %v10385_v37, 2 }
 0xa5c   : > { %v19589_v50 = vsel %vm8866_vm11, %v9929_v22, %v9930_v21  ;;  %v9932_v28 = vrot.slane %v9370_v44, 2  ;;  %v9372_v40 = vpop.f32.mrb[222].mxu0  ;;  %8702 = vrot.lane.b32.xlu1 %v19086_v2, %s15278_s20  ;;  %v10712_v33 = vrot.slane %v19598_v35, 1  ;;  %v10389_v30 = vpop.f32.mrb[167].mxu1 }
 0xa5d   : > { %21661 = vst [vmem:[#allocation145_spill] sm:$0xff] %v19589_v50  ;;  %v9373_v36 = vpop.f32.mrb[223].mxu0  ;;  %v19605_v42 = vsel %vm8609_vm10, %v9674_v0, %v9676_v41  ;;  %v10968_v53 = vrot.slane %v10389_v30, 2 }
 0xa5e   : > { %v9106_v9 = vld [vmem:[#allocation2 + $0x108] sm:$0xff]  ;;  %v19608_v60 = vsel %vm8866_vm11, %v9930_v21, %v9932_v28  ;;  %8716 = vrot.lane.b32.xlu0 %v19211_v16, %s15278_s20  ;;  %v19614_v2 = vsel %vm8609_vm10, %v10711_v12, %v10712_v33 }
 0xa5f   : > { %21662 = vst [vmem:[#allocation146_spill] sm:$0xff] %v19608_v60  ;;  %12483 = vmatmul.mubr.msk.bf16.gmra.mrb[52].mxu0 %vm1523_vm0, %v9106_v9  ;;  %12529 = vmatmul.mubr.msk.bf16.gmra.mrb[32].mxu1 %vm1523_vm0, %v9106_v9  ;;  %v19618_v4 = vsel %vm8866_vm11, %v10967_v62, %v10968_v53 }
 0xa60   : > { %8706 = vrot.lane.b32.xlu1 %v19131_v39, %s15278_s20  ;;  %10597 = vmatprep.mubr.bf16.mxu1 %v21433_v38 }
 0xa61   : > { %v19623_v31 = vpop.f32.mrb[224].mxu0  ;;  %v10393_v25 = vpop.f32.mrb[168].mxu1 }
 0xa62   : > { %21663 = vst [vmem:[#allocation147_spill] sm:$0xff] %v19623_v31  ;;  %8720 = vrot.lane.b32.xlu0 %v19243_v49, %s15278_s20  ;;  %v10714_v16 = vrot.slane %v10393_v25, 1  ;;  %v9378_v0 = vpop.f32.mrb[225].mxu0  ;;  %v10395_v19 = vpop.f32.mrb[169].mxu1  ;;  %v9678_v39 = vrot.slane %v19623_v31, 1 }
 0xa63   : > { %v10970_v5 = vrot.slane %v10395_v19, 2  ;;  %v19627_v32 = vpop.f32.mrb[226].mxu0  ;;  %v10397_v22 = vpop.f32.mrb[170].mxu1  ;;  %v9934_v49 = vrot.slane %v9378_v0, 2 }
 0xa64   : > { %21664 = vst [vmem:[#allocation148_spill] sm:$0xff] %v19627_v32  ;;  %8710 = vrot.lane.b32.xlu1 %v19169_v7, %s15278_s20  ;;  %v9679_v21 = vrot.slane %v19627_v32, 1  ;;  %v9382_v63 = vpop.f32.mrb[227].mxu0  ;;  %v10398_v41 = vpop.f32.mrb[171].mxu1  ;;  %v19634_v44 = vsel %vm8609_vm10, %v10712_v33, %v10714_v16 }
 0xa65   : > { %v9935_v37 = vrot.slane %v9382_v63, 2  ;;  %v19637_v28 = vsel %vm8866_vm11, %v10968_v53, %v10970_v5 }
 0xa66   : > { %8724 = vrot.lane.b32.xlu0 %v18818_v58, %s15278_s20  ;;  %v19642_v40 = vsel %vm8609_vm10, %v9678_v39, %v9679_v21 }
 0xa67   : > { %v19645_v7 = vsel %vm8866_vm11, %v9934_v49, %v9935_v37 }
 0xa68   : > { %21665 = vst [vmem:[#allocation149_spill] sm:$0xff] %v19645_v7  ;;  %8714 = vrot.lane.b32.xlu1 %v19196_v34, %s15278_s20 }
 0xa69   : > { %v9386_v12 = vpop.f32.mrb[228].mxu0  ;;  %v19649_v33 = vpop.f32.mrb[172].mxu1 }
 0xa6a   : > { %21666 = vst [vmem:[#allocation150_spill] sm:$0xff] %v19649_v33  ;;  %8728 = vrot.lane.b32.xlu0 %v18850_v8, %s15278_s20  ;;  %v9681_v36 = vrot.slane %v9386_v12, 1  ;;  %v9388_v30 = vpop.f32.mrb[229].mxu0  ;;  %v10403_v62 = vpop.f32.mrb[173].mxu1  ;;  %v10716_v25 = vrot.slane %v19649_v33, 1 }
 0xa6b   : > { %v9937_v53 = vrot.slane %v9388_v30, 2  ;;  %v9390_v58 = vpop.f32.mrb[230].mxu0  ;;  %v19653_v9 = vpop.f32.mrb[174].mxu1  ;;  %v10972_v8 = vrot.slane %v10403_v62, 2 }
 0xa6c   : > { %8718 = vrot.lane.b32.xlu1 %v19246_v29, %s15278_s20  ;;  %v10717_v34 = vrot.slane %v19653_v9, 1  ;;  %v9391_v16 = vpop.f32.mrb[231].mxu0  ;;  %v10407_v0 = vpop.f32.mrb[175].mxu1  ;;  %v19660_v19 = vsel %vm8609_vm10, %v9679_v21, %v9681_v36 }
 0xa6d   : > { %v10973_v5 = vrot.slane %v10407_v0, 2  ;;  %v19663_v22 = vsel %vm8866_vm11, %v9935_v37, %v9937_v53 }
 0xa6e   : > { %21667 = vst [vmem:[#allocation151_spill] sm:$0xff] %v19663_v22  ;;  %8732 = vrot.lane.b32.xlu0 %v18889_v26, %s15278_s20  ;;  %v19668_v39 = vsel %vm8609_vm10, %v10716_v25, %v10717_v34 }
 0xa6f   : > { %v19671_v29 = vsel %vm8866_vm11, %v10972_v8, %v10973_v5 }
 0xa70   : > { %21668 = vst [vmem:[#allocation152_spill] sm:$0xff] %v19671_v29  ;;  %8722 = vrot.lane.b32.xlu1 %v18794_v15, %s15278_s20 }
 0xa71   : > { %v19675_v63 = vpop.f32.mrb[232].mxu0 }
 0xa72   : > { %21669 = vst [vmem:[#allocation153_spill] sm:$0xff] %v19675_v63  ;;  %8736 = vrot.lane.b32.xlu0 %v18918_v45, %s15278_s20  ;;  %v10411_v21 = vpop.f32.mrb[176].mxu1  ;;  %v9396_v41 = vpop.f32.mrb[233].mxu0  ;;  %v9683_v26 = vrot.slane %v19675_v63, 1 }
 0xa73   : > { %v10719_v49 = vrot.slane %v10411_v21, 1  ;;  %v10413_v37 = vpop.f32.mrb[177].mxu1  ;;  %v19679_v12 = vpop.f32.mrb[234].mxu0  ;;  %v9939_v53 = vrot.slane %v9396_v41, 2 }
 0xa74   : > { %21670 = vst [vmem:[#allocation154_spill] sm:$0xff] %v19679_v12  ;;  %8726 = vrot.lane.b32.xlu1 %v18841_v14, %s15278_s20  ;;  %v10975_v36 = vrot.slane %v10413_v37, 2  ;;  %v9684_v30 = vrot.slane %v19679_v12, 1  ;;  %v10415_v15 = vpop.f32.mrb[178].mxu1  ;;  %v9400_v62 = vpop.f32.mrb[235].mxu0 }
 0xa75   : > { %v9940_v58 = vrot.slane %v9400_v62, 2  ;;  %v10416_v25 = vpop.f32.mrb[179].mxu1  ;;  %v19686_v45 = vsel %vm8609_vm10, %v10717_v34, %v10719_v49 }
 0xa76   : > { %8740 = vrot.lane.b32.xlu0 %v19106_v17, %s15278_s20  ;;  %v19691_v16 = vsel %vm8609_vm10, %v9683_v26, %v9684_v30  ;;  %v19694_v14 = vsel %vm8866_vm11, %v10973_v5, %v10975_v36 }
 0xa77   : > { %v19697_v0 = vsel %vm8866_vm11, %v9939_v53, %v9940_v58  ;;  %v21674_v53 = vld [vmem:[#allocation67_spill] sm:$0xff] }
 0xa78   : > { %21671 = vst [vmem:[#allocation155_spill] sm:$0xff] %v19697_v0  ;;  %8730 = vrot.lane.b32.xlu1 %v18875_v56, %s15278_s20 }
 0xa79   : > { %v9404_v8 = vpop.f32.mrb[236].mxu0 }
 0xa7a   : > { %8744 = vrot.lane.b32.xlu0 %v19150_v54, %s15278_s20  ;;  %v9686_v34 = vrot.slane %v9404_v8, 1  ;;  %v19703_v21 = vpop.f32.mrb[180].mxu1  ;;  %v9406_v17 = vpop.f32.mrb[237].mxu0 }
 0xa7b   : > { %21672 = vst [vmem:[#allocation156_spill] sm:$0xff] %v19703_v21  ;;  %v9942_v41 = vrot.slane %v9406_v17, 2  ;;  %v10421_v49 = vpop.f32.mrb[181].mxu1  ;;  %v9408_v37 = vpop.f32.mrb[238].mxu0  ;;  %v10721_v56 = vrot.slane %v19703_v21, 1  ;;  %v21675_v17 = vld [vmem:[#allocation82_spill] sm:$0xff] }
 0xa7c   : > { %8734 = vrot.lane.b32.xlu1 %v18906_v1, %s15278_s20  ;;  %v19707_v5 = vpop.f32.mrb[182].mxu1  ;;  %v9409_v26 = vpop.f32.mrb[239].mxu0  ;;  %v19710_v36 = vsel %vm8609_vm10, %v9684_v30, %v9686_v34  ;;  %v10977_v25 = vrot.slane %v10421_v49, 2  ;;  %v21678_v37 = vld [vmem:[#allocation117_spill] sm:$0xff] }
 0xa7d   : > { %v10722_v54 = vrot.slane %v19707_v5, 1  ;;  %v10425_v15 = vpop.f32.mrb[183].mxu1  ;;  %v19715_v62 = vsel %vm8866_vm11, %v9940_v58, %v9942_v41 }
 0xa7e   : > { %21673 = vst [vmem:[#allocation157_spill] sm:$0xff] %v19715_v62  ;;  %8748 = vrot.lane.b32.xlu0 %v21674_v53, %s15278_s20  ;;  %v10978_v8 = vrot.slane %v10425_v15, 2 }
 0xa7f   : > { %v19720_v1 = vsel %vm8609_vm10, %v10721_v56, %v10722_v54  ;;  %v21680_v56 = vld [vmem:[#allocation96_spill] sm:$0xff] }
 0xa80   : > { %8738 = vrot.lane.b32.xlu1 %v21675_v17, %s15278_s20  ;;  %v19725_v30 = vsel %vm8866_vm11, %v10977_v25, %v10978_v8 }
 0xa81   : > { %21676 = vst [vmem:[#allocation67_spill] sm:$0xff] %v19725_v30  ;;  %v19727_v34 = vpop.f32.mrb[240].mxu0 }
 0xa82   : > { %21677 = vst [vmem:[#allocation82_spill] sm:$0xff] %v19727_v34  ;;  %8752 = vrot.lane.b32.xlu0 %v21678_v37, %s15278_s20  ;;  %v10429_v58 = vpop.f32.mrb[184].mxu1  ;;  %v9414_v41 = vpop.f32.mrb[241].mxu0  ;;  %v9688_v15 = vrot.slane %v19727_v34, 1 }
 0xa83   : > { %v10724_v26 = vrot.slane %v10429_v58, 1  ;;  %v10431_v53 = vpop.f32.mrb[185].mxu1  ;;  %v19731_v49 = vpop.f32.mrb[242].mxu0  ;;  %v9944_v22 = vrot.slane %v9414_v41, 2  ;;  %v21681_v58 = vld [vmem:[#allocation111_spill] sm:$0xff] }
 0xa84   : > { %21679 = vst [vmem:[#allocation117_spill] sm:$0xff] %v19731_v49  ;;  %8742 = vrot.lane.b32.xlu1 %v21680_v56, %s15278_s20  ;;  %v10980_v17 = vrot.slane %v10431_v53, 2  ;;  %v9689_v25 = vrot.slane %v19731_v49, 1  ;;  %v10433_v62 = vpop.f32.mrb[186].mxu1  ;;  %v9418_v12 = vpop.f32.mrb[243].mxu0 }
 0xa85   : > { %v9945_v32 = vrot.slane %v9418_v12, 2  ;;  %v10434_v0 = vpop.f32.mrb[187].mxu1  ;;  %v19738_v37 = vsel %vm8609_vm10, %v10722_v54, %v10724_v26  ;;  %v21683_v62 = vld [vmem:[#allocation62_spill] sm:$0xff] }
 0xa86   : > { %9735 = vrot.lane.b32.xlu0 %v21681_v58, %s15278_s20  ;;  %v19743_v63 = vsel %vm8609_vm10, %v9688_v15, %v9689_v25  ;;  %v19746_v56 = vsel %vm8866_vm11, %v10978_v8, %v10980_v17  ;;  %v21684_v0 = vld [vmem:[#allocation123_spill] sm:$0xff]  ;;  %v21686_v8 = vld [vmem:[#allocation113_spill] sm:$0xff] }
 0xa87   : > { %v19749_v53 = vsel %vm8866_vm11, %v9944_v22, %v9945_v32 }
 0xa88   : > { %21682 = vst [vmem:[#allocation96_spill] sm:$0xff] %v19749_v53  ;;  %8746 = vrot.lane.b32.xlu1 %v21683_v62, %s15278_s20 }
 0xa89   : > { %v9422_v12 = vpop.f32.mrb[244].mxu0 }
 0xa8a   : > { %9739 = vrot.lane.b32.xlu0 %v21684_v0, %s15278_s20  ;;  %v9691_v54 = vrot.slane %v9422_v12, 1  ;;  %v19755_v41 = vpop.f32.mrb[188].mxu1  ;;  %v9424_v26 = vpop.f32.mrb[245].mxu0 }
 0xa8b   : > { %21685 = vst [vmem:[#allocation111_spill] sm:$0xff] %v19755_v41  ;;  %v9947_v58 = vrot.slane %v9424_v26, 2  ;;  %v10439_v15 = vpop.f32.mrb[189].mxu1  ;;  %v9426_v49 = vpop.f32.mrb[246].mxu0  ;;  %v10726_v62 = vrot.slane %v19755_v41, 1  ;;  %v21689_v26 = vld [vmem:[#allocation135_spill] sm:$0xff] }
 0xa8c   : > { %8750 = vrot.lane.b32.xlu1 %v21686_v8, %s15278_s20  ;;  %v19759_v17 = vpop.f32.mrb[190].mxu1  ;;  %v9427_v22 = vpop.f32.mrb[247].mxu0  ;;  %v19762_v53 = vsel %vm8609_vm10, %v9689_v25, %v9691_v54  ;;  %v10982_v49 = vrot.slane %v10439_v15, 2  ;;  %v14913_v41 = vld [vmem:[%s17699_s30] sm:$0xff]   ;;  %s21723_s30 = scalar_lea.vmem [#allocation12], %s15877_s12 }
 0xa8d   : > { %21687 = vst [vmem:[#allocation62_spill] sm:$0xff] %v19759_v17  ;;  %v10727_v0 = vrot.slane %v19759_v17, 1  ;;  %v10443_v12 = vpop.f32.mrb[191].mxu1  ;;  %v19767_v34 = vsel %vm8866_vm11, %v9945_v32, %v9947_v58  ;;  %v21690_v22 = vld [vmem:[#allocation107_spill] sm:$0xff] }
 0xa8e   : > { %21688 = vst [vmem:[#allocation123_spill] sm:$0xff] %v19767_v34  ;;  %9743 = vrot.lane.b32.xlu0 %v21689_v26, %s15278_s20  ;;  %v10983_v60 = vrot.slane %v10443_v12, 2 }
 0xa8f   : > { %v19772_v8 = vsel %vm8609_vm10, %v10726_v62, %v10727_v0  ;;  %v21695_v62 = vld [vmem:[#allocation119_spill] sm:$0xff] }
 0xa90   : > { %9733 = vrot.lane.b32.xlu1 %v21690_v22, %s15278_s20  ;;  %v19777_v25 = vsel %vm8866_vm11, %v10982_v49, %v10983_v60 }
 0xa91   : > { %21691 = vst [vmem:[#allocation113_spill] sm:$0xff] %v19777_v25  ;;  %v19779_v54 = vpop.f32.mrb[248].mxu0 }
 0xa92   : > { %21692 = vst [vmem:[#allocation135_spill] sm:$0xff] %v19779_v54  ;;  %10778 = vrot.lane.b32.xlu0 %v21693_v57, %s15278_s20  ;;  %v10447_v32 = vpop.f32.mrb[192].mxu1  ;;  %v9432_v58 = vpop.f32.mrb[249].mxu0  ;;  %v9693_v12 = vrot.slane %v19779_v54, 1 }
 0xa93   : > { %v10729_v34 = vrot.slane %v10447_v32, 1  ;;  %v10449_v26 = vpop.f32.mrb[193].mxu1  ;;  %v19783_v15 = vpop.f32.mrb[250].mxu0  ;;  %v9949_v46 = vrot.slane %v9432_v58, 2 }
 0xa94   : > { %21694 = vst [vmem:[#allocation107_spill] sm:$0xff] %v19783_v15  ;;  %9737 = vrot.lane.b32.xlu1 %v21695_v62, %s15278_s20  ;;  %v10985_v22 = vrot.slane %v10449_v26, 2  ;;  %v9694_v49 = vrot.slane %v19783_v15, 1  ;;  %v10451_v7 = vpop.f32.mrb[194].mxu1  ;;  %v9436_v31 = vpop.f32.mrb[251].mxu0 }
 0xa95   : > { %v9950_v61 = vrot.slane %v9436_v31, 2  ;;  %v10452_v50 = vpop.f32.mrb[195].mxu1  ;;  %v10730_v57 = vsel %vm8609_vm10, %v10727_v0, %v10729_v34  ;;  %v21698_v7 = vld [vmem:[#allocation131_spill] sm:$0xff] }
 0xa96   : > { %10782 = vrot.lane.b32.xlu0 %v19429_v48, %s15278_s20  ;;  %v19793_v32 = vsel %vm8609_vm10, %v9693_v12, %v9694_v49  ;;  %v19796_v62 = vsel %vm8866_vm11, %v10983_v60, %v10985_v22  ;;  %v21700_v60 = vld [vmem:[#allocation125_spill] sm:$0xff] }
 0xa97   : > { %21696 = vst [vmem:[#allocation129_spill] sm:$0xff] %v19796_v62  ;;  %v19799_v26 = vsel %vm8866_vm11, %v9949_v46, %v9950_v61 }
 0xa98   : > { %21697 = vst [vmem:[#allocation119_spill] sm:$0xff] %v19799_v26  ;;  %9741 = vrot.lane.b32.xlu1 %v21698_v7, %s15278_s20 }
 0xa99   : > { %v9440_v58 = vpop.f32.mrb[252].mxu0 }
 0xa9a   : > { %10786 = vrot.lane.b32.xlu0 %v19573_v55, %s15278_s20  ;;  %v9696_v50 = vrot.slane %v9440_v58, 1  ;;  %v19805_v31 = vpop.f32.mrb[196].mxu1  ;;  %v9442_v48 = vpop.f32.mrb[253].mxu0 }
 0xa9b   : > { %21699 = vst [vmem:[#allocation131_spill] sm:$0xff] %v19805_v31  ;;  %v9952_v34 = vrot.slane %v9442_v48, 2  ;;  %v10457_v0 = vpop.f32.mrb[197].mxu1  ;;  %v9444_v12 = vpop.f32.mrb[254].mxu0  ;;  %v10731_v7 = vrot.slane %v19805_v31, 1 }
 0xa9c   : > { %10776 = vrot.lane.b32.xlu1 %v21700_v60, %s15278_s20  ;;  %v19809_v22 = vpop.f32.mrb[198].mxu1  ;;  %v9445_v46 = vpop.f32.mrb[255].mxu0  ;;  %v19812_v15 = vsel %vm8609_vm10, %v9694_v49, %v9696_v50  ;;  %v10987_v48 = vrot.slane %v10457_v0, 2 }
 0xa9d   : > { %21701 = vst [vmem:[#allocation125_spill] sm:$0xff] %v19809_v22  ;;  %v10732_v55 = vrot.slane %v19809_v22, 1  ;;  %v10461_v58 = vpop.f32.mrb[199].mxu1  ;;  %v19817_v26 = vsel %vm8866_vm11, %v9950_v61, %v9952_v34  ;;  %v21703_v46 = vld [vmem:[#allocation137_spill] sm:$0xff] }
 0xa9e   : > { %21702 = vst [vmem:[#allocation158_spill] sm:$0xff] %v19817_v26  ;;  %10790 = vrot.lane.b32.xlu0 %v19634_v44, %s15278_s20  ;;  %v10988_v12 = vrot.slane %v10461_v58, 2 }
 0xa9f   : > { %v19822_v60 = vsel %vm8609_vm10, %v10731_v7, %v10732_v55 }
 0xaa0   : > { %10780 = vrot.lane.b32.xlu1 %v21703_v46, %s15278_s20  ;;  %v19827_v49 = vsel %vm8866_vm11, %v10987_v48, %v10988_v12 }
 0xaa1   : > { %21704 = vst [vmem:[#allocation137_spill] sm:$0xff] %v19827_v49  ;;  %v19829_v50 = vpop.f32.mrb[0].mxu0 }
 0xaa2   : > { %21705 = vst [vmem:[#allocation159_spill] sm:$0xff] %v19829_v50  ;;  %10794 = vrot.lane.b32.xlu0 %v19686_v45, %s15278_s20  ;;  %v10465_v61 = vpop.f32.mrb[200].mxu1  ;;  %v9450_v34 = vpop.f32.mrb[1].mxu0  ;;  %v9698_v7 = vrot.slane %v19829_v50, 1 }
 0xaa3   : > { %v10734_v26 = vrot.slane %v10465_v61, 1  ;;  %v10467_v44 = vpop.f32.mrb[201].mxu1  ;;  %v19833_v0 = vpop.f32.mrb[2].mxu0  ;;  %v9954_v47 = vrot.slane %v9450_v34, 2 }
 0xaa4   : > { %21706 = vst [vmem:[#allocation160_spill] sm:$0xff] %v19833_v0  ;;  %10784 = vrot.lane.b32.xlu1 %v19549_v13, %s15278_s20  ;;  %v10990_v58 = vrot.slane %v10467_v44, 2  ;;  %v9699_v48 = vrot.slane %v19833_v0, 1  ;;  %v10469_v46 = vpop.f32.mrb[202].mxu1  ;;  %v9454_v54 = vpop.f32.mrb[3].mxu0 }
 0xaa5   : > { %v9955_v3 = vrot.slane %v9454_v54, 2  ;;  %v10470_v27 = vpop.f32.mrb[203].mxu1  ;;  %v10735_v45 = vsel %vm8609_vm10, %v10732_v55, %v10734_v26 }
 0xaa6   : > { %10798 = vrot.lane.b32.xlu0 %v19738_v37, %s15278_s20  ;;  %v19843_v61 = vsel %vm8609_vm10, %v9698_v7, %v9699_v48  ;;  %v19846_v13 = vsel %vm8866_vm11, %v10988_v12, %v10990_v58 }
 0xaa7   : > { %21707 = vst [vmem:[#allocation161_spill] sm:$0xff] %v19846_v13  ;;  %v19849_v44 = vsel %vm8866_vm11, %v9954_v47, %v9955_v3  ;;  %v14915_v13 = vld [vmem:[%s21723_s30] sm:$0xff]  }
 0xaa8   : > { %21708 = vst [vmem:[#allocation162_spill] sm:$0xff] %v19849_v44  ;;  %10788 = vrot.lane.b32.xlu1 %v19614_v2, %s15278_s20 }
 0xaa9   : > { %v9458_v34 = vpop.f32.mrb[4].mxu0 }
 0xaaa   : > { %10802 = vrot.lane.b32.xlu0 %v10730_v57, %s15278_s20  ;;  %v9701_v27 = vrot.slane %v9458_v34, 1  ;;  %v19854_v54 = vpop.f32.mrb[204].mxu1  ;;  %v9460_v26 = vpop.f32.mrb[5].mxu0 }
 0xaab   : > { %21709 = vst [vmem:[#allocation163_spill] sm:$0xff] %v19854_v54  ;;  %v9957_v37 = vrot.slane %v9460_v26, 2  ;;  %v10475_v55 = vpop.f32.mrb[205].mxu1  ;;  %v9462_v7 = vpop.f32.mrb[6].mxu0  ;;  %v10736_v2 = vrot.slane %v19854_v54, 1 }
 0xaac   : > { %10792 = vrot.lane.b32.xlu1 %v19668_v39, %s15278_s20  ;;  %v19858_v12 = vpop.f32.mrb[206].mxu1  ;;  %v9463_v47 = vpop.f32.mrb[7].mxu0  ;;  %v19861_v58 = vsel %vm8609_vm10, %v9699_v48, %v9701_v27  ;;  %v10992_v26 = vrot.slane %v10475_v55, 2 }
 0xaad   : > { %21710 = vst [vmem:[#allocation164_spill] sm:$0xff] %v19858_v12  ;;  %v10737_v57 = vrot.slane %v19858_v12, 1  ;;  %v10479_v46 = vpop.f32.mrb[207].mxu1  ;;  %v19866_v34 = vsel %vm8866_vm11, %v9955_v3, %v9957_v37 }
 0xaae   : > { %21711 = vst [vmem:[#allocation165_spill] sm:$0xff] %v19866_v34  ;;  %10806 = vrot.lane.b32.xlu0 %v10735_v45, %s15278_s20  ;;  %v10993_v7 = vrot.slane %v10479_v46, 2 }
 0xaaf   : > { %v10738_v39 = vsel %vm8609_vm10, %v10736_v2, %v10737_v57 }
 0xab0   : > { %10796 = vrot.lane.b32.xlu1 %v19720_v1, %s15278_s20  ;;  %v19873_v48 = vsel %vm8866_vm11, %v10992_v26, %v10993_v7 }
 0xab1   : > { %21712 = vst [vmem:[#allocation166_spill] sm:$0xff] %v19873_v48  ;;  %v19875_v27 = vpop.f32.mrb[8].mxu0 }
 0xab2   : > { %21713 = vst [vmem:[#allocation167_spill] sm:$0xff] %v19875_v27  ;;  %v10483_v47 = vpop.f32.mrb[208].mxu1  ;;  %v9468_v0 = vpop.f32.mrb[9].mxu0  ;;  %v9703_v45 = vrot.slane %v19875_v27, 1 }
 0xab3   : > { %v10739_v44 = vrot.slane %v10483_v47, 1  ;;  %v10485_v50 = vpop.f32.mrb[209].mxu1  ;;  %v19877_v3 = vpop.f32.mrb[10].mxu0  ;;  %v9959_v46 = vrot.slane %v9468_v0, 2 }
 0xab4   : > { %21714 = vst [vmem:[#allocation168_spill] sm:$0xff] %v19877_v3  ;;  %10800 = vrot.lane.b32.xlu1 %v19772_v8, %s15278_s20  ;;  %v10995_v37 = vrot.slane %v10485_v50, 2  ;;  %v9704_v55 = vrot.slane %v19877_v3, 1  ;;  %v10487_v1 = vpop.f32.mrb[210].mxu1  ;;  %v9472_v2 = vpop.f32.mrb[11].mxu0 }
 0xab5   : > { %v9960_v26 = vrot.slane %v9472_v2, 2  ;;  %v10488_v34 = vpop.f32.mrb[211].mxu1  ;;  %v10740_v48 = vsel %vm8609_vm10, %v10737_v57, %v10739_v44 }
 0xab6   : > { %10810 = vrot.lane.b32.xlu0 %v10740_v48, %s15278_s20  ;;  %v19886_v47 = vsel %vm8609_vm10, %v9703_v45, %v9704_v55  ;;  %v19889_v54 = vsel %vm8866_vm11, %v10993_v7, %v10995_v37 }
 0xab7   : > { %21715 = vst [vmem:[#allocation169_spill] sm:$0xff] %v19889_v54  ;;  %v19891_v8 = vpop.permute.xlu1 %7557  ;;  %v7532_v50 = vpop.permute.xlu0 %7531  ;;  %v19894_v3 = vsel %vm8866_vm11, %v9959_v46, %v9960_v26  ;;  %v7522_v54 = vunpack.c.l.bf16 %v14913_v41 }
 0xab8   : > { %21716 = vst [vmem:[#allocation170_spill] sm:$0xff] %v19894_v3  ;;  %10804 = vrot.lane.b32.xlu1 %v19822_v60, %s15278_s20 }
 0xab9   : > { %v9476_v0 = vpop.f32.mrb[12].mxu0 }
 0xaba   : > { %v9706_v34 = vrot.slane %v9476_v0, 1  ;;  %v19898_v44 = vpop.f32.mrb[212].mxu1  ;;  %v9478_v57 = vpop.f32.mrb[13].mxu0 }
 0xabb   : > { %21717 = vst [vmem:[#allocation171_spill] sm:$0xff] %v19898_v44  ;;  %v9962_v48 = vrot.slane %v9478_v57, 2  ;;  %v10493_v45 = vpop.f32.mrb[213].mxu1  ;;  %v9480_v1 = vpop.f32.mrb[14].mxu0  ;;  %v10741_v3 = vrot.slane %v19898_v44, 1 }
 0xabc   : > { %10808 = vrot.lane.b32.xlu1 %v10738_v39, %s15278_s20  ;;  %v7527_v7 = vpop.permute.xlu1 %7526  ;;  %v7544_v37 = vpop.permute.xlu0 %7543  ;;  %v19902_v2 = vsel %vm8609_vm10, %v9704_v55, %v9706_v34  ;;  %v14912_v1 = vld [vmem:[%s17552_s7] sm:$0xff]   ;;  %v10997_v31 = vrot.slane %v10493_v45, 2  ;;  %v7523_v55 = vunpack.c.h.bf16 %v14913_v41  ;;  %s21722_s7 = scalar_lea.vmem [#allocation11], %s15877_s12 }
 0xabd   : > { %v19904_v46 = vpop.f32.mrb[214].mxu1  ;;  %v9481_v60 = vpop.f32.mrb[15].mxu0  ;;  %v19907_v0 = vsel %vm8866_vm11, %v9960_v26, %v9962_v48  ;;  %v7537_v49 = vunpack.c.h.bf16 %v14912_v1  ;;  %v7536_v39 = vunpack.c.l.bf16 %v14912_v1  ;;  %v7534_v29 = vmul.f32 %v7527_v7, %v7522_v54  ;;  %s19946_s12 = scalar_select %p7583_p11, 1.0, 0.0 }
 0xabe   : > { %21718 = vst [vmem:[#allocation172_spill] sm:$0xff] %v19904_v46  ;;  %21719 = vst [vmem:[#allocation173_spill] sm:$0xff] %v19907_v0  ;;  %v10742_v57 = vrot.slane %v19904_v46, 1  ;;  %v10497_v27 = vpop.f32.mrb[215].mxu1  ;;  %v7535_v21 = vmul.f32 %v7532_v50, %v7523_v55 }
 0xabf   : > { %v10998_v25 = vrot.slane %v10497_v27, 2  ;;  %v7547_v46 = vmul.f32 %v7544_v37, %v7537_v49  ;;  %v14914_v27 = vld [vmem:[%s21722_s7] sm:$0xff]  }
 0xac0   : > { %v10743_v34 = vsel %vm8609_vm10, %v10741_v3, %v10742_v57  ;;  %v7550_v45 = vunpack.c.l.bf16 %v14914_v27  ;;  %v7551_v30 = vunpack.c.h.bf16 %v14914_v27  ;;  %v21725_v27 = vld [vmem:[#allocation87_spill] sm:$0xff] }
 0xac1   : > { %v7540_v60 = vpop.permute.xlu1 %7539  ;;  %v7568_v26 = vpop.permute.xlu0 %7567  ;;  %10812 = vrot.lane.b32.xlu1 %v10743_v34, %s15278_s20  ;;  %v19916_v48 = vsel %vm8866_vm11, %v10997_v31, %v10998_v25  ;;  %v7564_v34 = vunpack.c.l.bf16 %v14915_v13  ;;  %v7549_v7 = vadd.f32 %v7547_v46, %v7535_v21  ;;  %v21729_v46 = vld [vmem:[#allocation45_spill] sm:$0xff] }
 0xac2   : > { %21720 = vst [vmem:[#allocation174_spill] sm:$0xff] %v19916_v48  ;;  %v19918_v0 = vpop.f32.mrb[16].mxu0  ;;  %v10501_v44 = vpop.f32.mrb[216].mxu1  ;;  %v7546_v1 = vmul.f32 %v7540_v60, %v7536_v39 }
 0xac3   : > { %21721 = vst [vmem:[#allocation175_spill] sm:$0xff] %v19918_v0  ;;  %v10744_v12 = vrot.slane %v10501_v44, 1  ;;  %v9486_v3 = vpop.f32.mrb[17].mxu0  ;;  %v10503_v41 = vpop.f32.mrb[217].mxu1  ;;  %v9708_v37 = vrot.slane %v19918_v0, 1  ;;  %v8530_v0 = vld [vmem:[%s19436_s14 + $0x8] sm:$0xff]  ;;  %v7574_v21 = vmul.f32 %v7568_v26, %v7564_v34 }
 0xac4   : > { %v11000_v22 = vrot.slane %v10503_v41, 2  ;;  %v19924_v31 = vpop.f32.mrb[18].mxu0  ;;  %v10505_v48 = vpop.f32.mrb[218].mxu1  ;;  %v9964_v33 = vrot.slane %v9486_v3, 2 }
 0xac5   : > { %21724 = vst [vmem:[#allocation176_spill] sm:$0xff] %v19924_v31  ;;  %v8693_v49 = vpop.permute.xlu0 %8692  ;;  %v9709_v39 = vrot.slane %v19924_v31, 1  ;;  %v9490_v44 = vpop.f32.mrb[19].mxu0  ;;  %v10745_v60 = vsel %vm8609_vm10, %v10742_v57, %v10744_v12  ;;  %v7548_v48 = vadd.f32 %v7546_v1, %v7534_v29  ;;  %v21727_v12 = vld [vmem:[#allocation83_spill] sm:$0xff] }
 0xac6   : > { %v8787_v50 = vadd.f32 %v8693_v49, %v21725_v27  ;;  %v7554_v55 = vpop.permute.xlu1 %7553  ;;  %v9965_v41 = vrot.slane %v9490_v44, 2  ;;  %v10506_v62 = vpop.f32.mrb[219].mxu1  ;;  %10814 = vrot.lane.b32.xlu0 %v10745_v60, %s15278_s20  ;;  %v19933_v54 = vsel %vm8866_vm11, %v10998_v25, %v11000_v22  ;;  %v7565_v49 = vunpack.c.h.bf16 %v14915_v13 }
 0xac7   : > { %21726 = vst [vmem:[#allocation87_spill] sm:$0xff] %v19933_v54  ;;  %v7560_v31 = vmul.f32 %v7554_v55, %v7550_v45  ;;  %v19937_v17 = vsel %vm8609_vm10, %v9708_v37, %v9709_v39  ;;  %v7561_v62 = vmul.f32 %v19891_v8, %v7551_v30 }
 0xac8   : > { %v8980_v57 = vadd.f32 %v21727_v12, %v8787_v50  ;;  %v19941_v3 = vsel %vm8866_vm11, %v9964_v33, %v9965_v41  ;;  %v8532_v33 = vld [vmem:[%s19436_s14 + $0x18] sm:$0xff]  ;;  %v21731_v50 = vld [vmem:[#allocation49_spill] sm:$0xff]  ;;  %v7585_v12 = vstv %s19946_s12 }
 0xac9   : > { %21728 = vst [vmem:[#allocation83_spill] sm:$0xff] %v19941_v3  ;;  %v7562_v44 = vadd.f32 %v7560_v31, %v7548_v48  ;;  %v8697_v25 = vpop.permute.xlu0 %8696  ;;  %v9494_v29 = vpop.f32.mrb[20].mxu0  ;;  %v7563_v27 = vadd.f32 %v7561_v62, %v7549_v7 }
 0xaca   : > { %v9012_v22 = vadd.f32 %v8980_v57, %v8530_v0  ;;  %v8789_v1 = vadd.f32 %v8697_v25, %v21729_v46  ;;  %v9711_v45 = vrot.slane %v9494_v29, 1  ;;  %v19949_v37 = vpop.f32.mrb[220].mxu1  ;;  %v9496_v13 = vpop.f32.mrb[21].mxu0 }
 0xacb   : > { %21730 = vst [vmem:[#allocation45_spill] sm:$0xff] %v19949_v37  ;;  %v7572_v60 = vpop.permute.xlu1 %7571  ;;  %v9967_v30 = vrot.slane %v9496_v13, 2  ;;  %v10511_v8 = vpop.f32.mrb[221].mxu1  ;;  %v7576_v31 = vadd.f32 %v7574_v21, %v7562_v44  ;;  %v10746_v7 = vrot.slane %v19949_v37, 1  ;;  %v21734_v21 = vld [vmem:[#allocation64_spill] sm:$0xff] }
 0xacc   : > { %9044 = vst.msk [vmem:[%s19436_s14 + $0x8] sm:$0xff] %vm1523_vm0, %v9012_v22  ;;  %v8982_v55 = vadd.f32 %v21731_v50, %v8789_v1  ;;  %v7575_v26 = vmul.f32 %v7572_v60, %v7565_v49  ;;  %v9498_v0 = vpop.f32.mrb[22].mxu0  ;;  %v19955_v34 = vpop.f32.mrb[222].mxu1  ;;  %v19958_v48 = vsel %vm8609_vm10, %v9709_v39, %v9711_v45  ;;  %v8534_v1 = vld [vmem:[%s19436_s14 + $0x28] sm:$0xff]  ;;  %v11002_v45 = vrot.slane %v10511_v8, 2 }
 0xacd   : > { %21732 = vst [vmem:[#allocation49_spill] sm:$0xff] %v19955_v34  ;;  %v8701_v57 = vpop.permute.xlu0 %8700  ;;  %v10747_v62 = vrot.slane %v19955_v34, 1  ;;  %v9499_v25 = vpop.f32.mrb[23].mxu0  ;;  %v19964_v44 = vsel %vm8866_vm11, %v9965_v41, %v9967_v30  ;;  %v7586_v50 = vmul.f32 %v7585_v12, %v7576_v31  ;;  %v21736_v30 = vld [vmem:[#allocation77_spill] sm:$0xff]  ;;  %v21740_v31 = vld [vmem:[#allocation52_spill] sm:$0xff] }
 0xace   : > { %21733 = vst [vmem:[#allocation177_spill] sm:$0xff] %v19964_v44  ;;  %v9014_v29 = vadd.f32 %v8982_v55, %v8532_v33  ;;  %v7577_v49 = vadd.f32 %v7575_v26, %v7563_v27  ;;  %v8791_v22 = vadd.f32 %v8701_v57, %v21734_v21  ;;  %v10515_v46 = vpop.f32.mrb[223].mxu1  ;;  %v21735_v25 = vld [vmem:[#allocation80_spill] sm:$0xff]  ;;  %v8529_v33 = vld [vmem:[%s19436_s14] sm:$0xff] }
 0xacf   : > { %v8691_v39 = vpop.permute.xlu1 %8690  ;;  %v11003_v13 = vrot.slane %v10515_v46, 2  ;;  %v10748_v60 = vsel %vm8609_vm10, %v10746_v7, %v10747_v62  ;;  %v21739_v7 = vld [vmem:[#allocation76_spill] sm:$0xff] }
 0xad0   : > { %9046 = vst.msk [vmem:[%s19436_s14 + $0x18] sm:$0xff] %vm1523_vm0, %v9014_v29  ;;  %v7587_v0 = vmul.f32 %v7585_v12, %v7577_v49  ;;  %v8984_v41 = vadd.f32 %v21735_v25, %v8791_v22  ;;  %v8786_v44 = vadd.f32 %v8691_v39, %v21736_v30  ;;  %10816 = vrot.lane.b32.xlu1 %v10748_v60, %s15278_s20  ;;  %v8536_v22 = vld [vmem:[%s19436_s14 + $0x38] sm:$0xff] }
 0xad1   : > { %v8705_v27 = vpop.permute.xlu0 %8704  ;;  %v19975_v55 = vpop.f32.mrb[24].mxu0  ;;  %v19978_v8 = vsel %vm8866_vm11, %v11002_v45, %v11003_v13 }
 0xad2   : > { %21737 = vst [vmem:[#allocation64_spill] sm:$0xff] %v19975_v55  ;;  %21738 = vst [vmem:[#allocation80_spill] sm:$0xff] %v19978_v8  ;;  %v7976_v26 = vpack.c.bf16 %v7587_v0, %v7586_v50  ;;  %v9016_v57 = vadd.f32 %v8984_v41, %v8534_v1  ;;  %v8979_v29 = vadd.f32 %v21739_v7, %v8786_v44  ;;  %v10519_v49 = vpop.f32.mrb[224].mxu1  ;;  %v9504_v21 = vpop.f32.mrb[25].mxu0  ;;  %v9713_v39 = vrot.slane %v19975_v55, 1  ;;  %v21741_v1 = vld [vmem:[#allocation66_spill] sm:$0xff] }
 0xad3   : > { %v8793_v12 = vadd.f32 %v8705_v27, %v21740_v31  ;;  %v8695_v46 = vpop.permute.xlu1 %8694  ;;  %v10749_v60 = vrot.slane %v10519_v49, 1  ;;  %v10521_v25 = vpop.f32.mrb[225].mxu1  ;;  %v7990_v41 = vld [vmem:[#allocation2 + $0x118] sm:$0x1]  ;;  %v9969_v54 = vrot.slane %v9504_v21, 2 }
 0xad4   : > { %v7978_v30 = vshrl.u32 %v7976_v26, 16  ;;  %v7981_v3 = vshll.u32 %v7976_v26, 16  ;;  %9048 = vst.msk [vmem:[%s19436_s14 + $0x28] sm:$0xff] %vm1523_vm0, %v9016_v57  ;;  %v9011_v45 = vadd.f32 %v8979_v29, %v8529_v33  ;;  %v19987_v44 = vpop.f32.mrb[26].mxu0  ;;  %v10523_v0 = vpop.f32.mrb[226].mxu1  ;;  %v21743_v27 = vld [vmem:[#allocation48_spill] sm:$0xff] }
 0xad5   : > { %v8986_v50 = vadd.f32 %v21741_v1, %v8793_v12  ;;  %21742 = vst [vmem:[#allocation77_spill] sm:$0xff] %v19987_v44  ;;  %v8788_v7 = vadd.f32 %v8695_v46, %v21743_v27  ;;  %v8709_v31 = vpop.permute.xlu0 %8708  ;;  %v11005_v55 = vrot.slane %v10521_v25, 2  ;;  %v9714_v49 = vrot.slane %v19987_v44, 1  ;;  %v9508_v34 = vpop.f32.mrb[27].mxu0  ;;  %v8531_v57 = vld [vmem:[%s19436_s14 + $0x10] sm:$0xff]  ;;  %v21744_v29 = vld [vmem:[#allocation56_spill] sm:$0xff] }
 0xad6   : > { %v10750_v26 = vsel %vm8609_vm10, %v10747_v62, %v10749_v60  ;;  %v7980_v8 = vrot.slane %v7978_v30, 7  ;;  %9043 = vst.msk [vmem:[%s19436_s14] sm:$0xff] %vm1523_vm0, %v9011_v45  ;;  %v8795_v12 = vadd.f32 %v8709_v31, %v21744_v29  ;;  %v9970_v1 = vrot.slane %v9508_v34, 2  ;;  %v10524_v0 = vpop.f32.mrb[227].mxu1  ;;  %v7987_v46 = vld [vmem:[#allocation2 + $0x110] sm:$0xff]  ;;  %v21745_v25 = vld [vmem:[#allocation46_spill] sm:$0xff] }
 0xad7   : > { %v9018_v33 = vadd.f32 %v8986_v50, %v8536_v22  ;;  %10818 = vrot.lane.b32.xlu0 %v10750_v26, %s15278_s20  ;;  %v8981_v27 = vadd.f32 %v21745_v25, %v8788_v7  ;;  %v8538_v44 = vld [vmem:[%s19436_s14 + $0x48] sm:$0xff]  ;;  %v8699_v37 = vpop.permute.xlu1 %8698  ;;  %v20000_v62 = vsel %vm8609_vm10, %v9713_v39, %v9714_v49  ;;  %v20003_v60 = vsel %vm8866_vm11, %v11003_v13, %v11005_v55  ;;  %v21746_v30 = vld [vmem:[#allocation59_spill] sm:$0xff]  ;;  %v8533_v31 = vld [vmem:[%s19436_s14 + $0x20] sm:$0xff] }
 0xad8   : > { %v7983_v22 = vor.u32 %v7981_v3, %v7980_v8  ;;  %v7991_v34 = vsel %vm17988_vm6, %v7980_v8, %v7990_v41  ;;  %v8988_v45 = vadd.f32 %v21746_v30, %v8795_v12  ;;  %v21747_v50 = vld [vmem:[#allocation70_spill] sm:$0xff]  ;;  %v20013_v13 = vsel %vm8866_vm11, %v9969_v54, %v9970_v1  ;;  %v21749_v55 = vld [vmem:[#allocation47_spill] sm:$0xff] }
 0xad9   : > { %9050 = vst.msk [vmem:[%s19436_s14 + $0x38] sm:$0xff] %vm1523_vm0, %v9018_v33  ;;  %v8790_v7 = vadd.f32 %v8699_v37, %v21747_v50  ;;  %7992 = vst [vmem:[#allocation2 + $0x118] sm:$0x1] %v7991_v34  ;;  %v9013_v21 = vadd.f32 %v8981_v27, %v8531_v57  ;;  %v8713_v39 = vpop.permute.xlu0 %8712  ;;  %v9512_v26 = vpop.f32.mrb[28].mxu0  ;;  %v21750_v41 = vld [vmem:[#allocation58_spill] sm:$0xff]  ;;  %v8540_v57 = vld [vmem:[%s19436_s14 + $0x58] sm:$0xff] }
 0xada   : > { %21748 = vst [vmem:[#allocation76_spill] sm:$0xff] %v20013_v13  ;;  %v7988_v51 = vsel %vm18250_vm9, %v7983_v22, %v7987_v46  ;;  %v9020_v3 = vadd.f32 %v8988_v45, %v8538_v44  ;;  %v8797_v33 = vadd.f32 %v8713_v39, %v21750_v41  ;;  %v20019_v29 = vpop.f32.mrb[228].mxu1  ;;  %v9514_v37 = vpop.f32.mrb[29].mxu0  ;;  %v9716_v0 = vrot.slane %v9512_v26, 1  ;;  %v21751_v44 = vld [vmem:[#allocation92_spill] sm:$0xff]  ;;  %v21752_v27 = vld [vmem:[#allocation50_spill] sm:$0xff] }
 0xadb   : > { %v8983_v8 = vadd.f32 %v21749_v55, %v8790_v7  ;;  %7989 = vst [vmem:[#allocation2 + $0x110] sm:$0xff] %v7988_v51  ;;  %9045 = vst.msk [vmem:[%s19436_s14 + $0x10] sm:$0xff] %vm1523_vm0, %v9013_v21  ;;  %v8703_v12 = vpop.permute.xlu1 %8702  ;;  %v9972_v54 = vrot.slane %v9514_v37, 2  ;;  %v10529_v25 = vpop.f32.mrb[229].mxu1  ;;  %12530 = vmatmul.mubr.msk.bf16.gmra.mrb[36].mxu1 %vm1523_vm0, %v7988_v51  ;;  %v8535_v45 = vld [vmem:[%s19436_s14 + $0x30] sm:$0xff]  ;;  %v10751_v7 = vrot.slane %v20019_v29, 1 }
 0xadc   : > { %9052 = vst.msk [vmem:[%s19436_s14 + $0x48] sm:$0xff] %vm1523_vm0, %v9020_v3  ;;  %v8990_v46 = vadd.f32 %v21751_v44, %v8797_v33  ;;  %v8792_v22 = vadd.f32 %v8703_v12, %v21752_v27  ;;  %v9516_v34 = vpop.f32.mrb[30].mxu0  ;;  %v20029_v30 = vpop.f32.mrb[230].mxu1  ;;  %10607 = vmatprep.mubr.bf16.mxu1 %v21433_v38  ;;  %v21754_v3 = vld [vmem:[#allocation75_spill] sm:$0xff]  ;;  %v8542_v33 = vld [vmem:[%s19436_s14 + $0x68] sm:$0xff]  ;;  %v11007_v12 = vrot.slane %v10529_v25, 2 }
 0xadd   : > { %v9015_v23 = vadd.f32 %v8983_v8, %v8533_v31  ;;  %v8717_v50 = vpop.permute.xlu0 %8716  ;;  %v10752_v21 = vrot.slane %v20029_v30, 1  ;;  %v9517_v39 = vpop.f32.mrb[31].mxu0  ;;  %v20036_v31 = vsel %vm8609_vm10, %v9714_v49, %v9716_v0  ;;  %v20039_v26 = vsel %vm8866_vm11, %v9970_v1, %v9972_v54  ;;  %v21755_v55 = vld [vmem:[#allocation99_spill] sm:$0xff]  ;;  %v21756_v0 = vld [vmem:[#allocation60_spill] sm:$0xff] }
 0xade   : > { %21753 = vst [vmem:[#allocation52_spill] sm:$0xff] %v20039_v26  ;;  %v9022_v51 = vadd.f32 %v8990_v46, %v8540_v57  ;;  %v8985_v38 = vadd.f32 %v21754_v3, %v8792_v22  ;;  %v8799_v8 = vadd.f32 %v8717_v50, %v21755_v55  ;;  %v10533_v41 = vpop.f32.mrb[231].mxu1  ;;  %v8537_v46 = vld [vmem:[%s19436_s14 + $0x40] sm:$0xff]  ;;  %v21759_v50 = vld [vmem:[#allocation74_spill] sm:$0xff]  ;;  %v8544_v55 = vld [vmem:[%s19436_s14 + $0x78] sm:$0xff] }
 0xadf   : > { %9047 = vst.msk [vmem:[%s19436_s14 + $0x20] sm:$0xff] %vm1523_vm0, %v9015_v23  ;;  %v8707_v37 = vpop.permute.xlu1 %8706  ;;  %v11008_v44 = vrot.slane %v10533_v41, 2  ;;  %v10753_v49 = vsel %vm8609_vm10, %v10751_v7, %v10752_v21  ;;  %v21757_v23 = vld [vmem:[#allocation42_spill] sm:$0xff] }
 0xae0   : > { %9054 = vst.msk [vmem:[%s19436_s14 + $0x58] sm:$0xff] %vm1523_vm0, %v9022_v51  ;;  %v9017_v1 = vadd.f32 %v8985_v38, %v8535_v45  ;;  %v8992_v54 = vadd.f32 %v21756_v0, %v8799_v8  ;;  %v8794_v57 = vadd.f32 %v8707_v37, %v21757_v23  ;;  %10820 = vrot.lane.b32.xlu1 %v10753_v49, %s15278_s20  ;;  %v21760_v45 = vld [vmem:[#allocation98_spill] sm:$0xff]  ;;  %v10149_v38 = vld [vmem:[#allocation2 + $0x118] sm:$0xff] }
 0xae1   : > { %v8721_v27 = vpop.permute.xlu0 %8720  ;;  %v20053_v22 = vpop.f32.mrb[32].mxu0  ;;  %v20056_v25 = vsel %vm8866_vm11, %v11007_v12, %v11008_v44  ;;  %v21761_v49 = vld [vmem:[#allocation72_spill] sm:$0xff] }
 0xae2   : > { %21758 = vst [vmem:[#allocation66_spill] sm:$0xff] %v20053_v22  ;;  %9049 = vst.msk [vmem:[%s19436_s14 + $0x30] sm:$0xff] %vm1523_vm0, %v9017_v1  ;;  %v9024_v34 = vadd.f32 %v8992_v54, %v8542_v33  ;;  %v8987_v7 = vadd.f32 %v21759_v50, %v8794_v57  ;;  %v8801_v39 = vadd.f32 %v8721_v27, %v21760_v45  ;;  %v10537_v51 = vpop.f32.mrb[232].mxu1  ;;  %v9522_v3 = vpop.f32.mrb[33].mxu0  ;;  %v21762_v1 = vld [vmem:[#allocation89_spill] sm:$0xff]  ;;  %v8539_v27 = vld [vmem:[%s19436_s14 + $0x50] sm:$0xff] }
 0xae3   : > { %v8711_v8 = vpop.permute.xlu1 %8710  ;;  %v10754_v41 = vrot.slane %v10537_v51, 1  ;;  %v10539_v37 = vpop.f32.mrb[233].mxu1  ;;  %12531 = vmatmul.mubr.msk.bf16.gmra.mrb[40].mxu1 %vm1523_vm0, %v10149_v38  ;;  %v9718_v45 = vrot.slane %v20053_v22, 1  ;;  %v9974_v51 = vrot.slane %v9522_v3, 2 }
 0xae4   : > { %9056 = vst.msk [vmem:[%s19436_s14 + $0x68] sm:$0xff] %vm1523_vm0, %v9024_v34  ;;  %v9019_v12 = vadd.f32 %v8987_v7, %v8537_v46  ;;  %v8994_v33 = vadd.f32 %v21761_v49, %v8801_v39  ;;  %v8796_v0 = vadd.f32 %v8711_v8, %v21762_v1  ;;  %v11010_v54 = vrot.slane %v10539_v37, 2  ;;  %v20068_v23 = vpop.f32.mrb[34].mxu0  ;;  %v10541_v57 = vpop.f32.mrb[234].mxu1  ;;  %v21764_v7 = vld [vmem:[#allocation91_spill] sm:$0xff]  ;;  %v21765_v8 = vld [vmem:[#allocation101_spill] sm:$0xff] }
 0xae5   : > { %21763 = vst [vmem:[#allocation48_spill] sm:$0xff] %v20068_v23  ;;  %v8725_v50 = vpop.permute.xlu0 %8724  ;;  %v9719_v38 = vrot.slane %v20068_v23, 1  ;;  %v9526_v26 = vpop.f32.mrb[35].mxu0  ;;  %v10755_v46 = vsel %vm8609_vm10, %v10752_v21, %v10754_v41  ;;  %v8546_v57 = vld [vmem:[%s19436_s14 + $0x88] sm:$0xff]  ;;  %v21766_v41 = vld [vmem:[#allocation103_spill] sm:$0xff] }
 0xae6   : > { %9051 = vst.msk [vmem:[%s19436_s14 + $0x40] sm:$0xff] %vm1523_vm0, %v9019_v12  ;;  %v9026_v34 = vadd.f32 %v8994_v33, %v8544_v55  ;;  %v8989_v39 = vadd.f32 %v21764_v7, %v8796_v0  ;;  %v8803_v37 = vadd.f32 %v8725_v50, %v21765_v8  ;;  %v9975_v49 = vrot.slane %v9526_v26, 2  ;;  %v10542_v1 = vpop.f32.mrb[235].mxu1  ;;  %10822 = vrot.lane.b32.xlu0 %v10755_v46, %s15278_s20  ;;  %v21767_v33 = vld [vmem:[#allocation95_spill] sm:$0xff]  ;;  %v8541_v50 = vld [vmem:[%s19436_s14 + $0x60] sm:$0xff] }
 0xae7   : > { %v8715_v3 = vpop.permute.xlu1 %8714  ;;  %v20081_v23 = vsel %vm8609_vm10, %v9718_v45, %v9719_v38  ;;  %v20084_v21 = vsel %vm8866_vm11, %v11008_v44, %v11010_v54  ;;  %v21769_v44 = vld [vmem:[#allocation61_spill] sm:$0xff]  ;;  %v8548_v1 = vld [vmem:[%s19436_s14 + $0x98] sm:$0xff] }
 0xae8   : > { %9058 = vst.msk [vmem:[%s19436_s14 + $0x78] sm:$0xff] %vm1523_vm0, %v9026_v34  ;;  %v9021_v55 = vadd.f32 %v8989_v39, %v8539_v27  ;;  %v8996_v12 = vadd.f32 %v21766_v41, %v8803_v37  ;;  %v8798_v0 = vadd.f32 %v8715_v3, %v21767_v33  ;;  %v20091_v26 = vsel %vm8866_vm11, %v9974_v51, %v9975_v49  ;;  %v21770_v8 = vld [vmem:[#allocation85_spill] sm:$0xff] }
 0xae9   : > { %21768 = vst [vmem:[#allocation56_spill] sm:$0xff] %v20091_v26  ;;  %v8729_v46 = vpop.permute.xlu0 %8728  ;;  %v9530_v7 = vpop.f32.mrb[36].mxu0  ;;  %v21772_v26 = vld [vmem:[#allocation105_spill] sm:$0xff] }
 0xaea   : > { %9053 = vst.msk [vmem:[%s19436_s14 + $0x50] sm:$0xff] %vm1523_vm0, %v9021_v55  ;;  %v9028_v45 = vadd.f32 %v8996_v12, %v8546_v57  ;;  %v8991_v54 = vadd.f32 %v21769_v44, %v8798_v0  ;;  %v8805_v34 = vadd.f32 %v8729_v46, %v21770_v8  ;;  %v9721_v27 = vrot.slane %v9530_v7, 1  ;;  %v20098_v39 = vpop.f32.mrb[236].mxu1  ;;  %v9532_v37 = vpop.f32.mrb[37].mxu0  ;;  %v21773_v57 = vld [vmem:[#allocation97_spill] sm:$0xff]  ;;  %v8543_v46 = vld [vmem:[%s19436_s14 + $0x70] sm:$0xff] }
 0xaeb   : > { %21771 = vst [vmem:[#allocation46_spill] sm:$0xff] %v20098_v39  ;;  %v8719_v3 = vpop.permute.xlu1 %8718  ;;  %v9977_v51 = vrot.slane %v9532_v37, 2  ;;  %v10547_v41 = vpop.f32.mrb[237].mxu1  ;;  %v10756_v8 = vrot.slane %v20098_v39, 1 }
 0xaec   : > { %9060 = vst.msk [vmem:[%s19436_s14 + $0x88] sm:$0xff] %vm1523_vm0, %v9028_v45  ;;  %v9023_v33 = vadd.f32 %v8991_v54, %v8541_v50  ;;  %v8998_v55 = vadd.f32 %v21772_v26, %v8805_v34  ;;  %v8800_v12 = vadd.f32 %v8719_v3, %v21773_v57  ;;  %v9534_v0 = vpop.f32.mrb[38].mxu0  ;;  %v20105_v44 = vpop.f32.mrb[238].mxu1  ;;  %v20111_v13 = vsel %vm8609_vm10, %v9719_v38, %v9721_v27  ;;  %v21776_v45 = vld [vmem:[#allocation44_spill] sm:$0xff]  ;;  %v21778_v27 = vld [vmem:[#allocation86_spill] sm:$0xff] }
 0xaed   : > { %21774 = vst [vmem:[#allocation59_spill] sm:$0xff] %v20105_v44  ;;  %v8733_v7 = vpop.permute.xlu0 %8732  ;;  %v10757_v22 = vrot.slane %v20105_v44, 1  ;;  %v9535_v37 = vpop.f32.mrb[39].mxu0  ;;  %v20114_v50 = vsel %vm8866_vm11, %v9975_v49, %v9977_v51  ;;  %v21777_v34 = vld [vmem:[#allocation68_spill] sm:$0xff]  ;;  %v8550_v0 = vld [vmem:[%s19436_s14 + $0xa8] sm:$0xff]  ;;  %v11012_v44 = vrot.slane %v10547_v41, 2 }
 0xaee   : > { %21775 = vst [vmem:[#allocation70_spill] sm:$0xff] %v20114_v50  ;;  %9055 = vst.msk [vmem:[%s19436_s14 + $0x60] sm:$0xff] %vm1523_vm0, %v9023_v33  ;;  %v9030_v26 = vadd.f32 %v8998_v55, %v8548_v1  ;;  %v8993_v54 = vadd.f32 %v21776_v45, %v8800_v12  ;;  %v8807_v3 = vadd.f32 %v8733_v7, %v21777_v34  ;;  %v10551_v57 = vpop.f32.mrb[239].mxu1  ;;  %v21779_v33 = vld [vmem:[#allocation79_spill] sm:$0xff]  ;;  %v8545_v55 = vld [vmem:[%s19436_s14 + $0x80] sm:$0xff] }
 0xaef   : > { %v8723_v39 = vpop.permute.xlu1 %8722  ;;  %v11013_v37 = vrot.slane %v10551_v57, 2  ;;  %v10758_v38 = vsel %vm8609_vm10, %v10756_v8, %v10757_v22  ;;  %v21782_v45 = vld [vmem:[#allocation71_spill] sm:$0xff] }
 0xaf0   : > { %9062 = vst.msk [vmem:[%s19436_s14 + $0x98] sm:$0xff] %vm1523_vm0, %v9030_v26  ;;  %v9025_v49 = vadd.f32 %v8993_v54, %v8543_v46  ;;  %v9000_v51 = vadd.f32 %v21778_v27, %v8807_v3  ;;  %v8802_v1 = vadd.f32 %v8723_v39, %v21779_v33  ;;  %10824 = vrot.lane.b32.xlu1 %v10758_v38, %s15278_s20  ;;  %v21783_v46 = vld [vmem:[#allocation69_spill] sm:$0xff]  ;;  %v8552_v3 = vld [vmem:[%s19436_s14 + $0xb8] sm:$0xff] }
 0xaf1   : > { %v8737_v12 = vpop.permute.xlu0 %8736  ;;  %v20128_v7 = vpop.f32.mrb[40].mxu0  ;;  %v20131_v41 = vsel %vm8866_vm11, %v11012_v44, %v11013_v37  ;;  %v21784_v44 = vld [vmem:[#allocation102_spill] sm:$0xff] }
 0xaf2   : > { %21780 = vst [vmem:[#allocation47_spill] sm:$0xff] %v20128_v7  ;;  %21781 = vst [vmem:[#allocation58_spill] sm:$0xff] %v20131_v41  ;;  %v9032_v8 = vadd.f32 %v9000_v51, %v8550_v0  ;;  %v8995_v26 = vadd.f32 %v21782_v45, %v8802_v1  ;;  %v8809_v54 = vadd.f32 %v8737_v12, %v21783_v46  ;;  %v10555_v34 = vpop.f32.mrb[240].mxu1  ;;  %v9540_v39 = vpop.f32.mrb[41].mxu0  ;;  %v21785_v41 = vld [vmem:[#allocation84_spill] sm:$0xff]  ;;  %v8547_v12 = vld [vmem:[%s19436_s14 + $0x90] sm:$0xff] }
 0xaf3   : > { %9057 = vst.msk [vmem:[%s19436_s14 + $0x70] sm:$0xff] %vm1523_vm0, %v9025_v49  ;;  %v8727_v57 = vpop.permute.xlu1 %8726  ;;  %v10759_v38 = vrot.slane %v10555_v34, 1  ;;  %v10557_v27 = vpop.f32.mrb[241].mxu1  ;;  %v9723_v46 = vrot.slane %v20128_v7, 1  ;;  %v9979_v34 = vrot.slane %v9540_v39, 2  ;;  %v8554_v7 = vld [vmem:[%s19436_s14 + $0xc8] sm:$0xff] }
 0xaf4   : > { %9064 = vst.msk [vmem:[%s19436_s14 + $0xa8] sm:$0xff] %vm1523_vm0, %v9032_v8  ;;  %v9027_v33 = vadd.f32 %v8995_v26, %v8545_v55  ;;  %v9002_v50 = vadd.f32 %v21784_v44, %v8809_v54  ;;  %v8804_v49 = vadd.f32 %v8727_v57, %v21785_v41  ;;  %v11015_v0 = vrot.slane %v10557_v27, 2  ;;  %v20142_v51 = vpop.f32.mrb[42].mxu0  ;;  %v10559_v1 = vpop.f32.mrb[242].mxu1  ;;  %9745 = vrot.lane.b32.xlu1 %v19513_v43, %s15278_s20  ;;  %v21787_v54 = vld [vmem:[#allocation100_spill] sm:$0xff]  ;;  %v21788_v27 = vld [vmem:[#allocation73_spill] sm:$0xff] }
 0xaf5   : > { %21786 = vst [vmem:[#allocation92_spill] sm:$0xff] %v20142_v51  ;;  %v8741_v45 = vpop.permute.xlu0 %8740  ;;  %v9724_v55 = vrot.slane %v20142_v51, 1  ;;  %v9544_v8 = vpop.f32.mrb[43].mxu0  ;;  %v10760_v26 = vsel %vm8609_vm10, %v10757_v22, %v10759_v38 }
 0xaf6   : > { %9059 = vst.msk [vmem:[%s19436_s14 + $0x80] sm:$0xff] %vm1523_vm0, %v9027_v33  ;;  %v9034_v41 = vadd.f32 %v9002_v50, %v8552_v3  ;;  %v8997_v57 = vadd.f32 %v21787_v54, %v8804_v49  ;;  %v8811_v44 = vadd.f32 %v8741_v45, %v21788_v27  ;;  %v9980_v43 = vrot.slane %v9544_v8, 2  ;;  %v10560_v1 = vpop.f32.mrb[243].mxu1  ;;  %10826 = vrot.lane.b32.xlu0 %v10760_v26, %s15278_s20  ;;  %v21789_v3 = vld [vmem:[#allocation41_spill] sm:$0xff]  ;;  %v21790_v33 = vld [vmem:[#allocation104_spill] sm:$0xff] }
 0xaf7   : > { %v8731_v39 = vpop.permute.xlu1 %8730  ;;  %v20157_v51 = vsel %vm8609_vm10, %v9723_v46, %v9724_v55  ;;  %v20160_v22 = vsel %vm8866_vm11, %v11013_v37, %v11015_v0  ;;  %v8549_v46 = vld [vmem:[%s19436_s14 + $0xa0] sm:$0xff]  ;;  %v21791_v0 = vld [vmem:[#allocation94_spill] sm:$0xff] }
 0xaf8   : > { %9066 = vst.msk [vmem:[%s19436_s14 + $0xb8] sm:$0xff] %vm1523_vm0, %v9034_v41  ;;  %v9029_v50 = vadd.f32 %v8997_v57, %v8547_v12  ;;  %v9004_v38 = vadd.f32 %v21789_v3, %v8811_v44  ;;  %v8806_v49 = vadd.f32 %v8731_v39, %v21790_v33  ;;  %9749 = vrot.lane.b32.xlu1 %v19584_v18, %s15278_s20  ;;  %v21792_v41 = vld [vmem:[#allocation55_spill] sm:$0xff] }
 0xaf9   : > { %v20169_v45 = vsel %vm8866_vm11, %v9979_v34, %v9980_v43  ;;  %v8745_v8 = vpop.permute.xlu0 %8744  ;;  %v9548_v26 = vpop.f32.mrb[44].mxu0  ;;  %v8556_v34 = vld [vmem:[%s19436_s14 + $0xd8] sm:$0xff] }
 0xafa   : > { %9061 = vst.msk [vmem:[%s19436_s14 + $0x90] sm:$0xff] %vm1523_vm0, %v9029_v50  ;;  %v9036_v37 = vadd.f32 %v9004_v38, %v8554_v7  ;;  %v8999_v12 = vadd.f32 %v21791_v0, %v8806_v49  ;;  %v8813_v54 = vadd.f32 %v8745_v8, %v21792_v41  ;;  %v9726_v57 = vrot.slane %v9548_v26, 1  ;;  %v20176_v27 = vpop.f32.mrb[244].mxu1  ;;  %9747 = vrot.lane.b32.xlu0 %v19539_v24, %s15278_s20  ;;  %v9550_v18 = vpop.f32.mrb[45].mxu0  ;;  %v21793_v50 = vld [vmem:[#allocation90_spill] sm:$0xff]  ;;  %v21794_v38 = vld [vmem:[#allocation88_spill] sm:$0xff] }
 0xafb   : > { %v8735_v44 = vpop.permute.xlu1 %8734  ;;  %v9982_v1 = vrot.slane %v9550_v18, 2  ;;  %v10565_v39 = vpop.f32.mrb[245].mxu1  ;;  %v8551_v24 = vld [vmem:[%s19436_s14 + $0xb0] sm:$0xff]  ;;  %v10761_v0 = vrot.slane %v20176_v27, 1  ;;  %v21795_v18 = vld [vmem:[#allocation78_spill] sm:$0xff] }
 0xafc   : > { %9068 = vst.msk [vmem:[%s19436_s14 + $0xc8] sm:$0xff] %vm1523_vm0, %v9036_v37  ;;  %v9031_v7 = vadd.f32 %v8999_v12, %v8549_v46  ;;  %v9006_v3 = vadd.f32 %v21793_v50, %v8813_v54  ;;  %v8808_v33 = vadd.f32 %v8735_v44, %v21794_v38  ;;  %v9552_v49 = vpop.f32.mrb[46].mxu0  ;;  %v20185_v8 = vpop.f32.mrb[246].mxu1  ;;  %9753 = vrot.lane.b32.xlu1 %v19642_v40, %s15278_s20  ;;  %v21796_v44 = vld [vmem:[#allocation93_spill] sm:$0xff] }
 0xafd   : > { %v8749_v26 = vpop.permute.xlu0 %8748  ;;  %v10762_v41 = vrot.slane %v20185_v8, 1  ;;  %v9553_v37 = vpop.f32.mrb[47].mxu0  ;;  %v20193_v46 = vsel %vm8609_vm10, %v9724_v55, %v9726_v57  ;;  %v20196_v12 = vsel %vm8866_vm11, %v9980_v43, %v9982_v1  ;;  %v8558_v49 = vld [vmem:[%s19436_s14 + $0xe8] sm:$0xff]  ;;  %v11017_v55 = vrot.slane %v10565_v39, 2 }
 0xafe   : > { %9063 = vst.msk [vmem:[%s19436_s14 + $0xa0] sm:$0xff] %vm1523_vm0, %v9031_v7  ;;  %v9038_v54 = vadd.f32 %v9006_v3, %v8556_v34  ;;  %v9001_v40 = vadd.f32 %v21795_v18, %v8808_v33  ;;  %v8815_v50 = vadd.f32 %v8749_v26, %v21796_v44  ;;  %v10569_v38 = vpop.f32.mrb[247].mxu1  ;;  %9751 = vrot.lane.b32.xlu0 %v19605_v42, %s15278_s20  ;;  %v21797_v1 = vld [vmem:[#allocation54_spill] sm:$0xff]  ;;  %v21798_v3 = vld [vmem:[#allocation51_spill] sm:$0xff]  ;;  %v8553_v42 = vld [vmem:[%s19436_s14 + $0xc0] sm:$0xff] }
 0xaff   : > { %v8739_v37 = vpop.permute.xlu1 %8738  ;;  %v11018_v57 = vrot.slane %v10569_v38, 2  ;;  %v20206_v43 = vsel %vm8609_vm10, %v10761_v0, %v10762_v41  ;;  %v21799_v18 = vld [vmem:[#allocation53_spill] sm:$0xff] }
 0xb00   : > { %9070 = vst.msk [vmem:[%s19436_s14 + $0xd8] sm:$0xff] %vm1523_vm0, %v9038_v54  ;;  %v9033_v34 = vadd.f32 %v9001_v40, %v8551_v24  ;;  %v9008_v7 = vadd.f32 %v21797_v1, %v8815_v50  ;;  %v8810_v33 = vadd.f32 %v8739_v37, %v21798_v3  ;;  %9757 = vrot.lane.b32.xlu1 %v19691_v16, %s15278_s20  ;;  %v21800_v24 = vld [vmem:[#allocation110_spill] sm:$0xff]  ;;  %v8560_v50 = vld [vmem:[%s19436_s14 + $0xf8] sm:$0xff] }
 0xb01   : > { %v8753_v26 = vpop.permute.xlu0 %8752  ;;  %v20216_v39 = vsel %vm8866_vm11, %v11017_v55, %v11018_v57  ;;  %v21801_v1 = vld [vmem:[#allocation118_spill] sm:$0xff] }
 0xb02   : > { %9065 = vst.msk [vmem:[%s19436_s14 + $0xb0] sm:$0xff] %vm1523_vm0, %v9033_v34  ;;  %v9040_v0 = vadd.f32 %v9008_v7, %v8558_v49  ;;  %v9003_v54 = vadd.f32 %v21799_v18, %v8810_v33  ;;  %v8817_v40 = vadd.f32 %v8753_v26, %v21800_v24  ;;  %v10573_v44 = vpop.f32.mrb[248].mxu1  ;;  %9755 = vrot.lane.b32.xlu0 %v19660_v19, %s15278_s20  ;;  %v21802_v49 = vld [vmem:[#allocation43_spill] sm:$0xff] }
 0xb03   : > { %v8743_v16 = vpop.permute.xlu1 %8742  ;;  %v10764_v38 = vrot.slane %v10573_v44, 1  ;;  %v10575_v37 = vpop.f32.mrb[249].mxu1  ;;  %v8555_v26 = vld [vmem:[%s19436_s14 + $0xd0] sm:$0xff] }
 0xb04   : > { %9072 = vst.msk [vmem:[%s19436_s14 + $0xe8] sm:$0xff] %vm1523_vm0, %v9040_v0  ;;  %v9035_v55 = vadd.f32 %v9003_v54, %v8553_v42  ;;  %v9010_v34 = vadd.f32 %v21801_v1, %v8817_v40  ;;  %v8812_v7 = vadd.f32 %v8743_v16, %v21802_v49  ;;  %v11020_v3 = vrot.slane %v10575_v37, 2  ;;  %v10577_v33 = vpop.f32.mrb[250].mxu1  ;;  %9761 = vrot.lane.b32.xlu1 %v19743_v63, %s15278_s20  ;;  %v21803_v0 = vld [vmem:[#allocation57_spill] sm:$0xff]  ;;  %v21804_v40 = vld [vmem:[#allocation106_spill] sm:$0xff]  ;;  %v21806_v1 = vld [vmem:[#allocation63_spill] sm:$0xff] }
 0xb05   : > { %v9736_v19 = vpop.permute.xlu0 %9735  ;;  %v10578_v18 = vpop.f32.mrb[251].mxu1  ;;  %v20233_v24 = vsel %vm8609_vm10, %v10762_v41, %v10764_v38  ;;  %v21805_v38 = vld [vmem:[#allocation112_spill] sm:$0xff]  ;;  %v21807_v49 = vld [vmem:[#allocation65_spill] sm:$0xff] }
 0xb06   : > { %9067 = vst.msk [vmem:[%s19436_s14 + $0xc0] sm:$0xff] %vm1523_vm0, %v9035_v55  ;;  %v9042_v42 = vadd.f32 %v9010_v34, %v8560_v50  ;;  %v9005_v54 = vadd.f32 %v21803_v0, %v8812_v7  ;;  %v9830_v44 = vadd.f32 %v9736_v19, %v21804_v40  ;;  %9759 = vrot.lane.b32.xlu0 %v19710_v36, %s15278_s20  ;;  %v9574_v50 = vld [vmem:[%s19436_s14 + $0x8] sm:$0xff]  ;;  %v8557_v34 = vld [vmem:[%s19436_s14 + $0xe0] sm:$0xff]  ;;  %v21809_v19 = vld [vmem:[#allocation124_spill] sm:$0xff] }
 0xb07   : > { %v20242_v63 = vsel %vm8866_vm11, %v11018_v57, %v11020_v3  ;;  %v8747_v16 = vpop.permute.xlu1 %8746  ;;  %v21808_v3 = vld [vmem:[#allocation116_spill] sm:$0xff]  ;;  %v8559_v40 = vld [vmem:[%s19436_s14 + $0xf0] sm:$0xff] }
 0xb08   : > { %9074 = vst.msk [vmem:[%s19436_s14 + $0xf8] sm:$0xff] %vm1523_vm0, %v9042_v42  ;;  %v9037_v41 = vadd.f32 %v9005_v54, %v8555_v26  ;;  %v10022_v37 = vadd.f32 %v21805_v38, %v9830_v44  ;;  %v8814_v55 = vadd.f32 %v8747_v16, %v21806_v1  ;;  %9765 = vrot.lane.b32.xlu1 %v19793_v32, %s15278_s20  ;;  %v21810_v42 = vld [vmem:[#allocation109_spill] sm:$0xff]  ;;  %v9576_v54 = vld [vmem:[%s19436_s14 + $0x18] sm:$0xff]  ;;  %v21811_v16 = vld [vmem:[#allocation114_spill] sm:$0xff] }
 0xb09   : > { %v9740_v36 = vpop.permute.xlu0 %9739  ;;  %v21812_v38 = vld [vmem:[#allocation128_spill] sm:$0xff] }
 0xb0a   : > { %9069 = vst.msk [vmem:[%s19436_s14 + $0xd0] sm:$0xff] %vm1523_vm0, %v9037_v41  ;;  %v10054_v57 = vadd.f32 %v10022_v37, %v9574_v50  ;;  %v9007_v7 = vadd.f32 %v21807_v49, %v8814_v55  ;;  %v9832_v33 = vadd.f32 %v9740_v36, %v21808_v3  ;;  %9763 = vrot.lane.b32.xlu0 %v19762_v53, %s15278_s20  ;;  %v21813_v55 = vld [vmem:[#allocation136_spill] sm:$0xff] }
 0xb0b   : > { %v8751_v26 = vpop.permute.xlu1 %8750 }
 0xb0c   : > { %10086 = vst.msk [vmem:[%s19436_s14 + $0x8] sm:$0xff] %vm1523_vm0, %v10054_v57  ;;  %v9039_v32 = vadd.f32 %v9007_v7, %v8557_v34  ;;  %v10024_v18 = vadd.f32 %v21809_v19, %v9832_v33  ;;  %v8816_v0 = vadd.f32 %v8751_v26, %v21810_v42  ;;  %9769 = vrot.lane.b32.xlu1 %v19843_v61, %s15278_s20  ;;  %v21814_v34 = vld [vmem:[#allocation81_spill] sm:$0xff]  ;;  %v9578_v57 = vld [vmem:[%s19436_s14 + $0x28] sm:$0xff] }
 0xb0d   : > { %v9744_v44 = vpop.permute.xlu0 %9743  ;;  %v21816_v33 = vld [vmem:[#allocation122_spill] sm:$0xff] }
 0xb0e   : > { %9071 = vst.msk [vmem:[%s19436_s14 + $0xe0] sm:$0xff] %vm1523_vm0, %v9039_v32  ;;  %v10056_v53 = vadd.f32 %v10024_v18, %v9576_v54  ;;  %v9009_v41 = vadd.f32 %v21811_v16, %v8816_v0  ;;  %v9834_v37 = vadd.f32 %v9744_v44, %v21812_v38  ;;  %9767 = vrot.lane.b32.xlu0 %v19812_v15, %s15278_s20  ;;  %v21815_v15 = vld [vmem:[#allocation108_spill] sm:$0xff]  ;;  %v9573_v32 = vld [vmem:[%s19436_s14] sm:$0xff]  ;;  %v21817_v18 = vld [vmem:[#allocation130_spill] sm:$0xff] }
 0xb0f   : > { %v9734_v1 = vpop.permute.xlu1 %9733  ;;  %v21818_v0 = vld [vmem:[#allocation115_spill] sm:$0xff] }
 0xb10   : > { %10088 = vst.msk [vmem:[%s19436_s14 + $0x18] sm:$0xff] %vm1523_vm0, %v10056_v53  ;;  %v9041_v61 = vadd.f32 %v9009_v41, %v8559_v40  ;;  %v10026_v50 = vadd.f32 %v21813_v55, %v9834_v37  ;;  %v9829_v36 = vadd.f32 %v9734_v1, %v21814_v34  ;;  %9773 = vrot.lane.b32.xlu1 %v19886_v47, %s15278_s20  ;;  %v21819_v53 = vld [vmem:[#allocation120_spill] sm:$0xff]  ;;  %v21820_v41 = vld [vmem:[#allocation134_spill] sm:$0xff]  ;;  %v9575_v37 = vld [vmem:[%s19436_s14 + $0x10] sm:$0xff] }
 0xb11   : > { %v10779_v49 = vpop.permute.xlu0 %10778  ;;  %v21821_v55 = vld [vmem:[#allocation127_spill] sm:$0xff] }
 0xb12   : > { %9073 = vst.msk [vmem:[%s19436_s14 + $0xf0] sm:$0xff] %vm1523_vm0, %v9041_v61  ;;  %v10058_v7 = vadd.f32 %v10026_v50, %v9578_v57  ;;  %v10021_v3 = vadd.f32 %v21815_v15, %v9829_v36  ;;  %v10873_v26 = vadd.f32 %v10779_v49, %v21816_v33  ;;  %9771 = vrot.lane.b32.xlu0 %v19861_v58, %s15278_s20  ;;  %v21822_v57 = vld [vmem:[#allocation132_spill] sm:$0xff]  ;;  %v21823_v33 = vld [vmem:[#allocation121_spill] sm:$0xff] }
 0xb13   : > { %v9738_v19 = vpop.permute.xlu1 %9737  ;;  %v10617_v40 = vld [vmem:[%s19436_s14 + $0x8] sm:$0xff] }
 0xb14   : > { %10090 = vst.msk [vmem:[%s19436_s14 + $0x28] sm:$0xff] %vm1523_vm0, %v10058_v7  ;;  %v10053_v47 = vadd.f32 %v10021_v3, %v9573_v32  ;;  %v11065_v42 = vadd.f32 %v21817_v18, %v10873_v26  ;;  %v9831_v54 = vadd.f32 %v9738_v19, %v21818_v0  ;;  %9777 = vrot.lane.b32.xlu1 %v19937_v17, %s15278_s20  ;;  %v21824_v19 = vld [vmem:[#allocation126_spill] sm:$0xff] }
 0xb15   : > { %v10783_v44 = vpop.permute.xlu0 %10782 }
 0xb16   : > { %10085 = vst.msk [vmem:[%s19436_s14] sm:$0xff] %vm1523_vm0, %v10053_v47  ;;  %v11097_v58 = vadd.f32 %v11065_v42, %v10617_v40  ;;  %v10023_v16 = vadd.f32 %v21819_v53, %v9831_v54  ;;  %v10875_v38 = vadd.f32 %v10783_v44, %v21820_v41  ;;  %9775 = vrot.lane.b32.xlu0 %v19902_v2, %s15278_s20  ;;  %v21825_v44 = vld [vmem:[#allocation133_spill] sm:$0xff] }
 0xb17   : > { %v9742_v1 = vpop.permute.xlu1 %9741  ;;  %v10619_v34 = vld [vmem:[%s19436_s14 + $0x18] sm:$0xff] }
 0xb18   : > { %11129 = vst.msk [vmem:[%s19436_s14 + $0x8] sm:$0xff] %vm1523_vm0, %v11097_v58  ;;  %v10055_v17 = vadd.f32 %v10023_v16, %v9575_v37  ;;  %v11067_v61 = vadd.f32 %v19505_v59, %v10875_v38  ;;  %v9833_v50 = vadd.f32 %v9742_v1, %v21821_v55  ;;  %9781 = vrot.lane.b32.xlu1 %v20000_v62, %s15278_s20  ;;  %v9577_v59 = vld [vmem:[%s19436_s14 + $0x20] sm:$0xff] }
 0xb19   : > { %v10787_v36 = vpop.permute.xlu0 %10786 }
 0xb1a   : > { %10087 = vst.msk [vmem:[%s19436_s14 + $0x10] sm:$0xff] %vm1523_vm0, %v10055_v17  ;;  %v11099_v2 = vadd.f32 %v11067_v61, %v10619_v34  ;;  %v10025_v49 = vadd.f32 %v21822_v57, %v9833_v50  ;;  %v10877_v7 = vadd.f32 %v10787_v36, %v19531_v11  ;;  %9779 = vrot.lane.b32.xlu0 %v19958_v48, %s15278_s20 }
 0xb1b   : > { %v10777_v15 = vpop.permute.xlu1 %10776  ;;  %v10621_v32 = vld [vmem:[%s19436_s14 + $0x28] sm:$0xff] }
 0xb1c   : > { %11131 = vst.msk [vmem:[%s19436_s14 + $0x18] sm:$0xff] %vm1523_vm0, %v11099_v2  ;;  %v10057_v62 = vadd.f32 %v10025_v49, %v9577_v59  ;;  %v11069_v3 = vadd.f32 %v19578_v20, %v10877_v7  ;;  %v10872_v26 = vadd.f32 %v10777_v15, %v21823_v33  ;;  %9785 = vrot.lane.b32.xlu1 %v20081_v23, %s15278_s20  ;;  %v21827_v7 = vld [vmem:[#allocation62_spill] sm:$0xff] }
 0xb1d   : > { %v10791_v11 = vpop.permute.xlu0 %10790  ;;  %v10616_v42 = vld [vmem:[%s19436_s14] sm:$0xff] }
 0xb1e   : > { %10089 = vst.msk [vmem:[%s19436_s14 + $0x20] sm:$0xff] %vm1523_vm0, %v10057_v62  ;;  %v11101_v48 = vadd.f32 %v11069_v3, %v10621_v32  ;;  %v11064_v47 = vadd.f32 %v21824_v19, %v10872_v26  ;;  %v10879_v18 = vadd.f32 %v10791_v11, %v19598_v35  ;;  %9783 = vrot.lane.b32.xlu0 %v20036_v31, %s15278_s20  ;;  %v21826_v31 = vld [vmem:[#allocation138_spill] sm:$0xff]  ;;  %v21828_v32 = vld [vmem:[#allocation129_spill] sm:$0xff] }
 0xb1f   : > { %v20328_v20 = vld [vmem:[%s19436_s14 + $0x8] sm:$0xff]  ;;  %v10781_v0 = vpop.permute.xlu1 %10780 }
 0xb20   : > { %v12533_v23 = vmul.f32 -1.442695, %v20328_v20  ;;  %11133 = vst.msk [vmem:[%s19436_s14 + $0x28] sm:$0xff] %vm1523_vm0, %v11101_v48  ;;  %v11096_v54 = vadd.f32 %v11064_v47, %v10616_v42  ;;  %v20335_v40 = vadd.f32 %v19637_v28, %v10879_v18  ;;  %v10874_v58 = vadd.f32 %v10781_v0, %v21825_v44  ;;  %9789 = vrot.lane.b32.xlu1 %v20157_v51, %s15278_s20  ;;  %v21829_v48 = vld [vmem:[#allocation150_spill] sm:$0xff] }
 0xb21   : > { %v10795_v35 = vpop.permute.xlu0 %10794  ;;  %v10618_v41 = vld [vmem:[%s19436_s14 + $0x10] sm:$0xff] }
 0xb22   : > { %14682 = vpow2.f32 %v12533_v23  ;;  %11128 = vst.msk [vmem:[%s19436_s14] sm:$0xff] %vm1523_vm0, %v11096_v54  ;;  %v11066_v53 = vadd.f32 %v21826_v31, %v10874_v58  ;;  %v10881_v16 = vadd.f32 %v10795_v35, %v19653_v9  ;;  %9787 = vrot.lane.b32.xlu0 %v20111_v13, %s15278_s20 }
 0xb23   : > { %v20347_v28 = vld [vmem:[%s19436_s14 + $0x18] sm:$0xff]  ;;  %v10785_v38 = vpop.permute.xlu1 %10784 }
 0xb24   : > { %v12535_v51 = vmul.f32 -1.442695, %v20347_v28  ;;  %v11098_v37 = vadd.f32 %v11066_v53, %v10618_v41  ;;  %v20352_v1 = vadd.f32 %v19694_v14, %v10881_v16  ;;  %v10876_v17 = vadd.f32 %v10785_v38, %v19526_v10  ;;  %v21830_v53 = vld [vmem:[#allocation152_spill] sm:$0xff]  ;;  %v21831_v41 = vld [vmem:[#allocation125_spill] sm:$0xff] }
 0xb25   : > { %v10799_v61 = vpop.permute.xlu0 %10798  ;;  %v10620_v50 = vld [vmem:[%s19436_s14 + $0x20] sm:$0xff] }
 0xb26   : > { %14684 = vpow2.f32 %v12535_v51  ;;  %11130 = vst.msk [vmem:[%s19436_s14 + $0x10] sm:$0xff] %vm1523_vm0, %v11098_v37  ;;  %v11068_v9 = vadd.f32 %v19552_v6, %v10876_v17  ;;  %v10883_v13 = vadd.f32 %v10799_v61, %v19707_v5  ;;  %9791 = vrot.lane.b32.xlu0 %v20193_v46, %s15278_s20 }
 0xb27   : > { %v20362_v55 = vld [vmem:[%s19436_s14 + $0x28] sm:$0xff]  ;;  %v10789_v34 = vpop.permute.xlu1 %10788 }
 0xb28   : > { %v12537_v14 = vmul.f32 -1.442695, %v20362_v55  ;;  %v11100_v36 = vadd.f32 %v11068_v9, %v10620_v50  ;;  %v20367_v10 = vadd.f32 %v19746_v56, %v10883_v13  ;;  %v10878_v2 = vadd.f32 %v10789_v34, %v19594_v52  ;;  %v21832_v34 = vld [vmem:[#allocation161_spill] sm:$0xff] }
 0xb29   : > { %v20371_v57 = vld [vmem:[%s19436_s14] sm:$0xff]  ;;  %v10803_v6 = vpop.permute.xlu0 %10802  ;;  %v20373_v49 = vpop.f32.mrb[48].mxu0 }
 0xb2a   : > { %14686 = vpow2.f32 %v12537_v14  ;;  %v12532_v5 = vmul.f32 -1.442695, %v20371_v57  ;;  %11132 = vst.msk [vmem:[%s19436_s14 + $0x20] sm:$0xff] %vm1523_vm0, %v11100_v36  ;;  %v20379_v46 = vadd.f32 %v19618_v4, %v10878_v2  ;;  %v10885_v59 = vadd.f32 %v10803_v6, %v21827_v7  ;;  %v20382_v56 = vpop.f32.mrb[252].mxu1  ;;  %v9558_v15 = vpop.f32.mrb[49].mxu0  ;;  %v21833_v36 = vld [vmem:[#allocation156_spill] sm:$0xff] }
 0xb2b   : > { %v10793_v52 = vpop.permute.xlu1 %10792  ;;  %v9728_v62 = vrot.slane %v20373_v49, 1  ;;  %v10766_v3 = vrot.slane %v20382_v56, 1  ;;  %v10583_v33 = vpop.f32.mrb[253].mxu1  ;;  %v9984_v19 = vrot.slane %v9558_v15, 2 }
 0xb2c   : > { %v14683_v26 = vpop.eup %14682  ;;  %14688 = vpow2.f32 %v12532_v5  ;;  %v20387_v11 = vadd.f32 %v21828_v32, %v10885_v59  ;;  %v10880_v4 = vadd.f32 %v10793_v52, %v21829_v48  ;;  %v20390_v47 = vpop.f32.mrb[50].mxu0  ;;  %v11022_v54 = vrot.slane %v10583_v33, 2 }
 0xb2d   : > { %v20392_v18 = vpop.f32.mrb[254].mxu1  ;;  %v11289_v42 = vadd.f32 1.0, %v14683_v26  ;;  %v20395_v0 = vld [vmem:[%s19436_s14 + $0x10] sm:$0xff]  ;;  %v10807_v23 = vpop.permute.xlu0 %10806  ;;  %v9729_v44 = vrot.slane %v20390_v47, 1  ;;  %v21835_v26 = vld [vmem:[#allocation164_spill] sm:$0xff] }
 0xb2e   : > { %v10767_v58 = vrot.slane %v20392_v18, 1  ;;  %v9562_v35 = vpop.f32.mrb[51].mxu0  ;;  %v12534_v31 = vmul.f32 -1.442695, %v20395_v0  ;;  %v20401_v16 = vadd.f32 %v21830_v53, %v10880_v4  ;;  %v10887_v38 = vadd.f32 %v10807_v23, %v21831_v41  ;;  %v10587_v37 = vpop.f32.mrb[255].mxu1  ;;  %v21836_v41 = vld [vmem:[#allocation169_spill] sm:$0xff] }
 0xb2f   : > { %v9985_v51 = vrot.slane %v9562_v35, 2  ;;  %14690 = vrcp.f32 %v11289_v42  ;;  %v10797_v17 = vpop.permute.xlu1 %10796  ;;  %v11023_v61 = vrot.slane %v10587_v37, 2  ;;  %v9730_v9 = vsel %vm8609_vm10, %v9728_v62, %v9729_v44 }
 0xb30   : > { %v10768_v13 = vsel %vm8609_vm10, %v10766_v3, %v10767_v58  ;;  %v14685_v50 = vpop.eup %14684  ;;  %14692 = vpow2.f32 %v12534_v31  ;;  %v20407_v14 = vadd.f32 %v21832_v34, %v10887_v38  ;;  %v10882_v2 = vadd.f32 %v10797_v17, %v21833_v36  ;;  %9793 = vrot.lane.b32.xlu1 %v9730_v9, %s15278_s20  ;;  %v21834_v3 = vld [vmem:[#allocation67_spill] sm:$0xff] }
 0xb31   : > { %v20412_v6 = vsel %vm8866_vm11, %v9984_v19, %v9985_v51  ;;  %v11291_v5 = vadd.f32 1.0, %v14685_v50  ;;  %v20415_v7 = vld [vmem:[%s19436_s14 + $0x20] sm:$0xff]  ;;  %v10811_v59 = vpop.permute.xlu0 %10810  ;;  %v20418_v52 = vsel %vm8866_vm11, %v11022_v54, %v11023_v61  ;;  %v21837_v38 = vld [vmem:[#allocation111_spill] sm:$0xff] }
 0xb32   : > { %v9566_v15 = vpop.f32.mrb[52].mxu0  ;;  %v12536_v62 = vmul.f32 -1.442695, %v20415_v7  ;;  %v20422_v33 = vadd.f32 %v21834_v3, %v10882_v2  ;;  %v10889_v32 = vadd.f32 %v10811_v59, %v21835_v26  ;;  %v10591_v4 = vpop.f32.mrb[32].mxu1  ;;  %v21838_v3 = vld [vmem:[#allocation113_spill] sm:$0xff] }
 0xb33   : > { %v9731_v48 = vrot.slane %v9566_v15, 1  ;;  %v9568_v42 = vpop.f32.mrb[53].mxu0  ;;  %14694 = vrcp.f32 %v11291_v5  ;;  %v10801_v19 = vpop.permute.xlu1 %10800  ;;  %v10769_v23 = vrot.slane %v10591_v4, 1 }
 0xb34   : > { %v9987_v35 = vrot.slane %v9568_v42, 2  ;;  %v10593_v31 = vpop.f32.mrb[33].mxu1  ;;  %v14687_v53 = vpop.eup %14686  ;;  %14696 = vpow2.f32 %v12536_v62  ;;  %v20426_v54 = vadd.f32 %v21836_v41, %v10889_v32  ;;  %v10884_v37 = vadd.f32 %v10801_v19, %v21837_v38  ;;  %10828 = vrot.lane.b32.xlu1 %v20206_v43, %s15278_s20  ;;  %v21839_v42 = vld [vmem:[#allocation131_spill] sm:$0xff] }
 0xb35   : > { %v11025_v17 = vrot.slane %v10593_v31, 2  ;;  %v10595_v9 = vpop.f32.mrb[34].mxu1  ;;  %v9570_v50 = vpop.f32.mrb[54].mxu0  ;;  %v11293_v34 = vadd.f32 1.0, %v14687_v53  ;;  %v9732_v5 = vsel %vm8609_vm10, %v9729_v44, %v9731_v48  ;;  %v10770_v59 = vsel %vm8609_vm10, %v10767_v58, %v10769_v23  ;;  %v21840_v48 = vld [vmem:[#allocation172_spill] sm:$0xff]  ;;  %v21841_v31 = vld [vmem:[#allocation137_spill] sm:$0xff] }
 0xb36   : > { %v9571_v36 = vpop.f32.mrb[55].mxu0  ;;  %v10596_v2 = vpop.f32.mrb[35].mxu1  ;;  %v20434_v15 = vsel %vm8866_vm11, %v9985_v51, %v9987_v35  ;;  %v20437_v26 = vadd.f32 %v21838_v3, %v10884_v37  ;;  %9795 = vrot.lane.b32.xlu0 %v9732_v5, %s15278_s20  ;;  %v21842_v38 = vld [vmem:[#allocation87_spill] sm:$0xff] }
 0xb37   : > { %v14689_v62 = vpop.eup %14688  ;;  %v20441_v32 = vsel %vm8866_vm11, %v11023_v61, %v11025_v17  ;;  %14698 = vrcp.f32 %v11293_v34  ;;  %v10805_v4 = vpop.permute.xlu1 %10804  ;;  %v21844_v34 = vld [vmem:[#allocation166_spill] sm:$0xff]  ;;  %v21845_v5 = vld [vmem:[#allocation171_spill] sm:$0xff] }
 0xb38   : > { %v11288_v43 = vadd.f32 1.0, %v14689_v62  ;;  %v10886_v44 = vadd.f32 %v10805_v4, %v21839_v42  ;;  %10832 = vrot.lane.b32.xlu1 %v10768_v13, %s15278_s20  ;;  %v10815_v58 = vpop.permute.xlu0 %10814  ;;  %v21843_v13 = vld [vmem:[#allocation163_spill] sm:$0xff]  ;;  %v21846_v4 = vld [vmem:[#allocation174_spill] sm:$0xff] }
 0xb39   : > { %v14691_v51 = vpop.eup %14690  ;;  %v10891_v19 = vadd.f32 %v10815_v58, %v21840_v48  ;;  %v21847_v58 = vld [vmem:[#allocation45_spill] sm:$0xff]  ;;  %v21848_v48 = vld [vmem:[#allocation80_spill] sm:$0xff] }
 0xb3a   : > { %14700 = vrcp.f32 %v11288_v43  ;;  %v14693_v23 = vpop.eup %14692  ;;  %v11385_v35 = vmul.f32 %v14691_v51, %v20328_v20  ;;  %v20448_v61 = vadd.f32 %v21841_v31, %v10886_v44  ;;  %10830 = vrot.lane.b32.xlu0 %v20233_v24, %s15278_s20  ;;  %v21849_v31 = vld [vmem:[#allocation49_spill] sm:$0xff] }
 0xb3b   : > { %v11290_v53 = vadd.f32 1.0, %v14693_v23  ;;  %v10809_v41 = vpop.permute.xlu1 %10808  ;;  %v20453_v37 = vadd.f32 %v21842_v38, %v10891_v19 }
 0xb3c   : > { %11417 = vst.msk [vmem:[%s19436_s14 + $0x8] sm:$0xff] %vm1523_vm0, %v11385_v35  ;;  %v10888_v17 = vadd.f32 %v10809_v41, %v21843_v13 }
 0xb3d   : > { %v14695_v9 = vpop.eup %14694  ;;  %14702 = vrcp.f32 %v11290_v53 }
 0xb3e   : > { %v14697_v20 = vpop.eup %14696  ;;  %v11387_v50 = vmul.f32 %v14695_v9, %v20347_v28  ;;  %v20460_v36 = vadd.f32 %v21844_v34, %v10888_v17  ;;  %10834 = vrot.lane.b32.xlu0 %v10770_v59, %s15278_s20  ;;  %v21850_v34 = vld [vmem:[#allocation46_spill] sm:$0xff] }
 0xb3f   : > { %v11292_v24 = vadd.f32 1.0, %v14697_v20  ;;  %v10813_v2 = vpop.permute.xlu1 %10812 }
 0xb40   : > { %11419 = vst.msk [vmem:[%s19436_s14 + $0x18] sm:$0xff] %vm1523_vm0, %v11387_v50  ;;  %v10890_v62 = vadd.f32 %v10813_v2, %v21845_v5 }
 0xb41   : > { %v14699_v3 = vpop.eup %14698  ;;  %14704 = vrcp.f32 %v11292_v24 }
 0xb42   : > { %v11389_v43 = vmul.f32 %v14699_v3, %v20362_v55  ;;  %v20468_v42 = vadd.f32 %v21846_v4, %v10890_v62  ;;  %v21852_v62 = vld [vmem:[#allocation139_spill] sm:$0xff] }
 0xb43   : > { %v10817_v44 = vpop.permute.xlu1 %10816  ;;  %v21854_v4 = vld [vmem:[#allocation59_spill] sm:$0xff] }
 0xb44   : > { %v14701_v28 = vpop.eup %14700  ;;  %11421 = vst.msk [vmem:[%s19436_s14 + $0x28] sm:$0xff] %vm1523_vm0, %v11389_v43  ;;  %v10892_v51 = vadd.f32 %v10817_v44, %v21847_v58  ;;  %v21855_v58 = vld [vmem:[#allocation143_spill] sm:$0xff] }
 0xb45   : > { %v11384_v59 = vmul.f32 %v14701_v28, %v20371_v57  ;;  %v9579_v28 = vld [vmem:[%s19436_s14 + $0x30] sm:$0xff] }
 0xb46   : > { %v20477_v19 = vadd.f32 %v21848_v48, %v10892_v51 }
 0xb47   : > { %11416 = vst.msk [vmem:[%s19436_s14] sm:$0xff] %vm1523_vm0, %v11384_v59  ;;  %v14703_v23 = vpop.eup %14702 }
 0xb48   : > { %v11386_v55 = vmul.f32 %v14703_v23, %v20395_v0  ;;  %v21856_v23 = vld [vmem:[#allocation145_spill] sm:$0xff] }
 0xb49   : > { %v10819_v35 = vpop.permute.xlu0 %10818 }
 0xb4a   : > { %v10893_v53 = vadd.f32 %v10819_v35, %v21849_v31  ;;  %11418 = vst.msk [vmem:[%s19436_s14 + $0x10] sm:$0xff] %vm1523_vm0, %v11386_v55  ;;  %v21857_v35 = vld [vmem:[#allocation140_spill] sm:$0xff] }
 0xb4b   : > { %v14705_v41 = vpop.eup %14704 }
 0xb4c   : > { %v20484_v38 = vadd.f32 %v20003_v60, %v10893_v53  ;;  %v11388_v57 = vmul.f32 %v14705_v41, %v20415_v7  ;;  %v21851_v7 = vld [vmem:[#allocation58_spill] sm:$0xff]  ;;  %v9581_v53 = vld [vmem:[%s19436_s14 + $0x40] sm:$0xff] }
 0xb4e   : > { %11420 = vst.msk [vmem:[%s19436_s14 + $0x20] sm:$0xff] %vm1523_vm0, %v11388_v57 }
 0xb52   : > { %v10821_v13 = vpop.permute.xlu1 %10820 }
 0xb53   : > { %v10894_v17 = vadd.f32 %v10821_v13, %v20019_v29  ;;  %v21858_v13 = vld [vmem:[#allocation142_spill] sm:$0xff] }
 0xb55   : > { %v20491_v9 = vadd.f32 %v20056_v25, %v10894_v17  ;;  %v21853_v25 = vld [vmem:[#allocation141_spill] sm:$0xff] }
 0xb58   : > { %v10823_v0 = vpop.permute.xlu0 %10822 }
 0xb59   : > { %v10895_v20 = vadd.f32 %v10823_v0, %v20029_v30 }
 0xb5b   : > { %v20495_v50 = vadd.f32 %v20084_v21, %v10895_v20  ;;  %v9580_v20 = vld [vmem:[%s19436_s14 + $0x38] sm:$0xff] }
 0xb62   : > { %v10825_v60 = vpop.permute.xlu1 %10824 }
 0xb63   : > { %v10896_v24 = vadd.f32 %v10825_v60, %v21850_v34 }
 0xb65   : > { %v20499_v2 = vadd.f32 %v21851_v7, %v10896_v24  ;;  %v21860_v24 = vld [vmem:[#allocation149_spill] sm:$0xff] }
 0xb66   : > { %v9746_v5 = vpop.permute.xlu1 %9745 }
 0xb67   : > { %v9835_v29 = vadd.f32 %v9746_v5, %v21852_v62  ;;  %v21861_v5 = vld [vmem:[#allocation144_spill] sm:$0xff] }
 0xb68   : > { %v10827_v3 = vpop.permute.xlu0 %10826 }
 0xb69   : > { %v10027_v43 = vadd.f32 %v21853_v25, %v9835_v29  ;;  %v10897_v30 = vadd.f32 %v10827_v3, %v21854_v4  ;;  %v9583_v29 = vld [vmem:[%s19436_s14 + $0x50] sm:$0xff] }
 0xb6a   : > { %v9750_v21 = vpop.permute.xlu1 %9749 }
 0xb6b   : > { %v10059_v44 = vadd.f32 %v10027_v43, %v9579_v28  ;;  %v20506_v59 = vadd.f32 %v20160_v22, %v10897_v30  ;;  %v9837_v51 = vadd.f32 %v9750_v21, %v21855_v58  ;;  %v21859_v22 = vld [vmem:[#allocation147_spill] sm:$0xff]  ;;  %v21862_v43 = vld [vmem:[#allocation146_spill] sm:$0xff]  ;;  %v21863_v30 = vld [vmem:[#allocation153_spill] sm:$0xff] }
 0xb6c   : > { %v9748_v48 = vpop.permute.xlu0 %9747 }
 0xb6d   : > { %10091 = vst.msk [vmem:[%s19436_s14 + $0x30] sm:$0xff] %vm1523_vm0, %v10059_v44  ;;  %v10029_v55 = vadd.f32 %v21856_v23, %v9837_v51  ;;  %v9836_v31 = vadd.f32 %v9748_v48, %v21857_v35  ;;  %v9582_v44 = vld [vmem:[%s19436_s14 + $0x48] sm:$0xff]  ;;  %v21864_v23 = vld [vmem:[#allocation155_spill] sm:$0xff]  ;;  %v21865_v35 = vld [vmem:[#allocation148_spill] sm:$0xff] }
 0xb6e   : > { %v9754_v41 = vpop.permute.xlu1 %9753 }
 0xb6f   : > { %v10061_v57 = vadd.f32 %v10029_v55, %v9581_v53  ;;  %v10028_v17 = vadd.f32 %v21858_v13, %v9836_v31  ;;  %v9839_v0 = vadd.f32 %v9754_v41, %v21859_v22  ;;  %v9585_v53 = vld [vmem:[%s19436_s14 + $0x60] sm:$0xff]  ;;  %v21866_v13 = vld [vmem:[#allocation151_spill] sm:$0xff] }
 0xb70   : > { %v9752_v60 = vpop.permute.xlu0 %9751 }
 0xb71   : > { %10093 = vst.msk [vmem:[%s19436_s14 + $0x40] sm:$0xff] %vm1523_vm0, %v10061_v57  ;;  %v10060_v34 = vadd.f32 %v10028_v17, %v9580_v20  ;;  %v10031_v7 = vadd.f32 %v21860_v24, %v9839_v0  ;;  %v9838_v62 = vadd.f32 %v9752_v60, %v21861_v5  ;;  %v21867_v17 = vld [vmem:[#allocation82_spill] sm:$0xff]  ;;  %v9584_v20 = vld [vmem:[%s19436_s14 + $0x58] sm:$0xff] }
 0xb72   : > { %v9758_v3 = vpop.permute.xlu1 %9757 }
 0xb73   : > { %10092 = vst.msk [vmem:[%s19436_s14 + $0x38] sm:$0xff] %vm1523_vm0, %v10060_v34  ;;  %v10063_v25 = vadd.f32 %v10031_v7, %v9583_v29  ;;  %v10030_v4 = vadd.f32 %v21862_v43, %v9838_v62  ;;  %v9841_v28 = vadd.f32 %v9758_v3, %v21863_v30  ;;  %v21868_v7 = vld [vmem:[#allocation96_spill] sm:$0xff]  ;;  %v21869_v62 = vld [vmem:[#allocation154_spill] sm:$0xff]  ;;  %v21870_v30 = vld [vmem:[#allocation157_spill] sm:$0xff] }
 0xb74   : > { %v10622_v21 = vld [vmem:[%s19436_s14 + $0x30] sm:$0xff]  ;;  %v9756_v58 = vpop.permute.xlu0 %9755 }
 0xb75   : > { %v11102_v51 = vadd.f32 %v20379_v46, %v10622_v21  ;;  %10095 = vst.msk [vmem:[%s19436_s14 + $0x50] sm:$0xff] %vm1523_vm0, %v10063_v25  ;;  %v10062_v48 = vadd.f32 %v10030_v4, %v9582_v44  ;;  %v10033_v55 = vadd.f32 %v21864_v23, %v9841_v28  ;;  %v9840_v31 = vadd.f32 %v9756_v58, %v21865_v35  ;;  %v9587_v25 = vld [vmem:[%s19436_s14 + $0x70] sm:$0xff] }
 0xb76   : > { %v9762_v41 = vpop.permute.xlu1 %9761  ;;  %v21871_v21 = vld [vmem:[#allocation135_spill] sm:$0xff] }
 0xb77   : > { %11134 = vst.msk [vmem:[%s19436_s14 + $0x30] sm:$0xff] %vm1523_vm0, %v11102_v51  ;;  %10094 = vst.msk [vmem:[%s19436_s14 + $0x48] sm:$0xff] %vm1523_vm0, %v10062_v48  ;;  %v10065_v57 = vadd.f32 %v10033_v55, %v9585_v53  ;;  %v10032_v46 = vadd.f32 %v21866_v13, %v9840_v31  ;;  %v9843_v22 = vadd.f32 %v9762_v41, %v21867_v17  ;;  %v9586_v51 = vld [vmem:[%s19436_s14 + $0x68] sm:$0xff]  ;;  %v21872_v55 = vld [vmem:[#allocation119_spill] sm:$0xff] }
 0xb78   : > { %v10624_v0 = vld [vmem:[%s19436_s14 + $0x40] sm:$0xff]  ;;  %v9760_v60 = vpop.permute.xlu0 %9759 }
 0xb79   : > { %v11104_v34 = vadd.f32 %v20401_v16, %v10624_v0  ;;  %10097 = vst.msk [vmem:[%s19436_s14 + $0x60] sm:$0xff] %vm1523_vm0, %v10065_v57  ;;  %v10064_v24 = vadd.f32 %v10032_v46, %v9584_v20  ;;  %v10035_v5 = vadd.f32 %v21868_v7, %v9843_v22  ;;  %v9842_v29 = vadd.f32 %v9760_v60, %v21869_v62  ;;  %v21873_v31 = vld [vmem:[#allocation117_spill] sm:$0xff]  ;;  %v21874_v0 = vld [vmem:[#allocation123_spill] sm:$0xff] }
 0xb7a   : > { %v10623_v3 = vld [vmem:[%s19436_s14 + $0x38] sm:$0xff]  ;;  %v9766_v43 = vpop.permute.xlu1 %9765  ;;  %v9589_v13 = vld [vmem:[%s19436_s14 + $0x80] sm:$0xff] }
 0xb7b   : > { %11136 = vst.msk [vmem:[%s19436_s14 + $0x40] sm:$0xff] %vm1523_vm0, %v11104_v34  ;;  %v11103_v4 = vadd.f32 %v20335_v40, %v10623_v3  ;;  %10096 = vst.msk [vmem:[%s19436_s14 + $0x58] sm:$0xff] %vm1523_vm0, %v10064_v24  ;;  %v10067_v16 = vadd.f32 %v10035_v5, %v9587_v25  ;;  %v10034_v28 = vadd.f32 %v21870_v30, %v9842_v29  ;;  %v9588_v34 = vld [vmem:[%s19436_s14 + $0x78] sm:$0xff]  ;;  %v21875_v24 = vld [vmem:[#allocation159_spill] sm:$0xff] }
 0xb7c   : > { %v9845_v44 = vadd.f32 %v9766_v43, %v21871_v21  ;;  %v10626_v58 = vld [vmem:[%s19436_s14 + $0x50] sm:$0xff]  ;;  %v9764_v48 = vpop.permute.xlu0 %9763 }
 0xb7d   : > { %11135 = vst.msk [vmem:[%s19436_s14 + $0x38] sm:$0xff] %vm1523_vm0, %v11103_v4  ;;  %v11106_v23 = vadd.f32 %v20422_v33, %v10626_v58  ;;  %10099 = vst.msk [vmem:[%s19436_s14 + $0x70] sm:$0xff] %vm1523_vm0, %v10067_v16  ;;  %v10066_v40 = vadd.f32 %v10034_v28, %v9586_v51  ;;  %v9844_v53 = vadd.f32 %v9764_v48, %v21873_v31  ;;  %v21876_v29 = vld [vmem:[#allocation107_spill] sm:$0xff]  ;;  %v21877_v4 = vld [vmem:[#allocation162_spill] sm:$0xff] }
 0xb7e   : > { %v10037_v35 = vadd.f32 %v21872_v55, %v9845_v44  ;;  %v20566_v41 = vld [vmem:[%s19436_s14 + $0x30] sm:$0xff]  ;;  %v10625_v57 = vld [vmem:[%s19436_s14 + $0x48] sm:$0xff]  ;;  %v9770_v46 = vpop.permute.xlu1 %9769 }
 0xb7f   : > { %v12538_v17 = vmul.f32 -1.442695, %v20566_v41  ;;  %11138 = vst.msk [vmem:[%s19436_s14 + $0x50] sm:$0xff] %vm1523_vm0, %v11106_v23  ;;  %v11105_v33 = vadd.f32 %v20352_v1, %v10625_v57  ;;  %10098 = vst.msk [vmem:[%s19436_s14 + $0x68] sm:$0xff] %vm1523_vm0, %v10066_v40  ;;  %v10036_v20 = vadd.f32 %v21874_v0, %v9844_v53  ;;  %v9847_v7 = vadd.f32 %v9770_v46, %v21875_v24  ;;  %v9591_v21 = vld [vmem:[%s19436_s14 + $0x90] sm:$0xff]  ;;  %v21878_v44 = vld [vmem:[#allocation158_spill] sm:$0xff] }
 0xb80   : > { %v10069_v22 = vadd.f32 %v10037_v35, %v9589_v13  ;;  %v10628_v60 = vld [vmem:[%s19436_s14 + $0x60] sm:$0xff]  ;;  %v9768_v5 = vpop.permute.xlu0 %9767  ;;  %v21879_v51 = vld [vmem:[#allocation167_spill] sm:$0xff]  ;;  %v9590_v35 = vld [vmem:[%s19436_s14 + $0x88] sm:$0xff] }
 0xb81   : > { %14706 = vpow2.f32 %v12538_v17  ;;  %11137 = vst.msk [vmem:[%s19436_s14 + $0x48] sm:$0xff] %vm1523_vm0, %v11105_v33  ;;  %v11108_v62 = vadd.f32 %v20437_v26, %v10628_v60  ;;  %v10068_v1 = vadd.f32 %v10036_v20, %v9588_v34  ;;  %v9846_v3 = vadd.f32 %v9768_v5, %v21876_v29  ;;  %v21880_v17 = vld [vmem:[#allocation170_spill] sm:$0xff]  ;;  %v9593_v34 = vld [vmem:[%s19436_s14 + $0xa0] sm:$0xff]  ;;  %v21882_v24 = vld [vmem:[#allocation175_spill] sm:$0xff] }
 0xb82   : > { %10101 = vst.msk [vmem:[%s19436_s14 + $0x80] sm:$0xff] %vm1523_vm0, %v10069_v22  ;;  %v20587_v25 = vld [vmem:[%s19436_s14 + $0x40] sm:$0xff]  ;;  %v10627_v43 = vld [vmem:[%s19436_s14 + $0x58] sm:$0xff]  ;;  %v10039_v16 = vadd.f32 %v21877_v4, %v9847_v7  ;;  %v9774_v30 = vpop.permute.xlu1 %9773 }
 0xb83   : > { %v12540_v28 = vmul.f32 -1.442695, %v20587_v25  ;;  %11140 = vst.msk [vmem:[%s19436_s14 + $0x60] sm:$0xff] %vm1523_vm0, %v11108_v62  ;;  %v11107_v26 = vadd.f32 %v20367_v10, %v10627_v43  ;;  %10100 = vst.msk [vmem:[%s19436_s14 + $0x78] sm:$0xff] %vm1523_vm0, %v10068_v1  ;;  %v10038_v58 = vadd.f32 %v21878_v44, %v9846_v3  ;;  %v9849_v48 = vadd.f32 %v9774_v30, %v21879_v51  ;;  %v21881_v22 = vld [vmem:[#allocation160_spill] sm:$0xff]  ;;  %v21883_v29 = vld [vmem:[#allocation165_spill] sm:$0xff] }
 0xb84   : > { %v20601_v23 = vld [vmem:[%s19436_s14 + $0x38] sm:$0xff]  ;;  %v10630_v40 = vld [vmem:[%s19436_s14 + $0x70] sm:$0xff]  ;;  %v10071_v55 = vadd.f32 %v10039_v16, %v9591_v21  ;;  %v9772_v31 = vpop.permute.xlu0 %9771 }
 0xb85   : > { %14708 = vpow2.f32 %v12540_v28  ;;  %v12539_v10 = vmul.f32 -1.442695, %v20601_v23  ;;  %11139 = vst.msk [vmem:[%s19436_s14 + $0x58] sm:$0xff] %vm1523_vm0, %v11107_v26  ;;  %v11110_v53 = vadd.f32 %v20448_v61, %v10630_v40  ;;  %v10070_v57 = vadd.f32 %v10038_v58, %v9590_v35  ;;  %v9592_v16 = vld [vmem:[%s19436_s14 + $0x98] sm:$0xff]  ;;  %v21884_v30 = vld [vmem:[#allocation83_spill] sm:$0xff] }
 0xb86   : > { %v20610_v13 = vld [vmem:[%s19436_s14 + $0x50] sm:$0xff]  ;;  %v10629_v46 = vld [vmem:[%s19436_s14 + $0x68] sm:$0xff]  ;;  %10103 = vst.msk [vmem:[%s19436_s14 + $0x90] sm:$0xff] %vm1523_vm0, %v10071_v55  ;;  %v10041_v33 = vadd.f32 %v21880_v17, %v9849_v48  ;;  %v9848_v0 = vadd.f32 %v9772_v31, %v21881_v22  ;;  %v9778_v20 = vpop.permute.xlu1 %9777  ;;  %v21885_v51 = vld [vmem:[#allocation168_spill] sm:$0xff] }
 0xb87   : > { %14710 = vpow2.f32 %v12539_v10  ;;  %v12542_v60 = vmul.f32 -1.442695, %v20610_v13  ;;  %11142 = vst.msk [vmem:[%s19436_s14 + $0x70] sm:$0xff] %vm1523_vm0, %v11110_v53  ;;  %v11109_v61 = vadd.f32 %v20387_v11, %v10629_v46  ;;  %10102 = vst.msk [vmem:[%s19436_s14 + $0x88] sm:$0xff] %vm1523_vm0, %v10070_v57  ;;  %v9851_v7 = vadd.f32 %v9778_v20, %v21882_v24  ;;  %v9595_v58 = vld [vmem:[%s19436_s14 + $0xb0] sm:$0xff]  ;;  %v21886_v57 = vld [vmem:[#allocation173_spill] sm:$0xff] }
 0xb88   : > { %v20626_v5 = vld [vmem:[%s19436_s14 + $0x48] sm:$0xff]  ;;  %v10073_v1 = vadd.f32 %v10041_v33, %v9593_v34  ;;  %v10040_v3 = vadd.f32 %v21883_v29, %v9848_v0  ;;  %v9776_v43 = vpop.permute.xlu0 %9775  ;;  %v21887_v17 = vld [vmem:[#allocation64_spill] sm:$0xff] }
 0xb89   : > { %v10632_v62 = vld [vmem:[%s19436_s14 + $0x80] sm:$0xff]  ;;  %14712 = vpow2.f32 %v12542_v60  ;;  %v12541_v4 = vmul.f32 -1.442695, %v20626_v5  ;;  %11141 = vst.msk [vmem:[%s19436_s14 + $0x68] sm:$0xff] %vm1523_vm0, %v11109_v61  ;;  %v10043_v28 = vadd.f32 %v21884_v30, %v9851_v7  ;;  %v9850_v48 = vadd.f32 %v9776_v43, %v21885_v51  ;;  %v9594_v20 = vld [vmem:[%s19436_s14 + $0xa8] sm:$0xff]  ;;  %v21888_v60 = vld [vmem:[#allocation176_spill] sm:$0xff] }
 0xb8a   : > { %v11112_v11 = vadd.f32 %v20460_v36, %v10632_v62  ;;  %v20637_v26 = vld [vmem:[%s19436_s14 + $0x60] sm:$0xff]  ;;  %v10631_v21 = vld [vmem:[%s19436_s14 + $0x78] sm:$0xff]  ;;  %10105 = vst.msk [vmem:[%s19436_s14 + $0xa0] sm:$0xff] %vm1523_vm0, %v10073_v1  ;;  %v10072_v44 = vadd.f32 %v10040_v3, %v9592_v16  ;;  %v9782_v40 = vpop.permute.xlu1 %9781  ;;  %v21891_v51 = vld [vmem:[#allocation66_spill] sm:$0xff] }
 0xb8b   : > { %v14707_v55 = vpop.eup %14706  ;;  %14714 = vpow2.f32 %v12541_v4  ;;  %v12544_v36 = vmul.f32 -1.442695, %v20637_v26  ;;  %v11111_v35 = vadd.f32 %v20407_v14, %v10631_v21  ;;  %v10075_v31 = vadd.f32 %v10043_v28, %v9595_v58  ;;  %v21889_v1 = vld [vmem:[#allocation76_spill] sm:$0xff]  ;;  %v9597_v16 = vld [vmem:[%s19436_s14 + $0xc0] sm:$0xff] }
 0xb8c   : > { %11144 = vst.msk [vmem:[%s19436_s14 + $0x80] sm:$0xff] %vm1523_vm0, %v11112_v11  ;;  %v11294_v10 = vadd.f32 1.0, %v14707_v55  ;;  %v20649_v53 = vld [vmem:[%s19436_s14 + $0x58] sm:$0xff]  ;;  %10104 = vst.msk [vmem:[%s19436_s14 + $0x98] sm:$0xff] %vm1523_vm0, %v10072_v44  ;;  %v10042_v46 = vadd.f32 %v21886_v57, %v9850_v48  ;;  %v9853_v33 = vadd.f32 %v9782_v40, %v21887_v17  ;;  %v9780_v22 = vpop.permute.xlu0 %9779  ;;  %v21890_v30 = vld [vmem:[#allocation177_spill] sm:$0xff] }
 0xb8d   : > { %14716 = vpow2.f32 %v12544_v36  ;;  %v12543_v0 = vmul.f32 -1.442695, %v20649_v53  ;;  %11143 = vst.msk [vmem:[%s19436_s14 + $0x78] sm:$0xff] %vm1523_vm0, %v11111_v35  ;;  %v10634_v14 = vld [vmem:[%s19436_s14 + $0x90] sm:$0xff]  ;;  %10107 = vst.msk [vmem:[%s19436_s14 + $0xb0] sm:$0xff] %vm1523_vm0, %v10075_v31  ;;  %v9852_v61 = vadd.f32 %v9780_v22, %v21888_v60  ;;  %v9596_v58 = vld [vmem:[%s19436_s14 + $0xb8] sm:$0xff] }
 0xb8e   : > { %14718 = vrcp.f32 %v11294_v10  ;;  %v20664_v34 = vld [vmem:[%s19436_s14 + $0x70] sm:$0xff]  ;;  %v11114_v24 = vadd.f32 %v20468_v42, %v10634_v14  ;;  %v10633_v7 = vld [vmem:[%s19436_s14 + $0x88] sm:$0xff]  ;;  %v10074_v62 = vadd.f32 %v10042_v46, %v9594_v20  ;;  %v10045_v29 = vadd.f32 %v21889_v1, %v9853_v33  ;;  %v9786_v3 = vpop.permute.xlu1 %9785  ;;  %v21892_v31 = vld [vmem:[#allocation77_spill] sm:$0xff] }
 0xb8f   : > { %v14709_v43 = vpop.eup %14708  ;;  %14720 = vpow2.f32 %v12543_v0  ;;  %v12546_v4 = vmul.f32 -1.442695, %v20664_v34  ;;  %v11113_v11 = vadd.f32 %v20426_v54, %v10633_v7  ;;  %v10044_v28 = vadd.f32 %v21890_v30, %v9852_v61  ;;  %v21893_v33 = vld [vmem:[#allocation56_spill] sm:$0xff]  ;;  %v9599_v61 = vld [vmem:[%s19436_s14 + $0xd0] sm:$0xff] }
 0xb90   : > { %v11296_v21 = vadd.f32 1.0, %v14709_v43  ;;  %v20674_v44 = vld [vmem:[%s19436_s14 + $0x68] sm:$0xff]  ;;  %11146 = vst.msk [vmem:[%s19436_s14 + $0x90] sm:$0xff] %vm1523_vm0, %v11114_v24  ;;  %10106 = vst.msk [vmem:[%s19436_s14 + $0xa8] sm:$0xff] %vm1523_vm0, %v10074_v62  ;;  %v10077_v42 = vadd.f32 %v10045_v29, %v9597_v16  ;;  %v9855_v48 = vadd.f32 %v9786_v3, %v21891_v51  ;;  %v9784_v40 = vpop.permute.xlu0 %9783  ;;  %v21894_v24 = vld [vmem:[#allocation52_spill] sm:$0xff] }
 0xb91   : > { %v14711_v55 = vpop.eup %14710  ;;  %14722 = vpow2.f32 %v12546_v4  ;;  %v12545_v54 = vmul.f32 -1.442695, %v20674_v44  ;;  %11145 = vst.msk [vmem:[%s19436_s14 + $0x88] sm:$0xff] %vm1523_vm0, %v11113_v11  ;;  %v10636_v36 = vld [vmem:[%s19436_s14 + $0xa0] sm:$0xff]  ;;  %v10076_v35 = vadd.f32 %v10044_v28, %v9596_v58  ;;  %v9854_v10 = vadd.f32 %v9784_v40, %v21892_v31  ;;  %v21895_v62 = vld [vmem:[#allocation47_spill] sm:$0xff]  ;;  %v9598_v11 = vld [vmem:[%s19436_s14 + $0xc8] sm:$0xff] }
 0xb92   : > { %14724 = vrcp.f32 %v11296_v21  ;;  %v11295_v57 = vadd.f32 1.0, %v14711_v55  ;;  %v11116_v17 = vadd.f32 %v20477_v19, %v10636_v36  ;;  %10109 = vst.msk [vmem:[%s19436_s14 + $0xc0] sm:$0xff] %vm1523_vm0, %v10077_v42  ;;  %v10047_v22 = vadd.f32 %v21893_v33, %v9855_v48  ;;  %v9790_v0 = vpop.permute.xlu1 %9789  ;;  %v21896_v51 = vld [vmem:[#allocation48_spill] sm:$0xff] }
 0xb93   : > { %v20688_v46 = vld [vmem:[%s19436_s14 + $0x80] sm:$0xff]  ;;  %v14713_v14 = vpop.eup %14712  ;;  %14726 = vpow2.f32 %v12545_v54  ;;  %v10635_v60 = vld [vmem:[%s19436_s14 + $0x98] sm:$0xff]  ;;  %10108 = vst.msk [vmem:[%s19436_s14 + $0xb8] sm:$0xff] %vm1523_vm0, %v10076_v35  ;;  %v10046_v7 = vadd.f32 %v21894_v24, %v9854_v10  ;;  %v9857_v1 = vadd.f32 %v9790_v0, %v21895_v62 }
 0xb94   : > { %v12548_v20 = vmul.f32 -1.442695, %v20688_v46  ;;  %14728 = vrcp.f32 %v11295_v57  ;;  %v11298_v19 = vadd.f32 1.0, %v14713_v14  ;;  %v20702_v29 = vld [vmem:[%s19436_s14 + $0x78] sm:$0xff]  ;;  %11148 = vst.msk [vmem:[%s19436_s14 + $0xa0] sm:$0xff] %vm1523_vm0, %v11116_v17  ;;  %v11115_v3 = vadd.f32 %v20453_v37, %v10635_v60  ;;  %v10638_v43 = vld [vmem:[%s19436_s14 + $0xb0] sm:$0xff]  ;;  %v9788_v16 = vpop.permute.xlu0 %9787 }
 0xb95   : > { %v10079_v4 = vadd.f32 %v10047_v22, %v9599_v61  ;;  %v14715_v30 = vpop.eup %14714  ;;  %v12547_v28 = vmul.f32 -1.442695, %v20702_v29  ;;  %v11118_v21 = vadd.f32 %v20491_v9, %v10638_v43  ;;  %v10078_v42 = vadd.f32 %v10046_v7, %v9598_v11  ;;  %v9601_v10 = vld [vmem:[%s19436_s14 + $0xe0] sm:$0xff]  ;;  %v9600_v7 = vld [vmem:[%s19436_s14 + $0xd8] sm:$0xff] }
 0xb96   : > { %14730 = vpow2.f32 %v12548_v20  ;;  %v11297_v58 = vadd.f32 1.0, %v14715_v30  ;;  %11147 = vst.msk [vmem:[%s19436_s14 + $0x98] sm:$0xff] %vm1523_vm0, %v11115_v3  ;;  %v10049_v37 = vadd.f32 %v20169_v45, %v9857_v1  ;;  %v9856_v48 = vadd.f32 %v9788_v16, %v21896_v51  ;;  %v21897_v20 = vld [vmem:[#allocation70_spill] sm:$0xff]  ;;  %v21898_v62 = vld [vmem:[#allocation92_spill] sm:$0xff] }
 0xb97   : > { %14732 = vrcp.f32 %v11298_v19  ;;  %10111 = vst.msk [vmem:[%s19436_s14 + $0xd0] sm:$0xff] %vm1523_vm0, %v10079_v4  ;;  %v14717_v40 = vpop.eup %14716  ;;  %v20718_v55 = vld [vmem:[%s19436_s14 + $0x90] sm:$0xff]  ;;  %11150 = vst.msk [vmem:[%s19436_s14 + $0xb0] sm:$0xff] %vm1523_vm0, %v11118_v21  ;;  %v10637_v9 = vld [vmem:[%s19436_s14 + $0xa8] sm:$0xff] }
 0xb98   : > { %14734 = vpow2.f32 %v12547_v28  ;;  %10110 = vst.msk [vmem:[%s19436_s14 + $0xc8] sm:$0xff] %vm1523_vm0, %v10078_v42  ;;  %v14719_v54 = vpop.eup %14718  ;;  %v11300_v36 = vadd.f32 1.0, %v14717_v40  ;;  %v12550_v35 = vmul.f32 -1.442695, %v20718_v55  ;;  %v20727_v45 = vld [vmem:[%s19436_s14 + $0x88] sm:$0xff]  ;;  %v11117_v31 = vadd.f32 %v20484_v38, %v10637_v9  ;;  %v9792_v57 = vpop.permute.xlu0 %9791 }
 0xb99   : > { %14736 = vrcp.f32 %v11297_v58  ;;  %v14721_v17 = vpop.eup %14720  ;;  %v11390_v33 = vmul.f32 %v14719_v54, %v20566_v41  ;;  %v12549_v22 = vmul.f32 -1.442695, %v20727_v45  ;;  %v10640_v0 = vld [vmem:[%s19436_s14 + $0xc0] sm:$0xff]  ;;  %v10081_v14 = vadd.f32 %v10049_v37, %v9601_v10  ;;  %v9602_v21 = vld [vmem:[%s19436_s14 + $0xe8] sm:$0xff] }
 0xb9a   : > { %v10048_v60 = vadd.f32 %v21897_v20, %v9856_v48  ;;  %14738 = vrcp.f32 %v11300_v36  ;;  %v11299_v61 = vadd.f32 1.0, %v14721_v17  ;;  %11149 = vst.msk [vmem:[%s19436_s14 + $0xa8] sm:$0xff] %vm1523_vm0, %v11117_v31  ;;  %v11120_v38 = vadd.f32 %v20499_v2, %v10640_v0  ;;  %v10639_v24 = vld [vmem:[%s19436_s14 + $0xb8] sm:$0xff] }
 0xb9b   : > { %v9858_v1 = vadd.f32 %v9792_v57, %v21898_v62  ;;  %v14723_v19 = vpop.eup %14722  ;;  %11422 = vst.msk [vmem:[%s19436_s14 + $0x30] sm:$0xff] %vm1523_vm0, %v11390_v33  ;;  %14740 = vpow2.f32 %v12550_v35  ;;  %v20744_v41 = vld [vmem:[%s19436_s14 + $0xa0] sm:$0xff]  ;;  %v11119_v3 = vadd.f32 %v20495_v50, %v10639_v24  ;;  %10113 = vst.msk [vmem:[%s19436_s14 + $0xe0] sm:$0xff] %vm1523_vm0, %v10081_v14  ;;  %v9603_v62 = vld [vmem:[%s19436_s14 + $0xf0] sm:$0xff] }
 0xb9c   : > { %v10080_v43 = vadd.f32 %v10048_v60, %v9600_v7  ;;  %v14725_v2 = vpop.eup %14724  ;;  %14742 = vrcp.f32 %v11299_v61  ;;  %v11302_v4 = vadd.f32 1.0, %v14723_v19  ;;  %v12552_v11 = vmul.f32 -1.442695, %v20744_v41  ;;  %11152 = vst.msk [vmem:[%s19436_s14 + $0xc0] sm:$0xff] %vm1523_vm0, %v11120_v38 }
 0xb9d   : > { %v10050_v16 = vadd.f32 %v20196_v12, %v9858_v1  ;;  %v14727_v30 = vpop.eup %14726  ;;  %v11392_v28 = vmul.f32 %v14725_v2, %v20587_v25  ;;  %14744 = vpow2.f32 %v12549_v22  ;;  %v20755_v50 = vld [vmem:[%s19436_s14 + $0x98] sm:$0xff]  ;;  %11151 = vst.msk [vmem:[%s19436_s14 + $0xb8] sm:$0xff] %vm1523_vm0, %v11119_v3 }
 0xb9e   : > { %10112 = vst.msk [vmem:[%s19436_s14 + $0xd8] sm:$0xff] %vm1523_vm0, %v10080_v43  ;;  %v14729_v42 = vpop.eup %14728  ;;  %14746 = vrcp.f32 %v11302_v4  ;;  %v11301_v58 = vadd.f32 1.0, %v14727_v30  ;;  %v12551_v37 = vmul.f32 -1.442695, %v20755_v50  ;;  %v20764_v12 = vld [vmem:[%s19436_s14 + $0xb0] sm:$0xff] }
 0xb9f   : > { %v10641_v51 = vld [vmem:[%s19436_s14 + $0xc8] sm:$0xff]  ;;  %v10082_v25 = vadd.f32 %v10050_v16, %v9602_v21  ;;  %11424 = vst.msk [vmem:[%s19436_s14 + $0x40] sm:$0xff] %vm1523_vm0, %v11392_v28  ;;  %v11391_v40 = vmul.f32 %v14729_v42, %v20601_v23  ;;  %14748 = vpow2.f32 %v12552_v11  ;;  %v12554_v9 = vmul.f32 -1.442695, %v20764_v12 }
 0xba0   : > { %v14731_v48 = vpop.eup %14730  ;;  %v11121_v54 = vadd.f32 %v20506_v59, %v10641_v51  ;;  %14750 = vrcp.f32 %v11301_v58  ;;  %v10642_v58 = vld [vmem:[%s19436_s14 + $0xd0] sm:$0xff] }
 0xba1   : > { %v14733_v36 = vpop.eup %14732  ;;  %v11304_v35 = vadd.f32 1.0, %v14731_v48  ;;  %10114 = vst.msk [vmem:[%s19436_s14 + $0xe8] sm:$0xff] %vm1523_vm0, %v10082_v25  ;;  %11423 = vst.msk [vmem:[%s19436_s14 + $0x38] sm:$0xff] %vm1523_vm0, %v11391_v40  ;;  %14752 = vpow2.f32 %v12551_v37  ;;  %v20778_v23 = vld [vmem:[%s19436_s14 + $0xa8] sm:$0xff] }
 0xba2   : > { %v14735_v31 = vpop.eup %14734  ;;  %v11394_v10 = vmul.f32 %v14733_v36, %v20610_v13  ;;  %11153 = vst.msk [vmem:[%s19436_s14 + $0xc8] sm:$0xff] %vm1523_vm0, %v11121_v54  ;;  %v12553_v17 = vmul.f32 -1.442695, %v20778_v23  ;;  %v9794_v33 = vpop.permute.xlu1 %9793 }
 0xba3   : > { %v14737_v59 = vpop.eup %14736  ;;  %14754 = vrcp.f32 %v11304_v35  ;;  %v11303_v57 = vadd.f32 1.0, %v14735_v31  ;;  %v20787_v13 = vld [vmem:[%s19436_s14 + $0xc0] sm:$0xff]  ;;  %v9859_v0 = vadd.f32 %v9794_v33, %v20373_v49 }
 0xba4   : > { %11426 = vst.msk [vmem:[%s19436_s14 + $0x50] sm:$0xff] %vm1523_vm0, %v11394_v10  ;;  %v11393_v22 = vmul.f32 %v14737_v59, %v20626_v5  ;;  %14756 = vpow2.f32 %v12554_v9  ;;  %v14739_v14 = vpop.eup %14738  ;;  %v12556_v20 = vmul.f32 -1.442695, %v20787_v13  ;;  %v20792_v60 = vld [vmem:[%s19436_s14 + $0xb8] sm:$0xff] }
 0xba5   : > { %14758 = vrcp.f32 %v11303_v57  ;;  %v14741_v61 = vpop.eup %14740  ;;  %v11396_v38 = vmul.f32 %v14739_v14, %v20637_v26  ;;  %v12555_v5 = vmul.f32 -1.442695, %v20792_v60  ;;  %v10051_v24 = vadd.f32 %v20412_v6, %v9859_v0 }
 0xba6   : > { %11425 = vst.msk [vmem:[%s19436_s14 + $0x48] sm:$0xff] %vm1523_vm0, %v11393_v22  ;;  %14760 = vpow2.f32 %v12553_v17  ;;  %v14743_v7 = vpop.eup %14742  ;;  %v11306_v49 = vadd.f32 1.0, %v14741_v61  ;;  %v10829_v1 = vpop.permute.xlu1 %10828 }
 0xba7   : > { %14762 = vpow2.f32 %v12556_v20  ;;  %v14745_v19 = vpop.eup %14744  ;;  %11428 = vst.msk [vmem:[%s19436_s14 + $0x60] sm:$0xff] %vm1523_vm0, %v11396_v38  ;;  %v11395_v3 = vmul.f32 %v14743_v7, %v20649_v53  ;;  %v10083_v26 = vadd.f32 %v10051_v24, %v9603_v62  ;;  %v10898_v43 = vadd.f32 %v10829_v1, %v20176_v27 }
 0xba8   : > { %14764 = vpow2.f32 %v12555_v5  ;;  %v14747_v2 = vpop.eup %14746  ;;  %v11305_v6 = vadd.f32 1.0, %v14745_v19  ;;  %v9796_v11 = vpop.permute.xlu0 %9795 }
 0xba9   : > { %14766 = vrcp.f32 %v11306_v49  ;;  %v20805_v4 = vld [vmem:[%s19436_s14 + $0xc8] sm:$0xff]  ;;  %v14749_v16 = vpop.eup %14748  ;;  %11427 = vst.msk [vmem:[%s19436_s14 + $0x58] sm:$0xff] %vm1523_vm0, %v11395_v3  ;;  %v11398_v30 = vmul.f32 %v14747_v2, %v20664_v34  ;;  %10115 = vst.msk [vmem:[%s19436_s14 + $0xf0] sm:$0xff] %vm1523_vm0, %v10083_v26  ;;  %v11090_v53 = vadd.f32 %v20216_v39, %v10898_v43  ;;  %v9860_v27 = vadd.f32 %v9796_v11, %v20390_v47  ;;  %v9604_v47 = vld [vmem:[%s19436_s14 + $0xf8] sm:$0xff] }
 0xbaa   : > { %v12557_v28 = vmul.f32 -1.442695, %v20805_v4  ;;  %v14751_v21 = vpop.eup %14750  ;;  %14768 = vrcp.f32 %v11305_v6  ;;  %v11308_v42 = vadd.f32 1.0, %v14749_v16  ;;  %v10833_v37 = vpop.permute.xlu1 %10832  ;;  %v10645_v11 = vld [vmem:[%s19436_s14 + $0xe8] sm:$0xff] }
 0xbab   : > { %v14753_v51 = vpop.eup %14752  ;;  %11430 = vst.msk [vmem:[%s19436_s14 + $0x70] sm:$0xff] %vm1523_vm0, %v11398_v30  ;;  %v11397_v34 = vmul.f32 %v14751_v21, %v20674_v44  ;;  %v11122_v25 = vadd.f32 %v11090_v53, %v10642_v58  ;;  %v10052_v48 = vadd.f32 %v20434_v15, %v9860_v27  ;;  %v10900_v9 = vadd.f32 %v10833_v37, %v20382_v56 }
 0xbac   : > { %14770 = vpow2.f32 %v12557_v28  ;;  %v11307_v40 = vadd.f32 1.0, %v14753_v51  ;;  %v10831_v54 = vpop.permute.xlu0 %10830 }
 0xbad   : > { %v14755_v39 = vpop.eup %14754  ;;  %14772 = vrcp.f32 %v11308_v42  ;;  %11429 = vst.msk [vmem:[%s19436_s14 + $0x68] sm:$0xff] %vm1523_vm0, %v11397_v34  ;;  %11154 = vst.msk [vmem:[%s19436_s14 + $0xd0] sm:$0xff] %vm1523_vm0, %v11122_v25  ;;  %v10084_v44 = vadd.f32 %v10052_v48, %v9604_v47  ;;  %v10899_v15 = vadd.f32 %v10831_v54, %v20185_v8  ;;  %v11092_v59 = vadd.f32 %v20418_v52, %v10900_v9  ;;  %v10643_v52 = vld [vmem:[%s19436_s14 + $0xd8] sm:$0xff] }
 0xbae   : > { %v14757_v36 = vpop.eup %14756  ;;  %v11400_v35 = vmul.f32 %v14755_v39, %v20688_v46  ;;  %14774 = vrcp.f32 %v11307_v40  ;;  %v20829_v56 = vpop.f32.mrb[36].mxu1  ;;  %v10644_v46 = vld [vmem:[%s19436_s14 + $0xe0] sm:$0xff] }
 0xbaf   : > { %v14759_v31 = vpop.eup %14758  ;;  %v11310_v10 = vadd.f32 1.0, %v14757_v36  ;;  %10116 = vst.msk [vmem:[%s19436_s14 + $0xf8] sm:$0xff] %vm1523_vm0, %v10084_v44  ;;  %v11091_v33 = vadd.f32 %v20242_v63, %v10899_v15  ;;  %v10601_v8 = vpop.f32.mrb[37].mxu1  ;;  %v11124_v14 = vadd.f32 %v11092_v59, %v10644_v46  ;;  %v10771_v20 = vrot.slane %v20829_v56, 1 }
 0xbb0   : > { %v14761_v57 = vpop.eup %14760  ;;  %11432 = vst.msk [vmem:[%s19436_s14 + $0x80] sm:$0xff] %vm1523_vm0, %v11400_v35  ;;  %v11399_v17 = vmul.f32 %v14759_v31, %v20702_v29  ;;  %v10835_v61 = vpop.permute.xlu0 %10834  ;;  %v11027_v19 = vrot.slane %v10601_v8, 2 }
 0xbb1   : > { %v14763_v22 = vpop.eup %14762  ;;  %14776 = vrcp.f32 %v11310_v10  ;;  %v11309_v0 = vadd.f32 1.0, %v14761_v57  ;;  %v20840_v38 = vpop.f32.mrb[38].mxu1  ;;  %v11123_v24 = vadd.f32 %v11091_v33, %v10643_v52  ;;  %v10901_v63 = vadd.f32 %v10835_v61, %v20392_v18  ;;  %11156 = vst.msk [vmem:[%s19436_s14 + $0xe0] sm:$0xff] %vm1523_vm0, %v11124_v14 }
 0xbb2   : > { %v14765_v5 = vpop.eup %14764  ;;  %11431 = vst.msk [vmem:[%s19436_s14 + $0x78] sm:$0xff] %vm1523_vm0, %v11399_v17  ;;  %v11312_v29 = vadd.f32 1.0, %v14763_v22  ;;  %v10772_v7 = vrot.slane %v20840_v38, 1  ;;  %v10605_v49 = vpop.f32.mrb[39].mxu1 }
 0xbb3   : > { %v14767_v62 = vpop.eup %14766  ;;  %14778 = vrcp.f32 %v11309_v0  ;;  %v11311_v1 = vadd.f32 1.0, %v14765_v5  ;;  %v11028_v3 = vrot.slane %v10605_v49, 2  ;;  %11155 = vst.msk [vmem:[%s19436_s14 + $0xd8] sm:$0xff] %vm1523_vm0, %v11123_v24  ;;  %v11093_v18 = vadd.f32 %v20441_v32, %v10901_v63 }
 0xbb4   : > { %v11402_v26 = vmul.f32 %v14767_v62, %v20718_v55  ;;  %14780 = vrcp.f32 %v11312_v29  ;;  %v10773_v43 = vsel %vm8609_vm10, %v10771_v20, %v10772_v7  ;;  %v14769_v2 = vpop.eup %14768  ;;  %v20854_v6 = vld [vmem:[%s19436_s14 + $0xd0] sm:$0xff] }
 0xbb5   : > { %14782 = vrcp.f32 %v11311_v1  ;;  %10836 = vrot.lane.b32.xlu1 %v10773_v43, %s15278_s20  ;;  %v20859_v16 = vsel %vm8866_vm11, %v11027_v19, %v11028_v3  ;;  %v11401_v30 = vmul.f32 %v14769_v2, %v20727_v45  ;;  %v12558_v32 = vmul.f32 -1.442695, %v20854_v6  ;;  %v10646_v1 = vld [vmem:[%s19436_s14 + $0xf0] sm:$0xff] }
 0xbb6   : > { %v14771_v55 = vpop.eup %14770  ;;  %11434 = vst.msk [vmem:[%s19436_s14 + $0x90] sm:$0xff] %vm1523_vm0, %v11402_v26  ;;  %v11125_v28 = vadd.f32 %v11093_v18, %v10645_v11  ;;  %v10609_v21 = vpop.f32.mrb[40].mxu1  ;;  %v10647_v43 = vld [vmem:[%s19436_s14 + $0xf8] sm:$0xff] }
 0xbb7   : > { %v14773_v53 = vpop.eup %14772  ;;  %v11313_v27 = vadd.f32 1.0, %v14771_v55  ;;  %11433 = vst.msk [vmem:[%s19436_s14 + $0x88] sm:$0xff] %vm1523_vm0, %v11401_v30  ;;  %14784 = vpow2.f32 %v12558_v32  ;;  %v10774_v58 = vrot.slane %v10609_v21, 1  ;;  %v10611_v37 = vpop.f32.mrb[41].mxu1 }
 0xbb8   : > { %v11404_v42 = vmul.f32 %v14773_v53, %v20744_v41  ;;  %11157 = vst.msk [vmem:[%s19436_s14 + $0xe8] sm:$0xff] %vm1523_vm0, %v11125_v28  ;;  %v14775_v45 = vpop.eup %14774  ;;  %v11030_v51 = vrot.slane %v10611_v37, 2  ;;  %v10613_v34 = vpop.f32.mrb[42].mxu1  ;;  %v11188_v48 = vld [vmem:[%s19436_s14 + $0xe0] sm:$0xff] }
 0xbb9   : > { %14786 = vrcp.f32 %v11313_v27  ;;  %v11403_v25 = vmul.f32 %v14775_v45, %v20755_v50  ;;  %v10614_v39 = vpop.f32.mrb[43].mxu1  ;;  %v10775_v41 = vsel %vm8609_vm10, %v10772_v7, %v10774_v58  ;;  %v12560_v47 = vmul.f32 -1.442695, %v11188_v48 }
 0xbba   : > { %11436 = vst.msk [vmem:[%s19436_s14 + $0xa0] sm:$0xff] %vm1523_vm0, %v11404_v42  ;;  %v11187_v9 = vld [vmem:[%s19436_s14 + $0xd8] sm:$0xff]  ;;  %10838 = vrot.lane.b32.xlu0 %v10775_v41, %s15278_s20  ;;  %v11031_v54 = vsel %vm8866_vm11, %v11028_v3, %v11030_v51  ;;  %s15102_s20 = scalar_lea.vmem %s15101_s18, 8192 }
 0xbbb   : > { %v14777_v40 = vpop.eup %14776  ;;  %11435 = vst.msk [vmem:[%s19436_s14 + $0x98] sm:$0xff] %vm1523_vm0, %v11403_v25  ;;  %v12559_v50 = vmul.f32 -1.442695, %v11187_v9  ;;  %14788 = vpow2.f32 %v12560_v47  ;;  %p15104_p12 = scmp.lt.s32.totalorder %s15102_s20, %s15096_s2 }
 0xbbc   : > { %v11406_v36 = vmul.f32 %v14777_v40, %v20764_v12 }
 0xbbd   : > { %v14779_v35 = vpop.eup %14778  ;;  %14790 = vpow2.f32 %v12559_v50  ;;  %p15105_p7 = por %p15104_p12, %p15103_p0 }
 0xbbe   : > { %v14781_v44 = vpop.eup %14780  ;;  %11438 = vst.msk [vmem:[%s19436_s14 + $0xb0] sm:$0xff] %vm1523_vm0, %v11406_v36  ;;  %v11405_v15 = vmul.f32 %v14779_v35, %v20778_v23 }
 0xbbf   : > { %v14783_v31 = vpop.eup %14782  ;;  %v11408_v10 = vmul.f32 %v14781_v44, %v20787_v13  ;;  %v11189_v59 = vld [vmem:[%s19436_s14 + $0xe8] sm:$0xff]  ;;  %p15106_p5 = pnand %p15105_p7, %p15099_p3 }
 0xbc0   : > { %11437 = vst.msk [vmem:[%s19436_s14 + $0xa8] sm:$0xff] %vm1523_vm0, %v11405_v15  ;;  %v11407_v57 = vmul.f32 %v14783_v31, %v20792_v60  ;;  %v12561_v12 = vmul.f32 -1.442695, %v11189_v59 }
 0xbc1   : > { %11440 = vst.msk [vmem:[%s19436_s14 + $0xc0] sm:$0xff] %vm1523_vm0, %v11408_v10  ;;  %v14785_v17 = vpop.eup %14784 }
 0xbc2   : > { %11439 = vst.msk [vmem:[%s19436_s14 + $0xb8] sm:$0xff] %vm1523_vm0, %v11407_v57  ;;  %14792 = vpow2.f32 %v12561_v12  ;;  %v11314_v23 = vadd.f32 1.0, %v14785_v17 }
 0xbc3   : > { %v14787_v46 = vpop.eup %14786 }
 0xbc4   : > { %v11409_v33 = vmul.f32 %v14787_v46, %v20805_v4  ;;  %14794 = vrcp.f32 %v11314_v23 }
 0xbc5   : > { %v14789_v13 = vpop.eup %14788 }
 0xbc6   : > { %11441 = vst.msk [vmem:[%s19436_s14 + $0xc8] sm:$0xff] %vm1523_vm0, %v11409_v33  ;;  %v11316_v60 = vadd.f32 1.0, %v14789_v13 }
 0xbc7   : > { %v14791_v8 = vpop.eup %14790 }
 0xbc8   : > { %v11315_v22 = vadd.f32 1.0, %v14791_v8  ;;  %14796 = vrcp.f32 %v11316_v60 }
 0xbca   : > { %14798 = vrcp.f32 %v11315_v22 }
 0xbcc   : > { %v14793_v0 = vpop.eup %14792 }
 0xbcd   : > { %v11317_v14 = vadd.f32 1.0, %v14793_v0 }
 0xbce   : > { %v14795_v52 = vpop.eup %14794 }
 0xbcf   : > { %14800 = vrcp.f32 %v11317_v14  ;;  %v11410_v20 = vmul.f32 %v14795_v52, %v20854_v6 }
 0xbd1   : > { %11442 = vst.msk [vmem:[%s19436_s14 + $0xd0] sm:$0xff] %vm1523_vm0, %v11410_v20 }
 0xbd2   : > { %v14797_v4 = vpop.eup %14796 }
 0xbd3   : > { %v11412_v5 = vmul.f32 %v14797_v4, %v11188_v48 }
 0xbd4   : > { %v14799_v61 = vpop.eup %14798 }
 0xbd5   : > { %v11411_v29 = vmul.f32 %v14799_v61, %v11187_v9  ;;  %11444 = vst.msk [vmem:[%s19436_s14 + $0xe0] sm:$0xff] %vm1523_vm0, %v11412_v5 }
 0xbd7   : > { %11443 = vst.msk [vmem:[%s19436_s14 + $0xd8] sm:$0xff] %vm1523_vm0, %v11411_v29 }
 0xbd9   : > { %v14801_v24 = vpop.eup %14800 }
 0xbda   : > { %v11413_v63 = vmul.f32 %v14801_v24, %v11189_v59 }
 0xbdc   : > { %11445 = vst.msk [vmem:[%s19436_s14 + $0xe8] sm:$0xff] %vm1523_vm0, %v11413_v63 }
 0xc27   : > { %v10837_v7 = vpop.permute.xlu1 %10836 }
 0xc28   : > { %v10902_v49 = vadd.f32 %v10837_v7, %v20829_v56 }
 0xc2a   : > { %v11094_v62 = vadd.f32 %v20859_v16, %v10902_v49 }
 0xc2c   : > { %v11126_v19 = vadd.f32 %v11094_v62, %v10646_v1  ;;  %v10839_v3 = vpop.permute.xlu0 %10838 }
 0xc2d   : > { %v10903_v26 = vadd.f32 %v10839_v3, %v20840_v38 }
 0xc2e   : > { %11158 = vst.msk [vmem:[%s19436_s14 + $0xf0] sm:$0xff] %vm1523_vm0, %v11126_v19 }
 0xc2f   : > { %v11095_v18 = vadd.f32 %v11031_v54, %v10903_v26 }
 0xc31   : > { %v11127_v2 = vadd.f32 %v11095_v18, %v10647_v43 }
 0xc33   : > { %11159 = vst.msk [vmem:[%s19436_s14 + $0xf8] sm:$0xff] %vm1523_vm0, %v11127_v2 }
 0xc35   : > { %v11190_v6 = vld [vmem:[%s19436_s14 + $0xf0] sm:$0xff] }
 0xc36   : > { %v12562_v11 = vmul.f32 -1.442695, %v11190_v6 }
 0xc38   : > { %14802 = vpow2.f32 %v12562_v11 }
 0xc3a   : > { %v11191_v56 = vld [vmem:[%s19436_s14 + $0xf8] sm:$0xff] }
 0xc3b   : > { %v12563_v16 = vmul.f32 -1.442695, %v11191_v56 }
 0xc3d   : > { %14804 = vpow2.f32 %v12563_v16 }
 0xc42   : > { %v14803_v55 = vpop.eup %14802 }
 0xc43   : > { %v11318_v30 = vadd.f32 1.0, %v14803_v55 }
 0xc45   : > { %14806 = vrcp.f32 %v11318_v30 }
 0xc47   : > { %v14805_v38 = vpop.eup %14804 }
 0xc48   : > { %v11319_v32 = vadd.f32 1.0, %v14805_v38 }
 0xc4a   : > { %14808 = vrcp.f32 %v11319_v32 }
 0xc4f   : > { %v14807_v28 = vpop.eup %14806 }
 0xc50   : > { %v11414_v53 = vmul.f32 %v14807_v28, %v11190_v6 }
 0xc52   : > { %11446 = vst.msk [vmem:[%s19436_s14 + $0xf0] sm:$0xff] %vm1523_vm0, %v11414_v53 }
 0xc54   : > { %v14809_v27 = vpop.eup %14808 }
 0xc55   : > { %v11415_v21 = vmul.f32 %v14809_v27, %v11191_v56 }
 0xc57   : > { %11447 = vst.msk [vmem:[%s19436_s14 + $0xf8] sm:$0xff] %vm1523_vm0, %v11415_v21 }
 0xc58   : > { %15109 = shalt.err (!%p15106_p5)
}
 0xc59   : > { %s15110_s14 = scalar_lea.hbm %s20926_s1, 4096  ;;  %s15114_s12 = scalar_lea.hbm %s21901_s4, 16384 }
 0xc5a   : > { %p15111_p13 = scmp.ne.s32.totalorder %s20926_s1, %s15110_s14  ;;  %p15115_p1 = scmp.lt.u32.totalorder %s20926_s1, %s21901_s4 }
 0xc5b   : > { %p15116_p10 = scmp.lt.u32.totalorder %s15114_s12, %s15110_s14  ;;  %p15118_p4 = scmp.lt.u32.totalorder %s15110_s14, %s20926_s1 }
 0xc5c   : > { %p15112_p9 = pnand %p15111_p13, %p21902_p2 }
 0xc5d   : > { %p15117_p11 = por %p15116_p10, %p15115_p1 }
 0xc5e   : > { %p15113_p8 = pneg %p15112_p9 }
 0xc5f   : > { %p15119_p6 = por %p15118_p4, %p15117_p11 }
 0xc61   : > { %p15120_p3 = pnand %p15119_p6, %p15113_p8 }
 0xc63   : > { %15123 = shalt.err (!%p15120_p3)
}
 0xc64   : > { %s15280_s13 = smov 128   ;;  %s15281_s0 = smov 8  }
 0xc65   : > { %13538 = dma.vmem_to_hbm [thread:$0]  (%p21902_p2), %s20921_s3, 4096, %s20926_s1, %s11449_s10, %s15280_s13, %s15280_s13, %s15281_s0  }
 0xc66 PF: > { %s21903_s27 = sld [smem:[#allocation24_spill]]  ;;  %s21904_s19 = sld [smem:[#allocation34_spill]] }
 0xc67   : > { %p13564_p0 = scmp.ge.s32.totalorder %s15262_s25, 2 }
 0xc6c   : > { %s11480_s24 = sand.u32 1, %s21903_s27   ;;  %p21905_p12 = scmp.ne.s32.totalorder %s21904_s19, 0 }
 0xc6d   : > { %s11481_s2 = scalar_lea.sflag [#allocation5], %s11480_s24 }
 0xc6e   : > { %p13560_p7 = pnand %p13564_p0, %p21905_p12 }
 0xc70   : > { %15205 = dma.done.wait (!%p13560_p7), %s11481_s2, 4096  }
 0xc71   : > { %15207 = vsyncadd (!%p13560_p7), %s11481_s2, 4294963200  ;;  %s43_s25 = sadd.s32 1, %s15262_s25   ;;  %s21907_s30 = sld [smem:[#allocation22_spill]] }
 0xc72   : > { %p20959_p5 = scmp.ge.s32.totalorder %s43_s25, 6   ;;  %s21908_s0 = sld [smem:[#allocation23_spill]] }
 0xc73   : > { %s21909_s19 = sld [smem:[#allocation40_spill]]  ;;  %s21910_s1 = sld [smem:[#allocation25_spill]] }
 0xc74   : > { %s21911_s22 = sld [smem:[#allocation38_spill]]  ;;  %s21912_s5 = sld [smem:[#allocation28_spill]] }
 0xc75   : > { %s21913_s2 = sld [smem:[#allocation29_spill]]  ;;  %s21914_s23 = sld [smem:[#allocation31_spill]] }
 0xc76   : > { %s21915_s24 = sld [smem:[#allocation37_spill]]  ;;  %s21916_s27 = smov %s15214_s28 }
 0xc77   : > { %s21917_s28 = smov %s15218_s29  ;;  %s21918_s29 = smov %s15757_s11 }
 0xc78   : > { %s21919_s20 = smov %s15242_s21  ;;  %42 = sbr.rel (!%p20959_p5) target bundleno = 36 (0x24), region = 227 }
 0xc7a   : > { %s21920_s21 = smov %s21911_s22  ;;  %s21921_s22 = smov %s21912_s5 }
 0xc7f   :  { %11486 = vsyncpa [#allocation4], 1 }
 0xc80   :  { %11488 = vsyncpa [#allocation4 + $0x1], 1 }
 0xc81   :  { %11489 = vsyncpa [#allocation7], 1 }
 0xc82   :  { %11491 = vsyncpa [#allocation7 + $0x1], 1 }
 0xc83   :  { %11492 = vsyncpa [#allocation10], 1 }
 0xc84   :  { %11494 = vsyncpa [#allocation10 + $0x1], 1 }
 0xc85   :  { %11495 = vsyncpa [#allocation13], 1 }
 0xc86   :  { %11497 = vsyncpa [#allocation13 + $0x1], 1 }
 0xc87   :  { %11498 = vsyncpa [#allocation5], 1 }
 0xc88   :  { %11500 = vsyncpa [#allocation5 + $0x1], 1 }

</bundles_post_ra>
